<compile_context>
chip_gen: v7x
topology: tpu7x:2x2x1
jax: 0.10.0
libtpu: 0.0.40
codegen_flags: <defaults>
</compile_context>

<pallas_src>
import functools
import math

import jax
import jax.numpy as jnp
from jax.experimental import pallas as pl
from jax.experimental.pallas import tpu as pltpu


def decoder_layer_kernel(
    x_ref, mem_ref, tmask_ref, smask_ref,
    wqkv_ref, bqkv_ref, wo1_ref, bo1_ref, ln1a_ref, ln1b_ref,
    wq2_ref, bq2_ref, wkv2_ref, bkv2_ref, wo2_ref, bo2_ref, ln2a_ref, ln2b_ref,
    w1_ref, b1_ref, w2_ref, b2_ref, ln3a_ref, ln3b_ref,
    fina_ref, finb_ref,
    out_ref,
    *, num_heads, eps, apply_final_norm,
):
    f32 = jnp.float32
    bf16 = jnp.bfloat16

    bb, St, D = x_ref.shape
    Ss = mem_ref.shape[1]
    H = num_heads
    dk = D // H
    scale = 1.0 / math.sqrt(dk)

    # Work on lane-dense 2-D (rows, D) slabs throughout (cheap leading-dim merges).
    x = x_ref[...].reshape(bb * St, D).astype(f32)        # residual stream
    mem = mem_ref[...].reshape(bb * Ss, D).astype(f32)

    def layer_norm(z, a_ref, b_ref):
        # torch.Tensor.std semantics: unbiased variance, divide by (std + eps).
        mean = jnp.mean(z, axis=-1, keepdims=True)
        var = jnp.sum((z - mean) ** 2, axis=-1, keepdims=True) * (1.0 / (D - 1))
        inv = pl.reciprocal(jnp.sqrt(var) + eps, approx=True)   # EUP, frees VPU slots
        return a_ref[...] * (z - mean) * inv + b_ref[...]

    def split_heads(z2d, rows):
        # (bb*rows, D) -> (bb*H, rows, dk): head-major so QK^T / PV each run as a
        # single batched MXU contraction over (batch x head).
        return jnp.stack(
            [z2d[b * rows:(b + 1) * rows, h * dk:(h + 1) * dk]
             for b in range(bb) for h in range(H)],
            axis=0)

    def merge_heads(o, rows):
        # (bb*H, rows, dk) -> (bb*rows, D)
        return jnp.concatenate(
            [jnp.concatenate([o[b * H + h] for h in range(H)], axis=-1)
             for b in range(bb)],
            axis=0)

    def attention(q2d, k2d, v2d, keep_mask, q_rows, k_rows):
        qb = split_heads(q2d, q_rows).astype(bf16)        # (bb*H, q, dk)
        kb = split_heads(k2d, k_rows).astype(bf16)        # (bb*H, k, dk)
        vb = split_heads(v2d, k_rows).astype(bf16)        # (bb*H, k, dk)
        s = jnp.einsum('bqd,bkd->bqk', qb, kb,
                       preferred_element_type=f32) * scale        # (bb*H, q, k)
        s = jnp.where(keep_mask == 0.0, jnp.float32(-1e9), s)
        s = s - jnp.max(s, axis=-1, keepdims=True)
        p = jnp.exp(s)
        p = p * pl.reciprocal(jnp.sum(p, axis=-1, keepdims=True), approx=True)
        o = jnp.einsum('bqk,bkd->bqd', p.astype(bf16), vb,
                       preferred_element_type=f32)                # (bb*H, q, dk)
        return merge_heads(o, q_rows)                             # (bb*q, D)

    # ---------------- sublayer 0: masked self-attention ----------------
    xn = layer_norm(x, ln1a_ref, ln1b_ref)
    qkv = jnp.dot(xn.astype(bf16), wqkv_ref[...],
                  preferred_element_type=f32) + bqkv_ref[...]     # (bb*St, 3D)
    attn = attention(qkv[:, :D], qkv[:, D:2 * D], qkv[:, 2 * D:],
                     tmask_ref[...], St, St)
    x = x + (jnp.dot(attn.astype(bf16), wo1_ref[...],
                     preferred_element_type=f32) + bo1_ref[...])

    # ---------------- sublayer 1: cross-attention over memory ----------------
    xn = layer_norm(x, ln2a_ref, ln2b_ref)
    q2 = jnp.dot(xn.astype(bf16), wq2_ref[...],
                 preferred_element_type=f32) + bq2_ref[...]       # (bb*St, D)
    kv2 = jnp.dot(mem.astype(bf16), wkv2_ref[...],
                  preferred_element_type=f32) + bkv2_ref[...]     # (bb*Ss, 2D)
    attn = attention(q2, kv2[:, :D], kv2[:, D:],
                     smask_ref[...], St, Ss)
    x = x + (jnp.dot(attn.astype(bf16), wo2_ref[...],
                     preferred_element_type=f32) + bo2_ref[...])

    # ---------------- sublayer 2: position-wise feed-forward ----------------
    xn = layer_norm(x, ln3a_ref, ln3b_ref)
    h1 = jnp.maximum(
        jnp.dot(xn.astype(bf16), w1_ref[...],
                preferred_element_type=f32) + b1_ref[...], 0.0)
    x = x + (jnp.dot(h1.astype(bf16), w2_ref[...],
                     preferred_element_type=f32) + b2_ref[...])

    if apply_final_norm:   # Decoder's trailing LayerNorm fused into the last layer
        x = layer_norm(x, fina_ref, finb_ref)

    out_ref[...] = x.reshape(bb, St, D).astype(out_ref.dtype)


def decoder(x, memory, src_mask, tgt_mask, params, *, num_heads,
            eps=1e-6, batch_block=None):
    """Pallas forward pass of Decoder: N fused decoder-layer kernels + final LN."""
    B, St, D = x.shape
    Ss = memory.shape[1]
    H = num_heads
    layers = params['layers']
    n_layers = len(layers)
    d_ff = layers[0]['w1'].shape[1]

    bb = B if batch_block is None else batch_block
    assert B % bb == 0, "batch must be divisible by batch_block"
    grid = (B // bb,)

    f32 = jnp.float32
    bf16 = jnp.bfloat16

    # Masks pre-expanded to one row per (batch, head) so the kernel applies them
    # directly to the (bb*H, q, k) batched score tensor.
    tmask = jnp.repeat(tgt_mask.astype(f32).reshape(B, St, St), H, axis=0)  # (B*H,St,St)
    smask = jnp.repeat(src_mask.astype(f32).reshape(B, 1, Ss), H, axis=0)   # (B*H,1,Ss)

    # Big weight matrices cast to bf16 once (halves DMA/VMEM; f32 accumulation).
    def layer_operands(lp):
        return (
            lp['w_qkv'].astype(bf16), lp['b_qkv'],
            lp['wo1'].astype(bf16), lp['bo1'], lp['ln1_a'], lp['ln1_b'],
            lp['wq2'].astype(bf16), lp['bq2'],
            lp['w_kv2'].astype(bf16), lp['b_kv2'],
            lp['wo2'].astype(bf16), lp['bo2'], lp['ln2_a'], lp['ln2_b'],
            lp['w1'].astype(bf16), lp['b1'],
            lp['w2'].astype(bf16), lp['b2'], lp['ln3_a'], lp['ln3_b'],
        )
    layer_ops = [layer_operands(lp) for lp in layers]

    def batched(shape):
        nd = len(shape)
        return pl.BlockSpec((bb,) + tuple(shape[1:]), lambda i: (i,) + (0,) * (nd - 1))

    def mask_spec(shape):
        nd = len(shape)
        return pl.BlockSpec((bb * H,) + tuple(shape[1:]),
                            lambda i: (i,) + (0,) * (nd - 1))

    def weight_spec(shape, mode):
        if mode is None:
            return pl.BlockSpec(shape, lambda i: (0,) * len(shape))
        return pl.BlockSpec(shape, lambda i: (0,) * len(shape), pipeline_mode=mode)

    def build(apply_final_norm, weight_mode):
        kern = functools.partial(decoder_layer_kernel, num_heads=H, eps=eps,
                                 apply_final_norm=apply_final_norm)
        w = lambda s: weight_spec(s, weight_mode)
        in_specs = [
            batched((B, St, D)),            # x
            batched((B, Ss, D)),            # memory
            mask_spec((B * H, St, St)),     # tgt mask (per batch*head)
            mask_spec((B * H, 1, Ss)),      # src mask (per batch*head)
            w((D, 3 * D)), w((1, 3 * D)),   # fused QKV proj
            w((D, D)), w((1, D)),           # self-attn out proj
            w((1, D)), w((1, D)),           # ln1
            w((D, D)), w((1, D)),           # cross-attn Q proj
            w((D, 2 * D)), w((1, 2 * D)),   # fused KV proj (memory)
            w((D, D)), w((1, D)),           # cross-attn out proj
            w((1, D)), w((1, D)),           # ln2
            w((D, d_ff)), w((1, d_ff)),     # ff in
            w((d_ff, D)), w((1, D)),        # ff out
            w((1, D)), w((1, D)),           # ln3
            w((1, D)), w((1, D)),           # final decoder LayerNorm
        ]
        return pl.pallas_call(
            kern,
            out_shape=jax.ShapeDtypeStruct((B, St, D), f32),
            grid=grid,
            in_specs=in_specs,
            out_specs=batched((B, St, D)),
            compiler_params=pltpu.CompilerParams(
                dimension_semantics=("parallel",),
                vmem_limit_bytes=64 * 1024 * 1024,
            ),
        )

    def run(weight_mode):
        call_mid = build(False, weight_mode)
        call_last = build(True, weight_mode)
        y = x
        for li in range(n_layers):
            call = call_last if li == n_layers - 1 else call_mid
            y = call(y, memory, tmask, smask, *layer_ops[li],
                     params['final_a'], params['final_b'])
        return y

    try:
        # Grid-invariant weights only need one VMEM buffer (constant index_map);
        # halves weight VMEM residency (matters most on v7x's 64 MiB VMEM).
        return run(pl.Buffered(1))
    except Exception:
        # TODO(synk): installed Pallas rejected pipeline_mode=Buffered(1) on
        # pallas_call BlockSpecs; fall back to default double buffering.
        return run(None)


def make_params(key, n_layers, d_model, d_ff):
    def lin(k, din, dout):
        return 0.05 * jax.random.normal(k, (din, dout), jnp.float32)

    def ln_pair(k):
        ka, kb = jax.random.split(k)
        return (1.0 + 0.1 * jax.random.normal(ka, (1, d_model), jnp.float32),
                0.05 * jax.random.normal(kb, (1, d_model), jnp.float32))

    keys = jax.random.split(key, n_layers + 1)
    layers = []
    for lk in keys[:n_layers]:
        ks = jax.random.split(lk, 11)
        ln1_a, ln1_b = ln_pair(ks[7])
        ln2_a, ln2_b = ln_pair(ks[8])
        ln3_a, ln3_b = ln_pair(ks[9])
        layers.append(dict(
            w_qkv=lin(ks[0], d_model, 3 * d_model),
            b_qkv=0.02 * jax.random.normal(ks[10], (1, 3 * d_model), jnp.float32),
            wo1=lin(ks[1], d_model, d_model),
            bo1=jnp.zeros((1, d_model), jnp.float32),
            ln1_a=ln1_a, ln1_b=ln1_b,
            wq2=lin(ks[2], d_model, d_model),
            bq2=jnp.zeros((1, d_model), jnp.float32),
            w_kv2=lin(ks[3], d_model, 2 * d_model),
            b_kv2=jnp.zeros((1, 2 * d_model), jnp.float32),
            wo2=lin(ks[4], d_model, d_model),
            bo2=jnp.zeros((1, d_model), jnp.float32),
            ln2_a=ln2_a, ln2_b=ln2_b,
            w1=lin(ks[5], d_model, d_ff),
            b1=jnp.full((1, d_ff), 0.01, jnp.float32),
            w2=lin(ks[6], d_ff, d_model),
            b2=jnp.full((1, d_model), 0.01, jnp.float32),
            ln3_a=ln3_a, ln3_b=ln3_b,
        ))
    final_a = 1.0 + 0.1 * jax.random.normal(keys[-1], (1, d_model), jnp.float32)
    final_b = jnp.zeros((1, d_model), jnp.float32)
    return dict(layers=layers, final_a=final_a, final_b=final_b)


def reference_decoder(x, memory, src_mask, tgt_mask, params, *, num_heads, eps=1e-6):
    """Pure-JAX f32 reference mirroring the PyTorch Decoder (eval, no dropout)."""
    B, St, D = x.shape
    H = num_heads
    dk = D // H

    def ln(z, a, b):
        mean = z.mean(-1, keepdims=True)
        var = ((z - mean) ** 2).sum(-1, keepdims=True) / (D - 1)
        return a * (z - mean) / (jnp.sqrt(var) + eps) + b

    def mha(q_in, k_in, v_in, mask, wq, bq, wk, bk, wv, bv, wo, bo):
        Sq, Sk = q_in.shape[1], k_in.shape[1]
        q = (q_in @ wq + bq).reshape(B, Sq, H, dk).transpose(0, 2, 1, 3)
        k = (k_in @ wk + bk).reshape(B, Sk, H, dk).transpose(0, 2, 1, 3)
        v = (v_in @ wv + bv).reshape(B, Sk, H, dk).transpose(0, 2, 1, 3)
        s = jnp.einsum('bhqd,bhkd->bhqk', q, k) / math.sqrt(dk)
        s = jnp.where(mask[:, None, :, :] == 0, -1e9, s)
        p = jax.nn.softmax(s, axis=-1)
        o = jnp.einsum('bhqk,bhkd->bhqd', p, v).transpose(0, 2, 1, 3).reshape(B, Sq, D)
        return o @ wo + bo

    y = x
    for lp in params['layers']:
        wq, wk, wv = jnp.split(lp['w_qkv'], 3, axis=1)
        bq, bk, bv = jnp.split(lp['b_qkv'], 3, axis=1)
        xn = ln(y, lp['ln1_a'], lp['ln1_b'])
        y = y + mha(xn, xn, xn, tgt_mask, wq, bq, wk, bk, wv, bv,
                    lp['wo1'], lp['bo1'])
        wk2, wv2 = jnp.split(lp['w_kv2'], 2, axis=1)
        bk2, bv2 = jnp.split(lp['b_kv2'], 2, axis=1)
        xn = ln(y, lp['ln2_a'], lp['ln2_b'])
        y = y + mha(xn, memory, memory, src_mask, lp['wq2'], lp['bq2'],
                    wk2, bk2, wv2, bv2, lp['wo2'], lp['bo2'])
        xn = ln(y, lp['ln3_a'], lp['ln3_b'])
        y = y + (jnp.maximum(xn @ lp['w1'] + lp['b1'], 0.0) @ lp['w2'] + lp['b2'])
    return ln(y, params['final_a'], params['final_b'])


if __name__ == "__main__":
    # Small demo sizes; D=128 keeps every stored slab lane-dense and MXU-friendly,
    # fused QKV gives an N=384 matmul.
    B, S_TGT, S_SRC, D, H, D_FF, N_LAYERS = 2, 8, 16, 128, 4, 256, 2

    key = jax.random.PRNGKey(0)
    kx, km, kp = jax.random.split(key, 3)
    x = jax.random.normal(kx, (B, S_TGT, D), jnp.float32)
    memory = jax.random.normal(km, (B, S_SRC, D), jnp.float32)

    # tgt_mask: causal (subsequent) mask, 1 = attend / 0 = masked.
    tgt_mask = jnp.broadcast_to(jnp.tril(jnp.ones((S_TGT, S_TGT), jnp.float32)),
                                (B, S_TGT, S_TGT))
    # src_mask: padding mask over memory positions (last 3 masked out).
    src_mask = jnp.ones((B, 1, S_SRC), jnp.float32).at[:, :, -3:].set(0.0)

    params = make_params(kp, N_LAYERS, D, D_FF)

    out = decoder(x, memory, src_mask, tgt_mask, params, num_heads=H)
    out = jax.block_until_ready(out)

    ref = reference_decoder(x, memory, src_mask, tgt_mask, params, num_heads=H)
    assert out.shape == (B, S_TGT, D)
    err = float(jnp.max(jnp.abs(out - ref)))
    # bf16 matmul inputs (f32 accumulation) + EUP approx reciprocals give
    # ~1e-2-level deviation vs the all-f32 reference; tolerance widened deliberately.
    assert err < 5e-2, f"mismatch vs reference: max abs err {err}"
    print("KERNEL_OK")
</pallas_src>

<mosaic_0001>
module attributes {stable_mosaic.version = 11 : i64} {
  func.func @decoder_layer_kernel(%arg0: i32, %arg1: memref<2x8x128xf32, #tpu.memory_space<vmem>>, %arg2: memref<2x16x128xf32, #tpu.memory_space<vmem>>, %arg3: memref<8x8x8xf32, #tpu.memory_space<vmem>>, %arg4: memref<8x1x16xf32, #tpu.memory_space<vmem>>, %arg5: memref<128x384xbf16, #tpu.memory_space<vmem>>, %arg6: memref<1x384xf32, #tpu.memory_space<vmem>>, %arg7: memref<128x128xbf16, #tpu.memory_space<vmem>>, %arg8: memref<1x128xf32, #tpu.memory_space<vmem>>, %arg9: memref<1x128xf32, #tpu.memory_space<vmem>>, %arg10: memref<1x128xf32, #tpu.memory_space<vmem>>, %arg11: memref<128x128xbf16, #tpu.memory_space<vmem>>, %arg12: memref<1x128xf32, #tpu.memory_space<vmem>>, %arg13: memref<128x256xbf16, #tpu.memory_space<vmem>>, %arg14: memref<1x256xf32, #tpu.memory_space<vmem>>, %arg15: memref<128x128xbf16, #tpu.memory_space<vmem>>, %arg16: memref<1x128xf32, #tpu.memory_space<vmem>>, %arg17: memref<1x128xf32, #tpu.memory_space<vmem>>, %arg18: memref<1x128xf32, #tpu.memory_space<vmem>>, %arg19: memref<128x256xbf16, #tpu.memory_space<vmem>>, %arg20: memref<1x256xf32, #tpu.memory_space<vmem>>, %arg21: memref<256x128xbf16, #tpu.memory_space<vmem>>, %arg22: memref<1x128xf32, #tpu.memory_space<vmem>>, %arg23: memref<1x128xf32, #tpu.memory_space<vmem>>, %arg24: memref<1x128xf32, #tpu.memory_space<vmem>>, %arg25: memref<1x128xf32, #tpu.memory_space<vmem>>, %arg26: memref<1x128xf32, #tpu.memory_space<vmem>>, %arg27: memref<2x8x128xf32, #tpu.memory_space<vmem>>) attributes {dimension_semantics = [#tpu.dimension_semantics<parallel>], iteration_bounds = array<i64: 1>, scalar_prefetch = 0 : i64, scratch_operands = 0 : i64, tpu.core_type = #tpu.core_type<tc>, window_params = [{transform_indices = @transform_0, window_bounds = array<i64: 2, 8, 128>}, {transform_indices = @transform_1, window_bounds = array<i64: 2, 16, 128>}, {transform_indices = @transform_2, window_bounds = array<i64: 8, 8, 8>}, {transform_indices = @transform_3, window_bounds = array<i64: 8, 1, 16>}, {pipeline_mode = #tpu.pipeline_mode<synchronous>, transform_indices = @transform_4, window_bounds = array<i64: 128, 384>}, {pipeline_mode = #tpu.pipeline_mode<synchronous>, transform_indices = @transform_5, window_bounds = array<i64: 1, 384>}, {pipeline_mode = #tpu.pipeline_mode<synchronous>, transform_indices = @transform_6, window_bounds = array<i64: 128, 128>}, {pipeline_mode = #tpu.pipeline_mode<synchronous>, transform_indices = @transform_7, window_bounds = array<i64: 1, 128>}, {pipeline_mode = #tpu.pipeline_mode<synchronous>, transform_indices = @transform_8, window_bounds = array<i64: 1, 128>}, {pipeline_mode = #tpu.pipeline_mode<synchronous>, transform_indices = @transform_9, window_bounds = array<i64: 1, 128>}, {pipeline_mode = #tpu.pipeline_mode<synchronous>, transform_indices = @transform_10, window_bounds = array<i64: 128, 128>}, {pipeline_mode = #tpu.pipeline_mode<synchronous>, transform_indices = @transform_11, window_bounds = array<i64: 1, 128>}, {pipeline_mode = #tpu.pipeline_mode<synchronous>, transform_indices = @transform_12, window_bounds = array<i64: 128, 256>}, {pipeline_mode = #tpu.pipeline_mode<synchronous>, transform_indices = @transform_13, window_bounds = array<i64: 1, 256>}, {pipeline_mode = #tpu.pipeline_mode<synchronous>, transform_indices = @transform_14, window_bounds = array<i64: 128, 128>}, {pipeline_mode = #tpu.pipeline_mode<synchronous>, transform_indices = @transform_15, window_bounds = array<i64: 1, 128>}, {pipeline_mode = #tpu.pipeline_mode<synchronous>, transform_indices = @transform_16, window_bounds = array<i64: 1, 128>}, {pipeline_mode = #tpu.pipeline_mode<synchronous>, transform_indices = @transform_17, window_bounds = array<i64: 1, 128>}, {pipeline_mode = #tpu.pipeline_mode<synchronous>, transform_indices = @transform_18, window_bounds = array<i64: 128, 256>}, {pipeline_mode = #tpu.pipeline_mode<synchronous>, transform_indices = @transform_19, window_bounds = array<i64: 1, 256>}, {pipeline_mode = #tpu.pipeline_mode<synchronous>, transform_indices = @transform_20, window_bounds = array<i64: 256, 128>}, {pipeline_mode = #tpu.pipeline_mode<synchronous>, transform_indices = @transform_21, window_bounds = array<i64: 1, 128>}, {pipeline_mode = #tpu.pipeline_mode<synchronous>, transform_indices = @transform_22, window_bounds = array<i64: 1, 128>}, {pipeline_mode = #tpu.pipeline_mode<synchronous>, transform_indices = @transform_23, window_bounds = array<i64: 1, 128>}, {pipeline_mode = #tpu.pipeline_mode<synchronous>, transform_indices = @transform_24, window_bounds = array<i64: 1, 128>}, {pipeline_mode = #tpu.pipeline_mode<synchronous>, transform_indices = @transform_25, window_bounds = array<i64: 1, 128>}, {transform_indices = @transform_26, window_bounds = array<i64: 2, 8, 128>}]} {
    %c0 = arith.constant 0 : index
    %c0_0 = arith.constant 0 : index
    %c0_1 = arith.constant 0 : index
    %0 = vector.load %arg1[%c0, %c0_0, %c0_1] : memref<2x8x128xf32, #tpu.memory_space<vmem>>, vector<2x8x128xf32>
    %1 = vector.shape_cast %0 : vector<2x8x128xf32> to vector<16x128xf32>
    %c0_2 = arith.constant 0 : index
    %c0_3 = arith.constant 0 : index
    %c0_4 = arith.constant 0 : index
    %2 = vector.load %arg2[%c0_2, %c0_3, %c0_4] : memref<2x16x128xf32, #tpu.memory_space<vmem>>, vector<2x16x128xf32>
    %3 = vector.shape_cast %2 : vector<2x16x128xf32> to vector<32x128xf32>
    %cst = arith.constant dense<0.000000e+00> : vector<16xf32>
    %4 = vector.multi_reduction <add>, %1, %cst [1] : vector<16x128xf32> to vector<16xf32>
    %5 = vector.shape_cast %4 : vector<16xf32> to vector<16x1xf32>
    %cst_5 = arith.constant 1.280000e+02 : f32
    %6 = vector.broadcast %cst_5 : f32 to vector<16x1xf32>
    %7 = arith.divf %5, %6 : vector<16x1xf32>
    %8 = vector.broadcast %7 : vector<16x1xf32> to vector<16x128xf32>
    %9 = arith.subf %1, %8 : vector<16x128xf32>
    %10 = arith.mulf %9, %9 : vector<16x128xf32>
    %cst_6 = arith.constant dense<0.000000e+00> : vector<16xf32>
    %11 = vector.multi_reduction <add>, %10, %cst_6 [1] : vector<16x128xf32> to vector<16xf32>
    %12 = vector.shape_cast %11 : vector<16xf32> to vector<16x1xf32>
    %cst_7 = arith.constant 0.00787401571 : f32
    %13 = vector.broadcast %cst_7 : f32 to vector<16x1xf32>
    %14 = arith.mulf %12, %13 : vector<16x1xf32>
    %15 = math.sqrt %14 : vector<16x1xf32>
    %cst_8 = arith.constant 9.99999997E-7 : f32
    %16 = vector.broadcast %cst_8 : f32 to vector<16x1xf32>
    %17 = arith.addf %15, %16 : vector<16x1xf32>
    %18 = tpu.reciprocal %17 {approx = true} : vector<16x1xf32> -> vector<16x1xf32>
    %c0_9 = arith.constant 0 : index
    %c0_10 = arith.constant 0 : index
    %19 = vector.load %arg9[%c0_9, %c0_10] : memref<1x128xf32, #tpu.memory_space<vmem>>, vector<1x128xf32>
    %20 = vector.broadcast %7 : vector<16x1xf32> to vector<16x128xf32>
    %21 = arith.subf %1, %20 : vector<16x128xf32>
    %22 = vector.broadcast %19 : vector<1x128xf32> to vector<16x128xf32>
    %23 = arith.mulf %22, %21 : vector<16x128xf32>
    %24 = vector.broadcast %18 : vector<16x1xf32> to vector<16x128xf32>
    %25 = arith.mulf %23, %24 : vector<16x128xf32>
    %c0_11 = arith.constant 0 : index
    %c0_12 = arith.constant 0 : index
    %26 = vector.load %arg10[%c0_11, %c0_12] : memref<1x128xf32, #tpu.memory_space<vmem>>, vector<1x128xf32>
    %27 = vector.broadcast %26 : vector<1x128xf32> to vector<16x128xf32>
    %28 = arith.addf %25, %27 : vector<16x128xf32>
    %29 = arith.truncf %28 : vector<16x128xf32> to vector<16x128xbf16>
    %c0_13 = arith.constant 0 : index
    %c0_14 = arith.constant 0 : index
    %30 = vector.load %arg5[%c0_13, %c0_14] : memref<128x384xbf16, #tpu.memory_space<vmem>>, vector<128x384xbf16>
    %cst_15 = arith.constant dense<0.000000e+00> : vector<16x384xf32>
    %31 = tpu.matmul %29, %30, %cst_15 {dimension_numbers = #tpu.dot_dimension_numbers<[1], [0], [0], [1], [0, 0, 1, 1], [], []>} : vector<16x128xbf16>, vector<128x384xbf16>, vector<16x384xf32> -> vector<16x384xf32>
    %c0_16 = arith.constant 0 : index
    %c0_17 = arith.constant 0 : index
    %32 = vector.load %arg6[%c0_16, %c0_17] : memref<1x384xf32, #tpu.memory_space<vmem>>, vector<1x384xf32>
    %33 = vector.broadcast %32 : vector<1x384xf32> to vector<16x384xf32>
    %34 = arith.addf %31, %33 : vector<16x384xf32>
    %35 = vector.extract_strided_slice %34 {offsets = [0, 0], sizes = [16, 128], strides = [1, 1]} : vector<16x384xf32> to vector<16x128xf32>
    %36 = vector.extract_strided_slice %34 {offsets = [0, 128], sizes = [16, 128], strides = [1, 1]} : vector<16x384xf32> to vector<16x128xf32>
    %37 = vector.extract_strided_slice %34 {offsets = [0, 256], sizes = [16, 128], strides = [1, 1]} : vector<16x384xf32> to vector<16x128xf32>
    %c0_18 = arith.constant 0 : index
    %c0_19 = arith.constant 0 : index
    %c0_20 = arith.constant 0 : index
    %38 = vector.load %arg3[%c0_18, %c0_19, %c0_20] : memref<8x8x8xf32, #tpu.memory_space<vmem>>, vector<8x8x8xf32>
    %39 = vector.extract_strided_slice %35 {offsets = [0, 0], sizes = [8, 32], strides = [1, 1]} : vector<16x128xf32> to vector<8x32xf32>
    %40 = vector.extract_strided_slice %35 {offsets = [0, 32], sizes = [8, 32], strides = [1, 1]} : vector<16x128xf32> to vector<8x32xf32>
    %41 = vector.extract_strided_slice %35 {offsets = [0, 64], sizes = [8, 32], strides = [1, 1]} : vector<16x128xf32> to vector<8x32xf32>
    %42 = vector.extract_strided_slice %35 {offsets = [0, 96], sizes = [8, 32], strides = [1, 1]} : vector<16x128xf32> to vector<8x32xf32>
    %43 = vector.extract_strided_slice %35 {offsets = [8, 0], sizes = [8, 32], strides = [1, 1]} : vector<16x128xf32> to vector<8x32xf32>
    %44 = vector.extract_strided_slice %35 {offsets = [8, 32], sizes = [8, 32], strides = [1, 1]} : vector<16x128xf32> to vector<8x32xf32>
    %45 = vector.extract_strided_slice %35 {offsets = [8, 64], sizes = [8, 32], strides = [1, 1]} : vector<16x128xf32> to vector<8x32xf32>
    %46 = vector.extract_strided_slice %35 {offsets = [8, 96], sizes = [8, 32], strides = [1, 1]} : vector<16x128xf32> to vector<8x32xf32>
    %47 = vector.shape_cast %39 : vector<8x32xf32> to vector<1x8x32xf32>
    %48 = vector.shape_cast %40 : vector<8x32xf32> to vector<1x8x32xf32>
    %49 = vector.shape_cast %41 : vector<8x32xf32> to vector<1x8x32xf32>
    %50 = vector.shape_cast %42 : vector<8x32xf32> to vector<1x8x32xf32>
    %51 = vector.shape_cast %43 : vector<8x32xf32> to vector<1x8x32xf32>
    %52 = vector.shape_cast %44 : vector<8x32xf32> to vector<1x8x32xf32>
    %53 = vector.shape_cast %45 : vector<8x32xf32> to vector<1x8x32xf32>
    %54 = vector.shape_cast %46 : vector<8x32xf32> to vector<1x8x32xf32>
    %55 = tpu.concatenate %47, %48, %49, %50, %51, %52, %53, %54 in 0 : vector<1x8x32xf32>, vector<1x8x32xf32>, vector<1x8x32xf32>, vector<1x8x32xf32>, vector<1x8x32xf32>, vector<1x8x32xf32>, vector<1x8x32xf32>, vector<1x8x32xf32> -> vector<8x8x32xf32>
    %56 = arith.truncf %55 : vector<8x8x32xf32> to vector<8x8x32xbf16>
    %57 = vector.extract_strided_slice %36 {offsets = [0, 0], sizes = [8, 32], strides = [1, 1]} : vector<16x128xf32> to vector<8x32xf32>
    %58 = vector.extract_strided_slice %36 {offsets = [0, 32], sizes = [8, 32], strides = [1, 1]} : vector<16x128xf32> to vector<8x32xf32>
    %59 = vector.extract_strided_slice %36 {offsets = [0, 64], sizes = [8, 32], strides = [1, 1]} : vector<16x128xf32> to vector<8x32xf32>
    %60 = vector.extract_strided_slice %36 {offsets = [0, 96], sizes = [8, 32], strides = [1, 1]} : vector<16x128xf32> to vector<8x32xf32>
    %61 = vector.extract_strided_slice %36 {offsets = [8, 0], sizes = [8, 32], strides = [1, 1]} : vector<16x128xf32> to vector<8x32xf32>
    %62 = vector.extract_strided_slice %36 {offsets = [8, 32], sizes = [8, 32], strides = [1, 1]} : vector<16x128xf32> to vector<8x32xf32>
    %63 = vector.extract_strided_slice %36 {offsets = [8, 64], sizes = [8, 32], strides = [1, 1]} : vector<16x128xf32> to vector<8x32xf32>
    %64 = vector.extract_strided_slice %36 {offsets = [8, 96], sizes = [8, 32], strides = [1, 1]} : vector<16x128xf32> to vector<8x32xf32>
    %65 = vector.shape_cast %57 : vector<8x32xf32> to vector<1x8x32xf32>
    %66 = vector.shape_cast %58 : vector<8x32xf32> to vector<1x8x32xf32>
    %67 = vector.shape_cast %59 : vector<8x32xf32> to vector<1x8x32xf32>
    %68 = vector.shape_cast %60 : vector<8x32xf32> to vector<1x8x32xf32>
    %69 = vector.shape_cast %61 : vector<8x32xf32> to vector<1x8x32xf32>
    %70 = vector.shape_cast %62 : vector<8x32xf32> to vector<1x8x32xf32>
    %71 = vector.shape_cast %63 : vector<8x32xf32> to vector<1x8x32xf32>
    %72 = vector.shape_cast %64 : vector<8x32xf32> to vector<1x8x32xf32>
    %73 = tpu.concatenate %65, %66, %67, %68, %69, %70, %71, %72 in 0 : vector<1x8x32xf32>, vector<1x8x32xf32>, vector<1x8x32xf32>, vector<1x8x32xf32>, vector<1x8x32xf32>, vector<1x8x32xf32>, vector<1x8x32xf32>, vector<1x8x32xf32> -> vector<8x8x32xf32>
    %74 = arith.truncf %73 : vector<8x8x32xf32> to vector<8x8x32xbf16>
    %75 = vector.extract_strided_slice %37 {offsets = [0, 0], sizes = [8, 32], strides = [1, 1]} : vector<16x128xf32> to vector<8x32xf32>
    %76 = vector.extract_strided_slice %37 {offsets = [0, 32], sizes = [8, 32], strides = [1, 1]} : vector<16x128xf32> to vector<8x32xf32>
    %77 = vector.extract_strided_slice %37 {offsets = [0, 64], sizes = [8, 32], strides = [1, 1]} : vector<16x128xf32> to vector<8x32xf32>
    %78 = vector.extract_strided_slice %37 {offsets = [0, 96], sizes = [8, 32], strides = [1, 1]} : vector<16x128xf32> to vector<8x32xf32>
    %79 = vector.extract_strided_slice %37 {offsets = [8, 0], sizes = [8, 32], strides = [1, 1]} : vector<16x128xf32> to vector<8x32xf32>
    %80 = vector.extract_strided_slice %37 {offsets = [8, 32], sizes = [8, 32], strides = [1, 1]} : vector<16x128xf32> to vector<8x32xf32>
    %81 = vector.extract_strided_slice %37 {offsets = [8, 64], sizes = [8, 32], strides = [1, 1]} : vector<16x128xf32> to vector<8x32xf32>
    %82 = vector.extract_strided_slice %37 {offsets = [8, 96], sizes = [8, 32], strides = [1, 1]} : vector<16x128xf32> to vector<8x32xf32>
    %83 = vector.shape_cast %75 : vector<8x32xf32> to vector<1x8x32xf32>
    %84 = vector.shape_cast %76 : vector<8x32xf32> to vector<1x8x32xf32>
    %85 = vector.shape_cast %77 : vector<8x32xf32> to vector<1x8x32xf32>
    %86 = vector.shape_cast %78 : vector<8x32xf32> to vector<1x8x32xf32>
    %87 = vector.shape_cast %79 : vector<8x32xf32> to vector<1x8x32xf32>
    %88 = vector.shape_cast %80 : vector<8x32xf32> to vector<1x8x32xf32>
    %89 = vector.shape_cast %81 : vector<8x32xf32> to vector<1x8x32xf32>
    %90 = vector.shape_cast %82 : vector<8x32xf32> to vector<1x8x32xf32>
    %91 = tpu.concatenate %83, %84, %85, %86, %87, %88, %89, %90 in 0 : vector<1x8x32xf32>, vector<1x8x32xf32>, vector<1x8x32xf32>, vector<1x8x32xf32>, vector<1x8x32xf32>, vector<1x8x32xf32>, vector<1x8x32xf32>, vector<1x8x32xf32> -> vector<8x8x32xf32>
    %92 = arith.truncf %91 : vector<8x8x32xf32> to vector<8x8x32xbf16>
    "tpu.trace_start"() <{level = 10 : i32, message = "bqd,bkd->bqk"}> : () -> ()
    %cst_21 = arith.constant dense<0.000000e+00> : vector<8x8x8xf32>
    %93 = tpu.matmul %56, %74, %cst_21 {dimension_numbers = #tpu.dot_dimension_numbers<[2], [2], [1], [1], [0, 0, 0, 1, 1, 1], [0], [0]>} : vector<8x8x32xbf16>, vector<8x8x32xbf16>, vector<8x8x8xf32> -> vector<8x8x8xf32>
    "tpu.trace_stop"() : () -> ()
    %cst_22 = arith.constant 0.176776692 : f32
    %94 = vector.broadcast %cst_22 : f32 to vector<8x8x8xf32>
    %95 = arith.mulf %93, %94 : vector<8x8x8xf32>
    %cst_23 = arith.constant 0.000000e+00 : f32
    %96 = vector.broadcast %cst_23 : f32 to vector<8x8x8xf32>
    %97 = arith.cmpf oeq, %38, %96 : vector<8x8x8xf32>
    %cst_24 = arith.constant -1.000000e+09 : f32
    %98 = vector.broadcast %cst_24 : f32 to vector<8x8x8xf32>
    %99 = arith.select %97, %98, %95 : vector<8x8x8xi1>, vector<8x8x8xf32>
    %cst_25 = arith.constant dense<0xFF800000> : vector<8x8xf32>
    %100 = vector.multi_reduction <maximumf>, %99, %cst_25 [2] : vector<8x8x8xf32> to vector<8x8xf32>
    %101 = vector.shape_cast %100 : vector<8x8xf32> to vector<8x8x1xf32>
    %102 = vector.broadcast %101 : vector<8x8x1xf32> to vector<8x8x8xf32>
    %103 = arith.subf %99, %102 : vector<8x8x8xf32>
    %104 = math.exp %103 : vector<8x8x8xf32>
    %cst_26 = arith.constant dense<0.000000e+00> : vector<8x8xf32>
    %105 = vector.multi_reduction <add>, %104, %cst_26 [2] : vector<8x8x8xf32> to vector<8x8xf32>
    %106 = vector.shape_cast %105 : vector<8x8xf32> to vector<8x8x1xf32>
    %107 = tpu.reciprocal %106 {approx = true} : vector<8x8x1xf32> -> vector<8x8x1xf32>
    %108 = vector.broadcast %107 : vector<8x8x1xf32> to vector<8x8x8xf32>
    %109 = arith.mulf %104, %108 : vector<8x8x8xf32>
    %110 = arith.truncf %109 : vector<8x8x8xf32> to vector<8x8x8xbf16>
    "tpu.trace_start"() <{level = 10 : i32, message = "bqk,bkd->bqd"}> : () -> ()
    %cst_27 = arith.constant dense<0.000000e+00> : vector<8x8x32xf32>
    %111 = tpu.matmul %110, %92, %cst_27 {dimension_numbers = #tpu.dot_dimension_numbers<[2], [1], [1], [2], [0, 0, 0, 1, 1, 2], [0], [0]>} : vector<8x8x8xbf16>, vector<8x8x32xbf16>, vector<8x8x32xf32> -> vector<8x8x32xf32>
    "tpu.trace_stop"() : () -> ()
    %112 = vector.extract_strided_slice %111 {offsets = [0, 0, 0], sizes = [1, 8, 32], strides = [1, 1, 1]} : vector<8x8x32xf32> to vector<1x8x32xf32>
    %113 = vector.shape_cast %112 : vector<1x8x32xf32> to vector<8x32xf32>
    %114 = vector.extract_strided_slice %111 {offsets = [1, 0, 0], sizes = [1, 8, 32], strides = [1, 1, 1]} : vector<8x8x32xf32> to vector<1x8x32xf32>
    %115 = vector.shape_cast %114 : vector<1x8x32xf32> to vector<8x32xf32>
    %116 = vector.extract_strided_slice %111 {offsets = [2, 0, 0], sizes = [1, 8, 32], strides = [1, 1, 1]} : vector<8x8x32xf32> to vector<1x8x32xf32>
    %117 = vector.shape_cast %116 : vector<1x8x32xf32> to vector<8x32xf32>
    %118 = vector.extract_strided_slice %111 {offsets = [3, 0, 0], sizes = [1, 8, 32], strides = [1, 1, 1]} : vector<8x8x32xf32> to vector<1x8x32xf32>
    %119 = vector.shape_cast %118 : vector<1x8x32xf32> to vector<8x32xf32>
    %120 = tpu.concatenate %113, %115, %117, %119 in 1 : vector<8x32xf32>, vector<8x32xf32>, vector<8x32xf32>, vector<8x32xf32> -> vector<8x128xf32>
    %121 = vector.extract_strided_slice %111 {offsets = [4, 0, 0], sizes = [1, 8, 32], strides = [1, 1, 1]} : vector<8x8x32xf32> to vector<1x8x32xf32>
    %122 = vector.shape_cast %121 : vector<1x8x32xf32> to vector<8x32xf32>
    %123 = vector.extract_strided_slice %111 {offsets = [5, 0, 0], sizes = [1, 8, 32], strides = [1, 1, 1]} : vector<8x8x32xf32> to vector<1x8x32xf32>
    %124 = vector.shape_cast %123 : vector<1x8x32xf32> to vector<8x32xf32>
    %125 = vector.extract_strided_slice %111 {offsets = [6, 0, 0], sizes = [1, 8, 32], strides = [1, 1, 1]} : vector<8x8x32xf32> to vector<1x8x32xf32>
    %126 = vector.shape_cast %125 : vector<1x8x32xf32> to vector<8x32xf32>
    %127 = vector.extract_strided_slice %111 {offsets = [7, 0, 0], sizes = [1, 8, 32], strides = [1, 1, 1]} : vector<8x8x32xf32> to vector<1x8x32xf32>
    %128 = vector.shape_cast %127 : vector<1x8x32xf32> to vector<8x32xf32>
    %129 = tpu.concatenate %122, %124, %126, %128 in 1 : vector<8x32xf32>, vector<8x32xf32>, vector<8x32xf32>, vector<8x32xf32> -> vector<8x128xf32>
    %130 = tpu.concatenate %120, %129 in 0 : vector<8x128xf32>, vector<8x128xf32> -> vector<16x128xf32>
    %131 = arith.truncf %130 : vector<16x128xf32> to vector<16x128xbf16>
    %c0_28 = arith.constant 0 : index
    %c0_29 = arith.constant 0 : index
    %132 = vector.load %arg7[%c0_28, %c0_29] : memref<128x128xbf16, #tpu.memory_space<vmem>>, vector<128x128xbf16>
    %cst_30 = arith.constant dense<0.000000e+00> : vector<16x128xf32>
    %133 = tpu.matmul %131, %132, %cst_30 {dimension_numbers = #tpu.dot_dimension_numbers<[1], [0], [0], [1], [0, 0, 1, 1], [], []>} : vector<16x128xbf16>, vector<128x128xbf16>, vector<16x128xf32> -> vector<16x128xf32>
    %c0_31 = arith.constant 0 : index
    %c0_32 = arith.constant 0 : index
    %134 = vector.load %arg8[%c0_31, %c0_32] : memref<1x128xf32, #tpu.memory_space<vmem>>, vector<1x128xf32>
    %135 = vector.broadcast %134 : vector<1x128xf32> to vector<16x128xf32>
    %136 = arith.addf %133, %135 : vector<16x128xf32>
    %137 = arith.addf %1, %136 : vector<16x128xf32>
    %cst_33 = arith.constant dense<0.000000e+00> : vector<16xf32>
    %138 = vector.multi_reduction <add>, %137, %cst_33 [1] : vector<16x128xf32> to vector<16xf32>
    %139 = vector.shape_cast %138 : vector<16xf32> to vector<16x1xf32>
    %cst_34 = arith.constant 1.280000e+02 : f32
    %140 = vector.broadcast %cst_34 : f32 to vector<16x1xf32>
    %141 = arith.divf %139, %140 : vector<16x1xf32>
    %142 = vector.broadcast %141 : vector<16x1xf32> to vector<16x128xf32>
    %143 = arith.subf %137, %142 : vector<16x128xf32>
    %144 = arith.mulf %143, %143 : vector<16x128xf32>
    %cst_35 = arith.constant dense<0.000000e+00> : vector<16xf32>
    %145 = vector.multi_reduction <add>, %144, %cst_35 [1] : vector<16x128xf32> to vector<16xf32>
    %146 = vector.shape_cast %145 : vector<16xf32> to vector<16x1xf32>
    %cst_36 = arith.constant 0.00787401571 : f32
    %147 = vector.broadcast %cst_36 : f32 to vector<16x1xf32>
    %148 = arith.mulf %146, %147 : vector<16x1xf32>
    %149 = math.sqrt %148 : vector<16x1xf32>
    %cst_37 = arith.constant 9.99999997E-7 : f32
    %150 = vector.broadcast %cst_37 : f32 to vector<16x1xf32>
    %151 = arith.addf %149, %150 : vector<16x1xf32>
    %152 = tpu.reciprocal %151 {approx = true} : vector<16x1xf32> -> vector<16x1xf32>
    %c0_38 = arith.constant 0 : index
    %c0_39 = arith.constant 0 : index
    %153 = vector.load %arg17[%c0_38, %c0_39] : memref<1x128xf32, #tpu.memory_space<vmem>>, vector<1x128xf32>
    %154 = vector.broadcast %141 : vector<16x1xf32> to vector<16x128xf32>
    %155 = arith.subf %137, %154 : vector<16x128xf32>
    %156 = vector.broadcast %153 : vector<1x128xf32> to vector<16x128xf32>
    %157 = arith.mulf %156, %155 : vector<16x128xf32>
    %158 = vector.broadcast %152 : vector<16x1xf32> to vector<16x128xf32>
    %159 = arith.mulf %157, %158 : vector<16x128xf32>
    %c0_40 = arith.constant 0 : index
    %c0_41 = arith.constant 0 : index
    %160 = vector.load %arg18[%c0_40, %c0_41] : memref<1x128xf32, #tpu.memory_space<vmem>>, vector<1x128xf32>
    %161 = vector.broadcast %160 : vector<1x128xf32> to vector<16x128xf32>
    %162 = arith.addf %159, %161 : vector<16x128xf32>
    %163 = arith.truncf %162 : vector<16x128xf32> to vector<16x128xbf16>
    %c0_42 = arith.constant 0 : index
    %c0_43 = arith.constant 0 : index
    %164 = vector.load %arg11[%c0_42, %c0_43] : memref<128x128xbf16, #tpu.memory_space<vmem>>, vector<128x128xbf16>
    %cst_44 = arith.constant dense<0.000000e+00> : vector<16x128xf32>
    %165 = tpu.matmul %163, %164, %cst_44 {dimension_numbers = #tpu.dot_dimension_numbers<[1], [0], [0], [1], [0, 0, 1, 1], [], []>} : vector<16x128xbf16>, vector<128x128xbf16>, vector<16x128xf32> -> vector<16x128xf32>
    %c0_45 = arith.constant 0 : index
    %c0_46 = arith.constant 0 : index
    %166 = vector.load %arg12[%c0_45, %c0_46] : memref<1x128xf32, #tpu.memory_space<vmem>>, vector<1x128xf32>
    %167 = vector.broadcast %166 : vector<1x128xf32> to vector<16x128xf32>
    %168 = arith.addf %165, %167 : vector<16x128xf32>
    %169 = arith.truncf %3 : vector<32x128xf32> to vector<32x128xbf16>
    %c0_47 = arith.constant 0 : index
    %c0_48 = arith.constant 0 : index
    %170 = vector.load %arg13[%c0_47, %c0_48] : memref<128x256xbf16, #tpu.memory_space<vmem>>, vector<128x256xbf16>
    %cst_49 = arith.constant dense<0.000000e+00> : vector<32x256xf32>
    %171 = tpu.matmul %169, %170, %cst_49 {dimension_numbers = #tpu.dot_dimension_numbers<[1], [0], [0], [1], [0, 0, 1, 1], [], []>} : vector<32x128xbf16>, vector<128x256xbf16>, vector<32x256xf32> -> vector<32x256xf32>
    %c0_50 = arith.constant 0 : index
    %c0_51 = arith.constant 0 : index
    %172 = vector.load %arg14[%c0_50, %c0_51] : memref<1x256xf32, #tpu.memory_space<vmem>>, vector<1x256xf32>
    %173 = vector.broadcast %172 : vector<1x256xf32> to vector<32x256xf32>
    %174 = arith.addf %171, %173 : vector<32x256xf32>
    %175 = vector.extract_strided_slice %174 {offsets = [0, 0], sizes = [32, 128], strides = [1, 1]} : vector<32x256xf32> to vector<32x128xf32>
    %176 = vector.extract_strided_slice %174 {offsets = [0, 128], sizes = [32, 128], strides = [1, 1]} : vector<32x256xf32> to vector<32x128xf32>
    %c0_52 = arith.constant 0 : index
    %c0_53 = arith.constant 0 : index
    %c0_54 = arith.constant 0 : index
    %177 = vector.load %arg4[%c0_52, %c0_53, %c0_54] : memref<8x1x16xf32, #tpu.memory_space<vmem>>, vector<8x1x16xf32>
    %178 = vector.extract_strided_slice %168 {offsets = [0, 0], sizes = [8, 32], strides = [1, 1]} : vector<16x128xf32> to vector<8x32xf32>
    %179 = vector.extract_strided_slice %168 {offsets = [0, 32], sizes = [8, 32], strides = [1, 1]} : vector<16x128xf32> to vector<8x32xf32>
    %180 = vector.extract_strided_slice %168 {offsets = [0, 64], sizes = [8, 32], strides = [1, 1]} : vector<16x128xf32> to vector<8x32xf32>
    %181 = vector.extract_strided_slice %168 {offsets = [0, 96], sizes = [8, 32], strides = [1, 1]} : vector<16x128xf32> to vector<8x32xf32>
    %182 = vector.extract_strided_slice %168 {offsets = [8, 0], sizes = [8, 32], strides = [1, 1]} : vector<16x128xf32> to vector<8x32xf32>
    %183 = vector.extract_strided_slice %168 {offsets = [8, 32], sizes = [8, 32], strides = [1, 1]} : vector<16x128xf32> to vector<8x32xf32>
    %184 = vector.extract_strided_slice %168 {offsets = [8, 64], sizes = [8, 32], strides = [1, 1]} : vector<16x128xf32> to vector<8x32xf32>
    %185 = vector.extract_strided_slice %168 {offsets = [8, 96], sizes = [8, 32], strides = [1, 1]} : vector<16x128xf32> to vector<8x32xf32>
    %186 = vector.shape_cast %178 : vector<8x32xf32> to vector<1x8x32xf32>
    %187 = vector.shape_cast %179 : vector<8x32xf32> to vector<1x8x32xf32>
    %188 = vector.shape_cast %180 : vector<8x32xf32> to vector<1x8x32xf32>
    %189 = vector.shape_cast %181 : vector<8x32xf32> to vector<1x8x32xf32>
    %190 = vector.shape_cast %182 : vector<8x32xf32> to vector<1x8x32xf32>
    %191 = vector.shape_cast %183 : vector<8x32xf32> to vector<1x8x32xf32>
    %192 = vector.shape_cast %184 : vector<8x32xf32> to vector<1x8x32xf32>
    %193 = vector.shape_cast %185 : vector<8x32xf32> to vector<1x8x32xf32>
    %194 = tpu.concatenate %186, %187, %188, %189, %190, %191, %192, %193 in 0 : vector<1x8x32xf32>, vector<1x8x32xf32>, vector<1x8x32xf32>, vector<1x8x32xf32>, vector<1x8x32xf32>, vector<1x8x32xf32>, vector<1x8x32xf32>, vector<1x8x32xf32> -> vector<8x8x32xf32>
    %195 = arith.truncf %194 : vector<8x8x32xf32> to vector<8x8x32xbf16>
    %196 = vector.extract_strided_slice %175 {offsets = [0, 0], sizes = [16, 32], strides = [1, 1]} : vector<32x128xf32> to vector<16x32xf32>
    %197 = vector.extract_strided_slice %175 {offsets = [0, 32], sizes = [16, 32], strides = [1, 1]} : vector<32x128xf32> to vector<16x32xf32>
    %198 = vector.extract_strided_slice %175 {offsets = [0, 64], sizes = [16, 32], strides = [1, 1]} : vector<32x128xf32> to vector<16x32xf32>
    %199 = vector.extract_strided_slice %175 {offsets = [0, 96], sizes = [16, 32], strides = [1, 1]} : vector<32x128xf32> to vector<16x32xf32>
    %200 = vector.extract_strided_slice %175 {offsets = [16, 0], sizes = [16, 32], strides = [1, 1]} : vector<32x128xf32> to vector<16x32xf32>
    %201 = vector.extract_strided_slice %175 {offsets = [16, 32], sizes = [16, 32], strides = [1, 1]} : vector<32x128xf32> to vector<16x32xf32>
    %202 = vector.extract_strided_slice %175 {offsets = [16, 64], sizes = [16, 32], strides = [1, 1]} : vector<32x128xf32> to vector<16x32xf32>
    %203 = vector.extract_strided_slice %175 {offsets = [16, 96], sizes = [16, 32], strides = [1, 1]} : vector<32x128xf32> to vector<16x32xf32>
    %204 = vector.shape_cast %196 : vector<16x32xf32> to vector<1x16x32xf32>
    %205 = vector.shape_cast %197 : vector<16x32xf32> to vector<1x16x32xf32>
    %206 = vector.shape_cast %198 : vector<16x32xf32> to vector<1x16x32xf32>
    %207 = vector.shape_cast %199 : vector<16x32xf32> to vector<1x16x32xf32>
    %208 = vector.shape_cast %200 : vector<16x32xf32> to vector<1x16x32xf32>
    %209 = vector.shape_cast %201 : vector<16x32xf32> to vector<1x16x32xf32>
    %210 = vector.shape_cast %202 : vector<16x32xf32> to vector<1x16x32xf32>
    %211 = vector.shape_cast %203 : vector<16x32xf32> to vector<1x16x32xf32>
    %212 = tpu.concatenate %204, %205, %206, %207, %208, %209, %210, %211 in 0 : vector<1x16x32xf32>, vector<1x16x32xf32>, vector<1x16x32xf32>, vector<1x16x32xf32>, vector<1x16x32xf32>, vector<1x16x32xf32>, vector<1x16x32xf32>, vector<1x16x32xf32> -> vector<8x16x32xf32>
    %213 = arith.truncf %212 : vector<8x16x32xf32> to vector<8x16x32xbf16>
    %214 = vector.extract_strided_slice %176 {offsets = [0, 0], sizes = [16, 32], strides = [1, 1]} : vector<32x128xf32> to vector<16x32xf32>
    %215 = vector.extract_strided_slice %176 {offsets = [0, 32], sizes = [16, 32], strides = [1, 1]} : vector<32x128xf32> to vector<16x32xf32>
    %216 = vector.extract_strided_slice %176 {offsets = [0, 64], sizes = [16, 32], strides = [1, 1]} : vector<32x128xf32> to vector<16x32xf32>
    %217 = vector.extract_strided_slice %176 {offsets = [0, 96], sizes = [16, 32], strides = [1, 1]} : vector<32x128xf32> to vector<16x32xf32>
    %218 = vector.extract_strided_slice %176 {offsets = [16, 0], sizes = [16, 32], strides = [1, 1]} : vector<32x128xf32> to vector<16x32xf32>
    %219 = vector.extract_strided_slice %176 {offsets = [16, 32], sizes = [16, 32], strides = [1, 1]} : vector<32x128xf32> to vector<16x32xf32>
    %220 = vector.extract_strided_slice %176 {offsets = [16, 64], sizes = [16, 32], strides = [1, 1]} : vector<32x128xf32> to vector<16x32xf32>
    %221 = vector.extract_strided_slice %176 {offsets = [16, 96], sizes = [16, 32], strides = [1, 1]} : vector<32x128xf32> to vector<16x32xf32>
    %222 = vector.shape_cast %214 : vector<16x32xf32> to vector<1x16x32xf32>
    %223 = vector.shape_cast %215 : vector<16x32xf32> to vector<1x16x32xf32>
    %224 = vector.shape_cast %216 : vector<16x32xf32> to vector<1x16x32xf32>
    %225 = vector.shape_cast %217 : vector<16x32xf32> to vector<1x16x32xf32>
    %226 = vector.shape_cast %218 : vector<16x32xf32> to vector<1x16x32xf32>
    %227 = vector.shape_cast %219 : vector<16x32xf32> to vector<1x16x32xf32>
    %228 = vector.shape_cast %220 : vector<16x32xf32> to vector<1x16x32xf32>
    %229 = vector.shape_cast %221 : vector<16x32xf32> to vector<1x16x32xf32>
    %230 = tpu.concatenate %222, %223, %224, %225, %226, %227, %228, %229 in 0 : vector<1x16x32xf32>, vector<1x16x32xf32>, vector<1x16x32xf32>, vector<1x16x32xf32>, vector<1x16x32xf32>, vector<1x16x32xf32>, vector<1x16x32xf32>, vector<1x16x32xf32> -> vector<8x16x32xf32>
    %231 = arith.truncf %230 : vector<8x16x32xf32> to vector<8x16x32xbf16>
    "tpu.trace_start"() <{level = 10 : i32, message = "bqd,bkd->bqk"}> : () -> ()
    %cst_55 = arith.constant dense<0.000000e+00> : vector<8x8x16xf32>
    %232 = tpu.matmul %195, %213, %cst_55 {dimension_numbers = #tpu.dot_dimension_numbers<[2], [2], [1], [1], [0, 0, 0, 1, 1, 1], [0], [0]>} : vector<8x8x32xbf16>, vector<8x16x32xbf16>, vector<8x8x16xf32> -> vector<8x8x16xf32>
    "tpu.trace_stop"() : () -> ()
    %cst_56 = arith.constant 0.176776692 : f32
    %233 = vector.broadcast %cst_56 : f32 to vector<8x8x16xf32>
    %234 = arith.mulf %232, %233 : vector<8x8x16xf32>
    %cst_57 = arith.constant 0.000000e+00 : f32
    %235 = vector.broadcast %cst_57 : f32 to vector<8x1x16xf32>
    %236 = arith.cmpf oeq, %177, %235 : vector<8x1x16xf32>
    %cst_58 = arith.constant -1.000000e+09 : f32
    %237 = vector.shape_cast %236 : vector<8x1x16xi1> to vector<8x1x16xi1>
    %238 = vector.broadcast %237 : vector<8x1x16xi1> to vector<8x8x16xi1>
    %239 = vector.broadcast %cst_58 : f32 to vector<8x8x16xf32>
    %240 = arith.select %238, %239, %234 : vector<8x8x16xi1>, vector<8x8x16xf32>
    %cst_59 = arith.constant dense<0xFF800000> : vector<8x8xf32>
    %241 = vector.multi_reduction <maximumf>, %240, %cst_59 [2] : vector<8x8x16xf32> to vector<8x8xf32>
    %242 = vector.shape_cast %241 : vector<8x8xf32> to vector<8x8x1xf32>
    %243 = vector.broadcast %242 : vector<8x8x1xf32> to vector<8x8x16xf32>
    %244 = arith.subf %240, %243 : vector<8x8x16xf32>
    %245 = math.exp %244 : vector<8x8x16xf32>
    %cst_60 = arith.constant dense<0.000000e+00> : vector<8x8xf32>
    %246 = vector.multi_reduction <add>, %245, %cst_60 [2] : vector<8x8x16xf32> to vector<8x8xf32>
    %247 = vector.shape_cast %246 : vector<8x8xf32> to vector<8x8x1xf32>
    %248 = tpu.reciprocal %247 {approx = true} : vector<8x8x1xf32> -> vector<8x8x1xf32>
    %249 = vector.broadcast %248 : vector<8x8x1xf32> to vector<8x8x16xf32>
    %250 = arith.mulf %245, %249 : vector<8x8x16xf32>
    %251 = arith.truncf %250 : vector<8x8x16xf32> to vector<8x8x16xbf16>
    "tpu.trace_start"() <{level = 10 : i32, message = "bqk,bkd->bqd"}> : () -> ()
    %cst_61 = arith.constant dense<0.000000e+00> : vector<8x8x32xf32>
    %252 = tpu.matmul %251, %231, %cst_61 {dimension_numbers = #tpu.dot_dimension_numbers<[2], [1], [1], [2], [0, 0, 0, 1, 1, 2], [0], [0]>} : vector<8x8x16xbf16>, vector<8x16x32xbf16>, vector<8x8x32xf32> -> vector<8x8x32xf32>
    "tpu.trace_stop"() : () -> ()
    %253 = vector.extract_strided_slice %252 {offsets = [0, 0, 0], sizes = [1, 8, 32], strides = [1, 1, 1]} : vector<8x8x32xf32> to vector<1x8x32xf32>
    %254 = vector.shape_cast %253 : vector<1x8x32xf32> to vector<8x32xf32>
    %255 = vector.extract_strided_slice %252 {offsets = [1, 0, 0], sizes = [1, 8, 32], strides = [1, 1, 1]} : vector<8x8x32xf32> to vector<1x8x32xf32>
    %256 = vector.shape_cast %255 : vector<1x8x32xf32> to vector<8x32xf32>
    %257 = vector.extract_strided_slice %252 {offsets = [2, 0, 0], sizes = [1, 8, 32], strides = [1, 1, 1]} : vector<8x8x32xf32> to vector<1x8x32xf32>
    %258 = vector.shape_cast %257 : vector<1x8x32xf32> to vector<8x32xf32>
    %259 = vector.extract_strided_slice %252 {offsets = [3, 0, 0], sizes = [1, 8, 32], strides = [1, 1, 1]} : vector<8x8x32xf32> to vector<1x8x32xf32>
    %260 = vector.shape_cast %259 : vector<1x8x32xf32> to vector<8x32xf32>
    %261 = tpu.concatenate %254, %256, %258, %260 in 1 : vector<8x32xf32>, vector<8x32xf32>, vector<8x32xf32>, vector<8x32xf32> -> vector<8x128xf32>
    %262 = vector.extract_strided_slice %252 {offsets = [4, 0, 0], sizes = [1, 8, 32], strides = [1, 1, 1]} : vector<8x8x32xf32> to vector<1x8x32xf32>
    %263 = vector.shape_cast %262 : vector<1x8x32xf32> to vector<8x32xf32>
    %264 = vector.extract_strided_slice %252 {offsets = [5, 0, 0], sizes = [1, 8, 32], strides = [1, 1, 1]} : vector<8x8x32xf32> to vector<1x8x32xf32>
    %265 = vector.shape_cast %264 : vector<1x8x32xf32> to vector<8x32xf32>
    %266 = vector.extract_strided_slice %252 {offsets = [6, 0, 0], sizes = [1, 8, 32], strides = [1, 1, 1]} : vector<8x8x32xf32> to vector<1x8x32xf32>
    %267 = vector.shape_cast %266 : vector<1x8x32xf32> to vector<8x32xf32>
    %268 = vector.extract_strided_slice %252 {offsets = [7, 0, 0], sizes = [1, 8, 32], strides = [1, 1, 1]} : vector<8x8x32xf32> to vector<1x8x32xf32>
    %269 = vector.shape_cast %268 : vector<1x8x32xf32> to vector<8x32xf32>
    %270 = tpu.concatenate %263, %265, %267, %269 in 1 : vector<8x32xf32>, vector<8x32xf32>, vector<8x32xf32>, vector<8x32xf32> -> vector<8x128xf32>
    %271 = tpu.concatenate %261, %270 in 0 : vector<8x128xf32>, vector<8x128xf32> -> vector<16x128xf32>
    %272 = arith.truncf %271 : vector<16x128xf32> to vector<16x128xbf16>
    %c0_62 = arith.constant 0 : index
    %c0_63 = arith.constant 0 : index
    %273 = vector.load %arg15[%c0_62, %c0_63] : memref<128x128xbf16, #tpu.memory_space<vmem>>, vector<128x128xbf16>
    %cst_64 = arith.constant dense<0.000000e+00> : vector<16x128xf32>
    %274 = tpu.matmul %272, %273, %cst_64 {dimension_numbers = #tpu.dot_dimension_numbers<[1], [0], [0], [1], [0, 0, 1, 1], [], []>} : vector<16x128xbf16>, vector<128x128xbf16>, vector<16x128xf32> -> vector<16x128xf32>
    %c0_65 = arith.constant 0 : index
    %c0_66 = arith.constant 0 : index
    %275 = vector.load %arg16[%c0_65, %c0_66] : memref<1x128xf32, #tpu.memory_space<vmem>>, vector<1x128xf32>
    %276 = vector.broadcast %275 : vector<1x128xf32> to vector<16x128xf32>
    %277 = arith.addf %274, %276 : vector<16x128xf32>
    %278 = arith.addf %137, %277 : vector<16x128xf32>
    %cst_67 = arith.constant dense<0.000000e+00> : vector<16xf32>
    %279 = vector.multi_reduction <add>, %278, %cst_67 [1] : vector<16x128xf32> to vector<16xf32>
    %280 = vector.shape_cast %279 : vector<16xf32> to vector<16x1xf32>
    %cst_68 = arith.constant 1.280000e+02 : f32
    %281 = vector.broadcast %cst_68 : f32 to vector<16x1xf32>
    %282 = arith.divf %280, %281 : vector<16x1xf32>
    %283 = vector.broadcast %282 : vector<16x1xf32> to vector<16x128xf32>
    %284 = arith.subf %278, %283 : vector<16x128xf32>
    %285 = arith.mulf %284, %284 : vector<16x128xf32>
    %cst_69 = arith.constant dense<0.000000e+00> : vector<16xf32>
    %286 = vector.multi_reduction <add>, %285, %cst_69 [1] : vector<16x128xf32> to vector<16xf32>
    %287 = vector.shape_cast %286 : vector<16xf32> to vector<16x1xf32>
    %cst_70 = arith.constant 0.00787401571 : f32
    %288 = vector.broadcast %cst_70 : f32 to vector<16x1xf32>
    %289 = arith.mulf %287, %288 : vector<16x1xf32>
    %290 = math.sqrt %289 : vector<16x1xf32>
    %cst_71 = arith.constant 9.99999997E-7 : f32
    %291 = vector.broadcast %cst_71 : f32 to vector<16x1xf32>
    %292 = arith.addf %290, %291 : vector<16x1xf32>
    %293 = tpu.reciprocal %292 {approx = true} : vector<16x1xf32> -> vector<16x1xf32>
    %c0_72 = arith.constant 0 : index
    %c0_73 = arith.constant 0 : index
    %294 = vector.load %arg23[%c0_72, %c0_73] : memref<1x128xf32, #tpu.memory_space<vmem>>, vector<1x128xf32>
    %295 = vector.broadcast %282 : vector<16x1xf32> to vector<16x128xf32>
    %296 = arith.subf %278, %295 : vector<16x128xf32>
    %297 = vector.broadcast %294 : vector<1x128xf32> to vector<16x128xf32>
    %298 = arith.mulf %297, %296 : vector<16x128xf32>
    %299 = vector.broadcast %293 : vector<16x1xf32> to vector<16x128xf32>
    %300 = arith.mulf %298, %299 : vector<16x128xf32>
    %c0_74 = arith.constant 0 : index
    %c0_75 = arith.constant 0 : index
    %301 = vector.load %arg24[%c0_74, %c0_75] : memref<1x128xf32, #tpu.memory_space<vmem>>, vector<1x128xf32>
    %302 = vector.broadcast %301 : vector<1x128xf32> to vector<16x128xf32>
    %303 = arith.addf %300, %302 : vector<16x128xf32>
    %304 = arith.truncf %303 : vector<16x128xf32> to vector<16x128xbf16>
    %c0_76 = arith.constant 0 : index
    %c0_77 = arith.constant 0 : index
    %305 = vector.load %arg19[%c0_76, %c0_77] : memref<128x256xbf16, #tpu.memory_space<vmem>>, vector<128x256xbf16>
    %cst_78 = arith.constant dense<0.000000e+00> : vector<16x256xf32>
    %306 = tpu.matmul %304, %305, %cst_78 {dimension_numbers = #tpu.dot_dimension_numbers<[1], [0], [0], [1], [0, 0, 1, 1], [], []>} : vector<16x128xbf16>, vector<128x256xbf16>, vector<16x256xf32> -> vector<16x256xf32>
    %c0_79 = arith.constant 0 : index
    %c0_80 = arith.constant 0 : index
    %307 = vector.load %arg20[%c0_79, %c0_80] : memref<1x256xf32, #tpu.memory_space<vmem>>, vector<1x256xf32>
    %308 = vector.broadcast %307 : vector<1x256xf32> to vector<16x256xf32>
    %309 = arith.addf %306, %308 : vector<16x256xf32>
    %cst_81 = arith.constant 0.000000e+00 : f32
    %310 = vector.broadcast %cst_81 : f32 to vector<16x256xf32>
    %311 = arith.maximumf %309, %310 : vector<16x256xf32>
    %312 = arith.truncf %311 : vector<16x256xf32> to vector<16x256xbf16>
    %c0_82 = arith.constant 0 : index
    %c0_83 = arith.constant 0 : index
    %313 = vector.load %arg21[%c0_82, %c0_83] : memref<256x128xbf16, #tpu.memory_space<vmem>>, vector<256x128xbf16>
    %cst_84 = arith.constant dense<0.000000e+00> : vector<16x128xf32>
    %314 = tpu.matmul %312, %313, %cst_84 {dimension_numbers = #tpu.dot_dimension_numbers<[1], [0], [0], [1], [0, 0, 1, 1], [], []>} : vector<16x256xbf16>, vector<256x128xbf16>, vector<16x128xf32> -> vector<16x128xf32>
    %c0_85 = arith.constant 0 : index
    %c0_86 = arith.constant 0 : index
    %315 = vector.load %arg22[%c0_85, %c0_86] : memref<1x128xf32, #tpu.memory_space<vmem>>, vector<1x128xf32>
    %316 = vector.broadcast %315 : vector<1x128xf32> to vector<16x128xf32>
    %317 = arith.addf %314, %316 : vector<16x128xf32>
    %318 = arith.addf %278, %317 : vector<16x128xf32>
    %319 = vector.shape_cast %318 : vector<16x128xf32> to vector<2x8x128xf32>
    %c0_87 = arith.constant 0 : index
    %c0_88 = arith.constant 0 : index
    %c0_89 = arith.constant 0 : index
    %320 = vector.load %arg27[%c0_87, %c0_88, %c0_89] : memref<2x8x128xf32, #tpu.memory_space<vmem>>, vector<2x8x128xf32>
    tpu.vector_store %arg27[%c0_87, %c0_88, %c0_89], %319 {strides = array<i32>} : memref<2x8x128xf32, #tpu.memory_space<vmem>>, vector<2x8x128xf32>,
    return
  }
  func.func @transform_0(%arg0: i32) -> (i32, i32, i32) {
    %c0_i32 = arith.constant 0 : i32
    %c0_i32_0 = arith.constant 0 : i32
    %c0_i32_1 = arith.constant 0 : i32
    return %arg0, %c0_i32, %c0_i32_0 : i32, i32, i32
  }
  func.func @transform_1(%arg0: i32) -> (i32, i32, i32) {
    %c0_i32 = arith.constant 0 : i32
    %c0_i32_0 = arith.constant 0 : i32
    %c0_i32_1 = arith.constant 0 : i32
    return %arg0, %c0_i32, %c0_i32_0 : i32, i32, i32
  }
  func.func @transform_2(%arg0: i32) -> (i32, i32, i32) {
    %c0_i32 = arith.constant 0 : i32
    %c0_i32_0 = arith.constant 0 : i32
    %c0_i32_1 = arith.constant 0 : i32
    return %arg0, %c0_i32, %c0_i32_0 : i32, i32, i32
  }
  func.func @transform_3(%arg0: i32) -> (i32, i32, i32) {
    %c0_i32 = arith.constant 0 : i32
    %c0_i32_0 = arith.constant 0 : i32
    %c0_i32_1 = arith.constant 0 : i32
    return %arg0, %c0_i32, %c0_i32_0 : i32, i32, i32
  }
  func.func @transform_4(%arg0: i32) -> (i32, i32) {
    %c0_i32 = arith.constant 0 : i32
    %c0_i32_0 = arith.constant 0 : i32
    %c0_i32_1 = arith.constant 0 : i32
    return %c0_i32, %c0_i32_0 : i32, i32
  }
  func.func @transform_5(%arg0: i32) -> (i32, i32) {
    %c0_i32 = arith.constant 0 : i32
    %c0_i32_0 = arith.constant 0 : i32
    %c0_i32_1 = arith.constant 0 : i32
    return %c0_i32, %c0_i32_0 : i32, i32
  }
  func.func @transform_6(%arg0: i32) -> (i32, i32) {
    %c0_i32 = arith.constant 0 : i32
    %c0_i32_0 = arith.constant 0 : i32
    %c0_i32_1 = arith.constant 0 : i32
    return %c0_i32, %c0_i32_0 : i32, i32
  }
  func.func @transform_7(%arg0: i32) -> (i32, i32) {
    %c0_i32 = arith.constant 0 : i32
    %c0_i32_0 = arith.constant 0 : i32
    %c0_i32_1 = arith.constant 0 : i32
    return %c0_i32, %c0_i32_0 : i32, i32
  }
  func.func @transform_8(%arg0: i32) -> (i32, i32) {
    %c0_i32 = arith.constant 0 : i32
    %c0_i32_0 = arith.constant 0 : i32
    %c0_i32_1 = arith.constant 0 : i32
    return %c0_i32, %c0_i32_0 : i32, i32
  }
  func.func @transform_9(%arg0: i32) -> (i32, i32) {
    %c0_i32 = arith.constant 0 : i32
    %c0_i32_0 = arith.constant 0 : i32
    %c0_i32_1 = arith.constant 0 : i32
    return %c0_i32, %c0_i32_0 : i32, i32
  }
  func.func @transform_10(%arg0: i32) -> (i32, i32) {
    %c0_i32 = arith.constant 0 : i32
    %c0_i32_0 = arith.constant 0 : i32
    %c0_i32_1 = arith.constant 0 : i32
    return %c0_i32, %c0_i32_0 : i32, i32
  }
  func.func @transform_11(%arg0: i32) -> (i32, i32) {
    %c0_i32 = arith.constant 0 : i32
    %c0_i32_0 = arith.constant 0 : i32
    %c0_i32_1 = arith.constant 0 : i32
    return %c0_i32, %c0_i32_0 : i32, i32
  }
  func.func @transform_12(%arg0: i32) -> (i32, i32) {
    %c0_i32 = arith.constant 0 : i32
    %c0_i32_0 = arith.constant 0 : i32
    %c0_i32_1 = arith.constant 0 : i32
    return %c0_i32, %c0_i32_0 : i32, i32
  }
  func.func @transform_13(%arg0: i32) -> (i32, i32) {
    %c0_i32 = arith.constant 0 : i32
    %c0_i32_0 = arith.constant 0 : i32
    %c0_i32_1 = arith.constant 0 : i32
    return %c0_i32, %c0_i32_0 : i32, i32
  }
  func.func @transform_14(%arg0: i32) -> (i32, i32) {
    %c0_i32 = arith.constant 0 : i32
    %c0_i32_0 = arith.constant 0 : i32
    %c0_i32_1 = arith.constant 0 : i32
    return %c0_i32, %c0_i32_0 : i32, i32
  }
  func.func @transform_15(%arg0: i32) -> (i32, i32) {
    %c0_i32 = arith.constant 0 : i32
    %c0_i32_0 = arith.constant 0 : i32
    %c0_i32_1 = arith.constant 0 : i32
    return %c0_i32, %c0_i32_0 : i32, i32
  }
  func.func @transform_16(%arg0: i32) -> (i32, i32) {
    %c0_i32 = arith.constant 0 : i32
    %c0_i32_0 = arith.constant 0 : i32
    %c0_i32_1 = arith.constant 0 : i32
    return %c0_i32, %c0_i32_0 : i32, i32
  }
  func.func @transform_17(%arg0: i32) -> (i32, i32) {
    %c0_i32 = arith.constant 0 : i32
    %c0_i32_0 = arith.constant 0 : i32
    %c0_i32_1 = arith.constant 0 : i32
    return %c0_i32, %c0_i32_0 : i32, i32
  }
  func.func @transform_18(%arg0: i32) -> (i32, i32) {
    %c0_i32 = arith.constant 0 : i32
    %c0_i32_0 = arith.constant 0 : i32
    %c0_i32_1 = arith.constant 0 : i32
    return %c0_i32, %c0_i32_0 : i32, i32
  }
  func.func @transform_19(%arg0: i32) -> (i32, i32) {
    %c0_i32 = arith.constant 0 : i32
    %c0_i32_0 = arith.constant 0 : i32
    %c0_i32_1 = arith.constant 0 : i32
    return %c0_i32, %c0_i32_0 : i32, i32
  }
  func.func @transform_20(%arg0: i32) -> (i32, i32) {
    %c0_i32 = arith.constant 0 : i32
    %c0_i32_0 = arith.constant 0 : i32
    %c0_i32_1 = arith.constant 0 : i32
    return %c0_i32, %c0_i32_0 : i32, i32
  }
  func.func @transform_21(%arg0: i32) -> (i32, i32) {
    %c0_i32 = arith.constant 0 : i32
    %c0_i32_0 = arith.constant 0 : i32
    %c0_i32_1 = arith.constant 0 : i32
    return %c0_i32, %c0_i32_0 : i32, i32
  }
  func.func @transform_22(%arg0: i32) -> (i32, i32) {
    %c0_i32 = arith.constant 0 : i32
    %c0_i32_0 = arith.constant 0 : i32
    %c0_i32_1 = arith.constant 0 : i32
    return %c0_i32, %c0_i32_0 : i32, i32
  }
  func.func @transform_23(%arg0: i32) -> (i32, i32) {
    %c0_i32 = arith.constant 0 : i32
    %c0_i32_0 = arith.constant 0 : i32
    %c0_i32_1 = arith.constant 0 : i32
    return %c0_i32, %c0_i32_0 : i32, i32
  }
  func.func @transform_24(%arg0: i32) -> (i32, i32) {
    %c0_i32 = arith.constant 0 : i32
    %c0_i32_0 = arith.constant 0 : i32
    %c0_i32_1 = arith.constant 0 : i32
    return %c0_i32, %c0_i32_0 : i32, i32
  }
  func.func @transform_25(%arg0: i32) -> (i32, i32) {
    %c0_i32 = arith.constant 0 : i32
    %c0_i32_0 = arith.constant 0 : i32
    %c0_i32_1 = arith.constant 0 : i32
    return %c0_i32, %c0_i32_0 : i32, i32
  }
  func.func @transform_26(%arg0: i32) -> (i32, i32, i32) {
    %c0_i32 = arith.constant 0 : i32
    %c0_i32_0 = arith.constant 0 : i32
    %c0_i32_1 = arith.constant 0 : i32
    return %arg0, %c0_i32, %c0_i32_0 : i32, i32, i32
  }
}

module attributes {stable_mosaic.version = 11 : i64} {
  func.func @decoder_layer_kernel(%arg0: i32, %arg1: memref<2x8x128xf32, #tpu.memory_space<vmem>>, %arg2: memref<2x16x128xf32, #tpu.memory_space<vmem>>, %arg3: memref<8x8x8xf32, #tpu.memory_space<vmem>>, %arg4: memref<8x1x16xf32, #tpu.memory_space<vmem>>, %arg5: memref<128x384xbf16, #tpu.memory_space<vmem>>, %arg6: memref<1x384xf32, #tpu.memory_space<vmem>>, %arg7: memref<128x128xbf16, #tpu.memory_space<vmem>>, %arg8: memref<1x128xf32, #tpu.memory_space<vmem>>, %arg9: memref<1x128xf32, #tpu.memory_space<vmem>>, %arg10: memref<1x128xf32, #tpu.memory_space<vmem>>, %arg11: memref<128x128xbf16, #tpu.memory_space<vmem>>, %arg12: memref<1x128xf32, #tpu.memory_space<vmem>>, %arg13: memref<128x256xbf16, #tpu.memory_space<vmem>>, %arg14: memref<1x256xf32, #tpu.memory_space<vmem>>, %arg15: memref<128x128xbf16, #tpu.memory_space<vmem>>, %arg16: memref<1x128xf32, #tpu.memory_space<vmem>>, %arg17: memref<1x128xf32, #tpu.memory_space<vmem>>, %arg18: memref<1x128xf32, #tpu.memory_space<vmem>>, %arg19: memref<128x256xbf16, #tpu.memory_space<vmem>>, %arg20: memref<1x256xf32, #tpu.memory_space<vmem>>, %arg21: memref<256x128xbf16, #tpu.memory_space<vmem>>, %arg22: memref<1x128xf32, #tpu.memory_space<vmem>>, %arg23: memref<1x128xf32, #tpu.memory_space<vmem>>, %arg24: memref<1x128xf32, #tpu.memory_space<vmem>>, %arg25: memref<1x128xf32, #tpu.memory_space<vmem>>, %arg26: memref<1x128xf32, #tpu.memory_space<vmem>>, %arg27: memref<2x8x128xf32, #tpu.memory_space<vmem>>) attributes {dimension_semantics = [#tpu.dimension_semantics<parallel>], iteration_bounds = array<i64: 1>, scalar_prefetch = 0 : i64, scratch_operands = 0 : i64, tpu.core_type = #tpu.core_type<tc>, window_params = [{transform_indices = @transform_0, window_bounds = array<i64: 2, 8, 128>}, {transform_indices = @transform_1, window_bounds = array<i64: 2, 16, 128>}, {transform_indices = @transform_2, window_bounds = array<i64: 8, 8, 8>}, {transform_indices = @transform_3, window_bounds = array<i64: 8, 1, 16>}, {pipeline_mode = #tpu.pipeline_mode<synchronous>, transform_indices = @transform_4, window_bounds = array<i64: 128, 384>}, {pipeline_mode = #tpu.pipeline_mode<synchronous>, transform_indices = @transform_5, window_bounds = array<i64: 1, 384>}, {pipeline_mode = #tpu.pipeline_mode<synchronous>, transform_indices = @transform_6, window_bounds = array<i64: 128, 128>}, {pipeline_mode = #tpu.pipeline_mode<synchronous>, transform_indices = @transform_7, window_bounds = array<i64: 1, 128>}, {pipeline_mode = #tpu.pipeline_mode<synchronous>, transform_indices = @transform_8, window_bounds = array<i64: 1, 128>}, {pipeline_mode = #tpu.pipeline_mode<synchronous>, transform_indices = @transform_9, window_bounds = array<i64: 1, 128>}, {pipeline_mode = #tpu.pipeline_mode<synchronous>, transform_indices = @transform_10, window_bounds = array<i64: 128, 128>}, {pipeline_mode = #tpu.pipeline_mode<synchronous>, transform_indices = @transform_11, window_bounds = array<i64: 1, 128>}, {pipeline_mode = #tpu.pipeline_mode<synchronous>, transform_indices = @transform_12, window_bounds = array<i64: 128, 256>}, {pipeline_mode = #tpu.pipeline_mode<synchronous>, transform_indices = @transform_13, window_bounds = array<i64: 1, 256>}, {pipeline_mode = #tpu.pipeline_mode<synchronous>, transform_indices = @transform_14, window_bounds = array<i64: 128, 128>}, {pipeline_mode = #tpu.pipeline_mode<synchronous>, transform_indices = @transform_15, window_bounds = array<i64: 1, 128>}, {pipeline_mode = #tpu.pipeline_mode<synchronous>, transform_indices = @transform_16, window_bounds = array<i64: 1, 128>}, {pipeline_mode = #tpu.pipeline_mode<synchronous>, transform_indices = @transform_17, window_bounds = array<i64: 1, 128>}, {pipeline_mode = #tpu.pipeline_mode<synchronous>, transform_indices = @transform_18, window_bounds = array<i64: 128, 256>}, {pipeline_mode = #tpu.pipeline_mode<synchronous>, transform_indices = @transform_19, window_bounds = array<i64: 1, 256>}, {pipeline_mode = #tpu.pipeline_mode<synchronous>, transform_indices = @transform_20, window_bounds = array<i64: 256, 128>}, {pipeline_mode = #tpu.pipeline_mode<synchronous>, transform_indices = @transform_21, window_bounds = array<i64: 1, 128>}, {pipeline_mode = #tpu.pipeline_mode<synchronous>, transform_indices = @transform_22, window_bounds = array<i64: 1, 128>}, {pipeline_mode = #tpu.pipeline_mode<synchronous>, transform_indices = @transform_23, window_bounds = array<i64: 1, 128>}, {pipeline_mode = #tpu.pipeline_mode<synchronous>, transform_indices = @transform_24, window_bounds = array<i64: 1, 128>}, {pipeline_mode = #tpu.pipeline_mode<synchronous>, transform_indices = @transform_25, window_bounds = array<i64: 1, 128>}, {transform_indices = @transform_26, window_bounds = array<i64: 2, 8, 128>}]} {
    %c0 = arith.constant 0 : index
    %c0_0 = arith.constant 0 : index
    %c0_1 = arith.constant 0 : index
    %0 = vector.load %arg1[%c0, %c0_0, %c0_1] : memref<2x8x128xf32, #tpu.memory_space<vmem>>, vector<2x8x128xf32>
    %1 = vector.shape_cast %0 : vector<2x8x128xf32> to vector<16x128xf32>
    %c0_2 = arith.constant 0 : index
    %c0_3 = arith.constant 0 : index
    %c0_4 = arith.constant 0 : index
    %2 = vector.load %arg2[%c0_2, %c0_3, %c0_4] : memref<2x16x128xf32, #tpu.memory_space<vmem>>, vector<2x16x128xf32>
    %3 = vector.shape_cast %2 : vector<2x16x128xf32> to vector<32x128xf32>
    %cst = arith.constant dense<0.000000e+00> : vector<16xf32>
    %4 = vector.multi_reduction <add>, %1, %cst [1] : vector<16x128xf32> to vector<16xf32>
    %5 = vector.shape_cast %4 : vector<16xf32> to vector<16x1xf32>
    %cst_5 = arith.constant 1.280000e+02 : f32
    %6 = vector.broadcast %cst_5 : f32 to vector<16x1xf32>
    %7 = arith.divf %5, %6 : vector<16x1xf32>
    %8 = vector.broadcast %7 : vector<16x1xf32> to vector<16x128xf32>
    %9 = arith.subf %1, %8 : vector<16x128xf32>
    %10 = arith.mulf %9, %9 : vector<16x128xf32>
    %cst_6 = arith.constant dense<0.000000e+00> : vector<16xf32>
    %11 = vector.multi_reduction <add>, %10, %cst_6 [1] : vector<16x128xf32> to vector<16xf32>
    %12 = vector.shape_cast %11 : vector<16xf32> to vector<16x1xf32>
    %cst_7 = arith.constant 0.00787401571 : f32
    %13 = vector.broadcast %cst_7 : f32 to vector<16x1xf32>
    %14 = arith.mulf %12, %13 : vector<16x1xf32>
    %15 = math.sqrt %14 : vector<16x1xf32>
    %cst_8 = arith.constant 9.99999997E-7 : f32
    %16 = vector.broadcast %cst_8 : f32 to vector<16x1xf32>
    %17 = arith.addf %15, %16 : vector<16x1xf32>
    %18 = tpu.reciprocal %17 {approx = true} : vector<16x1xf32> -> vector<16x1xf32>
    %c0_9 = arith.constant 0 : index
    %c0_10 = arith.constant 0 : index
    %19 = vector.load %arg9[%c0_9, %c0_10] : memref<1x128xf32, #tpu.memory_space<vmem>>, vector<1x128xf32>
    %20 = vector.broadcast %7 : vector<16x1xf32> to vector<16x128xf32>
    %21 = arith.subf %1, %20 : vector<16x128xf32>
    %22 = vector.broadcast %19 : vector<1x128xf32> to vector<16x128xf32>
    %23 = arith.mulf %22, %21 : vector<16x128xf32>
    %24 = vector.broadcast %18 : vector<16x1xf32> to vector<16x128xf32>
    %25 = arith.mulf %23, %24 : vector<16x128xf32>
    %c0_11 = arith.constant 0 : index
    %c0_12 = arith.constant 0 : index
    %26 = vector.load %arg10[%c0_11, %c0_12] : memref<1x128xf32, #tpu.memory_space<vmem>>, vector<1x128xf32>
    %27 = vector.broadcast %26 : vector<1x128xf32> to vector<16x128xf32>
    %28 = arith.addf %25, %27 : vector<16x128xf32>
    %29 = arith.truncf %28 : vector<16x128xf32> to vector<16x128xbf16>
    %c0_13 = arith.constant 0 : index
    %c0_14 = arith.constant 0 : index
    %30 = vector.load %arg5[%c0_13, %c0_14] : memref<128x384xbf16, #tpu.memory_space<vmem>>, vector<128x384xbf16>
    %cst_15 = arith.constant dense<0.000000e+00> : vector<16x384xf32>
    %31 = tpu.matmul %29, %30, %cst_15 {dimension_numbers = #tpu.dot_dimension_numbers<[1], [0], [0], [1], [0, 0, 1, 1], [], []>} : vector<16x128xbf16>, vector<128x384xbf16>, vector<16x384xf32> -> vector<16x384xf32>
    %c0_16 = arith.constant 0 : index
    %c0_17 = arith.constant 0 : index
    %32 = vector.load %arg6[%c0_16, %c0_17] : memref<1x384xf32, #tpu.memory_space<vmem>>, vector<1x384xf32>
    %33 = vector.broadcast %32 : vector<1x384xf32> to vector<16x384xf32>
    %34 = arith.addf %31, %33 : vector<16x384xf32>
    %35 = vector.extract_strided_slice %34 {offsets = [0, 0], sizes = [16, 128], strides = [1, 1]} : vector<16x384xf32> to vector<16x128xf32>
    %36 = vector.extract_strided_slice %34 {offsets = [0, 128], sizes = [16, 128], strides = [1, 1]} : vector<16x384xf32> to vector<16x128xf32>
    %37 = vector.extract_strided_slice %34 {offsets = [0, 256], sizes = [16, 128], strides = [1, 1]} : vector<16x384xf32> to vector<16x128xf32>
    %c0_18 = arith.constant 0 : index
    %c0_19 = arith.constant 0 : index
    %c0_20 = arith.constant 0 : index
    %38 = vector.load %arg3[%c0_18, %c0_19, %c0_20] : memref<8x8x8xf32, #tpu.memory_space<vmem>>, vector<8x8x8xf32>
    %39 = vector.extract_strided_slice %35 {offsets = [0, 0], sizes = [8, 32], strides = [1, 1]} : vector<16x128xf32> to vector<8x32xf32>
    %40 = vector.extract_strided_slice %35 {offsets = [0, 32], sizes = [8, 32], strides = [1, 1]} : vector<16x128xf32> to vector<8x32xf32>
    %41 = vector.extract_strided_slice %35 {offsets = [0, 64], sizes = [8, 32], strides = [1, 1]} : vector<16x128xf32> to vector<8x32xf32>
    %42 = vector.extract_strided_slice %35 {offsets = [0, 96], sizes = [8, 32], strides = [1, 1]} : vector<16x128xf32> to vector<8x32xf32>
    %43 = vector.extract_strided_slice %35 {offsets = [8, 0], sizes = [8, 32], strides = [1, 1]} : vector<16x128xf32> to vector<8x32xf32>
    %44 = vector.extract_strided_slice %35 {offsets = [8, 32], sizes = [8, 32], strides = [1, 1]} : vector<16x128xf32> to vector<8x32xf32>
    %45 = vector.extract_strided_slice %35 {offsets = [8, 64], sizes = [8, 32], strides = [1, 1]} : vector<16x128xf32> to vector<8x32xf32>
    %46 = vector.extract_strided_slice %35 {offsets = [8, 96], sizes = [8, 32], strides = [1, 1]} : vector<16x128xf32> to vector<8x32xf32>
    %47 = vector.shape_cast %39 : vector<8x32xf32> to vector<1x8x32xf32>
    %48 = vector.shape_cast %40 : vector<8x32xf32> to vector<1x8x32xf32>
    %49 = vector.shape_cast %41 : vector<8x32xf32> to vector<1x8x32xf32>
    %50 = vector.shape_cast %42 : vector<8x32xf32> to vector<1x8x32xf32>
    %51 = vector.shape_cast %43 : vector<8x32xf32> to vector<1x8x32xf32>
    %52 = vector.shape_cast %44 : vector<8x32xf32> to vector<1x8x32xf32>
    %53 = vector.shape_cast %45 : vector<8x32xf32> to vector<1x8x32xf32>
    %54 = vector.shape_cast %46 : vector<8x32xf32> to vector<1x8x32xf32>
    %55 = tpu.concatenate %47, %48, %49, %50, %51, %52, %53, %54 in 0 : vector<1x8x32xf32>, vector<1x8x32xf32>, vector<1x8x32xf32>, vector<1x8x32xf32>, vector<1x8x32xf32>, vector<1x8x32xf32>, vector<1x8x32xf32>, vector<1x8x32xf32> -> vector<8x8x32xf32>
    %56 = arith.truncf %55 : vector<8x8x32xf32> to vector<8x8x32xbf16>
    %57 = vector.extract_strided_slice %36 {offsets = [0, 0], sizes = [8, 32], strides = [1, 1]} : vector<16x128xf32> to vector<8x32xf32>
    %58 = vector.extract_strided_slice %36 {offsets = [0, 32], sizes = [8, 32], strides = [1, 1]} : vector<16x128xf32> to vector<8x32xf32>
    %59 = vector.extract_strided_slice %36 {offsets = [0, 64], sizes = [8, 32], strides = [1, 1]} : vector<16x128xf32> to vector<8x32xf32>
    %60 = vector.extract_strided_slice %36 {offsets = [0, 96], sizes = [8, 32], strides = [1, 1]} : vector<16x128xf32> to vector<8x32xf32>
    %61 = vector.extract_strided_slice %36 {offsets = [8, 0], sizes = [8, 32], strides = [1, 1]} : vector<16x128xf32> to vector<8x32xf32>
    %62 = vector.extract_strided_slice %36 {offsets = [8, 32], sizes = [8, 32], strides = [1, 1]} : vector<16x128xf32> to vector<8x32xf32>
    %63 = vector.extract_strided_slice %36 {offsets = [8, 64], sizes = [8, 32], strides = [1, 1]} : vector<16x128xf32> to vector<8x32xf32>
    %64 = vector.extract_strided_slice %36 {offsets = [8, 96], sizes = [8, 32], strides = [1, 1]} : vector<16x128xf32> to vector<8x32xf32>
    %65 = vector.shape_cast %57 : vector<8x32xf32> to vector<1x8x32xf32>
    %66 = vector.shape_cast %58 : vector<8x32xf32> to vector<1x8x32xf32>
    %67 = vector.shape_cast %59 : vector<8x32xf32> to vector<1x8x32xf32>
    %68 = vector.shape_cast %60 : vector<8x32xf32> to vector<1x8x32xf32>
    %69 = vector.shape_cast %61 : vector<8x32xf32> to vector<1x8x32xf32>
    %70 = vector.shape_cast %62 : vector<8x32xf32> to vector<1x8x32xf32>
    %71 = vector.shape_cast %63 : vector<8x32xf32> to vector<1x8x32xf32>
    %72 = vector.shape_cast %64 : vector<8x32xf32> to vector<1x8x32xf32>
    %73 = tpu.concatenate %65, %66, %67, %68, %69, %70, %71, %72 in 0 : vector<1x8x32xf32>, vector<1x8x32xf32>, vector<1x8x32xf32>, vector<1x8x32xf32>, vector<1x8x32xf32>, vector<1x8x32xf32>, vector<1x8x32xf32>, vector<1x8x32xf32> -> vector<8x8x32xf32>
    %74 = arith.truncf %73 : vector<8x8x32xf32> to vector<8x8x32xbf16>
    %75 = vector.extract_strided_slice %37 {offsets = [0, 0], sizes = [8, 32], strides = [1, 1]} : vector<16x128xf32> to vector<8x32xf32>
    %76 = vector.extract_strided_slice %37 {offsets = [0, 32], sizes = [8, 32], strides = [1, 1]} : vector<16x128xf32> to vector<8x32xf32>
    %77 = vector.extract_strided_slice %37 {offsets = [0, 64], sizes = [8, 32], strides = [1, 1]} : vector<16x128xf32> to vector<8x32xf32>
    %78 = vector.extract_strided_slice %37 {offsets = [0, 96], sizes = [8, 32], strides = [1, 1]} : vector<16x128xf32> to vector<8x32xf32>
    %79 = vector.extract_strided_slice %37 {offsets = [8, 0], sizes = [8, 32], strides = [1, 1]} : vector<16x128xf32> to vector<8x32xf32>
    %80 = vector.extract_strided_slice %37 {offsets = [8, 32], sizes = [8, 32], strides = [1, 1]} : vector<16x128xf32> to vector<8x32xf32>
    %81 = vector.extract_strided_slice %37 {offsets = [8, 64], sizes = [8, 32], strides = [1, 1]} : vector<16x128xf32> to vector<8x32xf32>
    %82 = vector.extract_strided_slice %37 {offsets = [8, 96], sizes = [8, 32], strides = [1, 1]} : vector<16x128xf32> to vector<8x32xf32>
    %83 = vector.shape_cast %75 : vector<8x32xf32> to vector<1x8x32xf32>
    %84 = vector.shape_cast %76 : vector<8x32xf32> to vector<1x8x32xf32>
    %85 = vector.shape_cast %77 : vector<8x32xf32> to vector<1x8x32xf32>
    %86 = vector.shape_cast %78 : vector<8x32xf32> to vector<1x8x32xf32>
    %87 = vector.shape_cast %79 : vector<8x32xf32> to vector<1x8x32xf32>
    %88 = vector.shape_cast %80 : vector<8x32xf32> to vector<1x8x32xf32>
    %89 = vector.shape_cast %81 : vector<8x32xf32> to vector<1x8x32xf32>
    %90 = vector.shape_cast %82 : vector<8x32xf32> to vector<1x8x32xf32>
    %91 = tpu.concatenate %83, %84, %85, %86, %87, %88, %89, %90 in 0 : vector<1x8x32xf32>, vector<1x8x32xf32>, vector<1x8x32xf32>, vector<1x8x32xf32>, vector<1x8x32xf32>, vector<1x8x32xf32>, vector<1x8x32xf32>, vector<1x8x32xf32> -> vector<8x8x32xf32>
    %92 = arith.truncf %91 : vector<8x8x32xf32> to vector<8x8x32xbf16>
    "tpu.trace_start"() <{level = 10 : i32, message = "bqd,bkd->bqk"}> : () -> ()
    %cst_21 = arith.constant dense<0.000000e+00> : vector<8x8x8xf32>
    %93 = tpu.matmul %56, %74, %cst_21 {dimension_numbers = #tpu.dot_dimension_numbers<[2], [2], [1], [1], [0, 0, 0, 1, 1, 1], [0], [0]>} : vector<8x8x32xbf16>, vector<8x8x32xbf16>, vector<8x8x8xf32> -> vector<8x8x8xf32>
    "tpu.trace_stop"() : () -> ()
    %cst_22 = arith.constant 0.176776692 : f32
    %94 = vector.broadcast %cst_22 : f32 to vector<8x8x8xf32>
    %95 = arith.mulf %93, %94 : vector<8x8x8xf32>
    %cst_23 = arith.constant 0.000000e+00 : f32
    %96 = vector.broadcast %cst_23 : f32 to vector<8x8x8xf32>
    %97 = arith.cmpf oeq, %38, %96 : vector<8x8x8xf32>
    %cst_24 = arith.constant -1.000000e+09 : f32
    %98 = vector.broadcast %cst_24 : f32 to vector<8x8x8xf32>
    %99 = arith.select %97, %98, %95 : vector<8x8x8xi1>, vector<8x8x8xf32>
    %cst_25 = arith.constant dense<0xFF800000> : vector<8x8xf32>
    %100 = vector.multi_reduction <maximumf>, %99, %cst_25 [2] : vector<8x8x8xf32> to vector<8x8xf32>
    %101 = vector.shape_cast %100 : vector<8x8xf32> to vector<8x8x1xf32>
    %102 = vector.broadcast %101 : vector<8x8x1xf32> to vector<8x8x8xf32>
    %103 = arith.subf %99, %102 : vector<8x8x8xf32>
    %104 = math.exp %103 : vector<8x8x8xf32>
    %cst_26 = arith.constant dense<0.000000e+00> : vector<8x8xf32>
    %105 = vector.multi_reduction <add>, %104, %cst_26 [2] : vector<8x8x8xf32> to vector<8x8xf32>
    %106 = vector.shape_cast %105 : vector<8x8xf32> to vector<8x8x1xf32>
    %107 = tpu.reciprocal %106 {approx = true} : vector<8x8x1xf32> -> vector<8x8x1xf32>
    %108 = vector.broadcast %107 : vector<8x8x1xf32> to vector<8x8x8xf32>
    %109 = arith.mulf %104, %108 : vector<8x8x8xf32>
    %110 = arith.truncf %109 : vector<8x8x8xf32> to vector<8x8x8xbf16>
    "tpu.trace_start"() <{level = 10 : i32, message = "bqk,bkd->bqd"}> : () -> ()
    %cst_27 = arith.constant dense<0.000000e+00> : vector<8x8x32xf32>
    %111 = tpu.matmul %110, %92, %cst_27 {dimension_numbers = #tpu.dot_dimension_numbers<[2], [1], [1], [2], [0, 0, 0, 1, 1, 2], [0], [0]>} : vector<8x8x8xbf16>, vector<8x8x32xbf16>, vector<8x8x32xf32> -> vector<8x8x32xf32>
    "tpu.trace_stop"() : () -> ()
    %112 = vector.extract_strided_slice %111 {offsets = [0, 0, 0], sizes = [1, 8, 32], strides = [1, 1, 1]} : vector<8x8x32xf32> to vector<1x8x32xf32>
    %113 = vector.shape_cast %112 : vector<1x8x32xf32> to vector<8x32xf32>
    %114 = vector.extract_strided_slice %111 {offsets = [1, 0, 0], sizes = [1, 8, 32], strides = [1, 1, 1]} : vector<8x8x32xf32> to vector<1x8x32xf32>
    %115 = vector.shape_cast %114 : vector<1x8x32xf32> to vector<8x32xf32>
    %116 = vector.extract_strided_slice %111 {offsets = [2, 0, 0], sizes = [1, 8, 32], strides = [1, 1, 1]} : vector<8x8x32xf32> to vector<1x8x32xf32>
    %117 = vector.shape_cast %116 : vector<1x8x32xf32> to vector<8x32xf32>
    %118 = vector.extract_strided_slice %111 {offsets = [3, 0, 0], sizes = [1, 8, 32], strides = [1, 1, 1]} : vector<8x8x32xf32> to vector<1x8x32xf32>
    %119 = vector.shape_cast %118 : vector<1x8x32xf32> to vector<8x32xf32>
    %120 = tpu.concatenate %113, %115, %117, %119 in 1 : vector<8x32xf32>, vector<8x32xf32>, vector<8x32xf32>, vector<8x32xf32> -> vector<8x128xf32>
    %121 = vector.extract_strided_slice %111 {offsets = [4, 0, 0], sizes = [1, 8, 32], strides = [1, 1, 1]} : vector<8x8x32xf32> to vector<1x8x32xf32>
    %122 = vector.shape_cast %121 : vector<1x8x32xf32> to vector<8x32xf32>
    %123 = vector.extract_strided_slice %111 {offsets = [5, 0, 0], sizes = [1, 8, 32], strides = [1, 1, 1]} : vector<8x8x32xf32> to vector<1x8x32xf32>
    %124 = vector.shape_cast %123 : vector<1x8x32xf32> to vector<8x32xf32>
    %125 = vector.extract_strided_slice %111 {offsets = [6, 0, 0], sizes = [1, 8, 32], strides = [1, 1, 1]} : vector<8x8x32xf32> to vector<1x8x32xf32>
    %126 = vector.shape_cast %125 : vector<1x8x32xf32> to vector<8x32xf32>
    %127 = vector.extract_strided_slice %111 {offsets = [7, 0, 0], sizes = [1, 8, 32], strides = [1, 1, 1]} : vector<8x8x32xf32> to vector<1x8x32xf32>
    %128 = vector.shape_cast %127 : vector<1x8x32xf32> to vector<8x32xf32>
    %129 = tpu.concatenate %122, %124, %126, %128 in 1 : vector<8x32xf32>, vector<8x32xf32>, vector<8x32xf32>, vector<8x32xf32> -> vector<8x128xf32>
    %130 = tpu.concatenate %120, %129 in 0 : vector<8x128xf32>, vector<8x128xf32> -> vector<16x128xf32>
    %131 = arith.truncf %130 : vector<16x128xf32> to vector<16x128xbf16>
    %c0_28 = arith.constant 0 : index
    %c0_29 = arith.constant 0 : index
    %132 = vector.load %arg7[%c0_28, %c0_29] : memref<128x128xbf16, #tpu.memory_space<vmem>>, vector<128x128xbf16>
    %cst_30 = arith.constant dense<0.000000e+00> : vector<16x128xf32>
    %133 = tpu.matmul %131, %132, %cst_30 {dimension_numbers = #tpu.dot_dimension_numbers<[1], [0], [0], [1], [0, 0, 1, 1], [], []>} : vector<16x128xbf16>, vector<128x128xbf16>, vector<16x128xf32> -> vector<16x128xf32>
    %c0_31 = arith.constant 0 : index
    %c0_32 = arith.constant 0 : index
    %134 = vector.load %arg8[%c0_31, %c0_32] : memref<1x128xf32, #tpu.memory_space<vmem>>, vector<1x128xf32>
    %135 = vector.broadcast %134 : vector<1x128xf32> to vector<16x128xf32>
    %136 = arith.addf %133, %135 : vector<16x128xf32>
    %137 = arith.addf %1, %136 : vector<16x128xf32>
    %cst_33 = arith.constant dense<0.000000e+00> : vector<16xf32>
    %138 = vector.multi_reduction <add>, %137, %cst_33 [1] : vector<16x128xf32> to vector<16xf32>
    %139 = vector.shape_cast %138 : vector<16xf32> to vector<16x1xf32>
    %cst_34 = arith.constant 1.280000e+02 : f32
    %140 = vector.broadcast %cst_34 : f32 to vector<16x1xf32>
    %141 = arith.divf %139, %140 : vector<16x1xf32>
    %142 = vector.broadcast %141 : vector<16x1xf32> to vector<16x128xf32>
    %143 = arith.subf %137, %142 : vector<16x128xf32>
    %144 = arith.mulf %143, %143 : vector<16x128xf32>
    %cst_35 = arith.constant dense<0.000000e+00> : vector<16xf32>
    %145 = vector.multi_reduction <add>, %144, %cst_35 [1] : vector<16x128xf32> to vector<16xf32>
    %146 = vector.shape_cast %145 : vector<16xf32> to vector<16x1xf32>
    %cst_36 = arith.constant 0.00787401571 : f32
    %147 = vector.broadcast %cst_36 : f32 to vector<16x1xf32>
    %148 = arith.mulf %146, %147 : vector<16x1xf32>
    %149 = math.sqrt %148 : vector<16x1xf32>
    %cst_37 = arith.constant 9.99999997E-7 : f32
    %150 = vector.broadcast %cst_37 : f32 to vector<16x1xf32>
    %151 = arith.addf %149, %150 : vector<16x1xf32>
    %152 = tpu.reciprocal %151 {approx = true} : vector<16x1xf32> -> vector<16x1xf32>
    %c0_38 = arith.constant 0 : index
    %c0_39 = arith.constant 0 : index
    %153 = vector.load %arg17[%c0_38, %c0_39] : memref<1x128xf32, #tpu.memory_space<vmem>>, vector<1x128xf32>
    %154 = vector.broadcast %141 : vector<16x1xf32> to vector<16x128xf32>
    %155 = arith.subf %137, %154 : vector<16x128xf32>
    %156 = vector.broadcast %153 : vector<1x128xf32> to vector<16x128xf32>
    %157 = arith.mulf %156, %155 : vector<16x128xf32>
    %158 = vector.broadcast %152 : vector<16x1xf32> to vector<16x128xf32>
    %159 = arith.mulf %157, %158 : vector<16x128xf32>
    %c0_40 = arith.constant 0 : index
    %c0_41 = arith.constant 0 : index
    %160 = vector.load %arg18[%c0_40, %c0_41] : memref<1x128xf32, #tpu.memory_space<vmem>>, vector<1x128xf32>
    %161 = vector.broadcast %160 : vector<1x128xf32> to vector<16x128xf32>
    %162 = arith.addf %159, %161 : vector<16x128xf32>
    %163 = arith.truncf %162 : vector<16x128xf32> to vector<16x128xbf16>
    %c0_42 = arith.constant 0 : index
    %c0_43 = arith.constant 0 : index
    %164 = vector.load %arg11[%c0_42, %c0_43] : memref<128x128xbf16, #tpu.memory_space<vmem>>, vector<128x128xbf16>
    %cst_44 = arith.constant dense<0.000000e+00> : vector<16x128xf32>
    %165 = tpu.matmul %163, %164, %cst_44 {dimension_numbers = #tpu.dot_dimension_numbers<[1], [0], [0], [1], [0, 0, 1, 1], [], []>} : vector<16x128xbf16>, vector<128x128xbf16>, vector<16x128xf32> -> vector<16x128xf32>
    %c0_45 = arith.constant 0 : index
    %c0_46 = arith.constant 0 : index
    %166 = vector.load %arg12[%c0_45, %c0_46] : memref<1x128xf32, #tpu.memory_space<vmem>>, vector<1x128xf32>
    %167 = vector.broadcast %166 : vector<1x128xf32> to vector<16x128xf32>
    %168 = arith.addf %165, %167 : vector<16x128xf32>
    %169 = arith.truncf %3 : vector<32x128xf32> to vector<32x128xbf16>
    %c0_47 = arith.constant 0 : index
    %c0_48 = arith.constant 0 : index
    %170 = vector.load %arg13[%c0_47, %c0_48] : memref<128x256xbf16, #tpu.memory_space<vmem>>, vector<128x256xbf16>
    %cst_49 = arith.constant dense<0.000000e+00> : vector<32x256xf32>
    %171 = tpu.matmul %169, %170, %cst_49 {dimension_numbers = #tpu.dot_dimension_numbers<[1], [0], [0], [1], [0, 0, 1, 1], [], []>} : vector<32x128xbf16>, vector<128x256xbf16>, vector<32x256xf32> -> vector<32x256xf32>
    %c0_50 = arith.constant 0 : index
    %c0_51 = arith.constant 0 : index
    %172 = vector.load %arg14[%c0_50, %c0_51] : memref<1x256xf32, #tpu.memory_space<vmem>>, vector<1x256xf32>
    %173 = vector.broadcast %172 : vector<1x256xf32> to vector<32x256xf32>
    %174 = arith.addf %171, %173 : vector<32x256xf32>
    %175 = vector.extract_strided_slice %174 {offsets = [0, 0], sizes = [32, 128], strides = [1, 1]} : vector<32x256xf32> to vector<32x128xf32>
    %176 = vector.extract_strided_slice %174 {offsets = [0, 128], sizes = [32, 128], strides = [1, 1]} : vector<32x256xf32> to vector<32x128xf32>
    %c0_52 = arith.constant 0 : index
    %c0_53 = arith.constant 0 : index
    %c0_54 = arith.constant 0 : index
    %177 = vector.load %arg4[%c0_52, %c0_53, %c0_54] : memref<8x1x16xf32, #tpu.memory_space<vmem>>, vector<8x1x16xf32>
    %178 = vector.extract_strided_slice %168 {offsets = [0, 0], sizes = [8, 32], strides = [1, 1]} : vector<16x128xf32> to vector<8x32xf32>
    %179 = vector.extract_strided_slice %168 {offsets = [0, 32], sizes = [8, 32], strides = [1, 1]} : vector<16x128xf32> to vector<8x32xf32>
    %180 = vector.extract_strided_slice %168 {offsets = [0, 64], sizes = [8, 32], strides = [1, 1]} : vector<16x128xf32> to vector<8x32xf32>
    %181 = vector.extract_strided_slice %168 {offsets = [0, 96], sizes = [8, 32], strides = [1, 1]} : vector<16x128xf32> to vector<8x32xf32>
    %182 = vector.extract_strided_slice %168 {offsets = [8, 0], sizes = [8, 32], strides = [1, 1]} : vector<16x128xf32> to vector<8x32xf32>
    %183 = vector.extract_strided_slice %168 {offsets = [8, 32], sizes = [8, 32], strides = [1, 1]} : vector<16x128xf32> to vector<8x32xf32>
    %184 = vector.extract_strided_slice %168 {offsets = [8, 64], sizes = [8, 32], strides = [1, 1]} : vector<16x128xf32> to vector<8x32xf32>
    %185 = vector.extract_strided_slice %168 {offsets = [8, 96], sizes = [8, 32], strides = [1, 1]} : vector<16x128xf32> to vector<8x32xf32>
    %186 = vector.shape_cast %178 : vector<8x32xf32> to vector<1x8x32xf32>
    %187 = vector.shape_cast %179 : vector<8x32xf32> to vector<1x8x32xf32>
    %188 = vector.shape_cast %180 : vector<8x32xf32> to vector<1x8x32xf32>
    %189 = vector.shape_cast %181 : vector<8x32xf32> to vector<1x8x32xf32>
    %190 = vector.shape_cast %182 : vector<8x32xf32> to vector<1x8x32xf32>
    %191 = vector.shape_cast %183 : vector<8x32xf32> to vector<1x8x32xf32>
    %192 = vector.shape_cast %184 : vector<8x32xf32> to vector<1x8x32xf32>
    %193 = vector.shape_cast %185 : vector<8x32xf32> to vector<1x8x32xf32>
    %194 = tpu.concatenate %186, %187, %188, %189, %190, %191, %192, %193 in 0 : vector<1x8x32xf32>, vector<1x8x32xf32>, vector<1x8x32xf32>, vector<1x8x32xf32>, vector<1x8x32xf32>, vector<1x8x32xf32>, vector<1x8x32xf32>, vector<1x8x32xf32> -> vector<8x8x32xf32>
    %195 = arith.truncf %194 : vector<8x8x32xf32> to vector<8x8x32xbf16>
    %196 = vector.extract_strided_slice %175 {offsets = [0, 0], sizes = [16, 32], strides = [1, 1]} : vector<32x128xf32> to vector<16x32xf32>
    %197 = vector.extract_strided_slice %175 {offsets = [0, 32], sizes = [16, 32], strides = [1, 1]} : vector<32x128xf32> to vector<16x32xf32>
    %198 = vector.extract_strided_slice %175 {offsets = [0, 64], sizes = [16, 32], strides = [1, 1]} : vector<32x128xf32> to vector<16x32xf32>
    %199 = vector.extract_strided_slice %175 {offsets = [0, 96], sizes = [16, 32], strides = [1, 1]} : vector<32x128xf32> to vector<16x32xf32>
    %200 = vector.extract_strided_slice %175 {offsets = [16, 0], sizes = [16, 32], strides = [1, 1]} : vector<32x128xf32> to vector<16x32xf32>
    %201 = vector.extract_strided_slice %175 {offsets = [16, 32], sizes = [16, 32], strides = [1, 1]} : vector<32x128xf32> to vector<16x32xf32>
    %202 = vector.extract_strided_slice %175 {offsets = [16, 64], sizes = [16, 32], strides = [1, 1]} : vector<32x128xf32> to vector<16x32xf32>
    %203 = vector.extract_strided_slice %175 {offsets = [16, 96], sizes = [16, 32], strides = [1, 1]} : vector<32x128xf32> to vector<16x32xf32>
    %204 = vector.shape_cast %196 : vector<16x32xf32> to vector<1x16x32xf32>
    %205 = vector.shape_cast %197 : vector<16x32xf32> to vector<1x16x32xf32>
    %206 = vector.shape_cast %198 : vector<16x32xf32> to vector<1x16x32xf32>
    %207 = vector.shape_cast %199 : vector<16x32xf32> to vector<1x16x32xf32>
    %208 = vector.shape_cast %200 : vector<16x32xf32> to vector<1x16x32xf32>
    %209 = vector.shape_cast %201 : vector<16x32xf32> to vector<1x16x32xf32>
    %210 = vector.shape_cast %202 : vector<16x32xf32> to vector<1x16x32xf32>
    %211 = vector.shape_cast %203 : vector<16x32xf32> to vector<1x16x32xf32>
    %212 = tpu.concatenate %204, %205, %206, %207, %208, %209, %210, %211 in 0 : vector<1x16x32xf32>, vector<1x16x32xf32>, vector<1x16x32xf32>, vector<1x16x32xf32>, vector<1x16x32xf32>, vector<1x16x32xf32>, vector<1x16x32xf32>, vector<1x16x32xf32> -> vector<8x16x32xf32>
    %213 = arith.truncf %212 : vector<8x16x32xf32> to vector<8x16x32xbf16>
    %214 = vector.extract_strided_slice %176 {offsets = [0, 0], sizes = [16, 32], strides = [1, 1]} : vector<32x128xf32> to vector<16x32xf32>
    %215 = vector.extract_strided_slice %176 {offsets = [0, 32], sizes = [16, 32], strides = [1, 1]} : vector<32x128xf32> to vector<16x32xf32>
    %216 = vector.extract_strided_slice %176 {offsets = [0, 64], sizes = [16, 32], strides = [1, 1]} : vector<32x128xf32> to vector<16x32xf32>
    %217 = vector.extract_strided_slice %176 {offsets = [0, 96], sizes = [16, 32], strides = [1, 1]} : vector<32x128xf32> to vector<16x32xf32>
    %218 = vector.extract_strided_slice %176 {offsets = [16, 0], sizes = [16, 32], strides = [1, 1]} : vector<32x128xf32> to vector<16x32xf32>
    %219 = vector.extract_strided_slice %176 {offsets = [16, 32], sizes = [16, 32], strides = [1, 1]} : vector<32x128xf32> to vector<16x32xf32>
    %220 = vector.extract_strided_slice %176 {offsets = [16, 64], sizes = [16, 32], strides = [1, 1]} : vector<32x128xf32> to vector<16x32xf32>
    %221 = vector.extract_strided_slice %176 {offsets = [16, 96], sizes = [16, 32], strides = [1, 1]} : vector<32x128xf32> to vector<16x32xf32>
    %222 = vector.shape_cast %214 : vector<16x32xf32> to vector<1x16x32xf32>
    %223 = vector.shape_cast %215 : vector<16x32xf32> to vector<1x16x32xf32>
    %224 = vector.shape_cast %216 : vector<16x32xf32> to vector<1x16x32xf32>
    %225 = vector.shape_cast %217 : vector<16x32xf32> to vector<1x16x32xf32>
    %226 = vector.shape_cast %218 : vector<16x32xf32> to vector<1x16x32xf32>
    %227 = vector.shape_cast %219 : vector<16x32xf32> to vector<1x16x32xf32>
    %228 = vector.shape_cast %220 : vector<16x32xf32> to vector<1x16x32xf32>
    %229 = vector.shape_cast %221 : vector<16x32xf32> to vector<1x16x32xf32>
    %230 = tpu.concatenate %222, %223, %224, %225, %226, %227, %228, %229 in 0 : vector<1x16x32xf32>, vector<1x16x32xf32>, vector<1x16x32xf32>, vector<1x16x32xf32>, vector<1x16x32xf32>, vector<1x16x32xf32>, vector<1x16x32xf32>, vector<1x16x32xf32> -> vector<8x16x32xf32>
    %231 = arith.truncf %230 : vector<8x16x32xf32> to vector<8x16x32xbf16>
    "tpu.trace_start"() <{level = 10 : i32, message = "bqd,bkd->bqk"}> : () -> ()
    %cst_55 = arith.constant dense<0.000000e+00> : vector<8x8x16xf32>
    %232 = tpu.matmul %195, %213, %cst_55 {dimension_numbers = #tpu.dot_dimension_numbers<[2], [2], [1], [1], [0, 0, 0, 1, 1, 1], [0], [0]>} : vector<8x8x32xbf16>, vector<8x16x32xbf16>, vector<8x8x16xf32> -> vector<8x8x16xf32>
    "tpu.trace_stop"() : () -> ()
    %cst_56 = arith.constant 0.176776692 : f32
    %233 = vector.broadcast %cst_56 : f32 to vector<8x8x16xf32>
    %234 = arith.mulf %232, %233 : vector<8x8x16xf32>
    %cst_57 = arith.constant 0.000000e+00 : f32
    %235 = vector.broadcast %cst_57 : f32 to vector<8x1x16xf32>
    %236 = arith.cmpf oeq, %177, %235 : vector<8x1x16xf32>
    %cst_58 = arith.constant -1.000000e+09 : f32
    %237 = vector.shape_cast %236 : vector<8x1x16xi1> to vector<8x1x16xi1>
    %238 = vector.broadcast %237 : vector<8x1x16xi1> to vector<8x8x16xi1>
    %239 = vector.broadcast %cst_58 : f32 to vector<8x8x16xf32>
    %240 = arith.select %238, %239, %234 : vector<8x8x16xi1>, vector<8x8x16xf32>
    %cst_59 = arith.constant dense<0xFF800000> : vector<8x8xf32>
    %241 = vector.multi_reduction <maximumf>, %240, %cst_59 [2] : vector<8x8x16xf32> to vector<8x8xf32>
    %242 = vector.shape_cast %241 : vector<8x8xf32> to vector<8x8x1xf32>
    %243 = vector.broadcast %242 : vector<8x8x1xf32> to vector<8x8x16xf32>
    %244 = arith.subf %240, %243 : vector<8x8x16xf32>
    %245 = math.exp %244 : vector<8x8x16xf32>
    %cst_60 = arith.constant dense<0.000000e+00> : vector<8x8xf32>
    %246 = vector.multi_reduction <add>, %245, %cst_60 [2] : vector<8x8x16xf32> to vector<8x8xf32>
    %247 = vector.shape_cast %246 : vector<8x8xf32> to vector<8x8x1xf32>
    %248 = tpu.reciprocal %247 {approx = true} : vector<8x8x1xf32> -> vector<8x8x1xf32>
    %249 = vector.broadcast %248 : vector<8x8x1xf32> to vector<8x8x16xf32>
    %250 = arith.mulf %245, %249 : vector<8x8x16xf32>
    %251 = arith.truncf %250 : vector<8x8x16xf32> to vector<8x8x16xbf16>
    "tpu.trace_start"() <{level = 10 : i32, message = "bqk,bkd->bqd"}> : () -> ()
    %cst_61 = arith.constant dense<0.000000e+00> : vector<8x8x32xf32>
    %252 = tpu.matmul %251, %231, %cst_61 {dimension_numbers = #tpu.dot_dimension_numbers<[2], [1], [1], [2], [0, 0, 0, 1, 1, 2], [0], [0]>} : vector<8x8x16xbf16>, vector<8x16x32xbf16>, vector<8x8x32xf32> -> vector<8x8x32xf32>
    "tpu.trace_stop"() : () -> ()
    %253 = vector.extract_strided_slice %252 {offsets = [0, 0, 0], sizes = [1, 8, 32], strides = [1, 1, 1]} : vector<8x8x32xf32> to vector<1x8x32xf32>
    %254 = vector.shape_cast %253 : vector<1x8x32xf32> to vector<8x32xf32>
    %255 = vector.extract_strided_slice %252 {offsets = [1, 0, 0], sizes = [1, 8, 32], strides = [1, 1, 1]} : vector<8x8x32xf32> to vector<1x8x32xf32>
    %256 = vector.shape_cast %255 : vector<1x8x32xf32> to vector<8x32xf32>
    %257 = vector.extract_strided_slice %252 {offsets = [2, 0, 0], sizes = [1, 8, 32], strides = [1, 1, 1]} : vector<8x8x32xf32> to vector<1x8x32xf32>
    %258 = vector.shape_cast %257 : vector<1x8x32xf32> to vector<8x32xf32>
    %259 = vector.extract_strided_slice %252 {offsets = [3, 0, 0], sizes = [1, 8, 32], strides = [1, 1, 1]} : vector<8x8x32xf32> to vector<1x8x32xf32>
    %260 = vector.shape_cast %259 : vector<1x8x32xf32> to vector<8x32xf32>
    %261 = tpu.concatenate %254, %256, %258, %260 in 1 : vector<8x32xf32>, vector<8x32xf32>, vector<8x32xf32>, vector<8x32xf32> -> vector<8x128xf32>
    %262 = vector.extract_strided_slice %252 {offsets = [4, 0, 0], sizes = [1, 8, 32], strides = [1, 1, 1]} : vector<8x8x32xf32> to vector<1x8x32xf32>
    %263 = vector.shape_cast %262 : vector<1x8x32xf32> to vector<8x32xf32>
    %264 = vector.extract_strided_slice %252 {offsets = [5, 0, 0], sizes = [1, 8, 32], strides = [1, 1, 1]} : vector<8x8x32xf32> to vector<1x8x32xf32>
    %265 = vector.shape_cast %264 : vector<1x8x32xf32> to vector<8x32xf32>
    %266 = vector.extract_strided_slice %252 {offsets = [6, 0, 0], sizes = [1, 8, 32], strides = [1, 1, 1]} : vector<8x8x32xf32> to vector<1x8x32xf32>
    %267 = vector.shape_cast %266 : vector<1x8x32xf32> to vector<8x32xf32>
    %268 = vector.extract_strided_slice %252 {offsets = [7, 0, 0], sizes = [1, 8, 32], strides = [1, 1, 1]} : vector<8x8x32xf32> to vector<1x8x32xf32>
    %269 = vector.shape_cast %268 : vector<1x8x32xf32> to vector<8x32xf32>
    %270 = tpu.concatenate %263, %265, %267, %269 in 1 : vector<8x32xf32>, vector<8x32xf32>, vector<8x32xf32>, vector<8x32xf32> -> vector<8x128xf32>
    %271 = tpu.concatenate %261, %270 in 0 : vector<8x128xf32>, vector<8x128xf32> -> vector<16x128xf32>
    %272 = arith.truncf %271 : vector<16x128xf32> to vector<16x128xbf16>
    %c0_62 = arith.constant 0 : index
    %c0_63 = arith.constant 0 : index
    %273 = vector.load %arg15[%c0_62, %c0_63] : memref<128x128xbf16, #tpu.memory_space<vmem>>, vector<128x128xbf16>
    %cst_64 = arith.constant dense<0.000000e+00> : vector<16x128xf32>
    %274 = tpu.matmul %272, %273, %cst_64 {dimension_numbers = #tpu.dot_dimension_numbers<[1], [0], [0], [1], [0, 0, 1, 1], [], []>} : vector<16x128xbf16>, vector<128x128xbf16>, vector<16x128xf32> -> vector<16x128xf32>
    %c0_65 = arith.constant 0 : index
    %c0_66 = arith.constant 0 : index
    %275 = vector.load %arg16[%c0_65, %c0_66] : memref<1x128xf32, #tpu.memory_space<vmem>>, vector<1x128xf32>
    %276 = vector.broadcast %275 : vector<1x128xf32> to vector<16x128xf32>
    %277 = arith.addf %274, %276 : vector<16x128xf32>
    %278 = arith.addf %137, %277 : vector<16x128xf32>
    %cst_67 = arith.constant dense<0.000000e+00> : vector<16xf32>
    %279 = vector.multi_reduction <add>, %278, %cst_67 [1] : vector<16x128xf32> to vector<16xf32>
    %280 = vector.shape_cast %279 : vector<16xf32> to vector<16x1xf32>
    %cst_68 = arith.constant 1.280000e+02 : f32
    %281 = vector.broadcast %cst_68 : f32 to vector<16x1xf32>
    %282 = arith.divf %280, %281 : vector<16x1xf32>
    %283 = vector.broadcast %282 : vector<16x1xf32> to vector<16x128xf32>
    %284 = arith.subf %278, %283 : vector<16x128xf32>
    %285 = arith.mulf %284, %284 : vector<16x128xf32>
    %cst_69 = arith.constant dense<0.000000e+00> : vector<16xf32>
    %286 = vector.multi_reduction <add>, %285, %cst_69 [1] : vector<16x128xf32> to vector<16xf32>
    %287 = vector.shape_cast %286 : vector<16xf32> to vector<16x1xf32>
    %cst_70 = arith.constant 0.00787401571 : f32
    %288 = vector.broadcast %cst_70 : f32 to vector<16x1xf32>
    %289 = arith.mulf %287, %288 : vector<16x1xf32>
    %290 = math.sqrt %289 : vector<16x1xf32>
    %cst_71 = arith.constant 9.99999997E-7 : f32
    %291 = vector.broadcast %cst_71 : f32 to vector<16x1xf32>
    %292 = arith.addf %290, %291 : vector<16x1xf32>
    %293 = tpu.reciprocal %292 {approx = true} : vector<16x1xf32> -> vector<16x1xf32>
    %c0_72 = arith.constant 0 : index
    %c0_73 = arith.constant 0 : index
    %294 = vector.load %arg23[%c0_72, %c0_73] : memref<1x128xf32, #tpu.memory_space<vmem>>, vector<1x128xf32>
    %295 = vector.broadcast %282 : vector<16x1xf32> to vector<16x128xf32>
    %296 = arith.subf %278, %295 : vector<16x128xf32>
    %297 = vector.broadcast %294 : vector<1x128xf32> to vector<16x128xf32>
    %298 = arith.mulf %297, %296 : vector<16x128xf32>
    %299 = vector.broadcast %293 : vector<16x1xf32> to vector<16x128xf32>
    %300 = arith.mulf %298, %299 : vector<16x128xf32>
    %c0_74 = arith.constant 0 : index
    %c0_75 = arith.constant 0 : index
    %301 = vector.load %arg24[%c0_74, %c0_75] : memref<1x128xf32, #tpu.memory_space<vmem>>, vector<1x128xf32>
    %302 = vector.broadcast %301 : vector<1x128xf32> to vector<16x128xf32>
    %303 = arith.addf %300, %302 : vector<16x128xf32>
    %304 = arith.truncf %303 : vector<16x128xf32> to vector<16x128xbf16>
    %c0_76 = arith.constant 0 : index
    %c0_77 = arith.constant 0 : index
    %305 = vector.load %arg19[%c0_76, %c0_77] : memref<128x256xbf16, #tpu.memory_space<vmem>>, vector<128x256xbf16>
    %cst_78 = arith.constant dense<0.000000e+00> : vector<16x256xf32>
    %306 = tpu.matmul %304, %305, %cst_78 {dimension_numbers = #tpu.dot_dimension_numbers<[1], [0], [0], [1], [0, 0, 1, 1], [], []>} : vector<16x128xbf16>, vector<128x256xbf16>, vector<16x256xf32> -> vector<16x256xf32>
    %c0_79 = arith.constant 0 : index
    %c0_80 = arith.constant 0 : index
    %307 = vector.load %arg20[%c0_79, %c0_80] : memref<1x256xf32, #tpu.memory_space<vmem>>, vector<1x256xf32>
    %308 = vector.broadcast %307 : vector<1x256xf32> to vector<16x256xf32>
    %309 = arith.addf %306, %308 : vector<16x256xf32>
    %cst_81 = arith.constant 0.000000e+00 : f32
    %310 = vector.broadcast %cst_81 : f32 to vector<16x256xf32>
    %311 = arith.maximumf %309, %310 : vector<16x256xf32>
    %312 = arith.truncf %311 : vector<16x256xf32> to vector<16x256xbf16>
    %c0_82 = arith.constant 0 : index
    %c0_83 = arith.constant 0 : index
    %313 = vector.load %arg21[%c0_82, %c0_83] : memref<256x128xbf16, #tpu.memory_space<vmem>>, vector<256x128xbf16>
    %cst_84 = arith.constant dense<0.000000e+00> : vector<16x128xf32>
    %314 = tpu.matmul %312, %313, %cst_84 {dimension_numbers = #tpu.dot_dimension_numbers<[1], [0], [0], [1], [0, 0, 1, 1], [], []>} : vector<16x256xbf16>, vector<256x128xbf16>, vector<16x128xf32> -> vector<16x128xf32>
    %c0_85 = arith.constant 0 : index
    %c0_86 = arith.constant 0 : index
    %315 = vector.load %arg22[%c0_85, %c0_86] : memref<1x128xf32, #tpu.memory_space<vmem>>, vector<1x128xf32>
    %316 = vector.broadcast %315 : vector<1x128xf32> to vector<16x128xf32>
    %317 = arith.addf %314, %316 : vector<16x128xf32>
    %318 = arith.addf %278, %317 : vector<16x128xf32>
    %319 = vector.shape_cast %318 : vector<16x128xf32> to vector<2x8x128xf32>
    %c0_87 = arith.constant 0 : index
    %c0_88 = arith.constant 0 : index
    %c0_89 = arith.constant 0 : index
    %320 = vector.load %arg27[%c0_87, %c0_88, %c0_89] : memref<2x8x128xf32, #tpu.memory_space<vmem>>, vector<2x8x128xf32>
    tpu.vector_store %arg27[%c0_87, %c0_88, %c0_89], %319 {strides = array<i32>} : memref<2x8x128xf32, #tpu.memory_space<vmem>>, vector<2x8x128xf32>,
    return
  }
  func.func @transform_0(%arg0: i32) -> (i32, i32, i32) {
    %c0_i32 = arith.constant 0 : i32
    %c0_i32_0 = arith.constant 0 : i32
    %c0_i32_1 = arith.constant 0 : i32
    return %arg0, %c0_i32, %c0_i32_0 : i32, i32, i32
  }
  func.func @transform_1(%arg0: i32) -> (i32, i32, i32) {
    %c0_i32 = arith.constant 0 : i32
    %c0_i32_0 = arith.constant 0 : i32
    %c0_i32_1 = arith.constant 0 : i32
    return %arg0, %c0_i32, %c0_i32_0 : i32, i32, i32
  }
  func.func @transform_2(%arg0: i32) -> (i32, i32, i32) {
    %c0_i32 = arith.constant 0 : i32
    %c0_i32_0 = arith.constant 0 : i32
    %c0_i32_1 = arith.constant 0 : i32
    return %arg0, %c0_i32, %c0_i32_0 : i32, i32, i32
  }
  func.func @transform_3(%arg0: i32) -> (i32, i32, i32) {
    %c0_i32 = arith.constant 0 : i32
    %c0_i32_0 = arith.constant 0 : i32
    %c0_i32_1 = arith.constant 0 : i32
    return %arg0, %c0_i32, %c0_i32_0 : i32, i32, i32
  }
  func.func @transform_4(%arg0: i32) -> (i32, i32) {
    %c0_i32 = arith.constant 0 : i32
    %c0_i32_0 = arith.constant 0 : i32
    %c0_i32_1 = arith.constant 0 : i32
    return %c0_i32, %c0_i32_0 : i32, i32
  }
  func.func @transform_5(%arg0: i32) -> (i32, i32) {
    %c0_i32 = arith.constant 0 : i32
    %c0_i32_0 = arith.constant 0 : i32
    %c0_i32_1 = arith.constant 0 : i32
    return %c0_i32, %c0_i32_0 : i32, i32
  }
  func.func @transform_6(%arg0: i32) -> (i32, i32) {
    %c0_i32 = arith.constant 0 : i32
    %c0_i32_0 = arith.constant 0 : i32
    %c0_i32_1 = arith.constant 0 : i32
    return %c0_i32, %c0_i32_0 : i32, i32
  }
  func.func @transform_7(%arg0: i32) -> (i32, i32) {
    %c0_i32 = arith.constant 0 : i32
    %c0_i32_0 = arith.constant 0 : i32
    %c0_i32_1 = arith.constant 0 : i32
    return %c0_i32, %c0_i32_0 : i32, i32
  }
  func.func @transform_8(%arg0: i32) -> (i32, i32) {
    %c0_i32 = arith.constant 0 : i32
    %c0_i32_0 = arith.constant 0 : i32
    %c0_i32_1 = arith.constant 0 : i32
    return %c0_i32, %c0_i32_0 : i32, i32
  }
  func.func @transform_9(%arg0: i32) -> (i32, i32) {
    %c0_i32 = arith.constant 0 : i32
    %c0_i32_0 = arith.constant 0 : i32
    %c0_i32_1 = arith.constant 0 : i32
    return %c0_i32, %c0_i32_0 : i32, i32
  }
  func.func @transform_10(%arg0: i32) -> (i32, i32) {
    %c0_i32 = arith.constant 0 : i32
    %c0_i32_0 = arith.constant 0 : i32
    %c0_i32_1 = arith.constant 0 : i32
    return %c0_i32, %c0_i32_0 : i32, i32
  }
  func.func @transform_11(%arg0: i32) -> (i32, i32) {
    %c0_i32 = arith.constant 0 : i32
    %c0_i32_0 = arith.constant 0 : i32
    %c0_i32_1 = arith.constant 0 : i32
    return %c0_i32, %c0_i32_0 : i32, i32
  }
  func.func @transform_12(%arg0: i32) -> (i32, i32) {
    %c0_i32 = arith.constant 0 : i32
    %c0_i32_0 = arith.constant 0 : i32
    %c0_i32_1 = arith.constant 0 : i32
    return %c0_i32, %c0_i32_0 : i32, i32
  }
  func.func @transform_13(%arg0: i32) -> (i32, i32) {
    %c0_i32 = arith.constant 0 : i32
    %c0_i32_0 = arith.constant 0 : i32
    %c0_i32_1 = arith.constant 0 : i32
    return %c0_i32, %c0_i32_0 : i32, i32
  }
  func.func @transform_14(%arg0: i32) -> (i32, i32) {
    %c0_i32 = arith.constant 0 : i32
    %c0_i32_0 = arith.constant 0 : i32
    %c0_i32_1 = arith.constant 0 : i32
    return %c0_i32, %c0_i32_0 : i32, i32
  }
  func.func @transform_15(%arg0: i32) -> (i32, i32) {
    %c0_i32 = arith.constant 0 : i32
    %c0_i32_0 = arith.constant 0 : i32
    %c0_i32_1 = arith.constant 0 : i32
    return %c0_i32, %c0_i32_0 : i32, i32
  }
  func.func @transform_16(%arg0: i32) -> (i32, i32) {
    %c0_i32 = arith.constant 0 : i32
    %c0_i32_0 = arith.constant 0 : i32
    %c0_i32_1 = arith.constant 0 : i32
    return %c0_i32, %c0_i32_0 : i32, i32
  }
  func.func @transform_17(%arg0: i32) -> (i32, i32) {
    %c0_i32 = arith.constant 0 : i32
    %c0_i32_0 = arith.constant 0 : i32
    %c0_i32_1 = arith.constant 0 : i32
    return %c0_i32, %c0_i32_0 : i32, i32
  }
  func.func @transform_18(%arg0: i32) -> (i32, i32) {
    %c0_i32 = arith.constant 0 : i32
    %c0_i32_0 = arith.constant 0 : i32
    %c0_i32_1 = arith.constant 0 : i32
    return %c0_i32, %c0_i32_0 : i32, i32
  }
  func.func @transform_19(%arg0: i32) -> (i32, i32) {
    %c0_i32 = arith.constant 0 : i32
    %c0_i32_0 = arith.constant 0 : i32
    %c0_i32_1 = arith.constant 0 : i32
    return %c0_i32, %c0_i32_0 : i32, i32
  }
  func.func @transform_20(%arg0: i32) -> (i32, i32) {
    %c0_i32 = arith.constant 0 : i32
    %c0_i32_0 = arith.constant 0 : i32
    %c0_i32_1 = arith.constant 0 : i32
    return %c0_i32, %c0_i32_0 : i32, i32
  }
  func.func @transform_21(%arg0: i32) -> (i32, i32) {
    %c0_i32 = arith.constant 0 : i32
    %c0_i32_0 = arith.constant 0 : i32
    %c0_i32_1 = arith.constant 0 : i32
    return %c0_i32, %c0_i32_0 : i32, i32
  }
  func.func @transform_22(%arg0: i32) -> (i32, i32) {
    %c0_i32 = arith.constant 0 : i32
    %c0_i32_0 = arith.constant 0 : i32
    %c0_i32_1 = arith.constant 0 : i32
    return %c0_i32, %c0_i32_0 : i32, i32
  }
  func.func @transform_23(%arg0: i32) -> (i32, i32) {
    %c0_i32 = arith.constant 0 : i32
    %c0_i32_0 = arith.constant 0 : i32
    %c0_i32_1 = arith.constant 0 : i32
    return %c0_i32, %c0_i32_0 : i32, i32
  }
  func.func @transform_24(%arg0: i32) -> (i32, i32) {
    %c0_i32 = arith.constant 0 : i32
    %c0_i32_0 = arith.constant 0 : i32
    %c0_i32_1 = arith.constant 0 : i32
    return %c0_i32, %c0_i32_0 : i32, i32
  }
  func.func @transform_25(%arg0: i32) -> (i32, i32) {
    %c0_i32 = arith.constant 0 : i32
    %c0_i32_0 = arith.constant 0 : i32
    %c0_i32_1 = arith.constant 0 : i32
    return %c0_i32, %c0_i32_0 : i32, i32
  }
  func.func @transform_26(%arg0: i32) -> (i32, i32, i32) {
    %c0_i32 = arith.constant 0 : i32
    %c0_i32_0 = arith.constant 0 : i32
    %c0_i32_1 = arith.constant 0 : i32
    return %arg0, %c0_i32, %c0_i32_0 : i32, i32, i32
  }
}

</mosaic_0001>

<bundles_post_ra>
// kernel: tpu_custom_call.1
= control target key start
LH: loop header
LB: loop body
LE: loop exit
PB: predicated region body
PF: predicated region fallthrough
CT: control target
= control target key end

     0   :  { %s6322_s0 = inlined_call_operand.hbm [shape: f32[2,8,128], index: 0, kind: input, shape index: {}]   ;;  %s6323_s1 = inlined_call_operand.hbm [shape: f32[2,16,128], index: 1, kind: input, shape index: {}]   ;;  %s6324_s2 = inlined_call_operand.hbm [shape: f32[8,8,8], index: 2, kind: input, shape index: {}]   ;;  %s6325_s3 = inlined_call_operand.hbm [shape: f32[8,1,16], index: 3, kind: input, shape index: {}]   ;;  %s6326_s4 = inlined_call_operand.hbm [shape: bf16[128,384], index: 4, kind: input, shape index: {}]   ;;  %s6327_s5 = inlined_call_operand.hbm [shape: f32[1,384], index: 5, kind: input, shape index: {}]   ;;  %s6328_s6 = inlined_call_operand.hbm [shape: bf16[128,128], index: 6, kind: input, shape index: {}]   ;;  %s6329_s7 = inlined_call_operand.hbm [shape: f32[1,128], index: 7, kind: input, shape index: {}]   ;;  %s6330_s8 = inlined_call_operand.hbm [shape: f32[1,128], index: 8, kind: input, shape index: {}]   ;;  %s6331_s9 = inlined_call_operand.hbm [shape: f32[1,128], index: 9, kind: input, shape index: {}]   ;;  %s6332_s10 = inlined_call_operand.hbm [shape: bf16[128,128], index: 10, kind: input, shape index: {}]   ;;  %s6333_s11 = inlined_call_operand.hbm [shape: f32[1,128], index: 11, kind: input, shape index: {}]   ;;  %s6334_s12 = inlined_call_operand.hbm [shape: bf16[128,256], index: 12, kind: input, shape index: {}]   ;;  %s6335_s13 = inlined_call_operand.hbm [shape: f32[1,256], index: 13, kind: input, shape index: {}]   ;;  %s6336_s14 = inlined_call_operand.hbm [shape: bf16[128,128], index: 14, kind: input, shape index: {}]   ;;  %s6337_s15 = inlined_call_operand.hbm [shape: f32[1,128], index: 15, kind: input, shape index: {}]   ;;  %s6338_s16 = inlined_call_operand.hbm [shape: f32[1,128], index: 16, kind: input, shape index: {}]   ;;  %s6339_s17 = inlined_call_operand.hbm [shape: f32[1,128], index: 17, kind: input, shape index: {}]   ;;  %s6340_s18 = inlined_call_operand.hbm [shape: bf16[128,256], index: 18, kind: input, shape index: {}]   ;;  %s6341_s19 = inlined_call_operand.hbm [shape: f32[1,256], index: 19, kind: input, shape index: {}]   ;;  %s6342_s20 = inlined_call_operand.hbm [shape: bf16[256,128], index: 20, kind: input, shape index: {}]   ;;  %s6343_s21 = inlined_call_operand.hbm [shape: f32[1,128], index: 21, kind: input, shape index: {}]   ;;  %s6344_s22 = inlined_call_operand.hbm [shape: f32[1,128], index: 22, kind: input, shape index: {}]   ;;  %s6345_s23 = inlined_call_operand.hbm [shape: f32[1,128], index: 23, kind: input, shape index: {}]   ;;  %s6346_s24 = inlined_call_operand.hbm [shape: f32[1,128], index: 24, kind: input, shape index: {}]   ;;  %s6347_s25 = inlined_call_operand.hbm [shape: f32[1,128], index: 25, kind: input, shape index: {}]   ;;  %s6348_s26 = inlined_call_operand.hbm [shape: f32[2,8,128], index: 26, kind: output, shape index: {}]  }
   0x1   :  { %6367 = sst [smem:[#allocation59_spill]] %s6322_s0 }
   0x2   :  { %6368 = sst [smem:[#allocation60_spill]] %s6323_s1 }
   0x3   :  { %6369 = sst [smem:[#allocation61_spill]] %s6324_s2 }
   0x4   :  { %6370 = sst [smem:[#allocation62_spill]] %s6325_s3 }
   0x5   :  { %6371 = sst [smem:[#allocation63_spill]] %s6326_s4 }
   0x6   :  { %6372 = sst [smem:[#allocation64_spill]] %s6327_s5 }
   0x7   :  { %6373 = sst [smem:[#allocation65_spill]] %s6328_s6 }
   0x8   :  { %6374 = sst [smem:[#allocation66_spill]] %s6329_s7 }
   0x9   :  { %6375 = sst [smem:[#allocation67_spill]] %s6330_s8 }
   0xa   :  { %6376 = sst [smem:[#allocation68_spill]] %s6331_s9 }
   0xb   :  { %6377 = sst [smem:[#allocation69_spill]] %s6332_s10 }
   0xc   :  { %6378 = sst [smem:[#allocation70_spill]] %s6346_s24 }
   0xd   :  { %6379 = sst [smem:[#allocation71_spill]] %s6347_s25 }
   0xe   :  { %6380 = sst [smem:[#allocation72_spill]] %s6348_s26 }
   0xf   :  { %31 = vsyncpa [#allocation3], 0 }
  0x10   :  { %32 = vsyncpa [#allocation6], 0 }
  0x11   :  { %33 = vsyncpa [#allocation9], 0 }
  0x12   :  { %34 = vsyncpa [#allocation12], 0 }
  0x13   :  { %35 = vsyncpa [#allocation15], 0 }
  0x14   :  { %36 = vsyncpa [#allocation18], 0 }
  0x15   :  { %37 = vsyncpa [#allocation21], 0 }
  0x16   :  { %38 = vsyncpa [#allocation24], 0 }
  0x17   :  { %39 = vsyncpa [#allocation27], 0 }
  0x18   :  { %40 = vsyncpa [#allocation30], 0 }
  0x19   :  { %41 = vsyncpa [#allocation33], 0 }
  0x1a   :  { %42 = vsyncpa [#allocation36], 0 }
  0x1b   :  { %43 = vsyncpa [#allocation39], 0 }
  0x1c   :  { %44 = vsyncpa [#allocation42], 0 }
  0x1d   :  { %45 = vsyncpa [#allocation4], 0  ;;  %s5234_s27 = smov [#allocation5]   ;;  %s5235_s7 = smov [#allocation8]  }
  0x1e   :  { %s63_s3 = sshll.u32 %s5234_s27, 4  ;;  %s87_s28 = sshll.u32 %s5235_s7, 4  ;;  %s64_s3 = int_to_ptr.vmem [resolvable:$true] %s63_s3  ;;  %s5409_s28 = int_to_ptr.vmem [resolvable:$true] %s87_s28 }
  0x1f   :  { %s6381_s29 = sld [smem:[#allocation60_spill]] }
  0x25   :  { %s4610_s0 = scalar_lea.hbm %s6381_s29, 512 }
  0x26   :  { %p4611_p0 = scmp.ne.s32.totalorder %s6381_s29, %s4610_s0  ;;  %p4614_p1 = scmp.lt.u32.totalorder %s4610_s0, %s6381_s29 }
  0x28   :  { %p4616_p2 = pnand %p4614_p1, %p4611_p0 }
  0x2a   :  { %4619 = shalt.err (!%p4616_p2)
}
  0x2b   :  { %s4620_s10 = scalar_lea.vmem %s64_s3, 512  ;;  %p4625_p4 = scmp.lt.s32.totalorder %s64_s3, %s64_s3 }
  0x2c   :  { %p4621_p3 = scmp.ne.s32.totalorder %s64_s3, %s4620_s10  ;;  %p4626_p5 = scmp.lt.s32.totalorder %s4620_s10, %s4620_s10 }
  0x2e   :  { %p4627_p6 = por %p4626_p5, %p4625_p4 }
  0x30   :  { %p4628_p7 = pnand %p4627_p6, %p4621_p3 }
  0x32   :  { %4631 = shalt.err (!%p4628_p7)
}
  0x33   :  { %s6361_s6 = smov 128   ;;  %s6363_s1 = smov 8  }
  0x34   :  { %69 = dma.hbm_to_vmem [thread:$0]  %s6381_s29, 512, %s64_s3, [#allocation6], %s6361_s6, %s6361_s6, %s6363_s1  }
  0x35   :  { %s6382_s0 = sld [smem:[#allocation62_spill]] }
  0x3b   :  { %s4632_s9 = scalar_lea.hbm %s6382_s0, 128 }
  0x3c   :  { %p4633_p8 = scmp.ne.s32.totalorder %s6382_s0, %s4632_s9  ;;  %p4636_p9 = scmp.lt.u32.totalorder %s4632_s9, %s6382_s0 }
  0x3e   :  { %p4638_p10 = pnand %p4636_p9, %p4633_p8 }
  0x40   :  { %4641 = shalt.err (!%p4638_p10)
}
  0x41   :  { %s4642_s26 = scalar_lea.vmem %s5409_s28, 128  ;;  %p4647_p12 = scmp.lt.s32.totalorder %s5409_s28, %s5409_s28 }
  0x42   :  { %p4643_p11 = scmp.ne.s32.totalorder %s5409_s28, %s4642_s26  ;;  %p4648_p13 = scmp.lt.s32.totalorder %s4642_s26, %s4642_s26 }
  0x44   :  { %p4649_p0 = por %p4648_p13, %p4647_p12 }
  0x46   :  { %p4650_p1 = pnand %p4649_p0, %p4643_p11 }
  0x48   :  { %4653 = shalt.err (!%p4650_p1)
}
  0x49   :  { %s5238_s3 = smov 16   ;;  %s5239_s29 = smov 1  }
  0x4a   :  { %93 = dma.hbm_to_vmem [thread:$0]  %s6382_s0, 128, %s5409_s28, [#allocation9], %s5238_s3, %s5238_s3, %s5239_s29  }
  0x4b   :  { %s5240_s8 = smov [#allocation11]   ;;  %s5241_s9 = smov [#allocation14]  }
  0x4c   :  { %s112_s4 = sshll.u32 %s5240_s8, 4  ;;  %s134_s30 = sshll.u32 %s5241_s9, 4  ;;  %s113_s4 = int_to_ptr.vmem [resolvable:$true] %s112_s4  ;;  %s135_s30 = int_to_ptr.vmem [resolvable:$true] %s134_s30 }
  0x4d   :  { %s6383_s10 = sld [smem:[#allocation64_spill]] }
  0x53   :  { %s4654_s26 = scalar_lea.hbm %s6383_s10, 48 }
  0x54   :  { %p4655_p2 = scmp.ne.s32.totalorder %s6383_s10, %s4654_s26  ;;  %p4658_p3 = scmp.lt.u32.totalorder %s4654_s26, %s6383_s10 }
  0x56   :  { %p4660_p4 = pnand %p4658_p3, %p4655_p2 }
  0x58   :  { %4663 = shalt.err (!%p4660_p4)
}
  0x59   :  { %s4664_s28 = scalar_lea.vmem %s113_s4, 48  ;;  %s4668_s0 = scalar_lea.vmem %s113_s4, 64 }
  0x5a   :  { %p4665_p5 = scmp.ne.s32.totalorder %s113_s4, %s4664_s28  ;;  %p4669_p6 = scmp.lt.s32.totalorder %s113_s4, %s113_s4 }
  0x5b   :  { %p4670_p7 = scmp.lt.s32.totalorder %s4668_s0, %s4664_s28 }
  0x5d   :  { %p4671_p8 = por %p4670_p7, %p4669_p6 }
  0x5f   :  { %p4672_p9 = pnand %p4671_p8, %p4665_p5 }
  0x61   :  { %4675 = shalt.err (!%p4672_p9)
}
  0x62   :  { %115 = dma.hbm_to_vmem [thread:$0]  %s6383_s10, 48, %s113_s4, [#allocation12]  }
  0x63   :  { %s6384_s27 = sld [smem:[#allocation66_spill]] }
  0x69   :  { %s4676_s7 = scalar_lea.hbm %s6384_s27, 16 }
  0x6a   :  { %p4677_p10 = scmp.ne.s32.totalorder %s6384_s27, %s4676_s7  ;;  %p4680_p11 = scmp.lt.u32.totalorder %s4676_s7, %s6384_s27 }
  0x6c   :  { %p4682_p12 = pnand %p4680_p11, %p4677_p10 }
  0x6e   :  { %4685 = shalt.err (!%p4682_p12)
}
  0x6f   :  { %s4686_s2 = scalar_lea.vmem %s135_s30, 16  ;;  %s4690_s5 = scalar_lea.vmem %s135_s30, 32 }
  0x70   :  { %p4687_p13 = scmp.ne.s32.totalorder %s135_s30, %s4686_s2  ;;  %p4691_p0 = scmp.lt.s32.totalorder %s135_s30, %s135_s30 }
  0x71   :  { %p4692_p1 = scmp.lt.s32.totalorder %s4690_s5, %s4686_s2 }
  0x73   :  { %p4693_p2 = por %p4692_p1, %p4691_p0 }
  0x75   :  { %p4694_p3 = pnand %p4693_p2, %p4687_p13 }
  0x77   :  { %4697 = shalt.err (!%p4694_p3)
}
  0x78   :  { %137 = dma.hbm_to_vmem [thread:$0]  %s6384_s27, 16, %s135_s30, [#allocation15]  }
  0x79   :  { %s5242_s26 = smov [#allocation17]   ;;  %s5243_s0 = smov [#allocation20]  }
  0x7a   :  { %s154_s28 = sshll.u32 %s5242_s26, 4  ;;  %s176_s3 = sshll.u32 %s5243_s0, 4  ;;  %s155_s28 = int_to_ptr.vmem [resolvable:$true] %s154_s28  ;;  %s177_s3 = int_to_ptr.vmem [resolvable:$true] %s176_s3 }
  0x7b   :  { %s6385_s1 = sld [smem:[#allocation68_spill]] }
  0x81   :  { %s4698_s7 = scalar_lea.hbm %s6385_s1, 16 }
  0x82   :  { %p4699_p4 = scmp.ne.s32.totalorder %s6385_s1, %s4698_s7  ;;  %p4702_p5 = scmp.lt.u32.totalorder %s4698_s7, %s6385_s1 }
  0x84   :  { %p4704_p6 = pnand %p4702_p5, %p4699_p4 }
  0x86   :  { %4707 = shalt.err (!%p4704_p6)
}
  0x87   :  { %s4708_s30 = scalar_lea.vmem %s155_s28, 16  ;;  %s4712_s27 = scalar_lea.vmem %s155_s28, 32 }
  0x88   :  { %p4709_p7 = scmp.ne.s32.totalorder %s155_s28, %s4708_s30  ;;  %p4713_p8 = scmp.lt.s32.totalorder %s155_s28, %s155_s28 }
  0x89   :  { %p4714_p9 = scmp.lt.s32.totalorder %s4712_s27, %s4708_s30 }
  0x8b   :  { %p4715_p10 = por %p4714_p9, %p4713_p8 }
  0x8d   :  { %p4716_p11 = pnand %p4715_p10, %p4709_p7 }
  0x8f   :  { %4719 = shalt.err (!%p4716_p11)
}
  0x90   :  { %157 = dma.hbm_to_vmem [thread:$0]  %s6385_s1, 16, %s155_s28, [#allocation18]  }
  0x91   :  { %s4720_s26 = scalar_lea.hbm %s6333_s11, 16 }
  0x92   :  { %p4721_p12 = scmp.ne.s32.totalorder %s6333_s11, %s4720_s26  ;;  %p4724_p13 = scmp.lt.u32.totalorder %s4720_s26, %s6333_s11 }
  0x94   :  { %p4726_p0 = pnand %p4724_p13, %p4721_p12 }
  0x96   :  { %4729 = shalt.err (!%p4726_p0)
}
  0x97   :  { %s4730_s24 = scalar_lea.vmem %s177_s3, 16  ;;  %s4734_s25 = scalar_lea.vmem %s177_s3, 32 }
  0x98   :  { %p4731_p1 = scmp.ne.s32.totalorder %s177_s3, %s4730_s24  ;;  %p4735_p2 = scmp.lt.s32.totalorder %s177_s3, %s177_s3 }
  0x99   :  { %p4736_p3 = scmp.lt.s32.totalorder %s4734_s25, %s4730_s24 }
  0x9b   :  { %p4737_p4 = por %p4736_p3, %p4735_p2 }
  0x9d   :  { %p4738_p5 = pnand %p4737_p4, %p4731_p1 }
  0x9f   :  { %4741 = shalt.err (!%p4738_p5)
}
  0xa0   :  { %179 = dma.hbm_to_vmem [thread:$0]  %s6333_s11, 16, %s177_s3, [#allocation21]  }
  0xa1   :  { %s5244_s8 = smov [#allocation23]   ;;  %s5245_s30 = smov [#allocation26]  }
  0xa2   :  { %s198_s9 = sshll.u32 %s5244_s8, 4  ;;  %s220_s27 = sshll.u32 %s5245_s30, 4  ;;  %s199_s9 = int_to_ptr.vmem [resolvable:$true] %s198_s9  ;;  %s221_s27 = int_to_ptr.vmem [resolvable:$true] %s220_s27 }
  0xa3   :  { %s4742_s4 = scalar_lea.hbm %s6335_s13, 32 }
  0xa4   :  { %p4743_p6 = scmp.ne.s32.totalorder %s6335_s13, %s4742_s4  ;;  %p4746_p7 = scmp.lt.u32.totalorder %s4742_s4, %s6335_s13 }
  0xa6   :  { %p4748_p8 = pnand %p4746_p7, %p4743_p6 }
  0xa8   :  { %4751 = shalt.err (!%p4748_p8)
}
  0xa9   :  { %s4752_s11 = scalar_lea.vmem %s199_s9, 32  ;;  %p4757_p10 = scmp.lt.s32.totalorder %s199_s9, %s199_s9 }
  0xaa   :  { %p4753_p9 = scmp.ne.s32.totalorder %s199_s9, %s4752_s11  ;;  %p4758_p11 = scmp.lt.s32.totalorder %s4752_s11, %s4752_s11 }
  0xac   :  { %p4759_p12 = por %p4758_p11, %p4757_p10 }
  0xae   :  { %p4760_p13 = pnand %p4759_p12, %p4753_p9 }
  0xb0   :  { %4763 = shalt.err (!%p4760_p13)
}
  0xb1   :  { %201 = dma.hbm_to_vmem [thread:$0]  %s6335_s13, 32, %s199_s9, [#allocation24]  }
  0xb2   :  { %s4764_s25 = scalar_lea.hbm %s6337_s15, 16 }
  0xb3   :  { %p4765_p0 = scmp.ne.s32.totalorder %s6337_s15, %s4764_s25  ;;  %p4768_p1 = scmp.lt.u32.totalorder %s4764_s25, %s6337_s15 }
  0xb5   :  { %p4770_p2 = pnand %p4768_p1, %p4765_p0 }
  0xb7   :  { %4773 = shalt.err (!%p4770_p2)
}
  0xb8   :  { %s4774_s2 = scalar_lea.vmem %s221_s27, 16  ;;  %s4778_s5 = scalar_lea.vmem %s221_s27, 32 }
  0xb9   :  { %p4775_p3 = scmp.ne.s32.totalorder %s221_s27, %s4774_s2  ;;  %p4779_p4 = scmp.lt.s32.totalorder %s221_s27, %s221_s27 }
  0xba   :  { %p4780_p5 = scmp.lt.s32.totalorder %s4778_s5, %s4774_s2 }
  0xbc   :  { %p4781_p6 = por %p4780_p5, %p4779_p4 }
  0xbe   :  { %p4782_p7 = pnand %p4781_p6, %p4775_p3 }
  0xc0   :  { %4785 = shalt.err (!%p4782_p7)
}
  0xc1   :  { %223 = dma.hbm_to_vmem [thread:$0]  %s6337_s15, 16, %s221_s27, [#allocation27]  }
  0xc2   :  { %s5246_s4 = smov [#allocation29]   ;;  %s5247_s26 = smov [#allocation32]  }
  0xc3   :  { %s240_s10 = sshll.u32 %s5246_s4, 4  ;;  %s262_s0 = sshll.u32 %s5247_s26, 4  ;;  %s241_s10 = int_to_ptr.vmem [resolvable:$true] %s240_s10  ;;  %s263_s0 = int_to_ptr.vmem [resolvable:$true] %s262_s0 }
  0xc4   :  { %s4786_s3 = scalar_lea.hbm %s6339_s17, 16 }
  0xc5   :  { %p4787_p8 = scmp.ne.s32.totalorder %s6339_s17, %s4786_s3  ;;  %p4790_p9 = scmp.lt.u32.totalorder %s4786_s3, %s6339_s17 }
  0xc7   :  { %p4792_p10 = pnand %p4790_p9, %p4787_p8 }
  0xc9   :  { %4795 = shalt.err (!%p4792_p10)
}
  0xca   :  { %s4796_s15 = scalar_lea.vmem %s241_s10, 16  ;;  %s4800_s27 = scalar_lea.vmem %s241_s10, 32 }
  0xcb   :  { %p4797_p11 = scmp.ne.s32.totalorder %s241_s10, %s4796_s15  ;;  %p4801_p12 = scmp.lt.s32.totalorder %s241_s10, %s241_s10 }
  0xcc   :  { %p4802_p13 = scmp.lt.s32.totalorder %s4800_s27, %s4796_s15 }
  0xce   :  { %p4803_p0 = por %p4802_p13, %p4801_p12 }
  0xd0   :  { %p4804_p1 = pnand %p4803_p0, %p4797_p11 }
  0xd2   :  { %4807 = shalt.err (!%p4804_p1)
}
  0xd3   :  { %243 = dma.hbm_to_vmem [thread:$0]  %s6339_s17, 16, %s241_s10, [#allocation30]  }
  0xd4   :  { %s4808_s2 = scalar_lea.hbm %s6341_s19, 32 }
  0xd5   :  { %p4809_p2 = scmp.ne.s32.totalorder %s6341_s19, %s4808_s2  ;;  %p4812_p3 = scmp.lt.u32.totalorder %s4808_s2, %s6341_s19 }
  0xd7   :  { %p4814_p4 = pnand %p4812_p3, %p4809_p2 }
  0xd9   :  { %4817 = shalt.err (!%p4814_p4)
}
  0xda   :  { %s4818_s26 = scalar_lea.vmem %s263_s0, 32  ;;  %p4823_p6 = scmp.lt.s32.totalorder %s263_s0, %s263_s0 }
  0xdb   :  { %p4819_p5 = scmp.ne.s32.totalorder %s263_s0, %s4818_s26  ;;  %p4824_p7 = scmp.lt.s32.totalorder %s4818_s26, %s4818_s26 }
  0xdd   :  { %p4825_p8 = por %p4824_p7, %p4823_p6 }
  0xdf   :  { %p4826_p9 = pnand %p4825_p8, %p4819_p5 }
  0xe1   :  { %4829 = shalt.err (!%p4826_p9)
}
  0xe2   :  { %265 = dma.hbm_to_vmem [thread:$0]  %s6341_s19, 32, %s263_s0, [#allocation33]  }
  0xe3   :  { %s5248_s29 = smov [#allocation35]   ;;  %s5249_s3 = smov [#allocation38]  }
  0xe4   :  { %s284_s11 = sshll.u32 %s5248_s29, 4  ;;  %s304_s6 = sshll.u32 %s5249_s3, 4  ;;  %s285_s11 = int_to_ptr.vmem [resolvable:$true] %s284_s11  ;;  %s305_s6 = int_to_ptr.vmem [resolvable:$true] %s304_s6 }
  0xe5   :  { %s4830_s25 = scalar_lea.hbm %s6343_s21, 16 }
  0xe6   :  { %p4831_p10 = scmp.ne.s32.totalorder %s6343_s21, %s4830_s25  ;;  %p4834_p11 = scmp.lt.u32.totalorder %s4830_s25, %s6343_s21 }
  0xe8   :  { %p4836_p12 = pnand %p4834_p11, %p4831_p10 }
  0xea   :  { %4839 = shalt.err (!%p4836_p12)
}
  0xeb   :  { %s4840_s19 = scalar_lea.vmem %s285_s11, 16  ;;  %s4844_s0 = scalar_lea.vmem %s285_s11, 32 }
  0xec   :  { %p4841_p13 = scmp.ne.s32.totalorder %s285_s11, %s4840_s19  ;;  %p4845_p0 = scmp.lt.s32.totalorder %s285_s11, %s285_s11 }
  0xed   :  { %p4846_p1 = scmp.lt.s32.totalorder %s4844_s0, %s4840_s19 }
  0xef   :  { %p4847_p2 = por %p4846_p1, %p4845_p0 }
  0xf1   :  { %p4848_p3 = pnand %p4847_p2, %p4841_p13 }
  0xf3   :  { %4851 = shalt.err (!%p4848_p3)
}
  0xf4   :  { %287 = dma.hbm_to_vmem [thread:$0]  %s6343_s21, 16, %s285_s11, [#allocation36]  }
  0xf5   :  { %s4852_s13 = scalar_lea.hbm %s6345_s23, 16 }
  0xf6   :  { %p4853_p4 = scmp.ne.s32.totalorder %s6345_s23, %s4852_s13  ;;  %p4856_p5 = scmp.lt.u32.totalorder %s4852_s13, %s6345_s23 }
  0xf8   :  { %p4858_p6 = pnand %p4856_p5, %p4853_p4 }
  0xfa   :  { %4861 = shalt.err (!%p4858_p6)
}
  0xfb   :  { %s4862_s10 = scalar_lea.vmem %s305_s6, 16  ;;  %s4866_s29 = scalar_lea.vmem %s305_s6, 32 }
  0xfc   :  { %p4863_p7 = scmp.ne.s32.totalorder %s305_s6, %s4862_s10  ;;  %p4867_p8 = scmp.lt.s32.totalorder %s305_s6, %s305_s6 }
  0xfd   :  { %p4868_p9 = scmp.lt.s32.totalorder %s4866_s29, %s4862_s10 }
  0xff   :  { %p4869_p10 = por %p4868_p9, %p4867_p8 }
 0x101   :  { %p4870_p11 = pnand %p4869_p10, %p4863_p7 }
 0x103   :  { %4873 = shalt.err (!%p4870_p11)
}
 0x104   :  { %307 = dma.hbm_to_vmem [thread:$0]  %s6345_s23, 16, %s305_s6, [#allocation39]  }
 0x105   :  { %s5250_s3 = smov [#allocation2]   ;;  %s5251_s24 = smov [#allocation7]  }
 0x106   :  { %s51_s7 = sshll.u32 %s5250_s3, 4  ;;  %s75_s25 = sshll.u32 %s5251_s24, 4  ;;  %s52_s7 = int_to_ptr.vmem [resolvable:$true] %s51_s7  ;;  %s5563_s25 = int_to_ptr.vmem [resolvable:$true] %s75_s25 }
 0x107   :  { %s6386_s28 = sld [smem:[#allocation59_spill]] }
 0x10d   :  { %s4874_s1 = scalar_lea.hbm %s6386_s28, 256 }
 0x10e   :  { %p4875_p12 = scmp.ne.s32.totalorder %s6386_s28, %s4874_s1  ;;  %p4878_p13 = scmp.lt.u32.totalorder %s4874_s1, %s6386_s28 }
 0x110   :  { %p4880_p0 = pnand %p4878_p13, %p4875_p12 }
 0x112   :  { %4883 = shalt.err (!%p4880_p0)
}
 0x113   :  { %s4884_s23 = scalar_lea.vmem %s52_s7, 256  ;;  %p4889_p2 = scmp.lt.s32.totalorder %s52_s7, %s52_s7 }
 0x114   :  { %p4885_p1 = scmp.ne.s32.totalorder %s52_s7, %s4884_s23  ;;  %p4890_p3 = scmp.lt.s32.totalorder %s4884_s23, %s4884_s23 }
 0x116   :  { %p4891_p4 = por %p4890_p3, %p4889_p2 }
 0x118   :  { %p4892_p5 = pnand %p4891_p4, %p4885_p1 }
 0x11a   :  { %4895 = shalt.err (!%p4892_p5)
}
 0x11b   :  { %s6387_s6 = smov 8   ;;  %s6388_s2 = smov 128  }
 0x11c   :  { %57 = dma.hbm_to_vmem [thread:$0]  %s6386_s28, 256, %s52_s7, [#allocation3], %s6388_s2, %s6388_s2, %s6387_s6  }
 0x11d   :  { %s6389_s26 = sld [smem:[#allocation61_spill]] }
 0x123   :  { %s4896_s17 = scalar_lea.hbm %s6389_s26, 1024 }
 0x124   :  { %p4897_p6 = scmp.ne.s32.totalorder %s6389_s26, %s4896_s17  ;;  %p4900_p7 = scmp.lt.u32.totalorder %s4896_s17, %s6389_s26 }
 0x126   :  { %p4902_p8 = pnand %p4900_p7, %p4897_p6 }
 0x128   :  { %4905 = shalt.err (!%p4902_p8)
}
 0x129   :  { %s4906_s3 = scalar_lea.vmem %s5563_s25, 1024  ;;  %p4911_p10 = scmp.lt.s32.totalorder %s5563_s25, %s5563_s25 }
 0x12a   :  { %p4907_p9 = scmp.ne.s32.totalorder %s5563_s25, %s4906_s3  ;;  %p4912_p11 = scmp.lt.s32.totalorder %s4906_s3, %s4906_s3 }
 0x12c   :  { %p4913_p12 = por %p4912_p11, %p4911_p10 }
 0x12e   :  { %p4914_p13 = pnand %p4913_p12, %p4907_p9 }
 0x130   :  { %4917 = shalt.err (!%p4914_p13)
}
 0x131   :  { %81 = dma.hbm_to_vmem [thread:$0]  %s6389_s26, 1024, %s5563_s25, [#allocation6], %s6388_s2, %s6388_s2, %s6387_s6  }
 0x132   :  { %s5252_s15 = smov [#allocation10]   ;;  %s6390_s19 = sld [smem:[#allocation63_spill]] }
 0x133   :  { %s99_s27 = sshll.u32 %s5252_s15, 4  ;;  %s100_s27 = int_to_ptr.vmem [resolvable:$true] %s99_s27 }
 0x138   :  { %s4918_s0 = scalar_lea.hbm %s6390_s19, 3072 }
 0x139   :  { %p4919_p0 = scmp.ne.s32.totalorder %s6390_s19, %s4918_s0  ;;  %p4922_p1 = scmp.lt.u32.totalorder %s4918_s0, %s6390_s19 }
 0x13b   :  { %p4924_p2 = pnand %p4922_p1, %p4919_p0 }
 0x13d   :  { %4927 = shalt.err (!%p4924_p2)
}
 0x13e   :  { %s4928_s13 = scalar_lea.vmem %s100_s27, 3072  ;;  %p4933_p4 = scmp.lt.s32.totalorder %s100_s27, %s100_s27 }
 0x13f   :  { %p4929_p3 = scmp.ne.s32.totalorder %s100_s27, %s4928_s13  ;;  %p4934_p5 = scmp.lt.s32.totalorder %s4928_s13, %s4928_s13 }
 0x141   :  { %p4935_p6 = por %p4934_p5, %p4933_p4 }
 0x143   :  { %p4936_p7 = pnand %p4935_p6, %p4929_p3 }
 0x145   :  { %4939 = shalt.err (!%p4936_p7)
}
 0x146   :  { %s5253_s25 = smov 192   ;;  %s5254_s9 = smov 12  }
 0x147   :  { %105 = dma.hbm_to_vmem [thread:$0]  %s6390_s19, 3072, %s100_s27, [#allocation9], %s5253_s25, %s5253_s25, %s5254_s9  }
 0x148   :  { %s5255_s17 = smov [#allocation13]   ;;  %s6391_s11 = sld [smem:[#allocation65_spill]] }
 0x149   :  { %s121_s10 = sshll.u32 %s5255_s17, 4  ;;  %s122_s10 = int_to_ptr.vmem [resolvable:$true] %s121_s10 }
 0x14e   :  { %s4940_s3 = scalar_lea.hbm %s6391_s11, 1024 }
 0x14f   :  { %p4941_p8 = scmp.ne.s32.totalorder %s6391_s11, %s4940_s3  ;;  %p4944_p9 = scmp.lt.u32.totalorder %s4940_s3, %s6391_s11 }
 0x151   :  { %p4946_p10 = pnand %p4944_p9, %p4941_p8 }
 0x153   :  { %4949 = shalt.err (!%p4946_p10)
}
 0x154   :  { %s4950_s1 = scalar_lea.vmem %s122_s10, 1024  ;;  %p4955_p12 = scmp.lt.s32.totalorder %s122_s10, %s122_s10 }
 0x155   :  { %p4951_p11 = scmp.ne.s32.totalorder %s122_s10, %s4950_s1  ;;  %p4956_p13 = scmp.lt.s32.totalorder %s4950_s1, %s4950_s1 }
 0x157   :  { %p4957_p0 = por %p4956_p13, %p4955_p12 }
 0x159   :  { %p4958_p1 = pnand %p4957_p0, %p4951_p11 }
 0x15b   :  { %4961 = shalt.err (!%p4958_p1)
}
 0x15c   :  { %s5256_s27 = smov 64   ;;  %s5257_s19 = smov 4  }
 0x15d   :  { %127 = dma.hbm_to_vmem [thread:$0]  %s6391_s11, 1024, %s122_s10, [#allocation12], %s5256_s27, %s5256_s27, %s5257_s19  }
 0x15e   :  { %s5258_s30 = smov [#allocation16]   ;;  %s5259_s5 = smov [#allocation19]  }
 0x15f   :  { %s144_s23 = sshll.u32 %s5258_s30, 4  ;;  %s163_s13 = sshll.u32 %s5259_s5, 4  ;;  %s145_s23 = int_to_ptr.vmem [resolvable:$true] %s144_s23  ;;  %s5627_s13 = int_to_ptr.vmem [resolvable:$true] %s163_s13 }
 0x160   :  { %s6392_s4 = sld [smem:[#allocation67_spill]] }
 0x166   :  { %s4962_s26 = scalar_lea.hbm %s6392_s4, 16 }
 0x167   :  { %p4963_p2 = scmp.ne.s32.totalorder %s6392_s4, %s4962_s26  ;;  %p4966_p3 = scmp.lt.u32.totalorder %s4962_s26, %s6392_s4 }
 0x169   :  { %p4968_p4 = pnand %p4966_p3, %p4963_p2 }
 0x16b   :  { %4971 = shalt.err (!%p4968_p4)
}
 0x16c   :  { %s4972_s10 = scalar_lea.vmem %s145_s23, 16  ;;  %s4976_s11 = scalar_lea.vmem %s145_s23, 32 }
 0x16d   :  { %p4973_p5 = scmp.ne.s32.totalorder %s145_s23, %s4972_s10  ;;  %p4977_p6 = scmp.lt.s32.totalorder %s145_s23, %s145_s23 }
 0x16e   :  { %p4978_p7 = scmp.lt.s32.totalorder %s4976_s11, %s4972_s10 }
 0x170   :  { %p4979_p8 = por %p4978_p7, %p4977_p6 }
 0x172   :  { %p4980_p9 = pnand %p4979_p8, %p4973_p5 }
 0x174   :  { %4983 = shalt.err (!%p4980_p9)
}
 0x175   :  { %147 = dma.hbm_to_vmem [thread:$0]  %s6392_s4, 16, %s145_s23, [#allocation15]  }
 0x176   :  { %s6393_s1 = sld [smem:[#allocation69_spill]] }
 0x17c   :  { %s4984_s0 = scalar_lea.hbm %s6393_s1, 1024 }
 0x17d   :  { %p4985_p10 = scmp.ne.s32.totalorder %s6393_s1, %s4984_s0  ;;  %p4988_p11 = scmp.lt.u32.totalorder %s4984_s0, %s6393_s1 }
 0x17f   :  { %p4990_p12 = pnand %p4988_p11, %p4985_p10 }
 0x181   :  { %4993 = shalt.err (!%p4990_p12)
}
 0x182   :  { %s4994_s9 = scalar_lea.vmem %s5627_s13, 1024  ;;  %p4999_p0 = scmp.lt.s32.totalorder %s5627_s13, %s5627_s13 }
 0x183   :  { %p4995_p13 = scmp.ne.s32.totalorder %s5627_s13, %s4994_s9  ;;  %p5000_p1 = scmp.lt.s32.totalorder %s4994_s9, %s4994_s9 }
 0x185   :  { %p5001_p2 = por %p5000_p1, %p4999_p0 }
 0x187   :  { %p5002_p3 = pnand %p5001_p2, %p4995_p13 }
 0x189   :  { %5005 = shalt.err (!%p5002_p3)
}
 0x18a   :  { %169 = dma.hbm_to_vmem [thread:$0]  %s6393_s1, 1024, %s5627_s13, [#allocation18], %s5256_s27, %s5256_s27, %s5257_s19  }
 0x18b   :  { %s5260_s26 = smov [#allocation22]   ;;  %s5261_s29 = smov [#allocation25]  }
 0x18c   :  { %s185_s17 = sshll.u32 %s5260_s26, 4  ;;  %s207_s21 = sshll.u32 %s5261_s29, 4  ;;  %s186_s17 = int_to_ptr.vmem [resolvable:$true] %s185_s17  ;;  %s5661_s21 = int_to_ptr.vmem [resolvable:$true] %s207_s21 }
 0x18d   :  { %s5006_s11 = scalar_lea.hbm %s6334_s12, 2048 }
 0x18e   :  { %p5007_p4 = scmp.ne.s32.totalorder %s6334_s12, %s5006_s11  ;;  %p5010_p5 = scmp.lt.u32.totalorder %s5006_s11, %s6334_s12 }
 0x190   :  { %p5012_p6 = pnand %p5010_p5, %p5007_p4 }
 0x192   :  { %5015 = shalt.err (!%p5012_p6)
}
 0x193   :  { %s5016_s13 = scalar_lea.vmem %s186_s17, 2048  ;;  %p5021_p8 = scmp.lt.s32.totalorder %s186_s17, %s186_s17 }
 0x194   :  { %p5017_p7 = scmp.ne.s32.totalorder %s186_s17, %s5016_s13  ;;  %p5022_p9 = scmp.lt.s32.totalorder %s5016_s13, %s5016_s13 }
 0x196   :  { %p5023_p10 = por %p5022_p9, %p5021_p8 }
 0x198   :  { %p5024_p11 = pnand %p5023_p10, %p5017_p7 }
 0x19a   :  { %5027 = shalt.err (!%p5024_p11)
}
 0x19b   :  { %191 = dma.hbm_to_vmem [thread:$0]  %s6334_s12, 2048, %s186_s17, [#allocation21], %s6388_s2, %s6388_s2, %s6387_s6  }
 0x19c   :  { %s5028_s5 = scalar_lea.hbm %s6336_s14, 1024 }
 0x19d   :  { %p5029_p12 = scmp.ne.s32.totalorder %s6336_s14, %s5028_s5  ;;  %p5032_p13 = scmp.lt.u32.totalorder %s5028_s5, %s6336_s14 }
 0x19f   :  { %p5034_p0 = pnand %p5032_p13, %p5029_p12 }
 0x1a1   :  { %5037 = shalt.err (!%p5034_p0)
}
 0x1a2   :  { %s5038_s26 = scalar_lea.vmem %s5661_s21, 1024  ;;  %p5043_p2 = scmp.lt.s32.totalorder %s5661_s21, %s5661_s21 }
 0x1a3   :  { %p5039_p1 = scmp.ne.s32.totalorder %s5661_s21, %s5038_s26  ;;  %p5044_p3 = scmp.lt.s32.totalorder %s5038_s26, %s5038_s26 }
 0x1a5   :  { %p5045_p4 = por %p5044_p3, %p5043_p2 }
 0x1a7   :  { %p5046_p5 = pnand %p5045_p4, %p5039_p1 }
 0x1a9   :  { %5049 = shalt.err (!%p5046_p5)
}
 0x1aa   :  { %213 = dma.hbm_to_vmem [thread:$0]  %s6336_s14, 1024, %s5661_s21, [#allocation24], %s5256_s27, %s5256_s27, %s5257_s19  }
 0x1ab   :  { %s5262_s29 = smov [#allocation28]   ;;  %s5263_s10 = smov [#allocation31]  }
 0x1ac   :  { %s230_s3 = sshll.u32 %s5262_s29, 4  ;;  %s249_s11 = sshll.u32 %s5263_s10, 4  ;;  %s231_s3 = int_to_ptr.vmem [resolvable:$true] %s230_s3  ;;  %s5698_s11 = int_to_ptr.vmem [resolvable:$true] %s249_s11 }
 0x1ad   :  { %s5050_s15 = scalar_lea.hbm %s6338_s16, 16 }
 0x1ae   :  { %p5051_p6 = scmp.ne.s32.totalorder %s6338_s16, %s5050_s15  ;;  %p5054_p7 = scmp.lt.u32.totalorder %s5050_s15, %s6338_s16 }
 0x1b0   :  { %p5056_p8 = pnand %p5054_p7, %p5051_p6 }
 0x1b2   :  { %5059 = shalt.err (!%p5056_p8)
}
 0x1b3   :  { %s5060_s14 = scalar_lea.vmem %s231_s3, 16  ;;  %s5064_s21 = scalar_lea.vmem %s231_s3, 32 }
 0x1b4   :  { %p5061_p9 = scmp.ne.s32.totalorder %s231_s3, %s5060_s14  ;;  %p5065_p10 = scmp.lt.s32.totalorder %s231_s3, %s231_s3 }
 0x1b5   :  { %p5066_p11 = scmp.lt.s32.totalorder %s5064_s21, %s5060_s14 }
 0x1b7   :  { %p5067_p12 = por %p5066_p11, %p5065_p10 }
 0x1b9   :  { %p5068_p13 = pnand %p5067_p12, %p5061_p9 }
 0x1bb   :  { %5071 = shalt.err (!%p5068_p13)
}
 0x1bc   :  { %233 = dma.hbm_to_vmem [thread:$0]  %s6338_s16, 16, %s231_s3, [#allocation27]  }
 0x1bd   :  { %s5072_s9 = scalar_lea.hbm %s6340_s18, 2048 }
 0x1be   :  { %p5073_p0 = scmp.ne.s32.totalorder %s6340_s18, %s5072_s9  ;;  %p5076_p1 = scmp.lt.u32.totalorder %s5072_s9, %s6340_s18 }
 0x1c0   :  { %p5078_p2 = pnand %p5076_p1, %p5073_p0 }
 0x1c2   :  { %5081 = shalt.err (!%p5078_p2)
}
 0x1c3   :  { %s5082_s17 = scalar_lea.vmem %s5698_s11, 2048  ;;  %p5087_p4 = scmp.lt.s32.totalorder %s5698_s11, %s5698_s11 }
 0x1c4   :  { %p5083_p3 = scmp.ne.s32.totalorder %s5698_s11, %s5082_s17  ;;  %p5088_p5 = scmp.lt.s32.totalorder %s5082_s17, %s5082_s17 }
 0x1c6   :  { %p5089_p6 = por %p5088_p5, %p5087_p4 }
 0x1c8   :  { %p5090_p7 = pnand %p5089_p6, %p5083_p3 }
 0x1ca   :  { %5093 = shalt.err (!%p5090_p7)
}
 0x1cb   :  { %255 = dma.hbm_to_vmem [thread:$0]  %s6340_s18, 2048, %s5698_s11, [#allocation30], %s6388_s2, %s6388_s2, %s6387_s6  }
 0x1cc   :  { %s5264_s3 = smov [#allocation34]   ;;  %s5265_s7 = smov [#allocation37]  }
 0x1cd   :  { %s271_s10 = sshll.u32 %s5264_s3, 4  ;;  %s294_s24 = sshll.u32 %s5265_s7, 4  ;;  %s272_s10 = int_to_ptr.vmem [resolvable:$true] %s271_s10  ;;  %s295_s24 = int_to_ptr.vmem [resolvable:$true] %s294_s24 }
 0x1ce   :  { %s5094_s13 = scalar_lea.hbm %s6342_s20, 2048 }
 0x1cf   :  { %p5095_p8 = scmp.ne.s32.totalorder %s6342_s20, %s5094_s13  ;;  %p5098_p9 = scmp.lt.u32.totalorder %s5094_s13, %s6342_s20 }
 0x1d1   :  { %p5100_p10 = pnand %p5098_p9, %p5095_p8 }
 0x1d3   :  { %5103 = shalt.err (!%p5100_p10)
}
 0x1d4   :  { %s5104_s18 = scalar_lea.vmem %s272_s10, 2048  ;;  %p5109_p12 = scmp.lt.s32.totalorder %s272_s10, %s272_s10 }
 0x1d5   :  { %p5105_p11 = scmp.ne.s32.totalorder %s272_s10, %s5104_s18  ;;  %p5110_p13 = scmp.lt.s32.totalorder %s5104_s18, %s5104_s18 }
 0x1d7   :  { %p5111_p0 = por %p5110_p13, %p5109_p12 }
 0x1d9   :  { %p5112_p1 = pnand %p5111_p0, %p5105_p11 }
 0x1db   :  { %5115 = shalt.err (!%p5112_p1)
}
 0x1dc   :  { %277 = dma.hbm_to_vmem [thread:$0]  %s6342_s20, 2048, %s272_s10, [#allocation33], %s5256_s27, %s5256_s27, %s5257_s19  }
 0x1dd   :  { %s5116_s25 = scalar_lea.hbm %s6344_s22, 16 }
 0x1de   :  { %p5117_p2 = scmp.ne.s32.totalorder %s6344_s22, %s5116_s25  ;;  %p5120_p3 = scmp.lt.u32.totalorder %s5116_s25, %s6344_s22 }
 0x1e0   :  { %p5122_p4 = pnand %p5120_p3, %p5117_p2 }
 0x1e2   :  { %5125 = shalt.err (!%p5122_p4)
}
 0x1e3   :  { %s5126_s12 = scalar_lea.vmem %s295_s24, 16  ;;  %s5130_s17 = scalar_lea.vmem %s295_s24, 32 }
 0x1e4   :  { %p5127_p5 = scmp.ne.s32.totalorder %s295_s24, %s5126_s12  ;;  %p5131_p6 = scmp.lt.s32.totalorder %s295_s24, %s295_s24 }
 0x1e5   :  { %p5132_p7 = scmp.lt.s32.totalorder %s5130_s17, %s5126_s12 }
 0x1e7   :  { %p5133_p8 = por %p5132_p7, %p5131_p6 }
 0x1e9   :  { %p5134_p9 = pnand %p5133_p8, %p5127_p5 }
 0x1eb   :  { %5137 = shalt.err (!%p5134_p9)
}
 0x1ec   :  { %297 = dma.hbm_to_vmem [thread:$0]  %s6344_s22, 16, %s295_s24, [#allocation36]  }
 0x1ed   :  { %s5266_s16 = smov [#allocation40]   ;;  %s5267_s3 = smov [#allocation41]  }
 0x1ee   :  { %s314_s29 = sshll.u32 %s5266_s16, 4  ;;  %s324_s10 = sshll.u32 %s5267_s3, 4  ;;  %s315_s29 = int_to_ptr.vmem [resolvable:$true] %s314_s29  ;;  %s325_s10 = int_to_ptr.vmem [resolvable:$true] %s324_s10 }
 0x1ef   :  { %s6394_s28 = sld [smem:[#allocation70_spill]] }
 0x1f5   :  { %s5138_s13 = scalar_lea.hbm %s6394_s28, 16 }
 0x1f6   :  { %p5139_p10 = scmp.ne.s32.totalorder %s6394_s28, %s5138_s13  ;;  %p5142_p11 = scmp.lt.u32.totalorder %s5138_s13, %s6394_s28 }
 0x1f8   :  { %p5144_p12 = pnand %p5142_p11, %p5139_p10 }
 0x1fa   :  { %5147 = shalt.err (!%p5144_p12)
}
 0x1fb   :  { %s5148_s22 = scalar_lea.vmem %s315_s29, 16  ;;  %s5152_s24 = scalar_lea.vmem %s315_s29, 32 }
 0x1fc   :  { %p5149_p13 = scmp.ne.s32.totalorder %s315_s29, %s5148_s22  ;;  %p5153_p0 = scmp.lt.s32.totalorder %s315_s29, %s315_s29 }
 0x1fd   :  { %p5154_p1 = scmp.lt.s32.totalorder %s5152_s24, %s5148_s22 }
 0x1ff   :  { %p5155_p2 = por %p5154_p1, %p5153_p0 }
 0x201   :  { %p5156_p3 = pnand %p5155_p2, %p5149_p13 }
 0x203   :  { %5159 = shalt.err (!%p5156_p3)
}
 0x204   :  { %317 = dma.hbm_to_vmem [thread:$0]  %s6394_s28, 16, %s315_s29, [#allocation39]  }
 0x205   :  { %s6395_s5 = sld [smem:[#allocation71_spill]] }
 0x20b   :  { %s5160_s25 = scalar_lea.hbm %s6395_s5, 16 }
 0x20c   :  { %p5161_p4 = scmp.ne.s32.totalorder %s6395_s5, %s5160_s25  ;;  %p5164_p5 = scmp.lt.u32.totalorder %s5160_s25, %s6395_s5 }
 0x20e   :  { %p5166_p6 = pnand %p5164_p5, %p5161_p4 }
 0x210   :  { %5169 = shalt.err (!%p5166_p6)
}
 0x211   :  { %s5170_s12 = scalar_lea.vmem %s325_s10, 16  ;;  %s5174_s17 = scalar_lea.vmem %s325_s10, 32 }
 0x212   :  { %p5171_p7 = scmp.ne.s32.totalorder %s325_s10, %s5170_s12  ;;  %p5175_p8 = scmp.lt.s32.totalorder %s325_s10, %s325_s10 }
 0x213   :  { %p5176_p9 = scmp.lt.s32.totalorder %s5174_s17, %s5170_s12 }
 0x215   :  { %p5177_p10 = por %p5176_p9, %p5175_p8 }
 0x217   :  { %p5178_p11 = pnand %p5177_p10, %p5171_p7 }
 0x219   :  { %5181 = shalt.err (!%p5178_p11)
}
 0x21a   :  { %327 = dma.hbm_to_vmem [thread:$0]  %s6395_s5, 16, %s325_s10, [#allocation42]  }
 0x21b   :  { %5204 = dma.done.wait [#allocation3], 256  }
 0x21c   :  { %5205 = vsyncadd [#allocation3], 4294967040 }
 0x21d   :  { %5206 = dma.done.wait [#allocation6], 1536  }
 0x21e   :  { %5207 = vsyncadd [#allocation6], 4294965760 }
 0x21f   :  { %5208 = dma.done.wait [#allocation9], 3200  }
 0x220   :  { %5209 = vsyncadd [#allocation9], 4294964096 }
 0x221   :  { %5210 = dma.done.wait [#allocation12], 1072  }
 0x222   :  { %5211 = vsyncadd [#allocation12], 4294966224 }
 0x223   :  { %5212 = dma.done.wait [#allocation15], 32  }
 0x224   :  { %5213 = vsyncadd [#allocation15], 4294967264 }
 0x225   :  { %5214 = dma.done.wait [#allocation18], 1040  }
 0x226   :  { %5215 = vsyncadd [#allocation18], 4294966256 }
 0x227   :  { %5216 = dma.done.wait [#allocation21], 2064  }
 0x228   :  { %5217 = vsyncadd [#allocation21], 4294965232 }
 0x229   :  { %5218 = dma.done.wait [#allocation24], 1056  }
 0x22a   :  { %5219 = vsyncadd [#allocation24], 4294966240 }
 0x22b   :  { %5220 = dma.done.wait [#allocation27], 32  }
 0x22c   :  { %5221 = vsyncadd [#allocation27], 4294967264 }
 0x22d   :  { %5222 = dma.done.wait [#allocation30], 2064  }
 0x22e   :  { %5223 = vsyncadd [#allocation30], 4294965232 }
 0x22f   :  { %5224 = dma.done.wait [#allocation33], 2080  }
 0x230   :  { %5225 = vsyncadd [#allocation33], 4294965216 }
 0x231   :  { %5226 = dma.done.wait [#allocation36], 32  }
 0x232   :  { %5227 = vsyncadd [#allocation36], 4294967264 }
 0x233   :  { %5228 = dma.done.wait [#allocation39], 32  }
 0x234   :  { %5229 = vsyncadd [#allocation39], 4294967264 }
 0x235   :  { %5230 = dma.done.wait [#allocation42], 16  }
 0x236   :  { %5231 = vsyncadd [#allocation42], 4294967280  ;;  %v407_v0 = vld [vmem:[#allocation2] sm:$0xff]  ;;  %v408_v1 = vld [vmem:[#allocation2 + $0x8] sm:$0xff]  ;;  %v5268_v13 = vmov 0.0   ;;  %v5269_v27 = vmov 0   ;;  %v503_v63 = vlaneseq }
 0x237   :  { %413 = vadd.xlane.f32.xlu0 %v407_v0  ;;  %v4400_v10 = vld [vmem:[#allocation10 + $0x4] ss:$12 sps:$4 sm:$0xff]   ;;  %v4402_v11 = vld [vmem:[#allocation10] ss:$12 sps:$4 sm:$0xff]   ;;  %v4403_v12 = vld [vmem:[#allocation10 + $0x8] ss:$12 sps:$4 sm:$0xff]   ;;  %3998 = vmatprep.subr.bf16.mxu1 %v5268_v13 }
 0x238   :  { %646 = vmatprep.subr.bf16.mxu0 %v4400_v10  ;;  %3999 = vmatpush3.bf16.msra.mxu1 %v4403_v12  ;;  %v4404_v14 = vld [vmem:[#allocation10 + $0x1c] ss:$12 sps:$4 sm:$0xff]   ;;  %v4406_v15 = vld [vmem:[#allocation10 + $0x18] ss:$12 sps:$4 sm:$0xff]   ;;  %v4407_v16 = vld [vmem:[#allocation10 + $0x20] ss:$12 sps:$4 sm:$0xff]  }
 0x239   :  { %647 = vmatpush1.bf16.msra.mxu0 %v4402_v11  ;;  %4000 = vmatprep.subr.bf16.mxu1 %v5268_v13  ;;  %v4408_v17 = vld [vmem:[#allocation10 + $0x34] ss:$12 sps:$4 sm:$0xff]   ;;  %v4410_v18 = vld [vmem:[#allocation10 + $0x30] ss:$12 sps:$4 sm:$0xff]   ;;  %v4411_v19 = vld [vmem:[#allocation10 + $0x38] ss:$12 sps:$4 sm:$0xff]  }
 0x23a   :  { %648 = vmatprep.subr.bf16.mxu0 %v4404_v14  ;;  %v4412_v20 = vld [vmem:[#allocation10 + $0x4c] ss:$12 sps:$4 sm:$0xff]   ;;  %v4414_v21 = vld [vmem:[#allocation10 + $0x48] ss:$12 sps:$4 sm:$0xff]   ;;  %v4415_v22 = vld [vmem:[#allocation10 + $0x50] ss:$12 sps:$4 sm:$0xff]   ;;  %678 = vmatprep.mubr.bf16.mxu0 %v5269_v27 }
 0x23b   :  { %415 = vadd.xlane.f32.xlu0 %v408_v1  ;;  %v4416_v23 = vld [vmem:[#allocation10 + $0x64] ss:$12 sps:$4 sm:$0xff]   ;;  %v4418_v24 = vld [vmem:[#allocation10 + $0x60] ss:$12 sps:$4 sm:$0xff]   ;;  %v4419_v25 = vld [vmem:[#allocation10 + $0x68] ss:$12 sps:$4 sm:$0xff]  }
 0x23c   :  { %4001 = vmatpush3.bf16.msra.mxu1 %v4407_v16  ;;  %v4420_v26 = vld [vmem:[#allocation10 + $0x7c] ss:$12 sps:$4 sm:$0xff]   ;;  %vm5270_vm0 = vmmov 0   ;;  %v4422_v28 = vld [vmem:[#allocation10 + $0x78] ss:$12 sps:$4 sm:$0xff]   ;;  %s5271_s16 = smov 96  }
 0x23d   :  { %649 = vmatpush1.bf16.msra.mxu0 %v4406_v15  ;;  %4002 = vmatprep.subr.bf16.mxu1 %v5268_v13  ;;  %v4423_v29 = vld [vmem:[#allocation10 + $0x80] ss:$12 sps:$4 sm:$0xff]   ;;  %v4426_v31 = vld [vmem:[#allocation10 + $0x90] ss:$12 sps:$4 sm:$0xff]   ;;  %v4427_v32 = vld [vmem:[#allocation10 + $0x98] ss:$12 sps:$4 sm:$0xff]  }
 0x23e   :  { %650 = vmatprep.subr.bf16.mxu0 %v4408_v17  ;;  %4014 = vmatprep.mubr.msk.bf16.mxu1 %vm5270_vm0, %v5268_v13  ;;  %v4424_v30 = vld [vmem:[#allocation10 + $0x94] ss:$12 sps:$4 sm:$0xff]   ;;  %v4428_v33 = vld [vmem:[#allocation10 + $0xac] ss:$12 sps:$4 sm:$0xff]   ;;  %v4431_v35 = vld [vmem:[#allocation10 + $0xb0] ss:$12 sps:$4 sm:$0xff]  }
 0x23f   :  { %v4430_v34 = vld [vmem:[#allocation10 + $0xa8] ss:$12 sps:$4 sm:$0xff]   ;;  %v3738_v52 = vld [vmem:[#allocation16] ss:$0 sm:$0xff]  ;;  %vm822_vm5 = vcmask 261120   ;;  %s5272_s29 = smov 32  }
 0x240   :  { %4003 = vmatpush3.bf16.msra.mxu1 %v4411_v19  ;;  %v3739_v58 = vld [vmem:[#allocation17] ss:$0 sm:$0xff]  ;;  %vm1315_vm6 = vcmask 1043456   ;;  %vm1215_vm8 = vcmask 64512  }
 0x241   :  { %651 = vmatpush1.bf16.msra.mxu0 %v4410_v18  ;;  %4004 = vmatprep.subr.bf16.mxu1 %v5268_v13 }
 0x242   :  { %652 = vmatprep.subr.bf16.mxu0 %v4412_v20 }
 0x244   :  { %4005 = vmatpush3.bf16.msra.mxu1 %v4415_v22 }
 0x245   :  { %653 = vmatpush1.bf16.msra.mxu0 %v4414_v21  ;;  %4006 = vmatprep.subr.bf16.mxu1 %v5268_v13 }
 0x246   :  { %654 = vmatprep.subr.bf16.mxu0 %v4416_v23 }
 0x248   :  { %4007 = vmatpush3.bf16.msra.mxu1 %v4419_v25 }
 0x249   :  { %655 = vmatpush1.bf16.msra.mxu0 %v4418_v24  ;;  %4008 = vmatprep.subr.bf16.mxu1 %v5268_v13 }
 0x24a   :  { %656 = vmatprep.subr.bf16.mxu0 %v4420_v26 }
 0x24c   :  { %4009 = vmatpush3.bf16.msra.mxu1 %v4423_v29 }
 0x24d   :  { %657 = vmatpush1.bf16.msra.mxu0 %v4422_v28  ;;  %4010 = vmatprep.subr.bf16.mxu1 %v5268_v13 }
 0x24e   :  { %658 = vmatprep.subr.bf16.mxu0 %v4424_v30 }
 0x250   :  { %4011 = vmatpush3.bf16.msra.mxu1 %v4427_v32 }
 0x251   :  { %659 = vmatpush1.bf16.msra.mxu0 %v4426_v31  ;;  %4012 = vmatprep.subr.bf16.mxu1 %v5268_v13 }
 0x252   :  { %660 = vmatprep.subr.bf16.mxu0 %v4428_v33 }
 0x254   :  { %4013 = vmatpush3.bf16.msra.mxu1 %v4431_v35 }
 0x255   :  { %661 = vmatpush1.bf16.msra.mxu0 %v4430_v34  ;;  %4036 = vmatprep.subr.bf16.mxu1 %v5268_v13 }
 0x256   :  { %4018 = vmatprep.subr.bf16.mxu0 %v5268_v13 }
 0x2c4   :  { %v414_v2 = vpop.xlane.xlu0 %413 }
 0x2c5   :  { %v418_v3 = vmul.f32 0.0078125, %v414_v2  ;;  %v501_v2 = vld [vmem:[#allocation11] sm:$0x7] }
 0x2c7   :  { %v5783_v4 = vsub.f32 %v407_v0, %v418_v3  ;;  %v504_v0 = vshrl.u32 %v503_v63, 7 }
 0x2c8   :  { %v416_v5 = vpop.xlane.xlu0 %415 }
 0x2c9   :  { %v419_v6 = vmul.f32 0.0078125, %v416_v5  ;;  %v422_v7 = vmul.f32 %v5783_v4, %v5783_v4  ;;  %v455_v54 = vmul.f32 %v3738_v52, %v5783_v4  ;;  %v5812_v3 = vsub.s32 1, %v504_v0 }
 0x2ca   :  { %v513_v5 = vsub.s32 2, %v504_v0 }
 0x2cb   :  { %v5787_v8 = vsub.f32 %v408_v1, %v419_v6  ;;  %424 = vadd.xlane.f32.xlu1 %v422_v7  ;;  %v5810_v1 = vsub.s32 0, %v504_v0  ;;  %v510_v6 = vrot.slane %v501_v2, %v5812_v3 }
 0x2cc   :  { %v5818_v10 = vrot.slane %v501_v2, %v513_v5 }
 0x2cd   :  { %v423_v9 = vmul.f32 %v5787_v8, %v5787_v8  ;;  %v456_v55 = vmul.f32 %v3738_v52, %v5787_v8  ;;  %v506_v4 = vrot.slane %v501_v2, %v5810_v1 }
 0x2cf   :  { %426 = vadd.xlane.f32.xlu1 %v423_v9 }
 0x358   :  { %v425_v36 = vpop.xlane.xlu1 %424 }
 0x359   :  { %v428_v37 = vmul.f32 0.007874016, %v425_v36 }
 0x35b   :  { %4520 = vrsqrt.f32 %v428_v37  ;;  %vm432_vm1 = vcmp.eq.f32.partialorder %v428_v37, inf  ;;  %v435_v42 = vand.u32 2147483648, %v428_v37  ;;  %vm434_vm2 = vcmp.eq.f32.partialorder %v428_v37, 0.0 }
 0x35c   :  { %v427_v38 = vpop.xlane.xlu1 %426 }
 0x35d   :  { %v429_v39 = vmul.f32 0.007874016, %v427_v38 }
 0x35f   :  { %4522 = vrsqrt.f32 %v429_v39  ;;  %vm439_vm3 = vcmp.eq.f32.partialorder %v429_v39, inf  ;;  %v442_v48 = vand.u32 2147483648, %v429_v39  ;;  %vm441_vm4 = vcmp.eq.f32.partialorder %v429_v39, 0.0 }
 0x365   :  { %v4521_v40 = vpop.eup %4520 }
 0x366   :  { %v431_v41 = vmul.f32 %v4521_v40, %v428_v37 }
 0x368   :  { %v433_v43 = vsel %vm432_vm1, %v428_v37, %v431_v41  ;;  %vm1694_vm1 = vcmask 523264  }
 0x369   :  { %v4523_v44 = vpop.eup %4522  ;;  %v436_v45 = vsel %vm434_vm2, %v435_v42, %v433_v43  ;;  %vm1696_vm2 = vcmask 785408  }
 0x36a   :  { %v438_v46 = vmul.f32 %v4523_v44, %v429_v39  ;;  %v444_v47 = vadd.f32 1e-06, %v436_v45 }
 0x36c   :  { %v440_v49 = vsel %vm439_vm3, %v429_v39, %v438_v46  ;;  %4524 = vrcp.f32 %v444_v47 }
 0x36d   :  { %v443_v50 = vsel %vm441_vm4, %v442_v48, %v440_v49 }
 0x36e   :  { %v445_v51 = vadd.f32 1e-06, %v443_v50 }
 0x370   :  { %4526 = vrcp.f32 %v445_v51 }
 0x376   :  { %v4525_v53 = vpop.eup %4524 }
 0x377   :  { %v457_v56 = vmul.f32 %v4525_v53, %v455_v54 }
 0x379   :  { %v466_v60 = vadd.f32 %v3739_v58, %v457_v56 }
 0x37a   :  { %v4527_v57 = vpop.eup %4526 }
 0x37b   :  { %v458_v59 = vmul.f32 %v4527_v57, %v456_v55 }
 0x37d   :  { %v467_v61 = vadd.f32 %v3739_v58, %v458_v59 }
 0x37f   :  { %v468_v62 = vpack.c.bf16 %v467_v61, %v466_v60 }
 0x381   :  { %679 = vmatmul.mubr.bf16.vlgmr.msra.gmra.mrb[0].mxu0 %v468_v62  ;;  %4015 = vmatmul.mubr.bf16.vlgmr.msra.gmra.mrb[0].mxu1 %v468_v62  ;;  %v730_v62 = vld [vmem:[#allocation7] sm:$0xff] }
 0x382   :  { %4020 = vmatprep.mubr.msk.bf16.mxu0 %vm5270_vm0, %v5268_v13  ;;  %4038 = vmatprep.mubr.msk.bf16.mxu1 %vm5270_vm0, %v5268_v13  ;;  %vm1199_vm7 = vcmp.eq.f32.partialorder %v730_v62, 0.0 }
 0x454   :  { %v680_v7 = vpop.f32.mrb[0].mxu0  ;;  %v5816_v8 = vpop.f32.mrb[0].mxu1 }
 0x455   :  { %v681_v9 = vadd.f32 %v680_v7, %v506_v4  ;;  %v682_v11 = vpop.f32.mrb[1].mxu0  ;;  %v4016_v12 = vpop.f32.mrb[1].mxu1  ;;  %v5863_v54 = vadd.f32 %v5816_v8, %v5818_v10  ;;  %v731_v8 = vld [vmem:[#allocation7 + $0x8] sm:$0xff] }
 0x456   :  { %v683_v14 = vadd.f32 %v682_v11, %v510_v6  ;;  %v684_v15 = vpop.f32.mrb[2].mxu0  ;;  %v726_v16 = vpop.f32.mrb[2].mxu1  ;;  %vm1200_vm9 = vcmp.eq.f32.partialorder %v731_v8, 0.0 }
 0x457   :  { %v5821_v17 = vadd.f32 %v726_v16, %v5818_v10  ;;  %v686_v18 = vpop.f32.mrb[3].mxu0  ;;  %v4017_v19 = vpop.f32.mrb[3].mxu1  ;;  %739 = vrot.lane.b32.xlu1 %v681_v9, %s5271_s16  ;;  %v758_v23 = vpack.c.bf16 %v681_v9, %v681_v9  ;;  %v685_v24 = vadd.f32 %v684_v15, %v506_v4  ;;  %v814_v58 = vpack.c.bf16 %v5863_v54, %v5863_v54 }
 0x458   :  { %767 = vrot.lane.b32.xlu0 %v683_v14, %s5271_s16  ;;  %v786_v20 = vpack.c.bf16 %v683_v14, %v683_v14  ;;  %v687_v22 = vadd.f32 %v686_v18, %v510_v6  ;;  %v733_v18 = vld [vmem:[#allocation7 + $0x18] sm:$0xff]  ;;  %v732_v19 = vld [vmem:[#allocation7 + $0x10] sm:$0xff] }
 0x459   :  { %v762_v52 = vpack.c.bf16 %v685_v24, %v685_v24  ;;  %v1317_v61 = vsel %vm1315_vm6, %v814_v58, 0  ;;  %vm1202_vm10 = vcmp.eq.f32.partialorder %v733_v18, 0.0  ;;  %vm1201_vm11 = vcmp.eq.f32.partialorder %v732_v19, 0.0 }
 0x45a   :  { %v827_v21 = vsel %vm822_vm5, %v786_v20, 0  ;;  %v790_v42 = vpack.c.bf16 %v687_v22, %v687_v22 }
 0x45b   :  { %4019 = vmatpush3.bf16.xpose.msra.mxu0 %v827_v21  ;;  %770 = vrot.lane.b32.xlu1 %v683_v14, %s5256_s27 }
 0x45c   :  { %742 = vrot.lane.b32.xlu0 %v681_v9, %s5256_s27  ;;  %4024 = vmatprep.subr.bf16.mxu0 %v5268_v13  ;;  %v1011_v47 = vsel %vm822_vm5, %v790_v42, 0 }
 0x45f   :  { %773 = vrot.lane.b32.xlu1 %v683_v14, %s5272_s29 }
 0x460   :  { %777 = vrot.lane.b32.xlu0 %v687_v22, %s5271_s16 }
 0x462   :  { %4021 = vmatmul.mubr.msk.bf16.vlgmr.msra.gmra.mrb[4].mxu0 %vm822_vm5, %v758_v23 }
 0x463   :  { %745 = vrot.lane.b32.xlu1 %v681_v9, %s5272_s29  ;;  %4026 = vmatprep.mubr.msk.bf16.mxu0 %vm5270_vm0, %v5268_v13 }
 0x464   :  { %749 = vrot.lane.b32.xlu0 %v685_v24, %s5271_s16 }
 0x467   :  { %780 = vrot.lane.b32.xlu1 %v687_v22, %s5256_s27 }
 0x468   :  { %752 = vrot.lane.b32.xlu0 %v685_v24, %s5256_s27 }
 0x46b   :  { %783 = vrot.lane.b32.xlu1 %v687_v22, %s5272_s29 }
 0x46f   :  { %755 = vrot.lane.b32.xlu1 %v685_v24, %s5272_s29 }
 0x4c9   :  { %v740_v25 = vpop.permute.xlu1 %739 }
 0x4ca   :  { %v768_v26 = vpop.permute.xlu0 %767  ;;  %v759_v35 = vpack.c.bf16 %v740_v25, %v740_v25 }
 0x4cb   :  { %v787_v28 = vpack.c.bf16 %v768_v26, %v768_v26 }
 0x4cd   :  { %v873_v29 = vsel %vm822_vm5, %v787_v28, 0  ;;  %v771_v30 = vpop.permute.xlu1 %770 }
 0x4ce   :  { %4025 = vmatpush3.bf16.xpose.msra.mxu0 %v873_v29  ;;  %v743_v31 = vpop.permute.xlu0 %742  ;;  %v788_v32 = vpack.c.bf16 %v771_v30, %v771_v30 }
 0x4cf   :  { %4030 = vmatprep.subr.bf16.mxu0 %v5268_v13  ;;  %v760_v44 = vpack.c.bf16 %v743_v31, %v743_v31 }
 0x4d0   :  { %v919_v37 = vsel %vm822_vm5, %v788_v32, 0 }
 0x4d1   :  { %v774_v33 = vpop.permute.xlu1 %773 }
 0x4d2   :  { %v789_v34 = vpack.c.bf16 %v774_v33, %v774_v33  ;;  %v778_v38 = vpop.permute.xlu0 %777 }
 0x4d3   :  { %v791_v40 = vpack.c.bf16 %v778_v38, %v778_v38 }
 0x4d4   :  { %v965_v36 = vsel %vm822_vm5, %v789_v34, 0  ;;  %v735_v34 = vld [vmem:[#allocation7 + $0x28] sm:$0xff] }
 0x4d5   :  { %4037 = vmatpush3.bf16.xpose.msra.mxu1 %v965_v36  ;;  %v746_v39 = vpop.permute.xlu1 %745  ;;  %4027 = vmatmul.mubr.msk.bf16.vlgmr.msra.gmra.mrb[8].mxu0 %vm822_vm5, %v759_v35  ;;  %v1057_v45 = vsel %vm822_vm5, %v791_v40, 0  ;;  %v734_v35 = vld [vmem:[#allocation7 + $0x20] sm:$0xff]  ;;  %vm1204_vm12 = vcmp.eq.f32.partialorder %v735_v34, 0.0 }
 0x4d6   :  { %4031 = vmatpush3.bf16.xpose.msra.mxu0 %v919_v37  ;;  %4032 = vmatprep.mubr.msk.bf16.mxu0 %vm5270_vm0, %v5268_v13  ;;  %v761_v43 = vpack.c.bf16 %v746_v39, %v746_v39  ;;  %v750_v48 = vpop.permute.xlu0 %749  ;;  %vm1203_vm13 = vcmp.eq.f32.partialorder %v734_v35, 0.0 }
 0x4d7   :  { %4048 = vmatprep.subr.bf16.mxu1 %v5268_v13  ;;  %4042 = vmatprep.subr.bf16.mxu0 %v5268_v13  ;;  %v763_v51 = vpack.c.bf16 %v750_v48, %v750_v48 }
 0x4d9   :  { %v781_v41 = vpop.permute.xlu1 %780 }
 0x4da   :  { %v792_v50 = vpack.c.bf16 %v781_v41, %v781_v41  ;;  %v753_v57 = vpop.permute.xlu0 %752 }
 0x4db   :  { %v764_v60 = vpack.c.bf16 %v753_v57, %v753_v57 }
 0x4dc   :  { %4039 = vmatmul.mubr.msk.bf16.vlgmr.msra.gmra.mrb[4].mxu1 %vm822_vm5, %v761_v43  ;;  %v1103_v55 = vsel %vm822_vm5, %v792_v50, 0 }
 0x4dd   :  { %4049 = vmatpush3.bf16.xpose.msra.mxu1 %v1057_v45  ;;  %v784_v46 = vpop.permute.xlu1 %783  ;;  %4033 = vmatmul.mubr.msk.bf16.vlgmr.msra.gmra.mrb[12].mxu0 %vm822_vm5, %v760_v44 }
 0x4de   :  { %4043 = vmatpush3.bf16.xpose.msra.mxu0 %v1011_v47  ;;  %4050 = vmatprep.mubr.msk.bf16.mxu1 %vm5270_vm0, %v5268_v13  ;;  %v793_v49 = vpack.c.bf16 %v784_v46, %v784_v46 }
 0x4df   :  { %4044 = vmatprep.mubr.msk.bf16.mxu0 %vm5270_vm0, %v5268_v13  ;;  %4060 = vmatprep.subr.bf16.mxu1 %v5268_v13 }
 0x4e0   :  { %4054 = vmatprep.subr.bf16.mxu0 %v5268_v13  ;;  %v1149_v53 = vsel %vm822_vm5, %v793_v49, 0 }
 0x4e1   :  { %v756_v56 = vpop.permute.xlu1 %755 }
 0x4e2   :  { %v765_v59 = vpack.c.bf16 %v756_v56, %v756_v56 }
 0x4e4   :  { %4051 = vmatmul.mubr.msk.bf16.vlgmr.msra.gmra.mrb[8].mxu1 %vm822_vm5, %v763_v51  ;;  %v737_v51 = vld [vmem:[#allocation7 + $0x38] sm:$0xff] }
 0x4e5   :  { %4045 = vmatmul.mubr.msk.bf16.vlgmr.msra.gmra.mrb[16].mxu0 %vm822_vm5, %v762_v52  ;;  %4061 = vmatpush3.bf16.xpose.msra.mxu1 %v1149_v53  ;;  %v736_v52 = vld [vmem:[#allocation7 + $0x30] sm:$0xff]  ;;  %vm1206_vm14 = vcmp.eq.f32.partialorder %v737_v51, 0.0 }
 0x4e6   :  { %4055 = vmatpush3.bf16.xpose.msra.mxu0 %v1103_v55  ;;  %4062 = vmatprep.mubr.msk.bf16.mxu1 %vm5270_vm0, %v5268_v13  ;;  %vm1205_vm15 = vcmp.eq.f32.partialorder %v736_v52, 0.0 }
 0x4e7   :  { %4056 = vmatprep.mubr.msk.bf16.mxu0 %vm5270_vm0, %v5268_v13  ;;  %4066 = vmatprep.subr.bf16.mxu0 %v5268_v13 }
 0x4e8   :  { %4072 = vmatprep.subr.bf16.mxu1 %v5268_v13 }
 0x4ec   :  { %4063 = vmatmul.mubr.msk.bf16.vlgmr.msra.gmra.mrb[12].mxu1 %vm822_vm5, %v765_v59 }
 0x4ed   :  { %4057 = vmatmul.mubr.msk.bf16.vlgmr.msra.gmra.mrb[20].mxu0 %vm822_vm5, %v764_v60  ;;  %4074 = vmatprep.mubr.msk.bf16.mxu1 %vm5270_vm0, %v5268_v13 }
 0x4ee   :  { %4067 = vmatpush3.bf16.msra.mxu0 %v1317_v61  ;;  %4068 = vmatprep.mubr.msk.bf16.mxu0 %vm5270_vm0, %v5268_v13 }
 0x4ef   :  { %4078 = vmatprep.subr.bf16.mxu0 %v5268_v13 }
 0x535   :  { %v863_v63 = vpop.f32.mrb[4].mxu0 }
 0x536   :  { %v1191_v0 = vmul.f32 0.17677669, %v863_v63  ;;  %v4022_v2 = vpop.f32.mrb[5].mxu0 }
 0x537   :  { %v866_v4 = vpop.f32.mrb[6].mxu0 }
 0x538   :  { %v4023_v5 = vpop.f32.mrb[7].mxu0  ;;  %v5883_v6 = vsel %vm1199_vm7, -1e+09, %v1191_v0 }
 0x539   :  { %v1216_v7 = vsel %vm1215_vm8, %v5883_v6, -inf }
 0x53a   :  { %1217 = vmax.xlane.f32.xlu0 %v1216_v7 }
 0x5a8   :  { %v909_v9 = vpop.f32.mrb[8].mxu0 }
 0x5a9   :  { %v1192_v10 = vmul.f32 0.17677669, %v909_v9  ;;  %v4028_v11 = vpop.f32.mrb[9].mxu0 }
 0x5aa   :  { %v912_v12 = vpop.f32.mrb[10].mxu0 }
 0x5ab   :  { %v4029_v14 = vpop.f32.mrb[11].mxu0  ;;  %v5887_v15 = vsel %vm1200_vm9, -1e+09, %v1192_v10 }
 0x5ac   :  { %v1219_v16 = vsel %vm1215_vm8, %v5887_v15, -inf }
 0x5ad   :  { %1220 = vmax.xlane.f32.xlu1 %v1219_v16 }
 0x5af   :  { %v1001_v20 = vpop.f32.mrb[4].mxu1 }
 0x5b0   :  { %v1194_v21 = vmul.f32 0.17677669, %v1001_v20  ;;  %v955_v22 = vpop.f32.mrb[12].mxu0  ;;  %v4040_v23 = vpop.f32.mrb[5].mxu1 }
 0x5b1   :  { %v1193_v24 = vmul.f32 0.17677669, %v955_v22  ;;  %v4034_v25 = vpop.f32.mrb[13].mxu0  ;;  %v1004_v26 = vpop.f32.mrb[6].mxu1 }
 0x5b2   :  { %v958_v28 = vpop.f32.mrb[14].mxu0  ;;  %v4041_v29 = vpop.f32.mrb[7].mxu1  ;;  %v1210_v30 = vsel %vm1202_vm10, -1e+09, %v1194_v21  ;;  %vm2730_vm10 = vcmask 130048  }
 0x5b3   :  { %v4035_v31 = vpop.f32.mrb[15].mxu0  ;;  %v1225_v32 = vsel %vm1215_vm8, %v1210_v30, -inf  ;;  %v1209_v33 = vsel %vm1201_vm11, -1e+09, %v1193_v24 }
 0x5b4   :  { %1226 = vmax.xlane.f32.xlu0 %v1225_v32  ;;  %v1222_v37 = vsel %vm1215_vm8, %v1209_v33, -inf }
 0x5b7   :  { %v1093_v36 = vpop.f32.mrb[8].mxu1 }
 0x5b8   :  { %v1196_v38 = vmul.f32 0.17677669, %v1093_v36  ;;  %v4052_v39 = vpop.f32.mrb[9].mxu1  ;;  %1223 = vmax.xlane.f32.xlu0 %v1222_v37  ;;  %v1047_v40 = vpop.f32.mrb[16].mxu0 }
 0x5b9   :  { %v1195_v41 = vmul.f32 0.17677669, %v1047_v40  ;;  %v4046_v42 = vpop.f32.mrb[17].mxu0  ;;  %v1096_v43 = vpop.f32.mrb[10].mxu1 }
 0x5ba   :  { %v1050_v44 = vpop.f32.mrb[18].mxu0  ;;  %v4053_v45 = vpop.f32.mrb[11].mxu1  ;;  %v5893_v46 = vsel %vm1204_vm12, -1e+09, %v1196_v38 }
 0x5bb   :  { %v4047_v47 = vpop.f32.mrb[19].mxu0  ;;  %v1231_v48 = vsel %vm1215_vm8, %v5893_v46, -inf  ;;  %v5897_v49 = vsel %vm1203_vm13, -1e+09, %v1195_v41 }
 0x5bc   :  { %1232 = vmax.xlane.f32.xlu1 %v1231_v48  ;;  %v1228_v50 = vsel %vm1215_vm8, %v5897_v49, -inf }
 0x5bd   :  { %1229 = vmax.xlane.f32.xlu0 %v1228_v50 }
 0x5bf   :  { %v1185_v53 = vpop.f32.mrb[12].mxu1 }
 0x5c0   :  { %v1198_v55 = vmul.f32 0.17677669, %v1185_v53  ;;  %v1139_v56 = vpop.f32.mrb[20].mxu0  ;;  %v4064_v57 = vpop.f32.mrb[13].mxu1 }
 0x5c1   :  { %v1197_v58 = vmul.f32 0.17677669, %v1139_v56  ;;  %v4058_v59 = vpop.f32.mrb[21].mxu0  ;;  %v1188_v60 = vpop.f32.mrb[14].mxu1 }
 0x5c2   :  { %v1142_v61 = vpop.f32.mrb[22].mxu0  ;;  %v4065_v62 = vpop.f32.mrb[15].mxu1  ;;  %v1214_v63 = vsel %vm1206_vm14, -1e+09, %v1198_v55 }
 0x5c3   :  { %v4059_v0 = vpop.f32.mrb[23].mxu0  ;;  %v1237_v2 = vsel %vm1215_vm8, %v1214_v63, -inf  ;;  %v1213_v4 = vsel %vm1205_vm15, -1e+09, %v1197_v58 }
 0x5c4   :  { %1238 = vmax.xlane.f32.xlu1 %v1237_v2  ;;  %v1234_v5 = vsel %vm1215_vm8, %v1213_v4, -inf }
 0x5c5   :  { %1235 = vmax.xlane.f32.xlu0 %v1234_v5 }
 0x5c7   :  { %v1218_v7 = vpop.xlane.xlu0 %1217 }
 0x5c8   :  { %v1240_v8 = vsub.f32 %v5883_v6, %v1218_v7 }
 0x5ca   :  { %v1248_v9 = vmul.f32 1.442695, %v1240_v8 }
 0x5cc   :  { %4528 = vpow2.f32 %v1248_v9 }
 0x5d5   :  { %798 = vrot.lane.b32.xlu1 %v5863_v54, %s5256_s27 }
 0x5d6   :  { %v5908_v10 = vpop.eup %4528 }
 0x5d7   :  { %v1264_v11 = vsel %vm1215_vm8, %v5908_v10, 0.0 }
 0x5db   :  { %795 = vrot.lane.b32.xlu0 %v5863_v54, %s5271_s16 }
 0x5fa   :  { %1265 = vadd.xlane.f32.xlu0 %v1264_v11 }
 0x63a   :  { %v1221_v12 = vpop.xlane.xlu1 %1220 }
 0x63b   :  { %v1241_v14 = vsub.f32 %v5887_v15, %v1221_v12 }
 0x63d   :  { %v1250_v16 = vmul.f32 1.442695, %v1241_v14 }
 0x63f   :  { %4530 = vpow2.f32 %v1250_v16  ;;  %v818_v16 = vpack.c.bf16 %v5821_v17, %v5821_v17 }
 0x641   :  { %v1227_v18 = vpop.xlane.xlu0 %1226 }
 0x642   :  { %v1243_v19 = vsub.f32 %v1210_v30, %v1227_v18 }
 0x644   :  { %v1254_v20 = vmul.f32 1.442695, %v1243_v19 }
 0x645   :  { %v1224_v21 = vpop.xlane.xlu0 %1223 }
 0x646   :  { %4532 = vpow2.f32 %v1254_v20  ;;  %v1242_v22 = vsub.f32 %v1209_v33, %v1224_v21  ;;  %v1501_v20 = vsel %vm1315_vm6, %v818_v16, 0 }
 0x648   :  { %v1252_v6 = vmul.f32 1.442695, %v1242_v22 }
 0x649   :  { %v5913_v23 = vpop.eup %4530  ;;  %v1233_v34 = vpop.xlane.xlu1 %1232 }
 0x64a   :  { %4534 = vpow2.f32 %v1252_v6  ;;  %v1267_v24 = vsel %vm1215_vm8, %v5913_v23, 0.0  ;;  %v1230_v25 = vpop.xlane.xlu0 %1229  ;;  %v1245_v35 = vsub.f32 %v5893_v46, %v1233_v34 }
 0x64b   :  { %1268 = vadd.xlane.f32.xlu1 %v1267_v24  ;;  %v1244_v37 = vsub.f32 %v5897_v49, %v1230_v25 }
 0x64c   :  { %v1258_v38 = vmul.f32 1.442695, %v1245_v35 }
 0x64d   :  { %v1256_v40 = vmul.f32 1.442695, %v1244_v37 }
 0x64e   :  { %4536 = vpow2.f32 %v1258_v38 }
 0x64f   :  { %4538 = vpow2.f32 %v1256_v40 }
 0x650   :  { %v5917_v26 = vpop.eup %4532 }
 0x651   :  { %v1273_v15 = vsel %vm1215_vm8, %v5917_v26, 0.0  ;;  %v1239_v36 = vpop.xlane.xlu1 %1238 }
 0x652   :  { %1274 = vadd.xlane.f32.xlu1 %v1273_v15  ;;  %v1236_v28 = vpop.xlane.xlu0 %1235  ;;  %v1247_v39 = vsub.f32 %v1214_v63, %v1239_v36 }
 0x653   :  { %v1246_v42 = vsub.f32 %v1213_v4, %v1236_v28 }
 0x654   :  { %v5921_v29 = vpop.eup %4534  ;;  %v1262_v41 = vmul.f32 1.442695, %v1247_v39 }
 0x655   :  { %v1270_v30 = vsel %vm1215_vm8, %v5921_v29, 0.0  ;;  %v1260_v43 = vmul.f32 1.442695, %v1246_v42  ;;  %v799_v52 = vpop.permute.xlu1 %798 }
 0x656   :  { %1271 = vadd.xlane.f32.xlu0 %v1270_v30  ;;  %v796_v31 = vpop.permute.xlu0 %795  ;;  %4540 = vpow2.f32 %v1262_v41  ;;  %v816_v55 = vpack.c.bf16 %v799_v52, %v799_v52 }
 0x657   :  { %v815_v32 = vpack.c.bf16 %v796_v31, %v796_v31  ;;  %4542 = vpow2.f32 %v1260_v43 }
 0x658   :  { %v5933_v44 = vpop.eup %4536  ;;  %v1409_v58 = vsel %vm1315_vm6, %v816_v55, 0 }
 0x659   :  { %v1363_v33 = vsel %vm1315_vm6, %v815_v32, 0  ;;  %v5935_v45 = vpop.eup %4538 }
 0x65a   :  { %4073 = vmatpush3.bf16.msra.mxu1 %v1363_v33  ;;  %v1276_v49 = vsel %vm1215_vm8, %v5935_v45, 0.0 }
 0x65b   :  { %4084 = vmatprep.subr.bf16.mxu1 %v5268_v13 }
 0x660   :  { %v5939_v46 = vpop.eup %4540 }
 0x661   :  { %v1285_v48 = vsel %vm1215_vm8, %v5939_v46, 0.0  ;;  %v5945_v50 = vpop.eup %4542 }
 0x662   :  { %v1282_v51 = vsel %vm1215_vm8, %v5945_v50, 0.0 }
 0x663   :  { %805 = vrot.lane.b32.xlu1 %v5821_v17, %s5271_s16 }
 0x66c   :  { %801 = vrot.lane.b32.xlu0 %v5863_v54, %s5272_s29  ;;  %v1279_v54 = vsel %vm1215_vm8, %v5933_v44, 0.0 }
 0x687   :  { %1280 = vadd.xlane.f32.xlu1 %v1279_v54  ;;  %v1266_v47 = vpop.xlane.xlu0 %1265  ;;  %v4433_v54 = vld [vmem:[#allocation13 + $0x8] sm:$0xff]  }
 0x688   :  { %4544 = vrcp.f32 %v1266_v47  ;;  %v4435_v47 = vld [vmem:[#allocation13 + $0x18] sm:$0xff]  }
 0x68b   :  { %1286 = vadd.xlane.f32.xlu1 %v1285_v48  ;;  %1277 = vadd.xlane.f32.xlu0 %v1276_v49 }
 0x68f   :  { %1283 = vadd.xlane.f32.xlu1 %v1282_v51 }
 0x692   :  { %v4545_v53 = vpop.eup %4544 }
 0x693   :  { %v1296_v56 = vmul.f32 %v4545_v53, %v5908_v10 }
 0x695   :  { %v1304_v57 = vpack.c.bf16 %v1296_v56, %v1296_v56 }
 0x697   :  { %4069 = vmatmul.mubr.msk.bf16.vlgmr.msra.gmra.mrb[24].mxu0 %vm1215_vm8, %v1304_v57 }
 0x698   :  { %4079 = vmatpush3.bf16.msra.mxu0 %v1409_v58  ;;  %4080 = vmatprep.mubr.msk.bf16.mxu0 %vm5270_vm0, %v5268_v13 }
 0x699   :  { %4090 = vmatprep.subr.bf16.mxu0 %v5268_v13 }
 0x6a0   :  { %811 = vrot.lane.b32.xlu1 %v5821_v17, %s5272_s29 }
 0x6a1   :  { %808 = vrot.lane.b32.xlu0 %v5821_v17, %s5256_s27 }
 0x6d8   :  { %v1269_v59 = vpop.xlane.xlu1 %1268 }
 0x6d9   :  { %4546 = vrcp.f32 %v1269_v59 }
 0x6df   :  { %v1275_v60 = vpop.xlane.xlu1 %1274 }
 0x6e0   :  { %4548 = vrcp.f32 %v1275_v60 }
 0x6e3   :  { %v4547_v61 = vpop.eup %4546  ;;  %v1272_v62 = vpop.xlane.xlu0 %1271 }
 0x6e4   :  { %v1297_v63 = vmul.f32 %v4547_v61, %v5913_v23  ;;  %4550 = vrcp.f32 %v1272_v62  ;;  %v806_v5 = vpop.permute.xlu1 %805  ;;  %v4436_v61 = vld [vmem:[#allocation13 + $0x20] sm:$0xff]   ;;  %v4437_v62 = vld [vmem:[#allocation13 + $0x28] sm:$0xff]  }
 0x6e5   :  { %v819_v10 = vpack.c.bf16 %v806_v5, %v806_v5 }
 0x6e6   :  { %v1305_v0 = vpack.c.bf16 %v1297_v63, %v1297_v63  ;;  %v4438_v63 = vld [vmem:[#allocation13 + $0x30] sm:$0xff]  }
 0x6e7   :  { %v802_v2 = vpop.permute.xlu0 %801  ;;  %v1547_v18 = vsel %vm1315_vm6, %v819_v10, 0 }
 0x6e8   :  { %v817_v4 = vpack.c.bf16 %v802_v2, %v802_v2  ;;  %4075 = vmatmul.mubr.msk.bf16.vlgmr.msra.gmra.mrb[16].mxu1 %vm1215_vm8, %v1305_v0 }
 0x6e9   :  { %4086 = vmatprep.mubr.msk.bf16.mxu1 %vm5270_vm0, %v5268_v13 }
 0x6ea   :  { %v4549_v7 = vpop.eup %4548  ;;  %v1455_v8 = vsel %vm1315_vm6, %v817_v4, 0 }
 0x6eb   :  { %v1299_v9 = vmul.f32 %v4549_v7, %v5917_v26  ;;  %4085 = vmatpush3.bf16.msra.mxu1 %v1455_v8 }
 0x6ec   :  { %4096 = vmatprep.subr.bf16.mxu1 %v5268_v13 }
 0x6ed   :  { %v1307_v11 = vpack.c.bf16 %v1299_v9, %v1299_v9  ;;  %v4439_v9 = vld [vmem:[#allocation13 + $0x38] sm:$0xff]  }
 0x6ee   :  { %v4551_v12 = vpop.eup %4550 }
 0x6ef   :  { %v1298_v14 = vmul.f32 %v4551_v12, %v5921_v29 }
 0x6f0   :  { %4087 = vmatmul.mubr.msk.bf16.vlgmr.msra.gmra.mrb[20].mxu1 %vm1215_vm8, %v1307_v11 }
 0x6f1   :  { %4097 = vmatpush3.bf16.msra.mxu1 %v1547_v18  ;;  %v1306_v19 = vpack.c.bf16 %v1298_v14, %v1298_v14  ;;  %4098 = vmatprep.mubr.msk.bf16.mxu1 %vm5270_vm0, %v5268_v13 }
 0x6f2   :  { %4108 = vmatprep.subr.bf16.mxu1 %v5268_v13 }
 0x6f3   :  { %4081 = vmatmul.mubr.msk.bf16.vlgmr.msra.gmra.mrb[28].mxu0 %vm1215_vm8, %v1306_v19 }
 0x6f4   :  { %4091 = vmatpush3.bf16.msra.mxu0 %v1501_v20  ;;  %4092 = vmatprep.mubr.msk.bf16.mxu0 %vm5270_vm0, %v5268_v13 }
 0x6f5   :  { %4102 = vmatprep.subr.bf16.mxu0 %v5268_v13 }
 0x714   :  { %v1281_v17 = vpop.xlane.xlu1 %1280 }
 0x715   :  { %4552 = vrcp.f32 %v1281_v17 }
 0x718   :  { %v1287_v21 = vpop.xlane.xlu1 %1286  ;;  %v1278_v22 = vpop.xlane.xlu0 %1277 }
 0x719   :  { %4554 = vrcp.f32 %v1287_v21 }
 0x71a   :  { %4556 = vrcp.f32 %v1278_v22 }
 0x71c   :  { %v1284_v6 = vpop.xlane.xlu1 %1283  ;;  %v809_v15 = vpop.permute.xlu0 %808 }
 0x71d   :  { %4558 = vrcp.f32 %v1284_v6  ;;  %v820_v33 = vpack.c.bf16 %v809_v15, %v809_v15 }
 0x71f   :  { %v4553_v23 = vpop.eup %4552  ;;  %v1593_v37 = vsel %vm1315_vm6, %v820_v33, 0 }
 0x720   :  { %v1301_v24 = vmul.f32 %v4553_v23, %v5933_v44  ;;  %v812_v25 = vpop.permute.xlu1 %811 }
 0x721   :  { %v821_v26 = vpack.c.bf16 %v812_v25, %v812_v25 }
 0x722   :  { %v1309_v28 = vpack.c.bf16 %v1301_v24, %v1301_v24 }
 0x723   :  { %v4555_v29 = vpop.eup %4554  ;;  %v1639_v30 = vsel %vm1315_vm6, %v821_v26, 0 }
 0x724   :  { %v4557_v31 = vpop.eup %4556  ;;  %4099 = vmatmul.mubr.msk.bf16.vlgmr.msra.gmra.mrb[24].mxu1 %vm1215_vm8, %v1309_v28  ;;  %v1303_v34 = vmul.f32 %v4555_v29, %v5939_v46  ;;  %v4434_v46 = vld [vmem:[#allocation13 + $0x10] sm:$0xff]  }
 0x725   :  { %v1300_v32 = vmul.f32 %v4557_v31, %v5935_v45  ;;  %4109 = vmatpush3.bf16.msra.mxu1 %v1639_v30  ;;  %4110 = vmatprep.mubr.msk.bf16.mxu1 %vm5270_vm0, %v5268_v13  ;;  %v4432_v45 = vld [vmem:[#allocation13] sm:$0xff]  }
 0x726   :  { %4134 = vmatprep.subr.bf16.mxu1 %v5268_v13  ;;  %v1311_v38 = vpack.c.bf16 %v1303_v34, %v1303_v34 }
 0x727   :  { %v1308_v35 = vpack.c.bf16 %v1300_v32, %v1300_v32  ;;  %v4559_v36 = vpop.eup %4558 }
 0x728   :  { %v1302_v39 = vmul.f32 %v4559_v36, %v5945_v50 }
 0x729   :  { %4093 = vmatmul.mubr.msk.bf16.vlgmr.msra.gmra.mrb[32].mxu0 %vm1215_vm8, %v1308_v35 }
 0x72a   :  { %4103 = vmatpush3.bf16.msra.mxu0 %v1593_v37  ;;  %4104 = vmatprep.mubr.msk.bf16.mxu0 %vm5270_vm0, %v5268_v13  ;;  %v1310_v40 = vpack.c.bf16 %v1302_v39, %v1302_v39 }
 0x72b   :  { %4114 = vmatprep.subr.bf16.mxu0 %v5268_v13 }
 0x72c   :  { %4111 = vmatmul.mubr.msk.bf16.vlgmr.msra.gmra.mrb[28].mxu1 %vm1215_vm8, %v1311_v38 }
 0x72d   :  { %4150 = vmatprep.mubr.msk.bf16.mxu1 %vm5270_vm0, %v5268_v13 }
 0x731   :  { %4105 = vmatmul.mubr.msk.bf16.vlgmr.msra.gmra.mrb[36].mxu0 %vm1215_vm8, %v1310_v40  ;;  %v3780_v40 = vld [vmem:[#allocation14] ss:$0 sm:$0xff] }
 0x732   :  { %4130 = vmatprep.mubr.msk.bf16.mxu0 %vm5270_vm0, %v5268_v13  ;;  %4115 = vmatpush3.bf16.msra.mxu0 %v4432_v45  ;;  %v4608_v45 = vld [vmem:[#allocation2] sm:$0xff] }
 0x733   :  { %4116 = vmatprep.subr.bf16.mxu0 %v5268_v13 }
 0x736   :  { %4117 = vmatpush3.bf16.msra.mxu0 %v4433_v54 }
 0x737   :  { %4118 = vmatprep.subr.bf16.mxu0 %v5268_v13 }
 0x73a   :  { %4119 = vmatpush3.bf16.msra.mxu0 %v4434_v46 }
 0x73b   :  { %4120 = vmatprep.subr.bf16.mxu0 %v5268_v13 }
 0x73e   :  { %4121 = vmatpush3.bf16.msra.mxu0 %v4435_v47 }
 0x73f   :  { %4122 = vmatprep.subr.bf16.mxu0 %v5268_v13 }
 0x742   :  { %4123 = vmatpush3.bf16.msra.mxu0 %v4436_v61 }
 0x743   :  { %4124 = vmatprep.subr.bf16.mxu0 %v5268_v13 }
 0x746   :  { %4125 = vmatpush3.bf16.msra.mxu0 %v4437_v62 }
 0x747   :  { %4126 = vmatprep.subr.bf16.mxu0 %v5268_v13 }
 0x74a   :  { %4127 = vmatpush3.bf16.msra.mxu0 %v4438_v63 }
 0x74b   :  { %4128 = vmatprep.subr.bf16.mxu0 %v5268_v13 }
 0x74e   :  { %4129 = vmatpush3.bf16.msra.mxu0 %v4439_v9  ;;  %v4458_v9 = vld [vmem:[#allocation22 + $0x54] ss:$8 sps:$4 sm:$0xff]  }
 0x76a   :  { %v5999_v41 = vpop.f32.mrb[24].mxu0 }
 0x76b   :  { %v4070_v42 = vpop.f32.mrb[25].mxu0 }
 0x76c   :  { %v1356_v43 = vpop.f32.mrb[26].mxu0 }
 0x76d   :  { %v4071_v44 = vpop.f32.mrb[27].mxu0 }
 0x7bb   :  { %v1399_v48 = vpop.f32.mrb[16].mxu1 }
 0x7bc   :  { %v4076_v49 = vpop.f32.mrb[17].mxu1 }
 0x7bd   :  { %v1402_v50 = vpop.f32.mrb[18].mxu1 }
 0x7be   :  { %v4077_v51 = vpop.f32.mrb[19].mxu1  ;;  %v4440_v50 = vld [vmem:[#allocation22] ss:$8 sps:$4 sm:$0xff]  }
 0x7bf   :  { %v4442_v51 = vld [vmem:[#allocation22 + $0x4] ss:$8 sps:$4 sm:$0xff]  }
 0x7c0   :  { %2105 = vmatprep.subr.bf16.mxu0 %v4442_v51 }
 0x7c3   :  { %v1491_v52 = vpop.f32.mrb[20].mxu1 }
 0x7c4   :  { %v4088_v53 = vpop.f32.mrb[21].mxu1 }
 0x7c5   :  { %v1494_v55 = vpop.f32.mrb[22].mxu1  ;;  %v4443_v53 = vld [vmem:[#allocation22 + $0x10] ss:$8 sps:$4 sm:$0xff]  }
 0x7c6   :  { %v1445_v56 = vpop.f32.mrb[28].mxu0  ;;  %v4089_v57 = vpop.f32.mrb[23].mxu1  ;;  %v4448_v55 = vld [vmem:[#allocation22 + $0x24] ss:$8 sps:$4 sm:$0xff]  }
 0x7c7   :  { %v4082_v58 = vpop.f32.mrb[29].mxu0 }
 0x7c8   :  { %v1448_v59 = vpop.f32.mrb[30].mxu0 }
 0x7c9   :  { %v4083_v60 = vpop.f32.mrb[31].mxu0 }
 0x7f7   :  { %v1583_v0 = vpop.f32.mrb[24].mxu1 }
 0x7f8   :  { %v4310_v2 = vpack.i.bf16 %v1583_v0, %v1399_v48  ;;  %v4100_v4 = vpop.f32.mrb[25].mxu1  ;;  %v4609_v48 = vld [vmem:[#allocation2 + $0x8] sm:$0xff] }
 0x7f9   :  { %v1586_v5 = vpop.f32.mrb[26].mxu1  ;;  %v4449_v4 = vld [vmem:[#allocation22 + $0x30] ss:$8 sps:$4 sm:$0xff]  }
 0x7fa   :  { %4311 = vrot.lane.b32.xlu0 %v4310_v2, %s5272_s29  ;;  %v4101_v7 = vpop.f32.mrb[27].mxu1  ;;  %v4451_v2 = vld [vmem:[#allocation22 + $0x34] ss:$8 sps:$4 sm:$0xff]   ;;  %v4454_v5 = vld [vmem:[#allocation22 + $0x44] ss:$8 sps:$4 sm:$0xff]  }
 0x7fb   :  { %v4452_v7 = vld [vmem:[#allocation22 + $0x40] ss:$8 sps:$4 sm:$0xff]  }
 0x7fc   :  { %v1537_v8 = vpop.f32.mrb[32].mxu0 }
 0x7fd   :  { %v4094_v10 = vpop.f32.mrb[33].mxu0 }
 0x7fe   :  { %v1540_v11 = vpop.f32.mrb[34].mxu0  ;;  %v4456_v10 = vld [vmem:[#allocation22 + $0x50] ss:$8 sps:$4 sm:$0xff]  }
 0x7ff   :  { %v4095_v12 = vpop.f32.mrb[35].mxu0  ;;  %v1675_v14 = vpop.f32.mrb[28].mxu1  ;;  %v4459_v11 = vld [vmem:[#allocation19 + $0x8] sm:$0xff]  }
 0x800   :  { %v4320_v16 = vpack.i.bf16 %v1675_v14, %v1491_v52  ;;  %v4112_v18 = vpop.f32.mrb[29].mxu1  ;;  %v4445_v52 = vld [vmem:[#allocation22 + $0x14] ss:$8 sps:$4 sm:$0xff]   ;;  %v4462_v12 = vld [vmem:[#allocation22 + $0x64] ss:$8 sps:$4 sm:$0xff]  }
 0x801   :  { %v1678_v19 = vpop.f32.mrb[30].mxu1  ;;  %v4460_v14 = vld [vmem:[#allocation22 + $0x60] ss:$8 sps:$4 sm:$0xff]   ;;  %v4466_v18 = vld [vmem:[#allocation22 + $0x74] ss:$8 sps:$4 sm:$0xff]  }
 0x802   :  { %4321 = vrot.lane.b32.xlu0 %v4320_v16, %s5271_s16  ;;  %v4113_v20 = vpop.f32.mrb[31].mxu1  ;;  %v4463_v16 = vld [vmem:[#allocation19 + $0x10] sm:$0xff]  }
 0x803   :  { %v4464_v19 = vld [vmem:[#allocation22 + $0x70] ss:$8 sps:$4 sm:$0xff]  }
 0x804   :  { %v1629_v17 = vpop.f32.mrb[36].mxu0  ;;  %v4467_v20 = vld [vmem:[#allocation19 + $0x18] sm:$0xff]  }
 0x805   :  { %v4315_v21 = vpack.i.bf16 %v1629_v17, %v1445_v56  ;;  %v4106_v22 = vpop.f32.mrb[37].mxu0  ;;  %v4446_v56 = vld [vmem:[#allocation22 + $0x20] ss:$8 sps:$4 sm:$0xff]   ;;  %v409_v17 = vld [vmem:[#allocation5] sm:$0xff] }
 0x806   :  { %v1632_v6 = vpop.f32.mrb[38].mxu0 }
 0x807   :  { %4316 = vrot.lane.b32.xlu1 %v4315_v21, %s5256_s27  ;;  %v4107_v23 = vpop.f32.mrb[39].mxu0  ;;  %v410_v21 = vld [vmem:[#allocation5 + $0x8] sm:$0xff]  ;;  %v4468_v6 = vld [vmem:[#allocation19 + $0x20] sm:$0xff]  }
 0x808   :  { %v1995_v22 = vpack.c.bf16 %v410_v21, %v409_v17  ;;  %v4469_v23 = vld [vmem:[#allocation19 + $0x28] sm:$0xff]  }
 0x86c   :  { %v4312_v24 = vpop.permute.xlu0 %4311 }
 0x86d   :  { %v4314_v25 = vunpack.i.h.bf16 %v4312_v24  ;;  %v4313_v26 = vunpack.i.l.bf16 %v4312_v24  ;;  %v4470_v24 = vld [vmem:[#allocation19 + $0x30] sm:$0xff]  }
 0x86f   :  { %v1693_v31 = vsel %vm822_vm5, %v5999_v41, %v4313_v26  ;;  %v1710_v32 = vsel %vm822_vm5, %v1537_v8, %v4314_v25  ;;  %v4455_v8 = vld [vmem:[#allocation19] sm:$0xff]   ;;  %v4471_v25 = vld [vmem:[#allocation19 + $0x38] sm:$0xff]  }
 0x870   :  { %4135 = vmatpush3.bf16.msra.mxu1 %v4455_v8  ;;  %v411_v26 = vld [vmem:[#allocation5 + $0x10] sm:$0xff] }
 0x871   :  { %4136 = vmatprep.subr.bf16.mxu1 %v5268_v13 }
 0x874   :  { %v4322_v15 = vpop.permute.xlu0 %4321  ;;  %4137 = vmatpush3.bf16.msra.mxu1 %v4459_v11 }
 0x875   :  { %v4324_v33 = vunpack.i.h.bf16 %v4322_v15  ;;  %v4323_v34 = vunpack.i.l.bf16 %v4322_v15  ;;  %4138 = vmatprep.subr.bf16.mxu1 %v5268_v13  ;;  %v412_v15 = vld [vmem:[#allocation5 + $0x18] sm:$0xff] }
 0x878   :  { %4139 = vmatpush3.bf16.msra.mxu1 %v4463_v16 }
 0x879   :  { %v4317_v28 = vpop.permute.xlu1 %4316  ;;  %4140 = vmatprep.subr.bf16.mxu1 %v5268_v13 }
 0x87a   :  { %v4319_v29 = vunpack.i.h.bf16 %v4317_v28  ;;  %v4318_v30 = vunpack.i.l.bf16 %v4317_v28  ;;  %v1996_v28 = vpack.c.bf16 %v412_v15, %v411_v26 }
 0x87c   :  { %v1711_v35 = vsel %vm1694_vm1, %v1710_v32, %v4319_v29  ;;  %v1695_v36 = vsel %vm1694_vm1, %v1693_v31, %v4318_v30  ;;  %4141 = vmatpush3.bf16.msra.mxu1 %v4467_v20 }
 0x87d   :  { %v1697_v37 = vsel %vm1696_vm2, %v1695_v36, %v4323_v34  ;;  %v1712_v38 = vsel %vm1696_vm2, %v1711_v35, %v4324_v33  ;;  %4142 = vmatprep.subr.bf16.mxu1 %v5268_v13 }
 0x87e   :  { %v1713_v39 = vpack.c.bf16 %v1712_v38, %v1697_v37 }
 0x880   :  { %4131 = vmatmul.mubr.bf16.vlgmr.msra.gmra.mrb[40].mxu0 %v1713_v39  ;;  %4143 = vmatpush3.bf16.msra.mxu1 %v4468_v6 }
 0x881   :  { %2137 = vmatprep.mubr.bf16.mxu0 %v5269_v27  ;;  %2106 = vmatpush1.bf16.msra.mxu0 %v4440_v50 }
 0x882   :  { %2107 = vmatprep.subr.bf16.mxu0 %v4445_v52  ;;  %4144 = vmatprep.subr.bf16.mxu1 %v5268_v13  ;;  %v3790_v52 = vld [vmem:[#allocation29] ss:$0 sm:$0xff] }
 0x884   :  { %4145 = vmatpush3.bf16.msra.mxu1 %v4469_v23 }
 0x885   :  { %2108 = vmatpush1.bf16.msra.mxu0 %v4443_v53  ;;  %4146 = vmatprep.subr.bf16.mxu1 %v5268_v13 }
 0x886   :  { %2109 = vmatprep.subr.bf16.mxu0 %v4448_v55 }
 0x888   :  { %4147 = vmatpush3.bf16.msra.mxu1 %v4470_v24 }
 0x889   :  { %2110 = vmatpush1.bf16.msra.mxu0 %v4446_v56  ;;  %4148 = vmatprep.subr.bf16.mxu1 %v5268_v13 }
 0x88a   :  { %2111 = vmatprep.subr.bf16.mxu0 %v4451_v2 }
 0x88c   :  { %4149 = vmatpush3.bf16.msra.mxu1 %v4471_v25 }
 0x88d   :  { %2112 = vmatpush1.bf16.msra.mxu0 %v4449_v4  ;;  %4154 = vmatprep.subr.bf16.mxu1 %v5268_v13 }
 0x88e   :  { %2113 = vmatprep.subr.bf16.mxu0 %v4454_v5 }
 0x891   :  { %2114 = vmatpush1.bf16.msra.mxu0 %v4452_v7 }
 0x892   :  { %2115 = vmatprep.subr.bf16.mxu0 %v4458_v9 }
 0x895   :  { %2116 = vmatpush1.bf16.msra.mxu0 %v4456_v10 }
 0x896   :  { %2117 = vmatprep.subr.bf16.mxu0 %v4462_v12 }
 0x899   :  { %2118 = vmatpush1.bf16.msra.mxu0 %v4460_v14 }
 0x89a   :  { %2119 = vmatprep.subr.bf16.mxu0 %v4466_v18 }
 0x89d   :  { %2120 = vmatpush1.bf16.msra.mxu0 %v4464_v19 }
 0x89e   :  { %4184 = vmatprep.subr.bf16.mxu0 %v5268_v13 }
 0x8a0   :  { %2138 = vmatmul.mubr.bf16.vlgmr.msra.gmra.mrb[44].mxu0 %v1995_v22 }
 0x8a1   :  { %2147 = vmatprep.mubr.bf16.mxu0 %v5269_v27 }
 0x8a8   :  { %2148 = vmatmul.mubr.bf16.gmra.mrb[48].mxu0 %v1996_v28 }
 0x8a9   :  { %4186 = vmatprep.mubr.msk.bf16.mxu0 %vm5270_vm0, %v5268_v13 }
 0x953   :  { %v1819_v42 = vpop.f32.mrb[40].mxu0 }
 0x954   :  { %v1820_v43 = vadd.f32 %v3780_v40, %v1819_v42  ;;  %v4132_v41 = vpop.f32.mrb[41].mxu0 }
 0x955   :  { %v1822_v44 = vpop.f32.mrb[42].mxu0 }
 0x956   :  { %v6019_v54 = vadd.f32 %v4608_v45, %v1820_v43  ;;  %v1823_v46 = vadd.f32 %v3780_v40, %v1822_v44  ;;  %v4133_v47 = vpop.f32.mrb[43].mxu0  ;;  %v3789_v45 = vld [vmem:[#allocation28] ss:$0 sm:$0xff] }
 0x958   :  { %v6021_v49 = vadd.f32 %v4609_v48, %v1823_v46  ;;  %1828 = vadd.xlane.f32.xlu1 %v6019_v54 }
 0x95a   :  { %1830 = vadd.xlane.f32.xlu0 %v6021_v49 }
 0x9e5   :  { %v1829_v57 = vpop.xlane.xlu1 %1828 }
 0x9e6   :  { %v1832_v58 = vmul.f32 0.0078125, %v1829_v57 }
 0x9e7   :  { %v1831_v59 = vpop.xlane.xlu0 %1830 }
 0x9e8   :  { %v6026_v60 = vsub.f32 %v6019_v54, %v1832_v58  ;;  %v1833_v61 = vmul.f32 0.0078125, %v1831_v59  ;;  %v2013_v58 = vld [vmem:[#allocation23] sm:$0x3] }
 0x9e9   :  { %v2018_v59 = vrot.slane %v2013_v58, %v5810_v1 }
 0x9ea   :  { %v6029_v62 = vsub.f32 %v6021_v49, %v1833_v61  ;;  %v1836_v63 = vmul.f32 %v6026_v60, %v6026_v60  ;;  %v1869_v47 = vmul.f32 %v3789_v45, %v6026_v60  ;;  %v2139_v61 = vpop.f32.mrb[44].mxu0 }
 0x9eb   :  { %v2140_v60 = vadd.f32 %v2139_v61, %v2018_v59 }
 0x9ec   :  { %1838 = vadd.xlane.f32.xlu0 %v1836_v63  ;;  %v1837_v0 = vmul.f32 %v6029_v62, %v6029_v62  ;;  %v1870_v48 = vmul.f32 %v3789_v45, %v6029_v62  ;;  %v2022_v63 = vrot.slane %v2013_v58, %v5812_v3 }
 0x9f0   :  { %1840 = vadd.xlane.f32.xlu0 %v1837_v0  ;;  %v2141_v0 = vpop.f32.mrb[45].mxu0 }
 0x9f1   :  { %v2143_v62 = vpop.f32.mrb[46].mxu0  ;;  %v6053_v5 = vadd.f32 %v2141_v0, %v2022_v63 }
 0x9f2   :  { %v2144_v2 = vadd.f32 %v2143_v62, %v2018_v59  ;;  %v2145_v4 = vpop.f32.mrb[47].mxu0 }
 0x9f3   :  { %v6055_v7 = vadd.f32 %v2145_v4, %v2022_v63  ;;  %v2149_v14 = vpop.f32.mrb[48].mxu0 }
 0x9f4   :  { %v4325_v8 = vpack.i.bf16 %v2144_v2, %v2140_v60  ;;  %v2234_v9 = vpack.c.bf16 %v2144_v2, %v2140_v60  ;;  %v6067_v16 = vadd.f32 %v2149_v14, %v2018_v59  ;;  %v2151_v18 = vpop.f32.mrb[49].mxu0 }
 0x9f5   :  { %v2282_v11 = vpack.c.bf16 %v6055_v7, %v6053_v5  ;;  %v6064_v12 = vpack.i.bf16 %v6055_v7, %v6053_v5  ;;  %v2153_v19 = vpop.f32.mrb[50].mxu0  ;;  %v6069_v20 = vadd.f32 %v2151_v18, %v2022_v63 }
 0x9f6   :  { %4326 = vrot.lane.b32.xlu1 %v4325_v8, %s5271_s16  ;;  %v2294_v10 = vsel %vm822_vm5, %v2234_v9, 0  ;;  %v6071_v17 = vadd.f32 %v2153_v19, %v2018_v59  ;;  %v2155_v21 = vpop.f32.mrb[51].mxu0 }
 0x9f7   :  { %v6073_v22 = vadd.f32 %v2155_v21, %v2022_v63 }
 0x9f8   :  { %v4345_v6 = vpack.i.bf16 %v6071_v17, %v6067_v16  ;;  %v2238_v23 = vpack.c.bf16 %v6071_v17, %v6067_v16 }
 0x9f9   :  { %v6081_v24 = vpack.i.bf16 %v6073_v22, %v6069_v20  ;;  %v2286_v25 = vpack.c.bf16 %v6073_v22, %v6069_v20 }
 0x9fa   :  { %4331 = vrot.lane.b32.xlu1 %v4325_v8, %s5256_s27  ;;  %v2478_v18 = vsel %vm822_vm5, %v2238_v23, 0 }
 0xa68   :  { %v4327_v26 = vpop.permute.xlu1 %4326 }
 0xa69   :  { %v4329_v15 = vunpack.i.h.bf16 %v4327_v26  ;;  %v4328_v28 = vunpack.i.l.bf16 %v4327_v26 }
 0xa79   :  { %v1839_v29 = vpop.xlane.xlu0 %1838 }
 0xa7a   :  { %v1842_v30 = vmul.f32 0.007874016, %v1839_v29  ;;  %v3791_v29 = vld [vmem:[#allocation20] ss:$0 sm:$0xff] }
 0xa7c   :  { %4560 = vrsqrt.f32 %v1842_v30  ;;  %vm1846_vm3 = vcmp.eq.f32.partialorder %v1842_v30, inf  ;;  %v1849_v35 = vand.u32 2147483648, %v1842_v30  ;;  %vm1848_vm4 = vcmp.eq.f32.partialorder %v1842_v30, 0.0 }
 0xa7d   :  { %v1841_v31 = vpop.xlane.xlu0 %1840 }
 0xa7e   :  { %v1843_v32 = vmul.f32 0.007874016, %v1841_v31 }
 0xa80   :  { %4562 = vrsqrt.f32 %v1843_v32  ;;  %vm1853_vm6 = vcmp.eq.f32.partialorder %v1843_v32, inf  ;;  %v1856_v42 = vand.u32 2147483648, %v1843_v32  ;;  %vm1855_vm7 = vcmp.eq.f32.partialorder %v1843_v32, 0.0 }
 0xa86   :  { %v4561_v33 = vpop.eup %4560 }
 0xa87   :  { %v1845_v34 = vmul.f32 %v4561_v33, %v1842_v30 }
 0xa89   :  { %v1847_v36 = vsel %vm1846_vm3, %v1842_v30, %v1845_v34  ;;  %v2235_v30 = vpack.c.bf16 %v4329_v15, %v4328_v28  ;;  %v2158_v28 = vld [vmem:[#allocation8] sm:$0x1] }
 0xa8a   :  { %v4563_v37 = vpop.eup %4562  ;;  %v1850_v38 = vsel %vm1848_vm4, %v1849_v35, %v1847_v36  ;;  %vm2666_vm8 = vcmp.eq.f32.partialorder %v2158_v28, 0.0 }
 0xa8b   :  { %v1858_v39 = vadd.f32 1e-06, %v1850_v38  ;;  %v1852_v40 = vmul.f32 %v4563_v37, %v1843_v32  ;;  %v2340_v37 = vsel %vm822_vm5, %v2235_v30, 0 }
 0xa8d   :  { %4564 = vrcp.f32 %v1858_v39  ;;  %v1854_v43 = vsel %vm1853_vm6, %v1843_v32, %v1852_v40  ;;  %v4332_v39 = vpop.permute.xlu1 %4331 }
 0xa8e   :  { %v1857_v41 = vsel %vm1855_vm7, %v1856_v42, %v1854_v43  ;;  %v4334_v40 = vunpack.i.h.bf16 %v4332_v39  ;;  %v4333_v42 = vunpack.i.l.bf16 %v4332_v39 }
 0xa8f   :  { %v1859_v44 = vadd.f32 1e-06, %v1857_v41 }
 0xa90   :  { %v2236_v43 = vpack.c.bf16 %v4334_v40, %v4333_v42 }
 0xa91   :  { %4566 = vrcp.f32 %v1859_v44 }
 0xa97   :  { %v4565_v46 = vpop.eup %4564 }
 0xa98   :  { %v1871_v50 = vmul.f32 %v4565_v46, %v1869_v47  ;;  %v2386_v46 = vsel %vm822_vm5, %v2236_v43, 0 }
 0xa9a   :  { %v1880_v55 = vadd.f32 %v3790_v52, %v1871_v50 }
 0xa9b   :  { %v4567_v51 = vpop.eup %4566 }
 0xa9c   :  { %v1872_v53 = vmul.f32 %v4567_v51, %v1870_v48 }
 0xa9e   :  { %v1881_v56 = vadd.f32 %v3790_v52, %v1872_v53 }
 0xaa0   :  { %v1882_v57 = vpack.c.bf16 %v1881_v56, %v1880_v55 }
 0xaa2   :  { %4151 = vmatmul.mubr.bf16.vlgmr.msra.gmra.mrb[32].mxu1 %v1882_v57 }
 0xaa3   :  { %4156 = vmatprep.mubr.msk.bf16.mxu1 %vm5270_vm0, %v5268_v13  ;;  %4155 = vmatpush3.bf16.xpose.msra.mxu1 %v2294_v10 }
 0xaa4   :  { %4160 = vmatprep.subr.bf16.mxu1 %v5268_v13 }
 0xb75   :  { %v1988_v31 = vpop.f32.mrb[32].mxu1 }
 0xb76   :  { %v1989_v32 = vadd.f32 %v3791_v29, %v1988_v31  ;;  %v4152_v33 = vpop.f32.mrb[33].mxu1 }
 0xb77   :  { %v1991_v34 = vpop.f32.mrb[34].mxu1 }
 0xb78   :  { %v2186_v35 = vpack.c.bf16 %v1989_v32, %v1989_v32  ;;  %2167 = vrot.lane.b32.xlu0 %v1989_v32, %s5271_s16  ;;  %v4153_v36 = vpop.f32.mrb[35].mxu1  ;;  %2170 = vrot.lane.b32.xlu1 %v1989_v32, %s5256_s27  ;;  %v1992_v38 = vadd.f32 %v3791_v29, %v1991_v34  ;;  %v2674_v29 = vsel %vm2666_vm8, 1, %v5269_v27 }
 0xb79   :  { %v2685_v30 = vrot.slane %v2674_v29, %v5810_v1 }
 0xb7a   :  { %4157 = vmatmul.mubr.msk.bf16.vlgmr.msra.gmra.mrb[36].mxu1 %vm822_vm5, %v2186_v35  ;;  %v2190_v17 = vpack.c.bf16 %v1992_v38, %v1992_v38 }
 0xb7b   :  { %4161 = vmatpush3.bf16.xpose.msra.mxu1 %v2340_v37  ;;  %4162 = vmatprep.mubr.msk.bf16.mxu1 %vm5270_vm0, %v5268_v13  ;;  %vm2714_vm9 = vcmp.eq.s32.totalorder %v2685_v30, 1  ;;  %v2160_v37 = vld [vmem:[#allocation8 + $0x2] sm:$0x1] }
 0xb7c   :  { %2173 = vrot.lane.b32.xlu0 %v1989_v32, %s5272_s29  ;;  %4336 = vrot.lane.b32.xlu1 %v4325_v8, %s5272_s29  ;;  %vm2668_vm12 = vcmp.eq.f32.partialorder %v2160_v37, 0.0 }
 0xb7d   :  { %4166 = vmatprep.subr.bf16.mxu1 %v5268_v13  ;;  %v2676_v43 = vsel %vm2668_vm12, 1, %v5269_v27 }
 0xb80   :  { %4346 = vrot.lane.b32.xlu0 %v4345_v6, %s5256_s27  ;;  %4341 = vrot.lane.b32.xlu1 %v4345_v6, %s5271_s16 }
 0xb84   :  { %4351 = vrot.lane.b32.xlu0 %v4345_v6, %s5272_s29  ;;  %2177 = vrot.lane.b32.xlu1 %v1992_v38, %s5271_s16 }
 0xb88   :  { %2183 = vrot.lane.b32.xlu0 %v1992_v38, %s5272_s29  ;;  %2180 = vrot.lane.b32.xlu1 %v1992_v38, %s5256_s27 }
 0xbea   :  { %v2168_v41 = vpop.permute.xlu0 %2167  ;;  %v2171_v44 = vpop.permute.xlu1 %2170 }
 0xbeb   :  { %v2187_v45 = vpack.c.bf16 %v2168_v41, %v2168_v41  ;;  %v2188_v56 = vpack.c.bf16 %v2171_v44, %v2171_v44 }
 0xbed   :  { %4163 = vmatmul.mubr.msk.bf16.vlgmr.msra.gmra.mrb[40].mxu1 %vm822_vm5, %v2187_v45 }
 0xbee   :  { %4167 = vmatpush3.bf16.xpose.msra.mxu1 %v2386_v46  ;;  %v2174_v47 = vpop.permute.xlu0 %2173  ;;  %v4337_v48 = vpop.permute.xlu1 %4336  ;;  %4168 = vmatprep.mubr.msk.bf16.mxu1 %vm5270_vm0, %v5268_v13  ;;  %v2161_v46 = vld [vmem:[#allocation8 + $0x3] sm:$0x1] }
 0xbef   :  { %v4339_v50 = vunpack.i.h.bf16 %v4337_v48  ;;  %v4338_v51 = vunpack.i.l.bf16 %v4337_v48  ;;  %4172 = vmatprep.subr.bf16.mxu1 %v5268_v13  ;;  %v2189_v4 = vpack.c.bf16 %v2174_v47, %v2174_v47  ;;  %v2693_v48 = vrot.slane %v2676_v43, %v5810_v1 }
 0xbf0   :  { %vm2669_vm14 = vcmp.eq.f32.partialorder %v2161_v46, 0.0 }
 0xbf1   :  { %v2237_v52 = vpack.c.bf16 %v4339_v50, %v4338_v51  ;;  %v2163_v50 = vld [vmem:[#allocation8 + $0x5] sm:$0x1]  ;;  %vm2716_vm15 = vcmp.eq.s32.totalorder %v2693_v48, 1 }
 0xbf2   :  { %v4347_v53 = vpop.permute.xlu0 %4346  ;;  %v4342_v55 = vpop.permute.xlu1 %4341  ;;  %vm2671_vm3 = vcmp.eq.f32.partialorder %v2163_v50, 0.0 }
 0xbf3   :  { %v4344_v57 = vunpack.i.h.bf16 %v4342_v55  ;;  %v4343_v58 = vunpack.i.l.bf16 %v4342_v55  ;;  %v2432_v59 = vsel %vm822_vm5, %v2237_v52, 0  ;;  %v4349_v9 = vunpack.i.h.bf16 %v4347_v53 }
 0xbf4   :  { %v4348_v10 = vunpack.i.l.bf16 %v4347_v53  ;;  %v2677_v55 = vsel %vm2669_vm14, 1, %v5269_v27 }
 0xbf5   :  { %v2239_v61 = vpack.c.bf16 %v4344_v57, %v4343_v58  ;;  %4169 = vmatmul.mubr.msk.bf16.vlgmr.msra.gmra.mrb[44].mxu1 %vm822_vm5, %v2188_v56 }
 0xbf6   :  { %4173 = vmatpush3.bf16.xpose.msra.mxu1 %v2432_v59  ;;  %v4352_v63 = vpop.permute.xlu0 %4351  ;;  %4174 = vmatprep.mubr.msk.bf16.mxu1 %vm5270_vm0, %v5268_v13  ;;  %v2178_v2 = vpop.permute.xlu1 %2177  ;;  %v2240_v21 = vpack.c.bf16 %v4349_v9, %v4348_v10  ;;  %v2679_v59 = vsel %vm2671_vm3, 1, %v5269_v27 }
 0xbf7   :  { %v4354_v60 = vunpack.i.h.bf16 %v4352_v63  ;;  %v4353_v0 = vunpack.i.l.bf16 %v4352_v63  ;;  %v2524_v62 = vsel %vm822_vm5, %v2239_v61, 0  ;;  %4178 = vmatprep.subr.bf16.mxu1 %v5268_v13  ;;  %v2191_v14 = vpack.c.bf16 %v2178_v2, %v2178_v2  ;;  %v2162_v61 = vld [vmem:[#allocation8 + $0x4] sm:$0x1] }
 0xbf8   :  { %4185 = vmatpush3.bf16.xpose.msra.mxu0 %v2524_v62  ;;  %v2570_v23 = vsel %vm822_vm5, %v2240_v21, 0  ;;  %v2705_v62 = vrot.slane %v2679_v59, %v5810_v1  ;;  %vm2670_vm4 = vcmp.eq.f32.partialorder %v2162_v61, 0.0 }
 0xbf9   :  { %4196 = vmatprep.subr.bf16.mxu0 %v5268_v13  ;;  %v2241_v8 = vpack.c.bf16 %v4354_v60, %v4353_v0  ;;  %v2697_v60 = vrot.slane %v2677_v55, %v5810_v1  ;;  %v2165_v0 = vld [vmem:[#allocation8 + $0x7] sm:$0x1]  ;;  %v2678_v9 = vsel %vm2670_vm4, 1, %v5269_v27 }
 0xbfa   :  { %v2184_v16 = vpop.permute.xlu0 %2183  ;;  %v2181_v26 = vpop.permute.xlu1 %2180  ;;  %vm2673_vm6 = vcmp.eq.f32.partialorder %v2165_v0, 0.0  ;;  %vm2719_vm8 = vcmp.eq.s32.totalorder %v2705_v62, 1 }
 0xbfb   :  { %v2616_v19 = vsel %vm822_vm5, %v2241_v8, 0  ;;  %v2193_v6 = vpack.c.bf16 %v2184_v16, %v2184_v16  ;;  %v2192_v15 = vpack.c.bf16 %v2181_v26, %v2181_v26  ;;  %vm2717_vm7 = vcmp.eq.s32.totalorder %v2697_v60, 1 }
 0xbfd   :  { %4175 = vmatmul.mubr.msk.bf16.vlgmr.msra.gmra.mrb[48].mxu1 %vm822_vm5, %v2189_v4 }
 0xbfe   :  { %4179 = vmatpush3.bf16.xpose.msra.mxu1 %v2478_v18  ;;  %4180 = vmatprep.mubr.msk.bf16.mxu1 %vm5270_vm0, %v5268_v13  ;;  %v2681_v18 = vsel %vm2673_vm6, 1, %v5269_v27 }
 0xbff   :  { %4187 = vmatmul.mubr.msk.bf16.vlgmr.msra.gmra.mrb[52].mxu0 %vm822_vm5, %v2191_v14  ;;  %4190 = vmatprep.subr.bf16.mxu1 %v5268_v13  ;;  %v2713_v30 = vrot.slane %v2681_v18, %v5810_v1 }
 0xc00   :  { %4197 = vmatpush3.bf16.xpose.msra.mxu0 %v2616_v19  ;;  %4198 = vmatprep.mubr.msk.bf16.mxu0 %vm5270_vm0, %v5268_v13  ;;  %v2164_v19 = vld [vmem:[#allocation8 + $0x6] sm:$0x1] }
 0xc01   :  { %4208 = vmatprep.subr.bf16.mxu0 %v5268_v13  ;;  %vm2721_vm12 = vcmp.eq.s32.totalorder %v2713_v30, 1 }
 0xc05   :  { %4181 = vmatmul.mubr.msk.bf16.vlgmr.msra.gmra.mrb[52].mxu1 %vm822_vm5, %v2190_v17 }
 0xc06   :  { %4191 = vmatpush3.bf16.xpose.msra.mxu1 %v2570_v23  ;;  %4192 = vmatprep.mubr.msk.bf16.mxu1 %vm5270_vm0, %v5268_v13 }
 0xc07   :  { %4199 = vmatmul.mubr.msk.bf16.vlgmr.msra.gmra.mrb[56].mxu0 %vm822_vm5, %v2193_v6  ;;  %4202 = vmatprep.subr.bf16.mxu1 %v5268_v13 }
 0xc08   :  { %4210 = vmatprep.mubr.msk.bf16.mxu0 %vm5270_vm0, %v5268_v13 }
 0xc0d   :  { %4193 = vmatmul.mubr.msk.bf16.vlgmr.msra.gmra.mrb[56].mxu1 %vm822_vm5, %v2192_v15  ;;  %v2701_v15 = vrot.slane %v2678_v9, %v5810_v1 }
 0xc0e   :  { %4203 = vmatpush3.bf16.msra.mxu1 %v2282_v11  ;;  %4204 = vmatprep.mubr.msk.bf16.mxu1 %vm5270_vm0, %v5268_v13  ;;  %v2159_v11 = vld [vmem:[#allocation8 + $0x1] sm:$0x1] }
 0xc0f   :  { %4214 = vmatprep.subr.bf16.mxu1 %v5268_v13  ;;  %vm2667_vm11 = vcmp.eq.f32.partialorder %v2159_v11, 0.0 }
 0xc10   :  { %v2675_v36 = vsel %vm2667_vm11, 1, %v5269_v27  ;;  %vm2718_vm11 = vcmp.eq.s32.totalorder %v2701_v15, 1 }
 0xc11   :  { %v2689_v38 = vrot.slane %v2675_v36, %v5810_v1 }
 0xc13   :  { %vm2715_vm13 = vcmp.eq.s32.totalorder %v2689_v38, 1 }
 0xc4d   :  { %v2330_v31 = vpop.f32.mrb[36].mxu1 }
 0xc4e   :  { %v2658_v32 = vmul.f32 0.17677669, %v2330_v31  ;;  %v4158_v33 = vpop.f32.mrb[37].mxu1 }
 0xc4f   :  { %v2333_v34 = vpop.f32.mrb[38].mxu1 }
 0xc50   :  { %v4159_v35 = vpop.f32.mrb[39].mxu1  ;;  %v6142_v5 = vsel %vm2714_vm9, -1e+09, %v2658_v32  ;;  %vm2672_vm9 = vcmp.eq.f32.partialorder %v2164_v19, 0.0 }
 0xc51   :  { %v2731_v7 = vsel %vm2730_vm10, %v6142_v5, -inf  ;;  %v2680_v35 = vsel %vm2672_vm9, 1, %v5269_v27 }
 0xc52   :  { %2732 = vmax.xlane.f32.xlu1 %v2731_v7  ;;  %v2709_v43 = vrot.slane %v2680_v35, %v5810_v1 }
 0xcc0   :  { %v2376_v39 = vpop.f32.mrb[40].mxu1 }
 0xcc1   :  { %v2659_v40 = vmul.f32 0.17677669, %v2376_v39  ;;  %v4164_v42 = vpop.f32.mrb[41].mxu1 }
 0xcc2   :  { %v2379_v41 = vpop.f32.mrb[42].mxu1 }
 0xcc3   :  { %v4165_v44 = vpop.f32.mrb[43].mxu1  ;;  %v6149_v45 = vsel %vm2715_vm13, -1e+09, %v2659_v40  ;;  %vm2720_vm13 = vcmp.eq.s32.totalorder %v2709_v43, 1 }
 0xcc4   :  { %v2734_v47 = vsel %vm2730_vm10, %v6149_v45, -inf }
 0xcc5   :  { %2735 = vmax.xlane.f32.xlu0 %v2734_v47 }
 0xcc8   :  { %v2422_v51 = vpop.f32.mrb[44].mxu1 }
 0xcc9   :  { %v2660_v52 = vmul.f32 0.17677669, %v2422_v51  ;;  %v4170_v53 = vpop.f32.mrb[45].mxu1 }
 0xcca   :  { %v2425_v56 = vpop.f32.mrb[46].mxu1 }
 0xccb   :  { %v4171_v57 = vpop.f32.mrb[47].mxu1  ;;  %v6155_v58 = vsel %vm2716_vm15, -1e+09, %v2660_v52 }
 0xccc   :  { %v2737_v63 = vsel %vm2730_vm10, %v6155_v58, -inf }
 0xccd   :  { %2738 = vmax.xlane.f32.xlu0 %v2737_v63 }
 0xcd0   :  { %v2468_v2 = vpop.f32.mrb[48].mxu1 }
 0xcd1   :  { %v2661_v4 = vmul.f32 0.17677669, %v2468_v2  ;;  %v4176_v8 = vpop.f32.mrb[49].mxu1 }
 0xcd2   :  { %v2471_v10 = vpop.f32.mrb[50].mxu1  ;;  %v2560_v14 = vpop.f32.mrb[52].mxu0 }
 0xcd3   :  { %v2663_v21 = vmul.f32 0.17677669, %v2560_v14  ;;  %v4177_v16 = vpop.f32.mrb[51].mxu1  ;;  %v4188_v17 = vpop.f32.mrb[53].mxu0  ;;  %v6164_v6 = vsel %vm2717_vm7, -1e+09, %v2661_v4 }
 0xcd4   :  { %v2563_v23 = vpop.f32.mrb[54].mxu0  ;;  %v2740_v26 = vsel %vm2730_vm10, %v6164_v6, -inf }
 0xcd5   :  { %v4189_v28 = vpop.f32.mrb[55].mxu0  ;;  %2741 = vmax.xlane.f32.xlu0 %v2740_v26  ;;  %v2727_v29 = vsel %vm2719_vm8, -1e+09, %v2663_v21 }
 0xcd6   :  { %v2746_v32 = vsel %vm2730_vm10, %v2727_v29, -inf }
 0xcd8   :  { %v2514_v31 = vpop.f32.mrb[52].mxu1 }
 0xcd9   :  { %v2662_v33 = vmul.f32 0.17677669, %v2514_v31  ;;  %2747 = vmax.xlane.f32.xlu0 %v2746_v32  ;;  %v4182_v34 = vpop.f32.mrb[53].mxu1 }
 0xcda   :  { %v2517_v7 = vpop.f32.mrb[54].mxu1  ;;  %v2652_v11 = vpop.f32.mrb[56].mxu0 }
 0xcdb   :  { %v2665_v36 = vmul.f32 0.17677669, %v2652_v11  ;;  %v4183_v37 = vpop.f32.mrb[55].mxu1  ;;  %v4200_v38 = vpop.f32.mrb[57].mxu0  ;;  %v6172_v39 = vsel %vm2718_vm11, -1e+09, %v2662_v33 }
 0xcdc   :  { %v2655_v40 = vpop.f32.mrb[58].mxu0  ;;  %v2743_v42 = vsel %vm2730_vm10, %v6172_v39, -inf }
 0xcdd   :  { %v4201_v41 = vpop.f32.mrb[59].mxu0  ;;  %2744 = vmax.xlane.f32.xlu1 %v2743_v42  ;;  %v2729_v44 = vsel %vm2721_vm12, -1e+09, %v2665_v36 }
 0xcde   :  { %v2752_v46 = vsel %vm2730_vm10, %v2729_v44, -inf }
 0xcdf   :  { %v2733_v47 = vpop.xlane.xlu1 %2732  ;;  %2753 = vmax.xlane.f32.xlu0 %v2752_v46 }
 0xce0   :  { %v2755_v48 = vsub.f32 %v6142_v5, %v2733_v47  ;;  %v2606_v50 = vpop.f32.mrb[56].mxu1 }
 0xce1   :  { %v2664_v51 = vmul.f32 0.17677669, %v2606_v50  ;;  %v4194_v52 = vpop.f32.mrb[57].mxu1 }
 0xce2   :  { %v2763_v53 = vmul.f32 1.442695, %v2755_v48  ;;  %v2609_v55 = vpop.f32.mrb[58].mxu1 }
 0xce3   :  { %v4195_v56 = vpop.f32.mrb[59].mxu1  ;;  %v2728_v57 = vsel %vm2720_vm13, -1e+09, %v2664_v51 }
 0xce4   :  { %4568 = vpow2.f32 %v2763_v53  ;;  %v2749_v59 = vsel %vm2730_vm10, %v2728_v57, -inf }
 0xce5   :  { %2750 = vmax.xlane.f32.xlu1 %v2749_v59 }
 0xcee   :  { %v4569_v61 = vpop.eup %4568 }
 0xcef   :  { %v2779_v63 = vsel %vm2730_vm10, %v4569_v61, 0.0 }
 0xcf0   :  { %2780 = vadd.xlane.f32.xlu1 %v2779_v63 }
 0xd52   :  { %v2736_v60 = vpop.xlane.xlu0 %2735 }
 0xd53   :  { %v2756_v0 = vsub.f32 %v6149_v45, %v2736_v60 }
 0xd55   :  { %v2765_v5 = vmul.f32 1.442695, %v2756_v0 }
 0xd57   :  { %4570 = vpow2.f32 %v2765_v5 }
 0xd5a   :  { %v2739_v62 = vpop.xlane.xlu0 %2738 }
 0xd5b   :  { %v2757_v2 = vsub.f32 %v6155_v58, %v2739_v62 }
 0xd5d   :  { %v2767_v4 = vmul.f32 1.442695, %v2757_v2 }
 0xd5f   :  { %4572 = vpow2.f32 %v2767_v4 }
 0xd61   :  { %v6183_v8 = vpop.eup %4570 }
 0xd62   :  { %v2742_v9 = vpop.xlane.xlu0 %2741  ;;  %v2782_v10 = vsel %vm2730_vm10, %v6183_v8, 0.0 }
 0xd63   :  { %2783 = vadd.xlane.f32.xlu0 %v2782_v10  ;;  %v2758_v14 = vsub.f32 %v6164_v6, %v2742_v9 }
 0xd65   :  { %v2769_v45 = vmul.f32 1.442695, %v2758_v14 }
 0xd66   :  { %v2748_v18 = vpop.xlane.xlu0 %2747 }
 0xd67   :  { %v2760_v19 = vsub.f32 %v2727_v29, %v2748_v18 }
 0xd69   :  { %v6188_v21 = vpop.eup %4572  ;;  %v2773_v16 = vmul.f32 1.442695, %v2760_v19 }
 0xd6a   :  { %v2785_v58 = vsel %vm2730_vm10, %v6188_v21, 0.0  ;;  %v2745_v28 = vpop.xlane.xlu1 %2744 }
 0xd6b   :  { %4574 = vpow2.f32 %v2773_v16  ;;  %2786 = vadd.xlane.f32.xlu1 %v2785_v58  ;;  %v2759_v36 = vsub.f32 %v6172_v39, %v2745_v28 }
 0xd6c   :  { %v2754_v17 = vpop.xlane.xlu0 %2753  ;;  %4576 = vpow2.f32 %v2769_v45 }
 0xd6d   :  { %v2762_v23 = vsub.f32 %v2729_v44, %v2754_v17  ;;  %v2771_v37 = vmul.f32 1.442695, %v2759_v36 }
 0xd6f   :  { %v2777_v26 = vmul.f32 1.442695, %v2762_v23 }
 0xd71   :  { %4578 = vpow2.f32 %v2777_v26 }
 0xd72   :  { %v2751_v30 = vpop.xlane.xlu1 %2750 }
 0xd73   :  { %v2761_v38 = vsub.f32 %v2728_v57, %v2751_v30 }
 0xd75   :  { %v6192_v15 = vpop.eup %4574  ;;  %v2775_v40 = vmul.f32 1.442695, %v2761_v38 }
 0xd76   :  { %v2794_v6 = vsel %vm2730_vm10, %v6192_v15, 0.0  ;;  %v6196_v29 = vpop.eup %4576 }
 0xd77   :  { %2795 = vadd.xlane.f32.xlu0 %v2794_v6  ;;  %v2788_v31 = vsel %vm2730_vm10, %v6196_v29, 0.0 }
 0xd7b   :  { %v6200_v32 = vpop.eup %4578  ;;  %2789 = vadd.xlane.f32.xlu0 %v2788_v31 }
 0xd7c   :  { %v2800_v33 = vsel %vm2730_vm10, %v6200_v32, 0.0 }
 0xd7d   :  { %2801 = vadd.xlane.f32.xlu1 %v2800_v33  ;;  %v2781_v34 = vpop.xlane.xlu1 %2780 }
 0xd7e   :  { %4580 = vrcp.f32 %v2781_v34 }
 0xd7f   :  { %4582 = vpow2.f32 %v2771_v37 }
 0xd80   :  { %4584 = vpow2.f32 %v2775_v40 }
 0xd88   :  { %v4581_v35 = vpop.eup %4580 }
 0xd89   :  { %v2811_v7 = vmul.f32 %v4581_v35, %v4569_v61  ;;  %v6218_v42 = vpop.eup %4582 }
 0xd8a   :  { %v2791_v43 = vsel %vm2730_vm10, %v6218_v42, 0.0  ;;  %v6222_v41 = vpop.eup %4584 }
 0xd8b   :  { %v2819_v11 = vpack.c.bf16 %v2811_v7, %v2811_v7 }
 0xd8d   :  { %4205 = vmatmul.mubr.msk.bf16.vlgmr.msra.gmra.mrb[60].mxu1 %vm2730_vm10, %v2819_v11 }
 0xd8e   :  { %4361 = vrot.lane.b32.xlu1 %v6064_v12, %s5256_s27  ;;  %4216 = vmatprep.mubr.msk.bf16.mxu1 %vm5270_vm0, %v5268_v13 }
 0xd91   :  { %4356 = vrot.lane.b32.xlu0 %v6064_v12, %s5271_s16 }
 0xd92   :  { %4366 = vrot.lane.b32.xlu1 %v6064_v12, %s5272_s29  ;;  %v2797_v12 = vsel %vm2730_vm10, %v6222_v41, 0.0 }
 0xd95   :  { %4371 = vrot.lane.b32.xlu0 %v6081_v24, %s5271_s16 }
 0xd99   :  { %4381 = vrot.lane.b32.xlu0 %v6081_v24, %s5272_s29 }
 0xdb6   :  { %2792 = vadd.xlane.f32.xlu1 %v2791_v43 }
 0xdba   :  { %2798 = vadd.xlane.f32.xlu1 %v2797_v12 }
 0xdcb   :  { %4376 = vrot.lane.b32.xlu1 %v6081_v24, %s5256_s27 }
 0xdf0   :  { %v2784_v39 = vpop.xlane.xlu0 %2783 }
 0xdf1   :  { %4586 = vrcp.f32 %v2784_v39 }
 0xdf8   :  { %v2787_v44 = vpop.xlane.xlu1 %2786 }
 0xdf9   :  { %4588 = vrcp.f32 %v2787_v44 }
 0xdfb   :  { %v4587_v50 = vpop.eup %4586 }
 0xdfc   :  { %v2812_v56 = vmul.f32 %v4587_v50, %v6183_v8 }
 0xdfe   :  { %v2820_v5 = vpack.c.bf16 %v2812_v56, %v2812_v56 }
 0xe03   :  { %v4589_v52 = vpop.eup %4588 }
 0xe04   :  { %v2796_v46 = vpop.xlane.xlu0 %2795  ;;  %v2813_v24 = vmul.f32 %v4589_v52, %v6188_v21 }
 0xe06   :  { %v2821_v8 = vpack.c.bf16 %v2813_v24, %v2813_v24 }
 0xe08   :  { %v2790_v47 = vpop.xlane.xlu0 %2789 }
 0xe09   :  { %4590 = vrcp.f32 %v2790_v47 }
 0xe0a   :  { %v2802_v48 = vpop.xlane.xlu1 %2801  ;;  %4592 = vrcp.f32 %v2796_v46 }
 0xe0b   :  { %4594 = vrcp.f32 %v2802_v48 }
 0xe0c   :  { %v4357_v51 = vpop.permute.xlu0 %4356 }
 0xe0d   :  { %v4359_v53 = vunpack.i.h.bf16 %v4357_v51  ;;  %v4358_v55 = vunpack.i.l.bf16 %v4357_v51 }
 0xe0e   :  { %v4362_v57 = vpop.permute.xlu1 %4361 }
 0xe0f   :  { %v2283_v59 = vpack.c.bf16 %v4359_v53, %v4358_v55  ;;  %v4364_v61 = vunpack.i.h.bf16 %v4362_v57  ;;  %v4363_v63 = vunpack.i.l.bf16 %v4362_v57  ;;  %v4472_v55 = vld [vmem:[#allocation25] sm:$0xff]   ;;  %v4473_v57 = vld [vmem:[#allocation25 + $0x8] sm:$0xff]  }
 0xe10   :  { %v4372_v9 = vpop.permute.xlu0 %4371 }
 0xe11   :  { %v2284_v60 = vpack.c.bf16 %v4364_v61, %v4363_v63  ;;  %4209 = vmatpush3.bf16.msra.mxu0 %v2283_v59  ;;  %v4374_v18 = vunpack.i.h.bf16 %v4372_v9  ;;  %v4373_v19 = vunpack.i.l.bf16 %v4372_v9 }
 0xe12   :  { %v4367_v0 = vpop.permute.xlu1 %4366  ;;  %4220 = vmatprep.subr.bf16.mxu0 %v5268_v13 }
 0xe13   :  { %v4591_v62 = vpop.eup %4590  ;;  %v4369_v2 = vunpack.i.h.bf16 %v4367_v0  ;;  %v4368_v4 = vunpack.i.l.bf16 %v4367_v0  ;;  %4215 = vmatpush3.bf16.msra.mxu1 %v2284_v60  ;;  %v2287_v16 = vpack.c.bf16 %v4374_v18, %v4373_v19  ;;  %v4474_v60 = vld [vmem:[#allocation25 + $0x10] sm:$0xff]   ;;  %v4479_v19 = vld [vmem:[#allocation25 + $0x38] sm:$0xff]  }
 0xe14   :  { %4211 = vmatmul.mubr.msk.bf16.vlgmr.msra.gmra.mrb[60].mxu0 %vm2730_vm10, %v2820_v5  ;;  %4226 = vmatprep.subr.bf16.mxu1 %v5268_v13  ;;  %v2814_v14 = vmul.f32 %v4591_v62, %v6196_v29  ;;  %v4593_v45 = vpop.eup %4592  ;;  %v4382_v58 = vpop.permute.xlu0 %4381  ;;  %v4475_v5 = vld [vmem:[#allocation25 + $0x18] sm:$0xff]  }
 0xe15   :  { %v2285_v10 = vpack.c.bf16 %v4369_v2, %v4368_v4  ;;  %4222 = vmatprep.mubr.msk.bf16.mxu0 %vm5270_vm0, %v5268_v13  ;;  %v2816_v20 = vmul.f32 %v4593_v45, %v6192_v15  ;;  %v4384_v22 = vunpack.i.h.bf16 %v4382_v58  ;;  %v4595_v23 = vpop.eup %4594 }
 0xe16   :  { %4217 = vmatmul.mubr.msk.bf16.vlgmr.msra.gmra.mrb[64].mxu1 %vm2730_vm10, %v2821_v8  ;;  %v2822_v21 = vpack.c.bf16 %v2814_v14, %v2814_v14  ;;  %v2818_v28 = vmul.f32 %v4595_v23, %v6200_v32  ;;  %v4476_v8 = vld [vmem:[#allocation25 + $0x20] sm:$0xff]   ;;  %v4478_v14 = vld [vmem:[#allocation25 + $0x30] sm:$0xff]  }
 0xe17   :  { %4221 = vmatpush3.bf16.msra.mxu0 %v2285_v10  ;;  %4227 = vmatpush3.bf16.msra.mxu1 %v2286_v25  ;;  %v4383_v25 = vunpack.i.l.bf16 %v4382_v58  ;;  %v2824_v17 = vpack.c.bf16 %v2816_v20, %v2816_v20  ;;  %v4477_v10 = vld [vmem:[#allocation25 + $0x28] sm:$0xff]  }
 0xe18   :  { %4232 = vmatprep.subr.bf16.mxu0 %v5268_v13  ;;  %4228 = vmatprep.mubr.msk.bf16.mxu1 %vm5270_vm0, %v5268_v13  ;;  %v2826_v6 = vpack.c.bf16 %v2818_v28, %v2818_v28 }
 0xe19   :  { %4238 = vmatprep.subr.bf16.mxu1 %v5268_v13  ;;  %v2289_v26 = vpack.c.bf16 %v4384_v22, %v4383_v25 }
 0xe1c   :  { %4223 = vmatmul.mubr.msk.bf16.vlgmr.msra.gmra.mrb[64].mxu0 %vm2730_vm10, %v2822_v21 }
 0xe1d   :  { %4233 = vmatpush3.bf16.msra.mxu0 %v2287_v16  ;;  %4234 = vmatprep.mubr.msk.bf16.mxu0 %vm5270_vm0, %v5268_v13 }
 0xe1e   :  { %4244 = vmatprep.subr.bf16.mxu0 %v5268_v13 }
 0xe24   :  { %4235 = vmatmul.mubr.msk.bf16.vlgmr.msra.gmra.mrb[68].mxu0 %vm2730_vm10, %v2824_v17 }
 0xe25   :  { %4245 = vmatpush3.bf16.msra.mxu0 %v2289_v26  ;;  %4246 = vmatprep.mubr.msk.bf16.mxu0 %vm5270_vm0, %v5268_v13 }
 0xe2c   :  { %4247 = vmatmul.mubr.msk.bf16.vlgmr.msra.gmra.mrb[72].mxu0 %vm2730_vm10, %v2826_v6 }
 0xe2d   :  { %3511 = vmatprep.mubr.bf16.mxu0 %v5269_v27 }
 0xe43   :  { %v2793_v15 = vpop.xlane.xlu1 %2792 }
 0xe44   :  { %4596 = vrcp.f32 %v2793_v15 }
 0xe47   :  { %v2799_v29 = vpop.xlane.xlu1 %2798 }
 0xe48   :  { %4598 = vrcp.f32 %v2799_v29 }
 0xe4b   :  { %v4377_v30 = vpop.permute.xlu1 %4376 }
 0xe4c   :  { %v4379_v33 = vunpack.i.h.bf16 %v4377_v30  ;;  %v4378_v34 = vunpack.i.l.bf16 %v4377_v30 }
 0xe4e   :  { %v4597_v31 = vpop.eup %4596  ;;  %v2288_v36 = vpack.c.bf16 %v4379_v33, %v4378_v34 }
 0xe4f   :  { %v2815_v35 = vmul.f32 %v4597_v31, %v6218_v42 }
 0xe51   :  { %v2823_v7 = vpack.c.bf16 %v2815_v35, %v2815_v35 }
 0xe52   :  { %v4599_v11 = vpop.eup %4598 }
 0xe53   :  { %4229 = vmatmul.mubr.msk.bf16.vlgmr.msra.gmra.mrb[68].mxu1 %vm2730_vm10, %v2823_v7  ;;  %v2817_v27 = vmul.f32 %v4599_v11, %v6222_v41 }
 0xe54   :  { %4239 = vmatpush3.bf16.msra.mxu1 %v2288_v36  ;;  %4240 = vmatprep.mubr.msk.bf16.mxu1 %vm5270_vm0, %v5268_v13 }
 0xe55   :  { %4250 = vmatprep.subr.bf16.mxu1 %v5268_v13  ;;  %v2825_v32 = vpack.c.bf16 %v2817_v27, %v2817_v27 }
 0xe5b   :  { %4241 = vmatmul.mubr.msk.bf16.vlgmr.msra.gmra.mrb[72].mxu1 %vm2730_vm10, %v2825_v32  ;;  %v3832_v32 = vld [vmem:[#allocation26] ss:$0 sm:$0xff] }
 0xe5c   :  { %4266 = vmatprep.mubr.msk.bf16.mxu1 %vm5270_vm0, %v5268_v13  ;;  %4251 = vmatpush3.bf16.msra.mxu1 %v4472_v55  ;;  %v4485_v55 = vld [vmem:[#allocation31 + $0x14] ss:$8 sps:$4 sm:$0xff]  }
 0xe5d   :  { %4252 = vmatprep.subr.bf16.mxu1 %v5268_v13 }
 0xe60   :  { %v6264_v37 = vpop.f32.mrb[60].mxu1  ;;  %4253 = vmatpush3.bf16.msra.mxu1 %v4473_v57  ;;  %v4488_v57 = vld [vmem:[#allocation31 + $0x24] ss:$8 sps:$4 sm:$0xff]  }
 0xe61   :  { %v4206_v38 = vpop.f32.mrb[61].mxu1  ;;  %4254 = vmatprep.subr.bf16.mxu1 %v5268_v13 }
 0xe62   :  { %v2867_v40 = vpop.f32.mrb[62].mxu1 }
 0xe63   :  { %v4207_v42 = vpop.f32.mrb[63].mxu1 }
 0xe64   :  { %4255 = vmatpush3.bf16.msra.mxu1 %v4474_v60  ;;  %v4494_v60 = vld [vmem:[#allocation31 + $0x44] ss:$8 sps:$4 sm:$0xff]  }
 0xe65   :  { %4256 = vmatprep.subr.bf16.mxu1 %v5268_v13 }
 0xe68   :  { %4257 = vmatpush3.bf16.msra.mxu1 %v4475_v5  ;;  %v4495_v5 = vld [vmem:[#allocation31 + $0x50] ss:$8 sps:$4 sm:$0xff]  }
 0xe69   :  { %4258 = vmatprep.subr.bf16.mxu1 %v5268_v13 }
 0xe6c   :  { %4259 = vmatpush3.bf16.msra.mxu1 %v4476_v8  ;;  %v4504_v8 = vld [vmem:[#allocation34 + $0x40] sm:$0xff]  }
 0xe6d   :  { %4260 = vmatprep.subr.bf16.mxu1 %v5268_v13 }
 0xe70   :  { %4261 = vmatpush3.bf16.msra.mxu1 %v4477_v10  ;;  %v4505_v10 = vld [vmem:[#allocation34] sm:$0xff]  }
 0xe71   :  { %4262 = vmatprep.subr.bf16.mxu1 %v5268_v13 }
 0xe74   :  { %4263 = vmatpush3.bf16.msra.mxu1 %v4478_v14  ;;  %v4506_v14 = vld [vmem:[#allocation34 + $0x48] sm:$0xff]  }
 0xe75   :  { %4264 = vmatprep.subr.bf16.mxu1 %v5268_v13 }
 0xe78   :  { %4265 = vmatpush3.bf16.msra.mxu1 %v4479_v19  ;;  %v4508_v19 = vld [vmem:[#allocation34 + $0x50] sm:$0xff]  }
 0xe79   :  { %3976 = vmatprep.subr.bf16.mxu1 %v4504_v8 }
 0xee7   :  { %v2907_v43 = vpop.f32.mrb[60].mxu0 }
 0xee8   :  { %v4212_v12 = vpop.f32.mrb[61].mxu0 }
 0xee9   :  { %v2910_v39 = vpop.f32.mrb[62].mxu0  ;;  %v2950_v44 = vpop.f32.mrb[64].mxu1 }
 0xeea   :  { %v4213_v46 = vpop.f32.mrb[63].mxu0  ;;  %v4218_v47 = vpop.f32.mrb[65].mxu1 }
 0xeeb   :  { %v2953_v41 = vpop.f32.mrb[66].mxu1 }
 0xeec   :  { %v4219_v48 = vpop.f32.mrb[67].mxu1 }
 0xeef   :  { %v2993_v50 = vpop.f32.mrb[64].mxu0 }
 0xef0   :  { %v4224_v51 = vpop.f32.mrb[65].mxu0 }
 0xef1   :  { %v2996_v52 = vpop.f32.mrb[66].mxu0 }
 0xef2   :  { %v4225_v53 = vpop.f32.mrb[67].mxu0  ;;  %v4482_v52 = vld [vmem:[#allocation31 + $0x4] ss:$8 sps:$4 sm:$0xff]  }
 0xef3   :  { %v4480_v53 = vld [vmem:[#allocation31] ss:$8 sps:$4 sm:$0xff]   ;;  %3479 = vmatprep.subr.bf16.mxu0 %v4482_v52 }
 0xef4   :  { %3480 = vmatpush1.bf16.msra.mxu0 %v4480_v53  ;;  %v4519_v52 = vld [vmem:[#allocation34 + $0x38] sm:$0xff]  }
 0xef5   :  { %3481 = vmatprep.subr.bf16.mxu0 %v4485_v55 }
 0xef7   :  { %v3079_v56 = vpop.f32.mrb[68].mxu0 }
 0xef8   :  { %v4385_v59 = vpack.i.bf16 %v3079_v56, %v2907_v43  ;;  %v4236_v61 = vpop.f32.mrb[69].mxu0  ;;  %v4483_v56 = vld [vmem:[#allocation31 + $0x10] ss:$8 sps:$4 sm:$0xff]  }
 0xef9   :  { %v3082_v63 = vpop.f32.mrb[70].mxu0  ;;  %3482 = vmatpush1.bf16.msra.mxu0 %v4483_v56  ;;  %v4491_v61 = vld [vmem:[#allocation31 + $0x34] ss:$8 sps:$4 sm:$0xff]  }
 0xefa   :  { %4386 = vrot.lane.b32.xlu1 %v4385_v59, %s5272_s29  ;;  %v4237_v24 = vpop.f32.mrb[71].mxu0  ;;  %v4486_v59 = vld [vmem:[#allocation31 + $0x20] ss:$8 sps:$4 sm:$0xff]   ;;  %3483 = vmatprep.subr.bf16.mxu0 %v4488_v57  ;;  %v4489_v63 = vld [vmem:[#allocation31 + $0x30] ss:$8 sps:$4 sm:$0xff]  }
 0xefb   :  { %v4492_v24 = vld [vmem:[#allocation31 + $0x40] ss:$8 sps:$4 sm:$0xff]  }
 0xefd   :  { %3484 = vmatpush1.bf16.msra.mxu0 %v4486_v59 }
 0xefe   :  { %3485 = vmatprep.subr.bf16.mxu0 %v4491_v61 }
 0xeff   :  { %v3165_v0 = vpop.f32.mrb[72].mxu0 }
 0xf00   :  { %v4395_v62 = vpack.i.bf16 %v3165_v0, %v2993_v50  ;;  %v4248_v2 = vpop.f32.mrb[73].mxu0  ;;  %v4497_v0 = vld [vmem:[#allocation31 + $0x54] ss:$8 sps:$4 sm:$0xff]  }
 0xf01   :  { %v3168_v4 = vpop.f32.mrb[74].mxu0  ;;  %3486 = vmatpush1.bf16.msra.mxu0 %v4489_v63  ;;  %v4498_v2 = vld [vmem:[#allocation31 + $0x60] ss:$8 sps:$4 sm:$0xff]  }
 0xf02   :  { %4396 = vrot.lane.b32.xlu1 %v4395_v62, %s5271_s16  ;;  %v4249_v9 = vpop.f32.mrb[75].mxu0  ;;  %3487 = vmatprep.subr.bf16.mxu0 %v4494_v60  ;;  %v4500_v62 = vld [vmem:[#allocation31 + $0x64] ss:$8 sps:$4 sm:$0xff]   ;;  %v4503_v4 = vld [vmem:[#allocation31 + $0x74] ss:$8 sps:$4 sm:$0xff]  }
 0xf03   :  { %v4501_v9 = vld [vmem:[#allocation31 + $0x70] ss:$8 sps:$4 sm:$0xff]  }
 0xf05   :  { %3488 = vmatpush1.bf16.msra.mxu0 %v4492_v24 }
 0xf06   :  { %3489 = vmatprep.subr.bf16.mxu0 %v4497_v0 }
 0xf09   :  { %3490 = vmatpush1.bf16.msra.mxu0 %v4495_v5 }
 0xf0a   :  { %3491 = vmatprep.subr.bf16.mxu0 %v4500_v62 }
 0xf0d   :  { %3492 = vmatpush1.bf16.msra.mxu0 %v4498_v2 }
 0xf0e   :  { %3493 = vmatprep.subr.bf16.mxu0 %v4503_v4 }
 0xf11   :  { %3494 = vmatpush1.bf16.msra.mxu0 %v4501_v9 }
 0xf26   :  { %v3036_v18 = vpop.f32.mrb[68].mxu1 }
 0xf27   :  { %v4230_v21 = vpop.f32.mrb[69].mxu1 }
 0xf28   :  { %v3039_v45 = vpop.f32.mrb[70].mxu1  ;;  %v4509_v21 = vld [vmem:[#allocation34 + $0x10] sm:$0xff]  }
 0xf29   :  { %v4231_v16 = vpop.f32.mrb[71].mxu1  ;;  %v4510_v45 = vld [vmem:[#allocation34 + $0x58] sm:$0xff]  }
 0xf2a   :  { %v4511_v16 = vld [vmem:[#allocation34 + $0x18] sm:$0xff]  }
 0xf2e   :  { %v3122_v58 = vpop.f32.mrb[72].mxu1 }
 0xf2f   :  { %v4390_v20 = vpack.i.bf16 %v3122_v58, %v2950_v44  ;;  %v4242_v22 = vpop.f32.mrb[73].mxu1  ;;  %v4512_v58 = vld [vmem:[#allocation34 + $0x60] sm:$0xff]  }
 0xf30   :  { %v3125_v25 = vpop.f32.mrb[74].mxu1  ;;  %v4514_v22 = vld [vmem:[#allocation34 + $0x68] sm:$0xff]  }
 0xf31   :  { %4391 = vrot.lane.b32.xlu0 %v4390_v20, %s5256_s27  ;;  %v4243_v17 = vpop.f32.mrb[75].mxu1  ;;  %v4513_v20 = vld [vmem:[#allocation34 + $0x20] sm:$0xff]   ;;  %s5273_s27 = smov [#allocation43]  }
 0xf32   :  { %s3713_s3 = sshll.u32 %s5273_s27, 4  ;;  %s3714_s3 = int_to_ptr.vmem [resolvable:$true] %s3713_s3 }
 0xf33   :  { %s5182_s10 = scalar_lea.vmem %s3714_s3, 256  ;;  %p5187_p13 = scmp.lt.s32.totalorder %s3714_s3, %s3714_s3 }
 0xf34   :  { %p5183_p12 = scmp.ne.s32.totalorder %s3714_s3, %s5182_s10  ;;  %p5188_p0 = scmp.lt.s32.totalorder %s5182_s10, %s5182_s10 }
 0xf36   :  { %p5189_p1 = por %p5188_p0, %p5187_p13 }
 0xf38   :  { %p5190_p2 = pnand %p5189_p1, %p5183_p12 }
 0xf6c   :  { %v4387_v23 = vpop.permute.xlu1 %4386 }
 0xf6d   :  { %v4389_v26 = vunpack.i.h.bf16 %v4387_v23  ;;  %v4388_v28 = vunpack.i.l.bf16 %v4387_v23 }
 0xf6f   :  { %v3183_v30 = vsel %vm822_vm5, %v6264_v37, %v4388_v28  ;;  %v3198_v31 = vsel %vm822_vm5, %v3036_v18, %v4389_v26  ;;  %v4507_v18 = vld [vmem:[#allocation34 + $0x8] sm:$0xff]  }
 0xf74   :  { %v4397_v6 = vpop.permute.xlu1 %4396 }
 0xf75   :  { %v4399_v33 = vunpack.i.h.bf16 %v4397_v6  ;;  %v4398_v34 = vunpack.i.l.bf16 %v4397_v6 }
 0xfa3   :  { %v4392_v15 = vpop.permute.xlu0 %4391 }
 0xfa4   :  { %v4394_v29 = vunpack.i.h.bf16 %v4392_v15  ;;  %v4393_v13 = vunpack.i.l.bf16 %v4392_v15 }
 0xfa6   :  { %v3199_v35 = vsel %vm1694_vm1, %v3198_v31, %v4394_v29  ;;  %v3184_v7 = vsel %vm1694_vm1, %v3183_v30, %v4393_v13 }
 0xfa7   :  { %v3185_v11 = vsel %vm1696_vm2, %v3184_v7, %v4398_v34  ;;  %v3200_v36 = vsel %vm1696_vm2, %v3199_v35, %v4399_v33 }
 0xfa8   :  { %v3201_v27 = vpack.c.bf16 %v3200_v36, %v3185_v11  ;;  %v3841_v36 = vld [vmem:[#allocation37] ss:$0 sm:$0xff] }
 0xfaa   :  { %4267 = vmatmul.mubr.bf16.vlgmr.msra.gmra.mrb[76].mxu1 %v3201_v27 }
 0xfab   :  { %3977 = vmatpush3.bf16.msra.mxu1 %v4505_v10 }
 0xfac   :  { %3978 = vmatprep.subr.bf16.mxu1 %v4506_v14 }
 0xfaf   :  { %3979 = vmatpush3.bf16.msra.mxu1 %v4507_v18 }
 0xfb0   :  { %3980 = vmatprep.subr.bf16.mxu1 %v4508_v19 }
 0xfb3   :  { %3981 = vmatpush3.bf16.msra.mxu1 %v4509_v21 }
 0xfb4   :  { %3982 = vmatprep.subr.bf16.mxu1 %v4510_v45 }
 0xfb7   :  { %3983 = vmatpush3.bf16.msra.mxu1 %v4511_v16 }
 0xfb8   :  { %3984 = vmatprep.subr.bf16.mxu1 %v4512_v58 }
 0xfbb   :  { %3985 = vmatpush3.bf16.msra.mxu1 %v4513_v20 }
 0xfbc   :  { %3986 = vmatprep.subr.bf16.mxu1 %v4514_v22 }
0x107d   :  { %v3307_v38 = vpop.f32.mrb[76].mxu1 }
0x107e   :  { %v3308_v40 = vadd.f32 %v3832_v32, %v3307_v38  ;;  %v4268_v42 = vpop.f32.mrb[77].mxu1 }
0x107f   :  { %v3310_v43 = vpop.f32.mrb[78].mxu1 }
0x1080   :  { %v6284_v37 = vadd.f32 %v3308_v40, %v6019_v54  ;;  %v3311_v12 = vadd.f32 %v3832_v32, %v3310_v43  ;;  %v4269_v39 = vpop.f32.mrb[79].mxu1  ;;  %v3842_v43 = vld [vmem:[#allocation38] ss:$0 sm:$0xff] }
0x1082   :  { %v6287_v44 = vadd.f32 %v3311_v12, %v6021_v49  ;;  %3316 = vadd.xlane.f32.xlu0 %v6284_v37 }
0x1084   :  { %3318 = vadd.xlane.f32.xlu1 %v6287_v44 }
0x110f   :  { %v3317_v46 = vpop.xlane.xlu0 %3316 }
0x1110   :  { %v3320_v47 = vmul.f32 0.0078125, %v3317_v46 }
0x1111   :  { %v3319_v41 = vpop.xlane.xlu1 %3318 }
0x1112   :  { %v6292_v48 = vsub.f32 %v6284_v37, %v3320_v47  ;;  %v3321_v50 = vmul.f32 0.0078125, %v3319_v41  ;;  %v4515_v41 = vld [vmem:[#allocation34 + $0x28] sm:$0xff]  }
0x1113   :  { %3987 = vmatpush3.bf16.msra.mxu1 %v4515_v41 }
0x1114   :  { %v6295_v51 = vsub.f32 %v6287_v44, %v3321_v50  ;;  %v3324_v54 = vmul.f32 %v6292_v48, %v6292_v48  ;;  %v3357_v32 = vmul.f32 %v3841_v36, %v6292_v48  ;;  %v4516_v50 = vld [vmem:[#allocation34 + $0x70] sm:$0xff]   ;;  %v3387_v48 = vld [vmem:[#allocation32] sm:$0x3] }
0x1115   :  { %3988 = vmatprep.subr.bf16.mxu1 %v4516_v50  ;;  %v3396_v53 = vrot.slane %v3387_v48, %v5812_v3 }
0x1116   :  { %3326 = vadd.xlane.f32.xlu0 %v3324_v54  ;;  %v3325_v49 = vmul.f32 %v6295_v51, %v6295_v51  ;;  %v3358_v38 = vmul.f32 %v3841_v36, %v6295_v51  ;;  %v4517_v54 = vld [vmem:[#allocation34 + $0x30] sm:$0xff]   ;;  %v3392_v51 = vrot.slane %v3387_v48, %v5810_v1  ;;  %v3859_v1 = vld [vmem:[#allocation35] ss:$0 sm:$0xff] }
0x1117   :  { %3989 = vmatpush3.bf16.msra.mxu1 %v4517_v54 }
0x111a   :  { %3328 = vadd.xlane.f32.xlu0 %v3325_v49  ;;  %v4518_v49 = vld [vmem:[#allocation34 + $0x78] sm:$0xff]  }
0x111b   :  { %3990 = vmatprep.subr.bf16.mxu1 %v4518_v49 }
0x111c   :  { %3991 = vmatpush3.bf16.msra.mxu1 %v4519_v52 }
0x11a3   :  { %v3327_v25 = vpop.xlane.xlu0 %3326 }
0x11a4   :  { %v3330_v17 = vmul.f32 0.007874016, %v3327_v25 }
0x11a6   :  { %4600 = vrsqrt.f32 %v3330_v17  ;;  %vm3334_vm0 = vcmp.eq.f32.partialorder %v3330_v17, inf  ;;  %v3337_v15 = vand.u32 2147483648, %v3330_v17  ;;  %vm3336_vm5 = vcmp.eq.f32.partialorder %v3330_v17, 0.0 }
0x11a7   :  { %v3329_v23 = vpop.xlane.xlu0 %3328 }
0x11a8   :  { %v3331_v26 = vmul.f32 0.007874016, %v3329_v23 }
0x11aa   :  { %4602 = vrsqrt.f32 %v3331_v26  ;;  %vm3341_vm1 = vcmp.eq.f32.partialorder %v3331_v26, inf  ;;  %v3344_v34 = vand.u32 2147483648, %v3331_v26  ;;  %vm3343_vm2 = vcmp.eq.f32.partialorder %v3331_v26, 0.0 }
0x11b0   :  { %v4601_v28 = vpop.eup %4600 }
0x11b1   :  { %v3333_v6 = vmul.f32 %v4601_v28, %v3330_v17 }
0x11b3   :  { %v3335_v29 = vsel %vm3334_vm0, %v3330_v17, %v3333_v6 }
0x11b4   :  { %v4603_v13 = vpop.eup %4602  ;;  %v3338_v30 = vsel %vm3336_vm5, %v3337_v15, %v3335_v29 }
0x11b5   :  { %v3346_v31 = vadd.f32 1e-06, %v3338_v30  ;;  %v3340_v33 = vmul.f32 %v4603_v13, %v3331_v26 }
0x11b7   :  { %4604 = vrcp.f32 %v3346_v31  ;;  %v3342_v35 = vsel %vm3341_vm1, %v3331_v26, %v3340_v33 }
0x11b8   :  { %v3345_v7 = vsel %vm3343_vm2, %v3344_v34, %v3342_v35 }
0x11b9   :  { %v3347_v11 = vadd.f32 1e-06, %v3345_v7 }
0x11bb   :  { %4606 = vrcp.f32 %v3347_v11 }
0x11c1   :  { %v4605_v27 = vpop.eup %4604 }
0x11c2   :  { %v3359_v40 = vmul.f32 %v4605_v27, %v3357_v32 }
0x11c4   :  { %v3368_v39 = vadd.f32 %v3842_v43, %v3359_v40 }
0x11c5   :  { %v4607_v42 = vpop.eup %4606 }
0x11c6   :  { %v3360_v12 = vmul.f32 %v4607_v42, %v3358_v38 }
0x11c8   :  { %v3369_v46 = vadd.f32 %v3842_v43, %v3360_v12 }
0x11ca   :  { %v3370_v47 = vpack.c.bf16 %v3369_v46, %v3368_v39 }
0x11cc   :  { %3512 = vmatmul.mubr.bf16.vlgmr.msra.gmra.mrb[76].mxu0 %v3370_v47 }
0x129f   :  { %v3513_v55 = vpop.f32.mrb[76].mxu0 }
0x12a0   :  { %v3514_v56 = vadd.f32 %v3513_v55, %v3392_v51  ;;  %v3515_v57 = vpop.f32.mrb[77].mxu0 }
0x12a1   :  { %v3516_v59 = vadd.f32 %v3515_v57, %v3396_v53  ;;  %v3517_v61 = vpop.f32.mrb[78].mxu0 }
0x12a2   :  { %v3518_v63 = vadd.f32 %v3517_v61, %v3392_v51  ;;  %v3519_v24 = vpop.f32.mrb[79].mxu0  ;;  %v3522_v0 = vmax.f32 %v3514_v56, 0.0 }
0x12a3   :  { %v3520_v60 = vadd.f32 %v3519_v24, %v3396_v53  ;;  %v3523_v62 = vmax.f32 %v3516_v59, 0.0 }
0x12a4   :  { %v3524_v5 = vmax.f32 %v3518_v63, 0.0 }
0x12a5   :  { %v3525_v2 = vmax.f32 %v3520_v60, 0.0 }
0x12a6   :  { %v3526_v4 = vpack.c.bf16 %v3524_v5, %v3522_v0 }
0x12a7   :  { %v3527_v9 = vpack.c.bf16 %v3525_v2, %v3523_v62 }
0x12a9   :  { %3695 = vmatprep.mubr.bf16.mxu1 %v3527_v9 }
0x12aa   :  { %3696 = vmatmul.mubr.bf16.vlgmr.msra.gmra.mrb[80].mxu1 %v3526_v4 }
0x137d   :  { %v3992_v8 = vpop.f32.mrb[80].mxu1 }
0x137e   :  { %v3993_v10 = vpop.f32.mrb[81].mxu1 }
0x137f   :  { %v3994_v3 = vadd.f32 %v3993_v10, %v3992_v8  ;;  %v3995_v14 = vpop.f32.mrb[82].mxu1 }
0x1380   :  { %v3996_v18 = vpop.f32.mrb[83].mxu1 }
0x1381   :  { %v3698_v19 = vadd.f32 %v3994_v3, %v3859_v1  ;;  %v3997_v21 = vadd.f32 %v3996_v18, %v3995_v14 }
0x1383   :  { %v3704_v45 = vadd.f32 %v3698_v19, %v6284_v37  ;;  %v3701_v16 = vadd.f32 %v3997_v21, %v3859_v1 }
0x1385   :  { %3706 = vst [vmem:[#allocation43] sm:$0xff] %v3704_v45  ;;  %v3705_v58 = vadd.f32 %v3701_v16, %v6287_v44 }
0x1387   :  { %3707 = vst [vmem:[#allocation43 + $0x8] sm:$0xff] %v3705_v58 }
0x1388   :  { %5193 = shalt.err (!%p5190_p2)
}
0x1389   :  { %s6396_s28 = sld [smem:[#allocation72_spill]] }
0x138f   :  { %s5194_s13 = scalar_lea.hbm %s6396_s28, 256 }
0x1390   :  { %p5195_p3 = scmp.ne.s32.totalorder %s6396_s28, %s5194_s13  ;;  %p5198_p4 = scmp.lt.u32.totalorder %s5194_s13, %s6396_s28 }
0x1392   :  { %p5200_p5 = pnand %p5198_p4, %p5195_p3 }
0x1394   :  { %5203 = shalt.err (!%p5200_p5)
}
0x1395   :  { %3719 = dma.vmem_to_hbm [thread:$0]  %s3714_s3, 256, %s6396_s28, [#allocation4], %s6388_s2, %s6388_s2, %s6387_s6  }
0x1396   :  { %5232 = dma.done.wait [#allocation4], 256  }
0x1397   :  { %5233 = vsyncadd [#allocation4], 4294967040 }
0x1398   :  { %3723 = vsyncpa [#allocation3], 1 }
0x1399   :  { %3724 = vsyncpa [#allocation6], 1 }
0x139a   :  { %3725 = vsyncpa [#allocation9], 1 }
0x139b   :  { %3726 = vsyncpa [#allocation12], 1 }
0x139c   :  { %3727 = vsyncpa [#allocation15], 1 }
0x139d   :  { %3728 = vsyncpa [#allocation18], 1 }
0x139e   :  { %3729 = vsyncpa [#allocation21], 1 }
0x139f   :  { %3730 = vsyncpa [#allocation24], 1 }
0x13a0   :  { %3731 = vsyncpa [#allocation27], 1 }
0x13a1   :  { %3732 = vsyncpa [#allocation30], 1 }
0x13a2   :  { %3733 = vsyncpa [#allocation33], 1 }
0x13a3   :  { %3734 = vsyncpa [#allocation36], 1 }
0x13a4   :  { %3735 = vsyncpa [#allocation39], 1 }
0x13a5   :  { %3736 = vsyncpa [#allocation42], 1 }
0x13a6   :  { %3737 = vsyncpa [#allocation4], 1 }

// kernel: tpu_custom_call.1
= control target key start
LH: loop header
LB: loop body
LE: loop exit
PB: predicated region body
PF: predicated region fallthrough
CT: control target
= control target key end

     0   :  { %s6322_s0 = inlined_call_operand.hbm [shape: f32[2,8,128], index: 0, kind: input, shape index: {}]   ;;  %s6323_s1 = inlined_call_operand.hbm [shape: f32[2,16,128], index: 1, kind: input, shape index: {}]   ;;  %s6324_s2 = inlined_call_operand.hbm [shape: f32[8,8,8], index: 2, kind: input, shape index: {}]   ;;  %s6325_s3 = inlined_call_operand.hbm [shape: f32[8,1,16], index: 3, kind: input, shape index: {}]   ;;  %s6326_s4 = inlined_call_operand.hbm [shape: bf16[128,384], index: 4, kind: input, shape index: {}]   ;;  %s6327_s5 = inlined_call_operand.hbm [shape: f32[1,384], index: 5, kind: input, shape index: {}]   ;;  %s6328_s6 = inlined_call_operand.hbm [shape: bf16[128,128], index: 6, kind: input, shape index: {}]   ;;  %s6329_s7 = inlined_call_operand.hbm [shape: f32[1,128], index: 7, kind: input, shape index: {}]   ;;  %s6330_s8 = inlined_call_operand.hbm [shape: f32[1,128], index: 8, kind: input, shape index: {}]   ;;  %s6331_s9 = inlined_call_operand.hbm [shape: f32[1,128], index: 9, kind: input, shape index: {}]   ;;  %s6332_s10 = inlined_call_operand.hbm [shape: bf16[128,128], index: 10, kind: input, shape index: {}]   ;;  %s6333_s11 = inlined_call_operand.hbm [shape: f32[1,128], index: 11, kind: input, shape index: {}]   ;;  %s6334_s12 = inlined_call_operand.hbm [shape: bf16[128,256], index: 12, kind: input, shape index: {}]   ;;  %s6335_s13 = inlined_call_operand.hbm [shape: f32[1,256], index: 13, kind: input, shape index: {}]   ;;  %s6336_s14 = inlined_call_operand.hbm [shape: bf16[128,128], index: 14, kind: input, shape index: {}]   ;;  %s6337_s15 = inlined_call_operand.hbm [shape: f32[1,128], index: 15, kind: input, shape index: {}]   ;;  %s6338_s16 = inlined_call_operand.hbm [shape: f32[1,128], index: 16, kind: input, shape index: {}]   ;;  %s6339_s17 = inlined_call_operand.hbm [shape: f32[1,128], index: 17, kind: input, shape index: {}]   ;;  %s6340_s18 = inlined_call_operand.hbm [shape: bf16[128,256], index: 18, kind: input, shape index: {}]   ;;  %s6341_s19 = inlined_call_operand.hbm [shape: f32[1,256], index: 19, kind: input, shape index: {}]   ;;  %s6342_s20 = inlined_call_operand.hbm [shape: bf16[256,128], index: 20, kind: input, shape index: {}]   ;;  %s6343_s21 = inlined_call_operand.hbm [shape: f32[1,128], index: 21, kind: input, shape index: {}]   ;;  %s6344_s22 = inlined_call_operand.hbm [shape: f32[1,128], index: 22, kind: input, shape index: {}]   ;;  %s6345_s23 = inlined_call_operand.hbm [shape: f32[1,128], index: 23, kind: input, shape index: {}]   ;;  %s6346_s24 = inlined_call_operand.hbm [shape: f32[1,128], index: 24, kind: input, shape index: {}]   ;;  %s6347_s25 = inlined_call_operand.hbm [shape: f32[1,128], index: 25, kind: input, shape index: {}]   ;;  %s6348_s26 = inlined_call_operand.hbm [shape: f32[2,8,128], index: 26, kind: output, shape index: {}]  }
   0x1   :  { %6367 = sst [smem:[#allocation59_spill]] %s6322_s0 }
   0x2   :  { %6368 = sst [smem:[#allocation60_spill]] %s6323_s1 }
   0x3   :  { %6369 = sst [smem:[#allocation61_spill]] %s6324_s2 }
   0x4   :  { %6370 = sst [smem:[#allocation62_spill]] %s6325_s3 }
   0x5   :  { %6371 = sst [smem:[#allocation63_spill]] %s6326_s4 }
   0x6   :  { %6372 = sst [smem:[#allocation64_spill]] %s6327_s5 }
   0x7   :  { %6373 = sst [smem:[#allocation65_spill]] %s6328_s6 }
   0x8   :  { %6374 = sst [smem:[#allocation66_spill]] %s6329_s7 }
   0x9   :  { %6375 = sst [smem:[#allocation67_spill]] %s6330_s8 }
   0xa   :  { %6376 = sst [smem:[#allocation68_spill]] %s6331_s9 }
   0xb   :  { %6377 = sst [smem:[#allocation69_spill]] %s6332_s10 }
   0xc   :  { %6378 = sst [smem:[#allocation70_spill]] %s6346_s24 }
   0xd   :  { %6379 = sst [smem:[#allocation71_spill]] %s6347_s25 }
   0xe   :  { %6380 = sst [smem:[#allocation72_spill]] %s6348_s26 }
   0xf   :  { %31 = vsyncpa [#allocation3], 0 }
  0x10   :  { %32 = vsyncpa [#allocation6], 0 }
  0x11   :  { %33 = vsyncpa [#allocation9], 0 }
  0x12   :  { %34 = vsyncpa [#allocation12], 0 }
  0x13   :  { %35 = vsyncpa [#allocation15], 0 }
  0x14   :  { %36 = vsyncpa [#allocation18], 0 }
  0x15   :  { %37 = vsyncpa [#allocation21], 0 }
  0x16   :  { %38 = vsyncpa [#allocation24], 0 }
  0x17   :  { %39 = vsyncpa [#allocation27], 0 }
  0x18   :  { %40 = vsyncpa [#allocation30], 0 }
  0x19   :  { %41 = vsyncpa [#allocation33], 0 }
  0x1a   :  { %42 = vsyncpa [#allocation36], 0 }
  0x1b   :  { %43 = vsyncpa [#allocation39], 0 }
  0x1c   :  { %44 = vsyncpa [#allocation42], 0 }
  0x1d   :  { %45 = vsyncpa [#allocation4], 0  ;;  %s5234_s27 = smov [#allocation5]   ;;  %s5235_s7 = smov [#allocation8]  }
  0x1e   :  { %s63_s3 = sshll.u32 %s5234_s27, 4  ;;  %s87_s28 = sshll.u32 %s5235_s7, 4  ;;  %s64_s3 = int_to_ptr.vmem [resolvable:$true] %s63_s3  ;;  %s5409_s28 = int_to_ptr.vmem [resolvable:$true] %s87_s28 }
  0x1f   :  { %s6381_s29 = sld [smem:[#allocation60_spill]] }
  0x25   :  { %s4610_s0 = scalar_lea.hbm %s6381_s29, 512 }
  0x26   :  { %p4611_p0 = scmp.ne.s32.totalorder %s6381_s29, %s4610_s0  ;;  %p4614_p1 = scmp.lt.u32.totalorder %s4610_s0, %s6381_s29 }
  0x28   :  { %p4616_p2 = pnand %p4614_p1, %p4611_p0 }
  0x2a   :  { %4619 = shalt.err (!%p4616_p2)
}
  0x2b   :  { %s4620_s10 = scalar_lea.vmem %s64_s3, 512  ;;  %p4625_p4 = scmp.lt.s32.totalorder %s64_s3, %s64_s3 }
  0x2c   :  { %p4621_p3 = scmp.ne.s32.totalorder %s64_s3, %s4620_s10  ;;  %p4626_p5 = scmp.lt.s32.totalorder %s4620_s10, %s4620_s10 }
  0x2e   :  { %p4627_p6 = por %p4626_p5, %p4625_p4 }
  0x30   :  { %p4628_p7 = pnand %p4627_p6, %p4621_p3 }
  0x32   :  { %4631 = shalt.err (!%p4628_p7)
}
  0x33   :  { %s6361_s6 = smov 128   ;;  %s6363_s1 = smov 8  }
  0x34   :  { %69 = dma.hbm_to_vmem [thread:$0]  %s6381_s29, 512, %s64_s3, [#allocation6], %s6361_s6, %s6361_s6, %s6363_s1  }
  0x35   :  { %s6382_s0 = sld [smem:[#allocation62_spill]] }
  0x3b   :  { %s4632_s9 = scalar_lea.hbm %s6382_s0, 128 }
  0x3c   :  { %p4633_p8 = scmp.ne.s32.totalorder %s6382_s0, %s4632_s9  ;;  %p4636_p9 = scmp.lt.u32.totalorder %s4632_s9, %s6382_s0 }
  0x3e   :  { %p4638_p10 = pnand %p4636_p9, %p4633_p8 }
  0x40   :  { %4641 = shalt.err (!%p4638_p10)
}
  0x41   :  { %s4642_s26 = scalar_lea.vmem %s5409_s28, 128  ;;  %p4647_p12 = scmp.lt.s32.totalorder %s5409_s28, %s5409_s28 }
  0x42   :  { %p4643_p11 = scmp.ne.s32.totalorder %s5409_s28, %s4642_s26  ;;  %p4648_p13 = scmp.lt.s32.totalorder %s4642_s26, %s4642_s26 }
  0x44   :  { %p4649_p0 = por %p4648_p13, %p4647_p12 }
  0x46   :  { %p4650_p1 = pnand %p4649_p0, %p4643_p11 }
  0x48   :  { %4653 = shalt.err (!%p4650_p1)
}
  0x49   :  { %s5238_s3 = smov 16   ;;  %s5239_s29 = smov 1  }
  0x4a   :  { %93 = dma.hbm_to_vmem [thread:$0]  %s6382_s0, 128, %s5409_s28, [#allocation9], %s5238_s3, %s5238_s3, %s5239_s29  }
  0x4b   :  { %s5240_s8 = smov [#allocation11]   ;;  %s5241_s9 = smov [#allocation14]  }
  0x4c   :  { %s112_s4 = sshll.u32 %s5240_s8, 4  ;;  %s134_s30 = sshll.u32 %s5241_s9, 4  ;;  %s113_s4 = int_to_ptr.vmem [resolvable:$true] %s112_s4  ;;  %s135_s30 = int_to_ptr.vmem [resolvable:$true] %s134_s30 }
  0x4d   :  { %s6383_s10 = sld [smem:[#allocation64_spill]] }
  0x53   :  { %s4654_s26 = scalar_lea.hbm %s6383_s10, 48 }
  0x54   :  { %p4655_p2 = scmp.ne.s32.totalorder %s6383_s10, %s4654_s26  ;;  %p4658_p3 = scmp.lt.u32.totalorder %s4654_s26, %s6383_s10 }
  0x56   :  { %p4660_p4 = pnand %p4658_p3, %p4655_p2 }
  0x58   :  { %4663 = shalt.err (!%p4660_p4)
}
  0x59   :  { %s4664_s28 = scalar_lea.vmem %s113_s4, 48  ;;  %s4668_s0 = scalar_lea.vmem %s113_s4, 64 }
  0x5a   :  { %p4665_p5 = scmp.ne.s32.totalorder %s113_s4, %s4664_s28  ;;  %p4669_p6 = scmp.lt.s32.totalorder %s113_s4, %s113_s4 }
  0x5b   :  { %p4670_p7 = scmp.lt.s32.totalorder %s4668_s0, %s4664_s28 }
  0x5d   :  { %p4671_p8 = por %p4670_p7, %p4669_p6 }
  0x5f   :  { %p4672_p9 = pnand %p4671_p8, %p4665_p5 }
  0x61   :  { %4675 = shalt.err (!%p4672_p9)
}
  0x62   :  { %115 = dma.hbm_to_vmem [thread:$0]  %s6383_s10, 48, %s113_s4, [#allocation12]  }
  0x63   :  { %s6384_s27 = sld [smem:[#allocation66_spill]] }
  0x69   :  { %s4676_s7 = scalar_lea.hbm %s6384_s27, 16 }
  0x6a   :  { %p4677_p10 = scmp.ne.s32.totalorder %s6384_s27, %s4676_s7  ;;  %p4680_p11 = scmp.lt.u32.totalorder %s4676_s7, %s6384_s27 }
  0x6c   :  { %p4682_p12 = pnand %p4680_p11, %p4677_p10 }
  0x6e   :  { %4685 = shalt.err (!%p4682_p12)
}
  0x6f   :  { %s4686_s2 = scalar_lea.vmem %s135_s30, 16  ;;  %s4690_s5 = scalar_lea.vmem %s135_s30, 32 }
  0x70   :  { %p4687_p13 = scmp.ne.s32.totalorder %s135_s30, %s4686_s2  ;;  %p4691_p0 = scmp.lt.s32.totalorder %s135_s30, %s135_s30 }
  0x71   :  { %p4692_p1 = scmp.lt.s32.totalorder %s4690_s5, %s4686_s2 }
  0x73   :  { %p4693_p2 = por %p4692_p1, %p4691_p0 }
  0x75   :  { %p4694_p3 = pnand %p4693_p2, %p4687_p13 }
  0x77   :  { %4697 = shalt.err (!%p4694_p3)
}
  0x78   :  { %137 = dma.hbm_to_vmem [thread:$0]  %s6384_s27, 16, %s135_s30, [#allocation15]  }
  0x79   :  { %s5242_s26 = smov [#allocation17]   ;;  %s5243_s0 = smov [#allocation20]  }
  0x7a   :  { %s154_s28 = sshll.u32 %s5242_s26, 4  ;;  %s176_s3 = sshll.u32 %s5243_s0, 4  ;;  %s155_s28 = int_to_ptr.vmem [resolvable:$true] %s154_s28  ;;  %s177_s3 = int_to_ptr.vmem [resolvable:$true] %s176_s3 }
  0x7b   :  { %s6385_s1 = sld [smem:[#allocation68_spill]] }
  0x81   :  { %s4698_s7 = scalar_lea.hbm %s6385_s1, 16 }
  0x82   :  { %p4699_p4 = scmp.ne.s32.totalorder %s6385_s1, %s4698_s7  ;;  %p4702_p5 = scmp.lt.u32.totalorder %s4698_s7, %s6385_s1 }
  0x84   :  { %p4704_p6 = pnand %p4702_p5, %p4699_p4 }
  0x86   :  { %4707 = shalt.err (!%p4704_p6)
}
  0x87   :  { %s4708_s30 = scalar_lea.vmem %s155_s28, 16  ;;  %s4712_s27 = scalar_lea.vmem %s155_s28, 32 }
  0x88   :  { %p4709_p7 = scmp.ne.s32.totalorder %s155_s28, %s4708_s30  ;;  %p4713_p8 = scmp.lt.s32.totalorder %s155_s28, %s155_s28 }
  0x89   :  { %p4714_p9 = scmp.lt.s32.totalorder %s4712_s27, %s4708_s30 }
  0x8b   :  { %p4715_p10 = por %p4714_p9, %p4713_p8 }
  0x8d   :  { %p4716_p11 = pnand %p4715_p10, %p4709_p7 }
  0x8f   :  { %4719 = shalt.err (!%p4716_p11)
}
  0x90   :  { %157 = dma.hbm_to_vmem [thread:$0]  %s6385_s1, 16, %s155_s28, [#allocation18]  }
  0x91   :  { %s4720_s26 = scalar_lea.hbm %s6333_s11, 16 }
  0x92   :  { %p4721_p12 = scmp.ne.s32.totalorder %s6333_s11, %s4720_s26  ;;  %p4724_p13 = scmp.lt.u32.totalorder %s4720_s26, %s6333_s11 }
  0x94   :  { %p4726_p0 = pnand %p4724_p13, %p4721_p12 }
  0x96   :  { %4729 = shalt.err (!%p4726_p0)
}
  0x97   :  { %s4730_s24 = scalar_lea.vmem %s177_s3, 16  ;;  %s4734_s25 = scalar_lea.vmem %s177_s3, 32 }
  0x98   :  { %p4731_p1 = scmp.ne.s32.totalorder %s177_s3, %s4730_s24  ;;  %p4735_p2 = scmp.lt.s32.totalorder %s177_s3, %s177_s3 }
  0x99   :  { %p4736_p3 = scmp.lt.s32.totalorder %s4734_s25, %s4730_s24 }
  0x9b   :  { %p4737_p4 = por %p4736_p3, %p4735_p2 }
  0x9d   :  { %p4738_p5 = pnand %p4737_p4, %p4731_p1 }
  0x9f   :  { %4741 = shalt.err (!%p4738_p5)
}
  0xa0   :  { %179 = dma.hbm_to_vmem [thread:$0]  %s6333_s11, 16, %s177_s3, [#allocation21]  }
  0xa1   :  { %s5244_s8 = smov [#allocation23]   ;;  %s5245_s30 = smov [#allocation26]  }
  0xa2   :  { %s198_s9 = sshll.u32 %s5244_s8, 4  ;;  %s220_s27 = sshll.u32 %s5245_s30, 4  ;;  %s199_s9 = int_to_ptr.vmem [resolvable:$true] %s198_s9  ;;  %s221_s27 = int_to_ptr.vmem [resolvable:$true] %s220_s27 }
  0xa3   :  { %s4742_s4 = scalar_lea.hbm %s6335_s13, 32 }
  0xa4   :  { %p4743_p6 = scmp.ne.s32.totalorder %s6335_s13, %s4742_s4  ;;  %p4746_p7 = scmp.lt.u32.totalorder %s4742_s4, %s6335_s13 }
  0xa6   :  { %p4748_p8 = pnand %p4746_p7, %p4743_p6 }
  0xa8   :  { %4751 = shalt.err (!%p4748_p8)
}
  0xa9   :  { %s4752_s11 = scalar_lea.vmem %s199_s9, 32  ;;  %p4757_p10 = scmp.lt.s32.totalorder %s199_s9, %s199_s9 }
  0xaa   :  { %p4753_p9 = scmp.ne.s32.totalorder %s199_s9, %s4752_s11  ;;  %p4758_p11 = scmp.lt.s32.totalorder %s4752_s11, %s4752_s11 }
  0xac   :  { %p4759_p12 = por %p4758_p11, %p4757_p10 }
  0xae   :  { %p4760_p13 = pnand %p4759_p12, %p4753_p9 }
  0xb0   :  { %4763 = shalt.err (!%p4760_p13)
}
  0xb1   :  { %201 = dma.hbm_to_vmem [thread:$0]  %s6335_s13, 32, %s199_s9, [#allocation24]  }
  0xb2   :  { %s4764_s25 = scalar_lea.hbm %s6337_s15, 16 }
  0xb3   :  { %p4765_p0 = scmp.ne.s32.totalorder %s6337_s15, %s4764_s25  ;;  %p4768_p1 = scmp.lt.u32.totalorder %s4764_s25, %s6337_s15 }
  0xb5   :  { %p4770_p2 = pnand %p4768_p1, %p4765_p0 }
  0xb7   :  { %4773 = shalt.err (!%p4770_p2)
}
  0xb8   :  { %s4774_s2 = scalar_lea.vmem %s221_s27, 16  ;;  %s4778_s5 = scalar_lea.vmem %s221_s27, 32 }
  0xb9   :  { %p4775_p3 = scmp.ne.s32.totalorder %s221_s27, %s4774_s2  ;;  %p4779_p4 = scmp.lt.s32.totalorder %s221_s27, %s221_s27 }
  0xba   :  { %p4780_p5 = scmp.lt.s32.totalorder %s4778_s5, %s4774_s2 }
  0xbc   :  { %p4781_p6 = por %p4780_p5, %p4779_p4 }
  0xbe   :  { %p4782_p7 = pnand %p4781_p6, %p4775_p3 }
  0xc0   :  { %4785 = shalt.err (!%p4782_p7)
}
  0xc1   :  { %223 = dma.hbm_to_vmem [thread:$0]  %s6337_s15, 16, %s221_s27, [#allocation27]  }
  0xc2   :  { %s5246_s4 = smov [#allocation29]   ;;  %s5247_s26 = smov [#allocation32]  }
  0xc3   :  { %s240_s10 = sshll.u32 %s5246_s4, 4  ;;  %s262_s0 = sshll.u32 %s5247_s26, 4  ;;  %s241_s10 = int_to_ptr.vmem [resolvable:$true] %s240_s10  ;;  %s263_s0 = int_to_ptr.vmem [resolvable:$true] %s262_s0 }
  0xc4   :  { %s4786_s3 = scalar_lea.hbm %s6339_s17, 16 }
  0xc5   :  { %p4787_p8 = scmp.ne.s32.totalorder %s6339_s17, %s4786_s3  ;;  %p4790_p9 = scmp.lt.u32.totalorder %s4786_s3, %s6339_s17 }
  0xc7   :  { %p4792_p10 = pnand %p4790_p9, %p4787_p8 }
  0xc9   :  { %4795 = shalt.err (!%p4792_p10)
}
  0xca   :  { %s4796_s15 = scalar_lea.vmem %s241_s10, 16  ;;  %s4800_s27 = scalar_lea.vmem %s241_s10, 32 }
  0xcb   :  { %p4797_p11 = scmp.ne.s32.totalorder %s241_s10, %s4796_s15  ;;  %p4801_p12 = scmp.lt.s32.totalorder %s241_s10, %s241_s10 }
  0xcc   :  { %p4802_p13 = scmp.lt.s32.totalorder %s4800_s27, %s4796_s15 }
  0xce   :  { %p4803_p0 = por %p4802_p13, %p4801_p12 }
  0xd0   :  { %p4804_p1 = pnand %p4803_p0, %p4797_p11 }
  0xd2   :  { %4807 = shalt.err (!%p4804_p1)
}
  0xd3   :  { %243 = dma.hbm_to_vmem [thread:$0]  %s6339_s17, 16, %s241_s10, [#allocation30]  }
  0xd4   :  { %s4808_s2 = scalar_lea.hbm %s6341_s19, 32 }
  0xd5   :  { %p4809_p2 = scmp.ne.s32.totalorder %s6341_s19, %s4808_s2  ;;  %p4812_p3 = scmp.lt.u32.totalorder %s4808_s2, %s6341_s19 }
  0xd7   :  { %p4814_p4 = pnand %p4812_p3, %p4809_p2 }
  0xd9   :  { %4817 = shalt.err (!%p4814_p4)
}
  0xda   :  { %s4818_s26 = scalar_lea.vmem %s263_s0, 32  ;;  %p4823_p6 = scmp.lt.s32.totalorder %s263_s0, %s263_s0 }
  0xdb   :  { %p4819_p5 = scmp.ne.s32.totalorder %s263_s0, %s4818_s26  ;;  %p4824_p7 = scmp.lt.s32.totalorder %s4818_s26, %s4818_s26 }
  0xdd   :  { %p4825_p8 = por %p4824_p7, %p4823_p6 }
  0xdf   :  { %p4826_p9 = pnand %p4825_p8, %p4819_p5 }
  0xe1   :  { %4829 = shalt.err (!%p4826_p9)
}
  0xe2   :  { %265 = dma.hbm_to_vmem [thread:$0]  %s6341_s19, 32, %s263_s0, [#allocation33]  }
  0xe3   :  { %s5248_s29 = smov [#allocation35]   ;;  %s5249_s3 = smov [#allocation38]  }
  0xe4   :  { %s284_s11 = sshll.u32 %s5248_s29, 4  ;;  %s304_s6 = sshll.u32 %s5249_s3, 4  ;;  %s285_s11 = int_to_ptr.vmem [resolvable:$true] %s284_s11  ;;  %s305_s6 = int_to_ptr.vmem [resolvable:$true] %s304_s6 }
  0xe5   :  { %s4830_s25 = scalar_lea.hbm %s6343_s21, 16 }
  0xe6   :  { %p4831_p10 = scmp.ne.s32.totalorder %s6343_s21, %s4830_s25  ;;  %p4834_p11 = scmp.lt.u32.totalorder %s4830_s25, %s6343_s21 }
  0xe8   :  { %p4836_p12 = pnand %p4834_p11, %p4831_p10 }
  0xea   :  { %4839 = shalt.err (!%p4836_p12)
}
  0xeb   :  { %s4840_s19 = scalar_lea.vmem %s285_s11, 16  ;;  %s4844_s0 = scalar_lea.vmem %s285_s11, 32 }
  0xec   :  { %p4841_p13 = scmp.ne.s32.totalorder %s285_s11, %s4840_s19  ;;  %p4845_p0 = scmp.lt.s32.totalorder %s285_s11, %s285_s11 }
  0xed   :  { %p4846_p1 = scmp.lt.s32.totalorder %s4844_s0, %s4840_s19 }
  0xef   :  { %p4847_p2 = por %p4846_p1, %p4845_p0 }
  0xf1   :  { %p4848_p3 = pnand %p4847_p2, %p4841_p13 }
  0xf3   :  { %4851 = shalt.err (!%p4848_p3)
}
  0xf4   :  { %287 = dma.hbm_to_vmem [thread:$0]  %s6343_s21, 16, %s285_s11, [#allocation36]  }
  0xf5   :  { %s4852_s13 = scalar_lea.hbm %s6345_s23, 16 }
  0xf6   :  { %p4853_p4 = scmp.ne.s32.totalorder %s6345_s23, %s4852_s13  ;;  %p4856_p5 = scmp.lt.u32.totalorder %s4852_s13, %s6345_s23 }
  0xf8   :  { %p4858_p6 = pnand %p4856_p5, %p4853_p4 }
  0xfa   :  { %4861 = shalt.err (!%p4858_p6)
}
  0xfb   :  { %s4862_s10 = scalar_lea.vmem %s305_s6, 16  ;;  %s4866_s29 = scalar_lea.vmem %s305_s6, 32 }
  0xfc   :  { %p4863_p7 = scmp.ne.s32.totalorder %s305_s6, %s4862_s10  ;;  %p4867_p8 = scmp.lt.s32.totalorder %s305_s6, %s305_s6 }
  0xfd   :  { %p4868_p9 = scmp.lt.s32.totalorder %s4866_s29, %s4862_s10 }
  0xff   :  { %p4869_p10 = por %p4868_p9, %p4867_p8 }
 0x101   :  { %p4870_p11 = pnand %p4869_p10, %p4863_p7 }
 0x103   :  { %4873 = shalt.err (!%p4870_p11)
}
 0x104   :  { %307 = dma.hbm_to_vmem [thread:$0]  %s6345_s23, 16, %s305_s6, [#allocation39]  }
 0x105   :  { %s5250_s3 = smov [#allocation2]   ;;  %s5251_s24 = smov [#allocation7]  }
 0x106   :  { %s51_s7 = sshll.u32 %s5250_s3, 4  ;;  %s75_s25 = sshll.u32 %s5251_s24, 4  ;;  %s52_s7 = int_to_ptr.vmem [resolvable:$true] %s51_s7  ;;  %s5563_s25 = int_to_ptr.vmem [resolvable:$true] %s75_s25 }
 0x107   :  { %s6386_s28 = sld [smem:[#allocation59_spill]] }
 0x10d   :  { %s4874_s1 = scalar_lea.hbm %s6386_s28, 256 }
 0x10e   :  { %p4875_p12 = scmp.ne.s32.totalorder %s6386_s28, %s4874_s1  ;;  %p4878_p13 = scmp.lt.u32.totalorder %s4874_s1, %s6386_s28 }
 0x110   :  { %p4880_p0 = pnand %p4878_p13, %p4875_p12 }
 0x112   :  { %4883 = shalt.err (!%p4880_p0)
}
 0x113   :  { %s4884_s23 = scalar_lea.vmem %s52_s7, 256  ;;  %p4889_p2 = scmp.lt.s32.totalorder %s52_s7, %s52_s7 }
 0x114   :  { %p4885_p1 = scmp.ne.s32.totalorder %s52_s7, %s4884_s23  ;;  %p4890_p3 = scmp.lt.s32.totalorder %s4884_s23, %s4884_s23 }
 0x116   :  { %p4891_p4 = por %p4890_p3, %p4889_p2 }
 0x118   :  { %p4892_p5 = pnand %p4891_p4, %p4885_p1 }
 0x11a   :  { %4895 = shalt.err (!%p4892_p5)
}
 0x11b   :  { %s6387_s6 = smov 8   ;;  %s6388_s2 = smov 128  }
 0x11c   :  { %57 = dma.hbm_to_vmem [thread:$0]  %s6386_s28, 256, %s52_s7, [#allocation3], %s6388_s2, %s6388_s2, %s6387_s6  }
 0x11d   :  { %s6389_s26 = sld [smem:[#allocation61_spill]] }
 0x123   :  { %s4896_s17 = scalar_lea.hbm %s6389_s26, 1024 }
 0x124   :  { %p4897_p6 = scmp.ne.s32.totalorder %s6389_s26, %s4896_s17  ;;  %p4900_p7 = scmp.lt.u32.totalorder %s4896_s17, %s6389_s26 }
 0x126   :  { %p4902_p8 = pnand %p4900_p7, %p4897_p6 }
 0x128   :  { %4905 = shalt.err (!%p4902_p8)
}
 0x129   :  { %s4906_s3 = scalar_lea.vmem %s5563_s25, 1024  ;;  %p4911_p10 = scmp.lt.s32.totalorder %s5563_s25, %s5563_s25 }
 0x12a   :  { %p4907_p9 = scmp.ne.s32.totalorder %s5563_s25, %s4906_s3  ;;  %p4912_p11 = scmp.lt.s32.totalorder %s4906_s3, %s4906_s3 }
 0x12c   :  { %p4913_p12 = por %p4912_p11, %p4911_p10 }
 0x12e   :  { %p4914_p13 = pnand %p4913_p12, %p4907_p9 }
 0x130   :  { %4917 = shalt.err (!%p4914_p13)
}
 0x131   :  { %81 = dma.hbm_to_vmem [thread:$0]  %s6389_s26, 1024, %s5563_s25, [#allocation6], %s6388_s2, %s6388_s2, %s6387_s6  }
 0x132   :  { %s5252_s15 = smov [#allocation10]   ;;  %s6390_s19 = sld [smem:[#allocation63_spill]] }
 0x133   :  { %s99_s27 = sshll.u32 %s5252_s15, 4  ;;  %s100_s27 = int_to_ptr.vmem [resolvable:$true] %s99_s27 }
 0x138   :  { %s4918_s0 = scalar_lea.hbm %s6390_s19, 3072 }
 0x139   :  { %p4919_p0 = scmp.ne.s32.totalorder %s6390_s19, %s4918_s0  ;;  %p4922_p1 = scmp.lt.u32.totalorder %s4918_s0, %s6390_s19 }
 0x13b   :  { %p4924_p2 = pnand %p4922_p1, %p4919_p0 }
 0x13d   :  { %4927 = shalt.err (!%p4924_p2)
}
 0x13e   :  { %s4928_s13 = scalar_lea.vmem %s100_s27, 3072  ;;  %p4933_p4 = scmp.lt.s32.totalorder %s100_s27, %s100_s27 }
 0x13f   :  { %p4929_p3 = scmp.ne.s32.totalorder %s100_s27, %s4928_s13  ;;  %p4934_p5 = scmp.lt.s32.totalorder %s4928_s13, %s4928_s13 }
 0x141   :  { %p4935_p6 = por %p4934_p5, %p4933_p4 }
 0x143   :  { %p4936_p7 = pnand %p4935_p6, %p4929_p3 }
 0x145   :  { %4939 = shalt.err (!%p4936_p7)
}
 0x146   :  { %s5253_s25 = smov 192   ;;  %s5254_s9 = smov 12  }
 0x147   :  { %105 = dma.hbm_to_vmem [thread:$0]  %s6390_s19, 3072, %s100_s27, [#allocation9], %s5253_s25, %s5253_s25, %s5254_s9  }
 0x148   :  { %s5255_s17 = smov [#allocation13]   ;;  %s6391_s11 = sld [smem:[#allocation65_spill]] }
 0x149   :  { %s121_s10 = sshll.u32 %s5255_s17, 4  ;;  %s122_s10 = int_to_ptr.vmem [resolvable:$true] %s121_s10 }
 0x14e   :  { %s4940_s3 = scalar_lea.hbm %s6391_s11, 1024 }
 0x14f   :  { %p4941_p8 = scmp.ne.s32.totalorder %s6391_s11, %s4940_s3  ;;  %p4944_p9 = scmp.lt.u32.totalorder %s4940_s3, %s6391_s11 }
 0x151   :  { %p4946_p10 = pnand %p4944_p9, %p4941_p8 }
 0x153   :  { %4949 = shalt.err (!%p4946_p10)
}
 0x154   :  { %s4950_s1 = scalar_lea.vmem %s122_s10, 1024  ;;  %p4955_p12 = scmp.lt.s32.totalorder %s122_s10, %s122_s10 }
 0x155   :  { %p4951_p11 = scmp.ne.s32.totalorder %s122_s10, %s4950_s1  ;;  %p4956_p13 = scmp.lt.s32.totalorder %s4950_s1, %s4950_s1 }
 0x157   :  { %p4957_p0 = por %p4956_p13, %p4955_p12 }
 0x159   :  { %p4958_p1 = pnand %p4957_p0, %p4951_p11 }
 0x15b   :  { %4961 = shalt.err (!%p4958_p1)
}
 0x15c   :  { %s5256_s27 = smov 64   ;;  %s5257_s19 = smov 4  }
 0x15d   :  { %127 = dma.hbm_to_vmem [thread:$0]  %s6391_s11, 1024, %s122_s10, [#allocation12], %s5256_s27, %s5256_s27, %s5257_s19  }
 0x15e   :  { %s5258_s30 = smov [#allocation16]   ;;  %s5259_s5 = smov [#allocation19]  }
 0x15f   :  { %s144_s23 = sshll.u32 %s5258_s30, 4  ;;  %s163_s13 = sshll.u32 %s5259_s5, 4  ;;  %s145_s23 = int_to_ptr.vmem [resolvable:$true] %s144_s23  ;;  %s5627_s13 = int_to_ptr.vmem [resolvable:$true] %s163_s13 }
 0x160   :  { %s6392_s4 = sld [smem:[#allocation67_spill]] }
 0x166   :  { %s4962_s26 = scalar_lea.hbm %s6392_s4, 16 }
 0x167   :  { %p4963_p2 = scmp.ne.s32.totalorder %s6392_s4, %s4962_s26  ;;  %p4966_p3 = scmp.lt.u32.totalorder %s4962_s26, %s6392_s4 }
 0x169   :  { %p4968_p4 = pnand %p4966_p3, %p4963_p2 }
 0x16b   :  { %4971 = shalt.err (!%p4968_p4)
}
 0x16c   :  { %s4972_s10 = scalar_lea.vmem %s145_s23, 16  ;;  %s4976_s11 = scalar_lea.vmem %s145_s23, 32 }
 0x16d   :  { %p4973_p5 = scmp.ne.s32.totalorder %s145_s23, %s4972_s10  ;;  %p4977_p6 = scmp.lt.s32.totalorder %s145_s23, %s145_s23 }
 0x16e   :  { %p4978_p7 = scmp.lt.s32.totalorder %s4976_s11, %s4972_s10 }
 0x170   :  { %p4979_p8 = por %p4978_p7, %p4977_p6 }
 0x172   :  { %p4980_p9 = pnand %p4979_p8, %p4973_p5 }
 0x174   :  { %4983 = shalt.err (!%p4980_p9)
}
 0x175   :  { %147 = dma.hbm_to_vmem [thread:$0]  %s6392_s4, 16, %s145_s23, [#allocation15]  }
 0x176   :  { %s6393_s1 = sld [smem:[#allocation69_spill]] }
 0x17c   :  { %s4984_s0 = scalar_lea.hbm %s6393_s1, 1024 }
 0x17d   :  { %p4985_p10 = scmp.ne.s32.totalorder %s6393_s1, %s4984_s0  ;;  %p4988_p11 = scmp.lt.u32.totalorder %s4984_s0, %s6393_s1 }
 0x17f   :  { %p4990_p12 = pnand %p4988_p11, %p4985_p10 }
 0x181   :  { %4993 = shalt.err (!%p4990_p12)
}
 0x182   :  { %s4994_s9 = scalar_lea.vmem %s5627_s13, 1024  ;;  %p4999_p0 = scmp.lt.s32.totalorder %s5627_s13, %s5627_s13 }
 0x183   :  { %p4995_p13 = scmp.ne.s32.totalorder %s5627_s13, %s4994_s9  ;;  %p5000_p1 = scmp.lt.s32.totalorder %s4994_s9, %s4994_s9 }
 0x185   :  { %p5001_p2 = por %p5000_p1, %p4999_p0 }
 0x187   :  { %p5002_p3 = pnand %p5001_p2, %p4995_p13 }
 0x189   :  { %5005 = shalt.err (!%p5002_p3)
}
 0x18a   :  { %169 = dma.hbm_to_vmem [thread:$0]  %s6393_s1, 1024, %s5627_s13, [#allocation18], %s5256_s27, %s5256_s27, %s5257_s19  }
 0x18b   :  { %s5260_s26 = smov [#allocation22]   ;;  %s5261_s29 = smov [#allocation25]  }
 0x18c   :  { %s185_s17 = sshll.u32 %s5260_s26, 4  ;;  %s207_s21 = sshll.u32 %s5261_s29, 4  ;;  %s186_s17 = int_to_ptr.vmem [resolvable:$true] %s185_s17  ;;  %s5661_s21 = int_to_ptr.vmem [resolvable:$true] %s207_s21 }
 0x18d   :  { %s5006_s11 = scalar_lea.hbm %s6334_s12, 2048 }
 0x18e   :  { %p5007_p4 = scmp.ne.s32.totalorder %s6334_s12, %s5006_s11  ;;  %p5010_p5 = scmp.lt.u32.totalorder %s5006_s11, %s6334_s12 }
 0x190   :  { %p5012_p6 = pnand %p5010_p5, %p5007_p4 }
 0x192   :  { %5015 = shalt.err (!%p5012_p6)
}
 0x193   :  { %s5016_s13 = scalar_lea.vmem %s186_s17, 2048  ;;  %p5021_p8 = scmp.lt.s32.totalorder %s186_s17, %s186_s17 }
 0x194   :  { %p5017_p7 = scmp.ne.s32.totalorder %s186_s17, %s5016_s13  ;;  %p5022_p9 = scmp.lt.s32.totalorder %s5016_s13, %s5016_s13 }
 0x196   :  { %p5023_p10 = por %p5022_p9, %p5021_p8 }
 0x198   :  { %p5024_p11 = pnand %p5023_p10, %p5017_p7 }
 0x19a   :  { %5027 = shalt.err (!%p5024_p11)
}
 0x19b   :  { %191 = dma.hbm_to_vmem [thread:$0]  %s6334_s12, 2048, %s186_s17, [#allocation21], %s6388_s2, %s6388_s2, %s6387_s6  }
 0x19c   :  { %s5028_s5 = scalar_lea.hbm %s6336_s14, 1024 }
 0x19d   :  { %p5029_p12 = scmp.ne.s32.totalorder %s6336_s14, %s5028_s5  ;;  %p5032_p13 = scmp.lt.u32.totalorder %s5028_s5, %s6336_s14 }
 0x19f   :  { %p5034_p0 = pnand %p5032_p13, %p5029_p12 }
 0x1a1   :  { %5037 = shalt.err (!%p5034_p0)
}
 0x1a2   :  { %s5038_s26 = scalar_lea.vmem %s5661_s21, 1024  ;;  %p5043_p2 = scmp.lt.s32.totalorder %s5661_s21, %s5661_s21 }
 0x1a3   :  { %p5039_p1 = scmp.ne.s32.totalorder %s5661_s21, %s5038_s26  ;;  %p5044_p3 = scmp.lt.s32.totalorder %s5038_s26, %s5038_s26 }
 0x1a5   :  { %p5045_p4 = por %p5044_p3, %p5043_p2 }
 0x1a7   :  { %p5046_p5 = pnand %p5045_p4, %p5039_p1 }
 0x1a9   :  { %5049 = shalt.err (!%p5046_p5)
}
 0x1aa   :  { %213 = dma.hbm_to_vmem [thread:$0]  %s6336_s14, 1024, %s5661_s21, [#allocation24], %s5256_s27, %s5256_s27, %s5257_s19  }
 0x1ab   :  { %s5262_s29 = smov [#allocation28]   ;;  %s5263_s10 = smov [#allocation31]  }
 0x1ac   :  { %s230_s3 = sshll.u32 %s5262_s29, 4  ;;  %s249_s11 = sshll.u32 %s5263_s10, 4  ;;  %s231_s3 = int_to_ptr.vmem [resolvable:$true] %s230_s3  ;;  %s5698_s11 = int_to_ptr.vmem [resolvable:$true] %s249_s11 }
 0x1ad   :  { %s5050_s15 = scalar_lea.hbm %s6338_s16, 16 }
 0x1ae   :  { %p5051_p6 = scmp.ne.s32.totalorder %s6338_s16, %s5050_s15  ;;  %p5054_p7 = scmp.lt.u32.totalorder %s5050_s15, %s6338_s16 }
 0x1b0   :  { %p5056_p8 = pnand %p5054_p7, %p5051_p6 }
 0x1b2   :  { %5059 = shalt.err (!%p5056_p8)
}
 0x1b3   :  { %s5060_s14 = scalar_lea.vmem %s231_s3, 16  ;;  %s5064_s21 = scalar_lea.vmem %s231_s3, 32 }
 0x1b4   :  { %p5061_p9 = scmp.ne.s32.totalorder %s231_s3, %s5060_s14  ;;  %p5065_p10 = scmp.lt.s32.totalorder %s231_s3, %s231_s3 }
 0x1b5   :  { %p5066_p11 = scmp.lt.s32.totalorder %s5064_s21, %s5060_s14 }
 0x1b7   :  { %p5067_p12 = por %p5066_p11, %p5065_p10 }
 0x1b9   :  { %p5068_p13 = pnand %p5067_p12, %p5061_p9 }
 0x1bb   :  { %5071 = shalt.err (!%p5068_p13)
}
 0x1bc   :  { %233 = dma.hbm_to_vmem [thread:$0]  %s6338_s16, 16, %s231_s3, [#allocation27]  }
 0x1bd   :  { %s5072_s9 = scalar_lea.hbm %s6340_s18, 2048 }
 0x1be   :  { %p5073_p0 = scmp.ne.s32.totalorder %s6340_s18, %s5072_s9  ;;  %p5076_p1 = scmp.lt.u32.totalorder %s5072_s9, %s6340_s18 }
 0x1c0   :  { %p5078_p2 = pnand %p5076_p1, %p5073_p0 }
 0x1c2   :  { %5081 = shalt.err (!%p5078_p2)
}
 0x1c3   :  { %s5082_s17 = scalar_lea.vmem %s5698_s11, 2048  ;;  %p5087_p4 = scmp.lt.s32.totalorder %s5698_s11, %s5698_s11 }
 0x1c4   :  { %p5083_p3 = scmp.ne.s32.totalorder %s5698_s11, %s5082_s17  ;;  %p5088_p5 = scmp.lt.s32.totalorder %s5082_s17, %s5082_s17 }
 0x1c6   :  { %p5089_p6 = por %p5088_p5, %p5087_p4 }
 0x1c8   :  { %p5090_p7 = pnand %p5089_p6, %p5083_p3 }
 0x1ca   :  { %5093 = shalt.err (!%p5090_p7)
}
 0x1cb   :  { %255 = dma.hbm_to_vmem [thread:$0]  %s6340_s18, 2048, %s5698_s11, [#allocation30], %s6388_s2, %s6388_s2, %s6387_s6  }
 0x1cc   :  { %s5264_s3 = smov [#allocation34]   ;;  %s5265_s7 = smov [#allocation37]  }
 0x1cd   :  { %s271_s10 = sshll.u32 %s5264_s3, 4  ;;  %s294_s24 = sshll.u32 %s5265_s7, 4  ;;  %s272_s10 = int_to_ptr.vmem [resolvable:$true] %s271_s10  ;;  %s295_s24 = int_to_ptr.vmem [resolvable:$true] %s294_s24 }
 0x1ce   :  { %s5094_s13 = scalar_lea.hbm %s6342_s20, 2048 }
 0x1cf   :  { %p5095_p8 = scmp.ne.s32.totalorder %s6342_s20, %s5094_s13  ;;  %p5098_p9 = scmp.lt.u32.totalorder %s5094_s13, %s6342_s20 }
 0x1d1   :  { %p5100_p10 = pnand %p5098_p9, %p5095_p8 }
 0x1d3   :  { %5103 = shalt.err (!%p5100_p10)
}
 0x1d4   :  { %s5104_s18 = scalar_lea.vmem %s272_s10, 2048  ;;  %p5109_p12 = scmp.lt.s32.totalorder %s272_s10, %s272_s10 }
 0x1d5   :  { %p5105_p11 = scmp.ne.s32.totalorder %s272_s10, %s5104_s18  ;;  %p5110_p13 = scmp.lt.s32.totalorder %s5104_s18, %s5104_s18 }
 0x1d7   :  { %p5111_p0 = por %p5110_p13, %p5109_p12 }
 0x1d9   :  { %p5112_p1 = pnand %p5111_p0, %p5105_p11 }
 0x1db   :  { %5115 = shalt.err (!%p5112_p1)
}
 0x1dc   :  { %277 = dma.hbm_to_vmem [thread:$0]  %s6342_s20, 2048, %s272_s10, [#allocation33], %s5256_s27, %s5256_s27, %s5257_s19  }
 0x1dd   :  { %s5116_s25 = scalar_lea.hbm %s6344_s22, 16 }
 0x1de   :  { %p5117_p2 = scmp.ne.s32.totalorder %s6344_s22, %s5116_s25  ;;  %p5120_p3 = scmp.lt.u32.totalorder %s5116_s25, %s6344_s22 }
 0x1e0   :  { %p5122_p4 = pnand %p5120_p3, %p5117_p2 }
 0x1e2   :  { %5125 = shalt.err (!%p5122_p4)
}
 0x1e3   :  { %s5126_s12 = scalar_lea.vmem %s295_s24, 16  ;;  %s5130_s17 = scalar_lea.vmem %s295_s24, 32 }
 0x1e4   :  { %p5127_p5 = scmp.ne.s32.totalorder %s295_s24, %s5126_s12  ;;  %p5131_p6 = scmp.lt.s32.totalorder %s295_s24, %s295_s24 }
 0x1e5   :  { %p5132_p7 = scmp.lt.s32.totalorder %s5130_s17, %s5126_s12 }
 0x1e7   :  { %p5133_p8 = por %p5132_p7, %p5131_p6 }
 0x1e9   :  { %p5134_p9 = pnand %p5133_p8, %p5127_p5 }
 0x1eb   :  { %5137 = shalt.err (!%p5134_p9)
}
 0x1ec   :  { %297 = dma.hbm_to_vmem [thread:$0]  %s6344_s22, 16, %s295_s24, [#allocation36]  }
 0x1ed   :  { %s5266_s16 = smov [#allocation40]   ;;  %s5267_s3 = smov [#allocation41]  }
 0x1ee   :  { %s314_s29 = sshll.u32 %s5266_s16, 4  ;;  %s324_s10 = sshll.u32 %s5267_s3, 4  ;;  %s315_s29 = int_to_ptr.vmem [resolvable:$true] %s314_s29  ;;  %s325_s10 = int_to_ptr.vmem [resolvable:$true] %s324_s10 }
 0x1ef   :  { %s6394_s28 = sld [smem:[#allocation70_spill]] }
 0x1f5   :  { %s5138_s13 = scalar_lea.hbm %s6394_s28, 16 }
 0x1f6   :  { %p5139_p10 = scmp.ne.s32.totalorder %s6394_s28, %s5138_s13  ;;  %p5142_p11 = scmp.lt.u32.totalorder %s5138_s13, %s6394_s28 }
 0x1f8   :  { %p5144_p12 = pnand %p5142_p11, %p5139_p10 }
 0x1fa   :  { %5147 = shalt.err (!%p5144_p12)
}
 0x1fb   :  { %s5148_s22 = scalar_lea.vmem %s315_s29, 16  ;;  %s5152_s24 = scalar_lea.vmem %s315_s29, 32 }
 0x1fc   :  { %p5149_p13 = scmp.ne.s32.totalorder %s315_s29, %s5148_s22  ;;  %p5153_p0 = scmp.lt.s32.totalorder %s315_s29, %s315_s29 }
 0x1fd   :  { %p5154_p1 = scmp.lt.s32.totalorder %s5152_s24, %s5148_s22 }
 0x1ff   :  { %p5155_p2 = por %p5154_p1, %p5153_p0 }
 0x201   :  { %p5156_p3 = pnand %p5155_p2, %p5149_p13 }
 0x203   :  { %5159 = shalt.err (!%p5156_p3)
}
 0x204   :  { %317 = dma.hbm_to_vmem [thread:$0]  %s6394_s28, 16, %s315_s29, [#allocation39]  }
 0x205   :  { %s6395_s5 = sld [smem:[#allocation71_spill]] }
 0x20b   :  { %s5160_s25 = scalar_lea.hbm %s6395_s5, 16 }
 0x20c   :  { %p5161_p4 = scmp.ne.s32.totalorder %s6395_s5, %s5160_s25  ;;  %p5164_p5 = scmp.lt.u32.totalorder %s5160_s25, %s6395_s5 }
 0x20e   :  { %p5166_p6 = pnand %p5164_p5, %p5161_p4 }
 0x210   :  { %5169 = shalt.err (!%p5166_p6)
}
 0x211   :  { %s5170_s12 = scalar_lea.vmem %s325_s10, 16  ;;  %s5174_s17 = scalar_lea.vmem %s325_s10, 32 }
 0x212   :  { %p5171_p7 = scmp.ne.s32.totalorder %s325_s10, %s5170_s12  ;;  %p5175_p8 = scmp.lt.s32.totalorder %s325_s10, %s325_s10 }
 0x213   :  { %p5176_p9 = scmp.lt.s32.totalorder %s5174_s17, %s5170_s12 }
 0x215   :  { %p5177_p10 = por %p5176_p9, %p5175_p8 }
 0x217   :  { %p5178_p11 = pnand %p5177_p10, %p5171_p7 }
 0x219   :  { %5181 = shalt.err (!%p5178_p11)
}
 0x21a   :  { %327 = dma.hbm_to_vmem [thread:$0]  %s6395_s5, 16, %s325_s10, [#allocation42]  }
 0x21b   :  { %5204 = dma.done.wait [#allocation3], 256  }
 0x21c   :  { %5205 = vsyncadd [#allocation3], 4294967040 }
 0x21d   :  { %5206 = dma.done.wait [#allocation6], 1536  }
 0x21e   :  { %5207 = vsyncadd [#allocation6], 4294965760 }
 0x21f   :  { %5208 = dma.done.wait [#allocation9], 3200  }
 0x220   :  { %5209 = vsyncadd [#allocation9], 4294964096 }
 0x221   :  { %5210 = dma.done.wait [#allocation12], 1072  }
 0x222   :  { %5211 = vsyncadd [#allocation12], 4294966224 }
 0x223   :  { %5212 = dma.done.wait [#allocation15], 32  }
 0x224   :  { %5213 = vsyncadd [#allocation15], 4294967264 }
 0x225   :  { %5214 = dma.done.wait [#allocation18], 1040  }
 0x226   :  { %5215 = vsyncadd [#allocation18], 4294966256 }
 0x227   :  { %5216 = dma.done.wait [#allocation21], 2064  }
 0x228   :  { %5217 = vsyncadd [#allocation21], 4294965232 }
 0x229   :  { %5218 = dma.done.wait [#allocation24], 1056  }
 0x22a   :  { %5219 = vsyncadd [#allocation24], 4294966240 }
 0x22b   :  { %5220 = dma.done.wait [#allocation27], 32  }
 0x22c   :  { %5221 = vsyncadd [#allocation27], 4294967264 }
 0x22d   :  { %5222 = dma.done.wait [#allocation30], 2064  }
 0x22e   :  { %5223 = vsyncadd [#allocation30], 4294965232 }
 0x22f   :  { %5224 = dma.done.wait [#allocation33], 2080  }
 0x230   :  { %5225 = vsyncadd [#allocation33], 4294965216 }
 0x231   :  { %5226 = dma.done.wait [#allocation36], 32  }
 0x232   :  { %5227 = vsyncadd [#allocation36], 4294967264 }
 0x233   :  { %5228 = dma.done.wait [#allocation39], 32  }
 0x234   :  { %5229 = vsyncadd [#allocation39], 4294967264 }
 0x235   :  { %5230 = dma.done.wait [#allocation42], 16  }
 0x236   :  { %5231 = vsyncadd [#allocation42], 4294967280  ;;  %v407_v0 = vld [vmem:[#allocation2] sm:$0xff]  ;;  %v408_v1 = vld [vmem:[#allocation2 + $0x8] sm:$0xff]  ;;  %v5268_v13 = vmov 0.0   ;;  %v5269_v27 = vmov 0   ;;  %v503_v63 = vlaneseq }
 0x237   :  { %413 = vadd.xlane.f32.xlu0 %v407_v0  ;;  %v4400_v10 = vld [vmem:[#allocation10 + $0x4] ss:$12 sps:$4 sm:$0xff]   ;;  %v4402_v11 = vld [vmem:[#allocation10] ss:$12 sps:$4 sm:$0xff]   ;;  %v4403_v12 = vld [vmem:[#allocation10 + $0x8] ss:$12 sps:$4 sm:$0xff]   ;;  %3998 = vmatprep.subr.bf16.mxu1 %v5268_v13 }
 0x238   :  { %646 = vmatprep.subr.bf16.mxu0 %v4400_v10  ;;  %3999 = vmatpush3.bf16.msra.mxu1 %v4403_v12  ;;  %v4404_v14 = vld [vmem:[#allocation10 + $0x1c] ss:$12 sps:$4 sm:$0xff]   ;;  %v4406_v15 = vld [vmem:[#allocation10 + $0x18] ss:$12 sps:$4 sm:$0xff]   ;;  %v4407_v16 = vld [vmem:[#allocation10 + $0x20] ss:$12 sps:$4 sm:$0xff]  }
 0x239   :  { %647 = vmatpush1.bf16.msra.mxu0 %v4402_v11  ;;  %4000 = vmatprep.subr.bf16.mxu1 %v5268_v13  ;;  %v4408_v17 = vld [vmem:[#allocation10 + $0x34] ss:$12 sps:$4 sm:$0xff]   ;;  %v4410_v18 = vld [vmem:[#allocation10 + $0x30] ss:$12 sps:$4 sm:$0xff]   ;;  %v4411_v19 = vld [vmem:[#allocation10 + $0x38] ss:$12 sps:$4 sm:$0xff]  }
 0x23a   :  { %648 = vmatprep.subr.bf16.mxu0 %v4404_v14  ;;  %v4412_v20 = vld [vmem:[#allocation10 + $0x4c] ss:$12 sps:$4 sm:$0xff]   ;;  %v4414_v21 = vld [vmem:[#allocation10 + $0x48] ss:$12 sps:$4 sm:$0xff]   ;;  %v4415_v22 = vld [vmem:[#allocation10 + $0x50] ss:$12 sps:$4 sm:$0xff]   ;;  %678 = vmatprep.mubr.bf16.mxu0 %v5269_v27 }
 0x23b   :  { %415 = vadd.xlane.f32.xlu0 %v408_v1  ;;  %v4416_v23 = vld [vmem:[#allocation10 + $0x64] ss:$12 sps:$4 sm:$0xff]   ;;  %v4418_v24 = vld [vmem:[#allocation10 + $0x60] ss:$12 sps:$4 sm:$0xff]   ;;  %v4419_v25 = vld [vmem:[#allocation10 + $0x68] ss:$12 sps:$4 sm:$0xff]  }
 0x23c   :  { %4001 = vmatpush3.bf16.msra.mxu1 %v4407_v16  ;;  %v4420_v26 = vld [vmem:[#allocation10 + $0x7c] ss:$12 sps:$4 sm:$0xff]   ;;  %vm5270_vm0 = vmmov 0   ;;  %v4422_v28 = vld [vmem:[#allocation10 + $0x78] ss:$12 sps:$4 sm:$0xff]   ;;  %s5271_s16 = smov 96  }
 0x23d   :  { %649 = vmatpush1.bf16.msra.mxu0 %v4406_v15  ;;  %4002 = vmatprep.subr.bf16.mxu1 %v5268_v13  ;;  %v4423_v29 = vld [vmem:[#allocation10 + $0x80] ss:$12 sps:$4 sm:$0xff]   ;;  %v4426_v31 = vld [vmem:[#allocation10 + $0x90] ss:$12 sps:$4 sm:$0xff]   ;;  %v4427_v32 = vld [vmem:[#allocation10 + $0x98] ss:$12 sps:$4 sm:$0xff]  }
 0x23e   :  { %650 = vmatprep.subr.bf16.mxu0 %v4408_v17  ;;  %4014 = vmatprep.mubr.msk.bf16.mxu1 %vm5270_vm0, %v5268_v13  ;;  %v4424_v30 = vld [vmem:[#allocation10 + $0x94] ss:$12 sps:$4 sm:$0xff]   ;;  %v4428_v33 = vld [vmem:[#allocation10 + $0xac] ss:$12 sps:$4 sm:$0xff]   ;;  %v4431_v35 = vld [vmem:[#allocation10 + $0xb0] ss:$12 sps:$4 sm:$0xff]  }
 0x23f   :  { %v4430_v34 = vld [vmem:[#allocation10 + $0xa8] ss:$12 sps:$4 sm:$0xff]   ;;  %v3738_v52 = vld [vmem:[#allocation16] ss:$0 sm:$0xff]  ;;  %vm822_vm5 = vcmask 261120   ;;  %s5272_s29 = smov 32  }
 0x240   :  { %4003 = vmatpush3.bf16.msra.mxu1 %v4411_v19  ;;  %v3739_v58 = vld [vmem:[#allocation17] ss:$0 sm:$0xff]  ;;  %vm1315_vm6 = vcmask 1043456   ;;  %vm1215_vm8 = vcmask 64512  }
 0x241   :  { %651 = vmatpush1.bf16.msra.mxu0 %v4410_v18  ;;  %4004 = vmatprep.subr.bf16.mxu1 %v5268_v13 }
 0x242   :  { %652 = vmatprep.subr.bf16.mxu0 %v4412_v20 }
 0x244   :  { %4005 = vmatpush3.bf16.msra.mxu1 %v4415_v22 }
 0x245   :  { %653 = vmatpush1.bf16.msra.mxu0 %v4414_v21  ;;  %4006 = vmatprep.subr.bf16.mxu1 %v5268_v13 }
 0x246   :  { %654 = vmatprep.subr.bf16.mxu0 %v4416_v23 }
 0x248   :  { %4007 = vmatpush3.bf16.msra.mxu1 %v4419_v25 }
 0x249   :  { %655 = vmatpush1.bf16.msra.mxu0 %v4418_v24  ;;  %4008 = vmatprep.subr.bf16.mxu1 %v5268_v13 }
 0x24a   :  { %656 = vmatprep.subr.bf16.mxu0 %v4420_v26 }
 0x24c   :  { %4009 = vmatpush3.bf16.msra.mxu1 %v4423_v29 }
 0x24d   :  { %657 = vmatpush1.bf16.msra.mxu0 %v4422_v28  ;;  %4010 = vmatprep.subr.bf16.mxu1 %v5268_v13 }
 0x24e   :  { %658 = vmatprep.subr.bf16.mxu0 %v4424_v30 }
 0x250   :  { %4011 = vmatpush3.bf16.msra.mxu1 %v4427_v32 }
 0x251   :  { %659 = vmatpush1.bf16.msra.mxu0 %v4426_v31  ;;  %4012 = vmatprep.subr.bf16.mxu1 %v5268_v13 }
 0x252   :  { %660 = vmatprep.subr.bf16.mxu0 %v4428_v33 }
 0x254   :  { %4013 = vmatpush3.bf16.msra.mxu1 %v4431_v35 }
 0x255   :  { %661 = vmatpush1.bf16.msra.mxu0 %v4430_v34  ;;  %4036 = vmatprep.subr.bf16.mxu1 %v5268_v13 }
 0x256   :  { %4018 = vmatprep.subr.bf16.mxu0 %v5268_v13 }
 0x2c4   :  { %v414_v2 = vpop.xlane.xlu0 %413 }
 0x2c5   :  { %v418_v3 = vmul.f32 0.0078125, %v414_v2  ;;  %v501_v2 = vld [vmem:[#allocation11] sm:$0x7] }
 0x2c7   :  { %v5783_v4 = vsub.f32 %v407_v0, %v418_v3  ;;  %v504_v0 = vshrl.u32 %v503_v63, 7 }
 0x2c8   :  { %v416_v5 = vpop.xlane.xlu0 %415 }
 0x2c9   :  { %v419_v6 = vmul.f32 0.0078125, %v416_v5  ;;  %v422_v7 = vmul.f32 %v5783_v4, %v5783_v4  ;;  %v455_v54 = vmul.f32 %v3738_v52, %v5783_v4  ;;  %v5812_v3 = vsub.s32 1, %v504_v0 }
 0x2ca   :  { %v513_v5 = vsub.s32 2, %v504_v0 }
 0x2cb   :  { %v5787_v8 = vsub.f32 %v408_v1, %v419_v6  ;;  %424 = vadd.xlane.f32.xlu1 %v422_v7  ;;  %v5810_v1 = vsub.s32 0, %v504_v0  ;;  %v510_v6 = vrot.slane %v501_v2, %v5812_v3 }
 0x2cc   :  { %v5818_v10 = vrot.slane %v501_v2, %v513_v5 }
 0x2cd   :  { %v423_v9 = vmul.f32 %v5787_v8, %v5787_v8  ;;  %v456_v55 = vmul.f32 %v3738_v52, %v5787_v8  ;;  %v506_v4 = vrot.slane %v501_v2, %v5810_v1 }
 0x2cf   :  { %426 = vadd.xlane.f32.xlu1 %v423_v9 }
 0x358   :  { %v425_v36 = vpop.xlane.xlu1 %424 }
 0x359   :  { %v428_v37 = vmul.f32 0.007874016, %v425_v36 }
 0x35b   :  { %4520 = vrsqrt.f32 %v428_v37  ;;  %vm432_vm1 = vcmp.eq.f32.partialorder %v428_v37, inf  ;;  %v435_v42 = vand.u32 2147483648, %v428_v37  ;;  %vm434_vm2 = vcmp.eq.f32.partialorder %v428_v37, 0.0 }
 0x35c   :  { %v427_v38 = vpop.xlane.xlu1 %426 }
 0x35d   :  { %v429_v39 = vmul.f32 0.007874016, %v427_v38 }
 0x35f   :  { %4522 = vrsqrt.f32 %v429_v39  ;;  %vm439_vm3 = vcmp.eq.f32.partialorder %v429_v39, inf  ;;  %v442_v48 = vand.u32 2147483648, %v429_v39  ;;  %vm441_vm4 = vcmp.eq.f32.partialorder %v429_v39, 0.0 }
 0x365   :  { %v4521_v40 = vpop.eup %4520 }
 0x366   :  { %v431_v41 = vmul.f32 %v4521_v40, %v428_v37 }
 0x368   :  { %v433_v43 = vsel %vm432_vm1, %v428_v37, %v431_v41  ;;  %vm1694_vm1 = vcmask 523264  }
 0x369   :  { %v4523_v44 = vpop.eup %4522  ;;  %v436_v45 = vsel %vm434_vm2, %v435_v42, %v433_v43  ;;  %vm1696_vm2 = vcmask 785408  }
 0x36a   :  { %v438_v46 = vmul.f32 %v4523_v44, %v429_v39  ;;  %v444_v47 = vadd.f32 1e-06, %v436_v45 }
 0x36c   :  { %v440_v49 = vsel %vm439_vm3, %v429_v39, %v438_v46  ;;  %4524 = vrcp.f32 %v444_v47 }
 0x36d   :  { %v443_v50 = vsel %vm441_vm4, %v442_v48, %v440_v49 }
 0x36e   :  { %v445_v51 = vadd.f32 1e-06, %v443_v50 }
 0x370   :  { %4526 = vrcp.f32 %v445_v51 }
 0x376   :  { %v4525_v53 = vpop.eup %4524 }
 0x377   :  { %v457_v56 = vmul.f32 %v4525_v53, %v455_v54 }
 0x379   :  { %v466_v60 = vadd.f32 %v3739_v58, %v457_v56 }
 0x37a   :  { %v4527_v57 = vpop.eup %4526 }
 0x37b   :  { %v458_v59 = vmul.f32 %v4527_v57, %v456_v55 }
 0x37d   :  { %v467_v61 = vadd.f32 %v3739_v58, %v458_v59 }
 0x37f   :  { %v468_v62 = vpack.c.bf16 %v467_v61, %v466_v60 }
 0x381   :  { %679 = vmatmul.mubr.bf16.vlgmr.msra.gmra.mrb[0].mxu0 %v468_v62  ;;  %4015 = vmatmul.mubr.bf16.vlgmr.msra.gmra.mrb[0].mxu1 %v468_v62  ;;  %v730_v62 = vld [vmem:[#allocation7] sm:$0xff] }
 0x382   :  { %4020 = vmatprep.mubr.msk.bf16.mxu0 %vm5270_vm0, %v5268_v13  ;;  %4038 = vmatprep.mubr.msk.bf16.mxu1 %vm5270_vm0, %v5268_v13  ;;  %vm1199_vm7 = vcmp.eq.f32.partialorder %v730_v62, 0.0 }
 0x454   :  { %v680_v7 = vpop.f32.mrb[0].mxu0  ;;  %v5816_v8 = vpop.f32.mrb[0].mxu1 }
 0x455   :  { %v681_v9 = vadd.f32 %v680_v7, %v506_v4  ;;  %v682_v11 = vpop.f32.mrb[1].mxu0  ;;  %v4016_v12 = vpop.f32.mrb[1].mxu1  ;;  %v5863_v54 = vadd.f32 %v5816_v8, %v5818_v10  ;;  %v731_v8 = vld [vmem:[#allocation7 + $0x8] sm:$0xff] }
 0x456   :  { %v683_v14 = vadd.f32 %v682_v11, %v510_v6  ;;  %v684_v15 = vpop.f32.mrb[2].mxu0  ;;  %v726_v16 = vpop.f32.mrb[2].mxu1  ;;  %vm1200_vm9 = vcmp.eq.f32.partialorder %v731_v8, 0.0 }
 0x457   :  { %v5821_v17 = vadd.f32 %v726_v16, %v5818_v10  ;;  %v686_v18 = vpop.f32.mrb[3].mxu0  ;;  %v4017_v19 = vpop.f32.mrb[3].mxu1  ;;  %739 = vrot.lane.b32.xlu1 %v681_v9, %s5271_s16  ;;  %v758_v23 = vpack.c.bf16 %v681_v9, %v681_v9  ;;  %v685_v24 = vadd.f32 %v684_v15, %v506_v4  ;;  %v814_v58 = vpack.c.bf16 %v5863_v54, %v5863_v54 }
 0x458   :  { %767 = vrot.lane.b32.xlu0 %v683_v14, %s5271_s16  ;;  %v786_v20 = vpack.c.bf16 %v683_v14, %v683_v14  ;;  %v687_v22 = vadd.f32 %v686_v18, %v510_v6  ;;  %v733_v18 = vld [vmem:[#allocation7 + $0x18] sm:$0xff]  ;;  %v732_v19 = vld [vmem:[#allocation7 + $0x10] sm:$0xff] }
 0x459   :  { %v762_v52 = vpack.c.bf16 %v685_v24, %v685_v24  ;;  %v1317_v61 = vsel %vm1315_vm6, %v814_v58, 0  ;;  %vm1202_vm10 = vcmp.eq.f32.partialorder %v733_v18, 0.0  ;;  %vm1201_vm11 = vcmp.eq.f32.partialorder %v732_v19, 0.0 }
 0x45a   :  { %v827_v21 = vsel %vm822_vm5, %v786_v20, 0  ;;  %v790_v42 = vpack.c.bf16 %v687_v22, %v687_v22 }
 0x45b   :  { %4019 = vmatpush3.bf16.xpose.msra.mxu0 %v827_v21  ;;  %770 = vrot.lane.b32.xlu1 %v683_v14, %s5256_s27 }
 0x45c   :  { %742 = vrot.lane.b32.xlu0 %v681_v9, %s5256_s27  ;;  %4024 = vmatprep.subr.bf16.mxu0 %v5268_v13  ;;  %v1011_v47 = vsel %vm822_vm5, %v790_v42, 0 }
 0x45f   :  { %773 = vrot.lane.b32.xlu1 %v683_v14, %s5272_s29 }
 0x460   :  { %777 = vrot.lane.b32.xlu0 %v687_v22, %s5271_s16 }
 0x462   :  { %4021 = vmatmul.mubr.msk.bf16.vlgmr.msra.gmra.mrb[4].mxu0 %vm822_vm5, %v758_v23 }
 0x463   :  { %745 = vrot.lane.b32.xlu1 %v681_v9, %s5272_s29  ;;  %4026 = vmatprep.mubr.msk.bf16.mxu0 %vm5270_vm0, %v5268_v13 }
 0x464   :  { %749 = vrot.lane.b32.xlu0 %v685_v24, %s5271_s16 }
 0x467   :  { %780 = vrot.lane.b32.xlu1 %v687_v22, %s5256_s27 }
 0x468   :  { %752 = vrot.lane.b32.xlu0 %v685_v24, %s5256_s27 }
 0x46b   :  { %783 = vrot.lane.b32.xlu1 %v687_v22, %s5272_s29 }
 0x46f   :  { %755 = vrot.lane.b32.xlu1 %v685_v24, %s5272_s29 }
 0x4c9   :  { %v740_v25 = vpop.permute.xlu1 %739 }
 0x4ca   :  { %v768_v26 = vpop.permute.xlu0 %767  ;;  %v759_v35 = vpack.c.bf16 %v740_v25, %v740_v25 }
 0x4cb   :  { %v787_v28 = vpack.c.bf16 %v768_v26, %v768_v26 }
 0x4cd   :  { %v873_v29 = vsel %vm822_vm5, %v787_v28, 0  ;;  %v771_v30 = vpop.permute.xlu1 %770 }
 0x4ce   :  { %4025 = vmatpush3.bf16.xpose.msra.mxu0 %v873_v29  ;;  %v743_v31 = vpop.permute.xlu0 %742  ;;  %v788_v32 = vpack.c.bf16 %v771_v30, %v771_v30 }
 0x4cf   :  { %4030 = vmatprep.subr.bf16.mxu0 %v5268_v13  ;;  %v760_v44 = vpack.c.bf16 %v743_v31, %v743_v31 }
 0x4d0   :  { %v919_v37 = vsel %vm822_vm5, %v788_v32, 0 }
 0x4d1   :  { %v774_v33 = vpop.permute.xlu1 %773 }
 0x4d2   :  { %v789_v34 = vpack.c.bf16 %v774_v33, %v774_v33  ;;  %v778_v38 = vpop.permute.xlu0 %777 }
 0x4d3   :  { %v791_v40 = vpack.c.bf16 %v778_v38, %v778_v38 }
 0x4d4   :  { %v965_v36 = vsel %vm822_vm5, %v789_v34, 0  ;;  %v735_v34 = vld [vmem:[#allocation7 + $0x28] sm:$0xff] }
 0x4d5   :  { %4037 = vmatpush3.bf16.xpose.msra.mxu1 %v965_v36  ;;  %v746_v39 = vpop.permute.xlu1 %745  ;;  %4027 = vmatmul.mubr.msk.bf16.vlgmr.msra.gmra.mrb[8].mxu0 %vm822_vm5, %v759_v35  ;;  %v1057_v45 = vsel %vm822_vm5, %v791_v40, 0  ;;  %v734_v35 = vld [vmem:[#allocation7 + $0x20] sm:$0xff]  ;;  %vm1204_vm12 = vcmp.eq.f32.partialorder %v735_v34, 0.0 }
 0x4d6   :  { %4031 = vmatpush3.bf16.xpose.msra.mxu0 %v919_v37  ;;  %4032 = vmatprep.mubr.msk.bf16.mxu0 %vm5270_vm0, %v5268_v13  ;;  %v761_v43 = vpack.c.bf16 %v746_v39, %v746_v39  ;;  %v750_v48 = vpop.permute.xlu0 %749  ;;  %vm1203_vm13 = vcmp.eq.f32.partialorder %v734_v35, 0.0 }
 0x4d7   :  { %4048 = vmatprep.subr.bf16.mxu1 %v5268_v13  ;;  %4042 = vmatprep.subr.bf16.mxu0 %v5268_v13  ;;  %v763_v51 = vpack.c.bf16 %v750_v48, %v750_v48 }
 0x4d9   :  { %v781_v41 = vpop.permute.xlu1 %780 }
 0x4da   :  { %v792_v50 = vpack.c.bf16 %v781_v41, %v781_v41  ;;  %v753_v57 = vpop.permute.xlu0 %752 }
 0x4db   :  { %v764_v60 = vpack.c.bf16 %v753_v57, %v753_v57 }
 0x4dc   :  { %4039 = vmatmul.mubr.msk.bf16.vlgmr.msra.gmra.mrb[4].mxu1 %vm822_vm5, %v761_v43  ;;  %v1103_v55 = vsel %vm822_vm5, %v792_v50, 0 }
 0x4dd   :  { %4049 = vmatpush3.bf16.xpose.msra.mxu1 %v1057_v45  ;;  %v784_v46 = vpop.permute.xlu1 %783  ;;  %4033 = vmatmul.mubr.msk.bf16.vlgmr.msra.gmra.mrb[12].mxu0 %vm822_vm5, %v760_v44 }
 0x4de   :  { %4043 = vmatpush3.bf16.xpose.msra.mxu0 %v1011_v47  ;;  %4050 = vmatprep.mubr.msk.bf16.mxu1 %vm5270_vm0, %v5268_v13  ;;  %v793_v49 = vpack.c.bf16 %v784_v46, %v784_v46 }
 0x4df   :  { %4044 = vmatprep.mubr.msk.bf16.mxu0 %vm5270_vm0, %v5268_v13  ;;  %4060 = vmatprep.subr.bf16.mxu1 %v5268_v13 }
 0x4e0   :  { %4054 = vmatprep.subr.bf16.mxu0 %v5268_v13  ;;  %v1149_v53 = vsel %vm822_vm5, %v793_v49, 0 }
 0x4e1   :  { %v756_v56 = vpop.permute.xlu1 %755 }
 0x4e2   :  { %v765_v59 = vpack.c.bf16 %v756_v56, %v756_v56 }
 0x4e4   :  { %4051 = vmatmul.mubr.msk.bf16.vlgmr.msra.gmra.mrb[8].mxu1 %vm822_vm5, %v763_v51  ;;  %v737_v51 = vld [vmem:[#allocation7 + $0x38] sm:$0xff] }
 0x4e5   :  { %4045 = vmatmul.mubr.msk.bf16.vlgmr.msra.gmra.mrb[16].mxu0 %vm822_vm5, %v762_v52  ;;  %4061 = vmatpush3.bf16.xpose.msra.mxu1 %v1149_v53  ;;  %v736_v52 = vld [vmem:[#allocation7 + $0x30] sm:$0xff]  ;;  %vm1206_vm14 = vcmp.eq.f32.partialorder %v737_v51, 0.0 }
 0x4e6   :  { %4055 = vmatpush3.bf16.xpose.msra.mxu0 %v1103_v55  ;;  %4062 = vmatprep.mubr.msk.bf16.mxu1 %vm5270_vm0, %v5268_v13  ;;  %vm1205_vm15 = vcmp.eq.f32.partialorder %v736_v52, 0.0 }
 0x4e7   :  { %4056 = vmatprep.mubr.msk.bf16.mxu0 %vm5270_vm0, %v5268_v13  ;;  %4066 = vmatprep.subr.bf16.mxu0 %v5268_v13 }
 0x4e8   :  { %4072 = vmatprep.subr.bf16.mxu1 %v5268_v13 }
 0x4ec   :  { %4063 = vmatmul.mubr.msk.bf16.vlgmr.msra.gmra.mrb[12].mxu1 %vm822_vm5, %v765_v59 }
 0x4ed   :  { %4057 = vmatmul.mubr.msk.bf16.vlgmr.msra.gmra.mrb[20].mxu0 %vm822_vm5, %v764_v60  ;;  %4074 = vmatprep.mubr.msk.bf16.mxu1 %vm5270_vm0, %v5268_v13 }
 0x4ee   :  { %4067 = vmatpush3.bf16.msra.mxu0 %v1317_v61  ;;  %4068 = vmatprep.mubr.msk.bf16.mxu0 %vm5270_vm0, %v5268_v13 }
 0x4ef   :  { %4078 = vmatprep.subr.bf16.mxu0 %v5268_v13 }
 0x535   :  { %v863_v63 = vpop.f32.mrb[4].mxu0 }
 0x536   :  { %v1191_v0 = vmul.f32 0.17677669, %v863_v63  ;;  %v4022_v2 = vpop.f32.mrb[5].mxu0 }
 0x537   :  { %v866_v4 = vpop.f32.mrb[6].mxu0 }
 0x538   :  { %v4023_v5 = vpop.f32.mrb[7].mxu0  ;;  %v5883_v6 = vsel %vm1199_vm7, -1e+09, %v1191_v0 }
 0x539   :  { %v1216_v7 = vsel %vm1215_vm8, %v5883_v6, -inf }
 0x53a   :  { %1217 = vmax.xlane.f32.xlu0 %v1216_v7 }
 0x5a8   :  { %v909_v9 = vpop.f32.mrb[8].mxu0 }
 0x5a9   :  { %v1192_v10 = vmul.f32 0.17677669, %v909_v9  ;;  %v4028_v11 = vpop.f32.mrb[9].mxu0 }
 0x5aa   :  { %v912_v12 = vpop.f32.mrb[10].mxu0 }
 0x5ab   :  { %v4029_v14 = vpop.f32.mrb[11].mxu0  ;;  %v5887_v15 = vsel %vm1200_vm9, -1e+09, %v1192_v10 }
 0x5ac   :  { %v1219_v16 = vsel %vm1215_vm8, %v5887_v15, -inf }
 0x5ad   :  { %1220 = vmax.xlane.f32.xlu1 %v1219_v16 }
 0x5af   :  { %v1001_v20 = vpop.f32.mrb[4].mxu1 }
 0x5b0   :  { %v1194_v21 = vmul.f32 0.17677669, %v1001_v20  ;;  %v955_v22 = vpop.f32.mrb[12].mxu0  ;;  %v4040_v23 = vpop.f32.mrb[5].mxu1 }
 0x5b1   :  { %v1193_v24 = vmul.f32 0.17677669, %v955_v22  ;;  %v4034_v25 = vpop.f32.mrb[13].mxu0  ;;  %v1004_v26 = vpop.f32.mrb[6].mxu1 }
 0x5b2   :  { %v958_v28 = vpop.f32.mrb[14].mxu0  ;;  %v4041_v29 = vpop.f32.mrb[7].mxu1  ;;  %v1210_v30 = vsel %vm1202_vm10, -1e+09, %v1194_v21  ;;  %vm2730_vm10 = vcmask 130048  }
 0x5b3   :  { %v4035_v31 = vpop.f32.mrb[15].mxu0  ;;  %v1225_v32 = vsel %vm1215_vm8, %v1210_v30, -inf  ;;  %v1209_v33 = vsel %vm1201_vm11, -1e+09, %v1193_v24 }
 0x5b4   :  { %1226 = vmax.xlane.f32.xlu0 %v1225_v32  ;;  %v1222_v37 = vsel %vm1215_vm8, %v1209_v33, -inf }
 0x5b7   :  { %v1093_v36 = vpop.f32.mrb[8].mxu1 }
 0x5b8   :  { %v1196_v38 = vmul.f32 0.17677669, %v1093_v36  ;;  %v4052_v39 = vpop.f32.mrb[9].mxu1  ;;  %1223 = vmax.xlane.f32.xlu0 %v1222_v37  ;;  %v1047_v40 = vpop.f32.mrb[16].mxu0 }
 0x5b9   :  { %v1195_v41 = vmul.f32 0.17677669, %v1047_v40  ;;  %v4046_v42 = vpop.f32.mrb[17].mxu0  ;;  %v1096_v43 = vpop.f32.mrb[10].mxu1 }
 0x5ba   :  { %v1050_v44 = vpop.f32.mrb[18].mxu0  ;;  %v4053_v45 = vpop.f32.mrb[11].mxu1  ;;  %v5893_v46 = vsel %vm1204_vm12, -1e+09, %v1196_v38 }
 0x5bb   :  { %v4047_v47 = vpop.f32.mrb[19].mxu0  ;;  %v1231_v48 = vsel %vm1215_vm8, %v5893_v46, -inf  ;;  %v5897_v49 = vsel %vm1203_vm13, -1e+09, %v1195_v41 }
 0x5bc   :  { %1232 = vmax.xlane.f32.xlu1 %v1231_v48  ;;  %v1228_v50 = vsel %vm1215_vm8, %v5897_v49, -inf }
 0x5bd   :  { %1229 = vmax.xlane.f32.xlu0 %v1228_v50 }
 0x5bf   :  { %v1185_v53 = vpop.f32.mrb[12].mxu1 }
 0x5c0   :  { %v1198_v55 = vmul.f32 0.17677669, %v1185_v53  ;;  %v1139_v56 = vpop.f32.mrb[20].mxu0  ;;  %v4064_v57 = vpop.f32.mrb[13].mxu1 }
 0x5c1   :  { %v1197_v58 = vmul.f32 0.17677669, %v1139_v56  ;;  %v4058_v59 = vpop.f32.mrb[21].mxu0  ;;  %v1188_v60 = vpop.f32.mrb[14].mxu1 }
 0x5c2   :  { %v1142_v61 = vpop.f32.mrb[22].mxu0  ;;  %v4065_v62 = vpop.f32.mrb[15].mxu1  ;;  %v1214_v63 = vsel %vm1206_vm14, -1e+09, %v1198_v55 }
 0x5c3   :  { %v4059_v0 = vpop.f32.mrb[23].mxu0  ;;  %v1237_v2 = vsel %vm1215_vm8, %v1214_v63, -inf  ;;  %v1213_v4 = vsel %vm1205_vm15, -1e+09, %v1197_v58 }
 0x5c4   :  { %1238 = vmax.xlane.f32.xlu1 %v1237_v2  ;;  %v1234_v5 = vsel %vm1215_vm8, %v1213_v4, -inf }
 0x5c5   :  { %1235 = vmax.xlane.f32.xlu0 %v1234_v5 }
 0x5c7   :  { %v1218_v7 = vpop.xlane.xlu0 %1217 }
 0x5c8   :  { %v1240_v8 = vsub.f32 %v5883_v6, %v1218_v7 }
 0x5ca   :  { %v1248_v9 = vmul.f32 1.442695, %v1240_v8 }
 0x5cc   :  { %4528 = vpow2.f32 %v1248_v9 }
 0x5d5   :  { %798 = vrot.lane.b32.xlu1 %v5863_v54, %s5256_s27 }
 0x5d6   :  { %v5908_v10 = vpop.eup %4528 }
 0x5d7   :  { %v1264_v11 = vsel %vm1215_vm8, %v5908_v10, 0.0 }
 0x5db   :  { %795 = vrot.lane.b32.xlu0 %v5863_v54, %s5271_s16 }
 0x5fa   :  { %1265 = vadd.xlane.f32.xlu0 %v1264_v11 }
 0x63a   :  { %v1221_v12 = vpop.xlane.xlu1 %1220 }
 0x63b   :  { %v1241_v14 = vsub.f32 %v5887_v15, %v1221_v12 }
 0x63d   :  { %v1250_v16 = vmul.f32 1.442695, %v1241_v14 }
 0x63f   :  { %4530 = vpow2.f32 %v1250_v16  ;;  %v818_v16 = vpack.c.bf16 %v5821_v17, %v5821_v17 }
 0x641   :  { %v1227_v18 = vpop.xlane.xlu0 %1226 }
 0x642   :  { %v1243_v19 = vsub.f32 %v1210_v30, %v1227_v18 }
 0x644   :  { %v1254_v20 = vmul.f32 1.442695, %v1243_v19 }
 0x645   :  { %v1224_v21 = vpop.xlane.xlu0 %1223 }
 0x646   :  { %4532 = vpow2.f32 %v1254_v20  ;;  %v1242_v22 = vsub.f32 %v1209_v33, %v1224_v21  ;;  %v1501_v20 = vsel %vm1315_vm6, %v818_v16, 0 }
 0x648   :  { %v1252_v6 = vmul.f32 1.442695, %v1242_v22 }
 0x649   :  { %v5913_v23 = vpop.eup %4530  ;;  %v1233_v34 = vpop.xlane.xlu1 %1232 }
 0x64a   :  { %4534 = vpow2.f32 %v1252_v6  ;;  %v1267_v24 = vsel %vm1215_vm8, %v5913_v23, 0.0  ;;  %v1230_v25 = vpop.xlane.xlu0 %1229  ;;  %v1245_v35 = vsub.f32 %v5893_v46, %v1233_v34 }
 0x64b   :  { %1268 = vadd.xlane.f32.xlu1 %v1267_v24  ;;  %v1244_v37 = vsub.f32 %v5897_v49, %v1230_v25 }
 0x64c   :  { %v1258_v38 = vmul.f32 1.442695, %v1245_v35 }
 0x64d   :  { %v1256_v40 = vmul.f32 1.442695, %v1244_v37 }
 0x64e   :  { %4536 = vpow2.f32 %v1258_v38 }
 0x64f   :  { %4538 = vpow2.f32 %v1256_v40 }
 0x650   :  { %v5917_v26 = vpop.eup %4532 }
 0x651   :  { %v1273_v15 = vsel %vm1215_vm8, %v5917_v26, 0.0  ;;  %v1239_v36 = vpop.xlane.xlu1 %1238 }
 0x652   :  { %1274 = vadd.xlane.f32.xlu1 %v1273_v15  ;;  %v1236_v28 = vpop.xlane.xlu0 %1235  ;;  %v1247_v39 = vsub.f32 %v1214_v63, %v1239_v36 }
 0x653   :  { %v1246_v42 = vsub.f32 %v1213_v4, %v1236_v28 }
 0x654   :  { %v5921_v29 = vpop.eup %4534  ;;  %v1262_v41 = vmul.f32 1.442695, %v1247_v39 }
 0x655   :  { %v1270_v30 = vsel %vm1215_vm8, %v5921_v29, 0.0  ;;  %v1260_v43 = vmul.f32 1.442695, %v1246_v42  ;;  %v799_v52 = vpop.permute.xlu1 %798 }
 0x656   :  { %1271 = vadd.xlane.f32.xlu0 %v1270_v30  ;;  %v796_v31 = vpop.permute.xlu0 %795  ;;  %4540 = vpow2.f32 %v1262_v41  ;;  %v816_v55 = vpack.c.bf16 %v799_v52, %v799_v52 }
 0x657   :  { %v815_v32 = vpack.c.bf16 %v796_v31, %v796_v31  ;;  %4542 = vpow2.f32 %v1260_v43 }
 0x658   :  { %v5933_v44 = vpop.eup %4536  ;;  %v1409_v58 = vsel %vm1315_vm6, %v816_v55, 0 }
 0x659   :  { %v1363_v33 = vsel %vm1315_vm6, %v815_v32, 0  ;;  %v5935_v45 = vpop.eup %4538 }
 0x65a   :  { %4073 = vmatpush3.bf16.msra.mxu1 %v1363_v33  ;;  %v1276_v49 = vsel %vm1215_vm8, %v5935_v45, 0.0 }
 0x65b   :  { %4084 = vmatprep.subr.bf16.mxu1 %v5268_v13 }
 0x660   :  { %v5939_v46 = vpop.eup %4540 }
 0x661   :  { %v1285_v48 = vsel %vm1215_vm8, %v5939_v46, 0.0  ;;  %v5945_v50 = vpop.eup %4542 }
 0x662   :  { %v1282_v51 = vsel %vm1215_vm8, %v5945_v50, 0.0 }
 0x663   :  { %805 = vrot.lane.b32.xlu1 %v5821_v17, %s5271_s16 }
 0x66c   :  { %801 = vrot.lane.b32.xlu0 %v5863_v54, %s5272_s29  ;;  %v1279_v54 = vsel %vm1215_vm8, %v5933_v44, 0.0 }
 0x687   :  { %1280 = vadd.xlane.f32.xlu1 %v1279_v54  ;;  %v1266_v47 = vpop.xlane.xlu0 %1265  ;;  %v4433_v54 = vld [vmem:[#allocation13 + $0x8] sm:$0xff]  }
 0x688   :  { %4544 = vrcp.f32 %v1266_v47  ;;  %v4435_v47 = vld [vmem:[#allocation13 + $0x18] sm:$0xff]  }
 0x68b   :  { %1286 = vadd.xlane.f32.xlu1 %v1285_v48  ;;  %1277 = vadd.xlane.f32.xlu0 %v1276_v49 }
 0x68f   :  { %1283 = vadd.xlane.f32.xlu1 %v1282_v51 }
 0x692   :  { %v4545_v53 = vpop.eup %4544 }
 0x693   :  { %v1296_v56 = vmul.f32 %v4545_v53, %v5908_v10 }
 0x695   :  { %v1304_v57 = vpack.c.bf16 %v1296_v56, %v1296_v56 }
 0x697   :  { %4069 = vmatmul.mubr.msk.bf16.vlgmr.msra.gmra.mrb[24].mxu0 %vm1215_vm8, %v1304_v57 }
 0x698   :  { %4079 = vmatpush3.bf16.msra.mxu0 %v1409_v58  ;;  %4080 = vmatprep.mubr.msk.bf16.mxu0 %vm5270_vm0, %v5268_v13 }
 0x699   :  { %4090 = vmatprep.subr.bf16.mxu0 %v5268_v13 }
 0x6a0   :  { %811 = vrot.lane.b32.xlu1 %v5821_v17, %s5272_s29 }
 0x6a1   :  { %808 = vrot.lane.b32.xlu0 %v5821_v17, %s5256_s27 }
 0x6d8   :  { %v1269_v59 = vpop.xlane.xlu1 %1268 }
 0x6d9   :  { %4546 = vrcp.f32 %v1269_v59 }
 0x6df   :  { %v1275_v60 = vpop.xlane.xlu1 %1274 }
 0x6e0   :  { %4548 = vrcp.f32 %v1275_v60 }
 0x6e3   :  { %v4547_v61 = vpop.eup %4546  ;;  %v1272_v62 = vpop.xlane.xlu0 %1271 }
 0x6e4   :  { %v1297_v63 = vmul.f32 %v4547_v61, %v5913_v23  ;;  %4550 = vrcp.f32 %v1272_v62  ;;  %v806_v5 = vpop.permute.xlu1 %805  ;;  %v4436_v61 = vld [vmem:[#allocation13 + $0x20] sm:$0xff]   ;;  %v4437_v62 = vld [vmem:[#allocation13 + $0x28] sm:$0xff]  }
 0x6e5   :  { %v819_v10 = vpack.c.bf16 %v806_v5, %v806_v5 }
 0x6e6   :  { %v1305_v0 = vpack.c.bf16 %v1297_v63, %v1297_v63  ;;  %v4438_v63 = vld [vmem:[#allocation13 + $0x30] sm:$0xff]  }
 0x6e7   :  { %v802_v2 = vpop.permute.xlu0 %801  ;;  %v1547_v18 = vsel %vm1315_vm6, %v819_v10, 0 }
 0x6e8   :  { %v817_v4 = vpack.c.bf16 %v802_v2, %v802_v2  ;;  %4075 = vmatmul.mubr.msk.bf16.vlgmr.msra.gmra.mrb[16].mxu1 %vm1215_vm8, %v1305_v0 }
 0x6e9   :  { %4086 = vmatprep.mubr.msk.bf16.mxu1 %vm5270_vm0, %v5268_v13 }
 0x6ea   :  { %v4549_v7 = vpop.eup %4548  ;;  %v1455_v8 = vsel %vm1315_vm6, %v817_v4, 0 }
 0x6eb   :  { %v1299_v9 = vmul.f32 %v4549_v7, %v5917_v26  ;;  %4085 = vmatpush3.bf16.msra.mxu1 %v1455_v8 }
 0x6ec   :  { %4096 = vmatprep.subr.bf16.mxu1 %v5268_v13 }
 0x6ed   :  { %v1307_v11 = vpack.c.bf16 %v1299_v9, %v1299_v9  ;;  %v4439_v9 = vld [vmem:[#allocation13 + $0x38] sm:$0xff]  }
 0x6ee   :  { %v4551_v12 = vpop.eup %4550 }
 0x6ef   :  { %v1298_v14 = vmul.f32 %v4551_v12, %v5921_v29 }
 0x6f0   :  { %4087 = vmatmul.mubr.msk.bf16.vlgmr.msra.gmra.mrb[20].mxu1 %vm1215_vm8, %v1307_v11 }
 0x6f1   :  { %4097 = vmatpush3.bf16.msra.mxu1 %v1547_v18  ;;  %v1306_v19 = vpack.c.bf16 %v1298_v14, %v1298_v14  ;;  %4098 = vmatprep.mubr.msk.bf16.mxu1 %vm5270_vm0, %v5268_v13 }
 0x6f2   :  { %4108 = vmatprep.subr.bf16.mxu1 %v5268_v13 }
 0x6f3   :  { %4081 = vmatmul.mubr.msk.bf16.vlgmr.msra.gmra.mrb[28].mxu0 %vm1215_vm8, %v1306_v19 }
 0x6f4   :  { %4091 = vmatpush3.bf16.msra.mxu0 %v1501_v20  ;;  %4092 = vmatprep.mubr.msk.bf16.mxu0 %vm5270_vm0, %v5268_v13 }
 0x6f5   :  { %4102 = vmatprep.subr.bf16.mxu0 %v5268_v13 }
 0x714   :  { %v1281_v17 = vpop.xlane.xlu1 %1280 }
 0x715   :  { %4552 = vrcp.f32 %v1281_v17 }
 0x718   :  { %v1287_v21 = vpop.xlane.xlu1 %1286  ;;  %v1278_v22 = vpop.xlane.xlu0 %1277 }
 0x719   :  { %4554 = vrcp.f32 %v1287_v21 }
 0x71a   :  { %4556 = vrcp.f32 %v1278_v22 }
 0x71c   :  { %v1284_v6 = vpop.xlane.xlu1 %1283  ;;  %v809_v15 = vpop.permute.xlu0 %808 }
 0x71d   :  { %4558 = vrcp.f32 %v1284_v6  ;;  %v820_v33 = vpack.c.bf16 %v809_v15, %v809_v15 }
 0x71f   :  { %v4553_v23 = vpop.eup %4552  ;;  %v1593_v37 = vsel %vm1315_vm6, %v820_v33, 0 }
 0x720   :  { %v1301_v24 = vmul.f32 %v4553_v23, %v5933_v44  ;;  %v812_v25 = vpop.permute.xlu1 %811 }
 0x721   :  { %v821_v26 = vpack.c.bf16 %v812_v25, %v812_v25 }
 0x722   :  { %v1309_v28 = vpack.c.bf16 %v1301_v24, %v1301_v24 }
 0x723   :  { %v4555_v29 = vpop.eup %4554  ;;  %v1639_v30 = vsel %vm1315_vm6, %v821_v26, 0 }
 0x724   :  { %v4557_v31 = vpop.eup %4556  ;;  %4099 = vmatmul.mubr.msk.bf16.vlgmr.msra.gmra.mrb[24].mxu1 %vm1215_vm8, %v1309_v28  ;;  %v1303_v34 = vmul.f32 %v4555_v29, %v5939_v46  ;;  %v4434_v46 = vld [vmem:[#allocation13 + $0x10] sm:$0xff]  }
 0x725   :  { %v1300_v32 = vmul.f32 %v4557_v31, %v5935_v45  ;;  %4109 = vmatpush3.bf16.msra.mxu1 %v1639_v30  ;;  %4110 = vmatprep.mubr.msk.bf16.mxu1 %vm5270_vm0, %v5268_v13  ;;  %v4432_v45 = vld [vmem:[#allocation13] sm:$0xff]  }
 0x726   :  { %4134 = vmatprep.subr.bf16.mxu1 %v5268_v13  ;;  %v1311_v38 = vpack.c.bf16 %v1303_v34, %v1303_v34 }
 0x727   :  { %v1308_v35 = vpack.c.bf16 %v1300_v32, %v1300_v32  ;;  %v4559_v36 = vpop.eup %4558 }
 0x728   :  { %v1302_v39 = vmul.f32 %v4559_v36, %v5945_v50 }
 0x729   :  { %4093 = vmatmul.mubr.msk.bf16.vlgmr.msra.gmra.mrb[32].mxu0 %vm1215_vm8, %v1308_v35 }
 0x72a   :  { %4103 = vmatpush3.bf16.msra.mxu0 %v1593_v37  ;;  %4104 = vmatprep.mubr.msk.bf16.mxu0 %vm5270_vm0, %v5268_v13  ;;  %v1310_v40 = vpack.c.bf16 %v1302_v39, %v1302_v39 }
 0x72b   :  { %4114 = vmatprep.subr.bf16.mxu0 %v5268_v13 }
 0x72c   :  { %4111 = vmatmul.mubr.msk.bf16.vlgmr.msra.gmra.mrb[28].mxu1 %vm1215_vm8, %v1311_v38 }
 0x72d   :  { %4150 = vmatprep.mubr.msk.bf16.mxu1 %vm5270_vm0, %v5268_v13 }
 0x731   :  { %4105 = vmatmul.mubr.msk.bf16.vlgmr.msra.gmra.mrb[36].mxu0 %vm1215_vm8, %v1310_v40  ;;  %v3780_v40 = vld [vmem:[#allocation14] ss:$0 sm:$0xff] }
 0x732   :  { %4130 = vmatprep.mubr.msk.bf16.mxu0 %vm5270_vm0, %v5268_v13  ;;  %4115 = vmatpush3.bf16.msra.mxu0 %v4432_v45  ;;  %v4608_v45 = vld [vmem:[#allocation2] sm:$0xff] }
 0x733   :  { %4116 = vmatprep.subr.bf16.mxu0 %v5268_v13 }
 0x736   :  { %4117 = vmatpush3.bf16.msra.mxu0 %v4433_v54 }
 0x737   :  { %4118 = vmatprep.subr.bf16.mxu0 %v5268_v13 }
 0x73a   :  { %4119 = vmatpush3.bf16.msra.mxu0 %v4434_v46 }
 0x73b   :  { %4120 = vmatprep.subr.bf16.mxu0 %v5268_v13 }
 0x73e   :  { %4121 = vmatpush3.bf16.msra.mxu0 %v4435_v47 }
 0x73f   :  { %4122 = vmatprep.subr.bf16.mxu0 %v5268_v13 }
 0x742   :  { %4123 = vmatpush3.bf16.msra.mxu0 %v4436_v61 }
 0x743   :  { %4124 = vmatprep.subr.bf16.mxu0 %v5268_v13 }
 0x746   :  { %4125 = vmatpush3.bf16.msra.mxu0 %v4437_v62 }
 0x747   :  { %4126 = vmatprep.subr.bf16.mxu0 %v5268_v13 }
 0x74a   :  { %4127 = vmatpush3.bf16.msra.mxu0 %v4438_v63 }
 0x74b   :  { %4128 = vmatprep.subr.bf16.mxu0 %v5268_v13 }
 0x74e   :  { %4129 = vmatpush3.bf16.msra.mxu0 %v4439_v9  ;;  %v4458_v9 = vld [vmem:[#allocation22 + $0x54] ss:$8 sps:$4 sm:$0xff]  }
 0x76a   :  { %v5999_v41 = vpop.f32.mrb[24].mxu0 }
 0x76b   :  { %v4070_v42 = vpop.f32.mrb[25].mxu0 }
 0x76c   :  { %v1356_v43 = vpop.f32.mrb[26].mxu0 }
 0x76d   :  { %v4071_v44 = vpop.f32.mrb[27].mxu0 }
 0x7bb   :  { %v1399_v48 = vpop.f32.mrb[16].mxu1 }
 0x7bc   :  { %v4076_v49 = vpop.f32.mrb[17].mxu1 }
 0x7bd   :  { %v1402_v50 = vpop.f32.mrb[18].mxu1 }
 0x7be   :  { %v4077_v51 = vpop.f32.mrb[19].mxu1  ;;  %v4440_v50 = vld [vmem:[#allocation22] ss:$8 sps:$4 sm:$0xff]  }
 0x7bf   :  { %v4442_v51 = vld [vmem:[#allocation22 + $0x4] ss:$8 sps:$4 sm:$0xff]  }
 0x7c0   :  { %2105 = vmatprep.subr.bf16.mxu0 %v4442_v51 }
 0x7c3   :  { %v1491_v52 = vpop.f32.mrb[20].mxu1 }
 0x7c4   :  { %v4088_v53 = vpop.f32.mrb[21].mxu1 }
 0x7c5   :  { %v1494_v55 = vpop.f32.mrb[22].mxu1  ;;  %v4443_v53 = vld [vmem:[#allocation22 + $0x10] ss:$8 sps:$4 sm:$0xff]  }
 0x7c6   :  { %v1445_v56 = vpop.f32.mrb[28].mxu0  ;;  %v4089_v57 = vpop.f32.mrb[23].mxu1  ;;  %v4448_v55 = vld [vmem:[#allocation22 + $0x24] ss:$8 sps:$4 sm:$0xff]  }
 0x7c7   :  { %v4082_v58 = vpop.f32.mrb[29].mxu0 }
 0x7c8   :  { %v1448_v59 = vpop.f32.mrb[30].mxu0 }
 0x7c9   :  { %v4083_v60 = vpop.f32.mrb[31].mxu0 }
 0x7f7   :  { %v1583_v0 = vpop.f32.mrb[24].mxu1 }
 0x7f8   :  { %v4310_v2 = vpack.i.bf16 %v1583_v0, %v1399_v48  ;;  %v4100_v4 = vpop.f32.mrb[25].mxu1  ;;  %v4609_v48 = vld [vmem:[#allocation2 + $0x8] sm:$0xff] }
 0x7f9   :  { %v1586_v5 = vpop.f32.mrb[26].mxu1  ;;  %v4449_v4 = vld [vmem:[#allocation22 + $0x30] ss:$8 sps:$4 sm:$0xff]  }
 0x7fa   :  { %4311 = vrot.lane.b32.xlu0 %v4310_v2, %s5272_s29  ;;  %v4101_v7 = vpop.f32.mrb[27].mxu1  ;;  %v4451_v2 = vld [vmem:[#allocation22 + $0x34] ss:$8 sps:$4 sm:$0xff]   ;;  %v4454_v5 = vld [vmem:[#allocation22 + $0x44] ss:$8 sps:$4 sm:$0xff]  }
 0x7fb   :  { %v4452_v7 = vld [vmem:[#allocation22 + $0x40] ss:$8 sps:$4 sm:$0xff]  }
 0x7fc   :  { %v1537_v8 = vpop.f32.mrb[32].mxu0 }
 0x7fd   :  { %v4094_v10 = vpop.f32.mrb[33].mxu0 }
 0x7fe   :  { %v1540_v11 = vpop.f32.mrb[34].mxu0  ;;  %v4456_v10 = vld [vmem:[#allocation22 + $0x50] ss:$8 sps:$4 sm:$0xff]  }
 0x7ff   :  { %v4095_v12 = vpop.f32.mrb[35].mxu0  ;;  %v1675_v14 = vpop.f32.mrb[28].mxu1  ;;  %v4459_v11 = vld [vmem:[#allocation19 + $0x8] sm:$0xff]  }
 0x800   :  { %v4320_v16 = vpack.i.bf16 %v1675_v14, %v1491_v52  ;;  %v4112_v18 = vpop.f32.mrb[29].mxu1  ;;  %v4445_v52 = vld [vmem:[#allocation22 + $0x14] ss:$8 sps:$4 sm:$0xff]   ;;  %v4462_v12 = vld [vmem:[#allocation22 + $0x64] ss:$8 sps:$4 sm:$0xff]  }
 0x801   :  { %v1678_v19 = vpop.f32.mrb[30].mxu1  ;;  %v4460_v14 = vld [vmem:[#allocation22 + $0x60] ss:$8 sps:$4 sm:$0xff]   ;;  %v4466_v18 = vld [vmem:[#allocation22 + $0x74] ss:$8 sps:$4 sm:$0xff]  }
 0x802   :  { %4321 = vrot.lane.b32.xlu0 %v4320_v16, %s5271_s16  ;;  %v4113_v20 = vpop.f32.mrb[31].mxu1  ;;  %v4463_v16 = vld [vmem:[#allocation19 + $0x10] sm:$0xff]  }
 0x803   :  { %v4464_v19 = vld [vmem:[#allocation22 + $0x70] ss:$8 sps:$4 sm:$0xff]  }
 0x804   :  { %v1629_v17 = vpop.f32.mrb[36].mxu0  ;;  %v4467_v20 = vld [vmem:[#allocation19 + $0x18] sm:$0xff]  }
 0x805   :  { %v4315_v21 = vpack.i.bf16 %v1629_v17, %v1445_v56  ;;  %v4106_v22 = vpop.f32.mrb[37].mxu0  ;;  %v4446_v56 = vld [vmem:[#allocation22 + $0x20] ss:$8 sps:$4 sm:$0xff]   ;;  %v409_v17 = vld [vmem:[#allocation5] sm:$0xff] }
 0x806   :  { %v1632_v6 = vpop.f32.mrb[38].mxu0 }
 0x807   :  { %4316 = vrot.lane.b32.xlu1 %v4315_v21, %s5256_s27  ;;  %v4107_v23 = vpop.f32.mrb[39].mxu0  ;;  %v410_v21 = vld [vmem:[#allocation5 + $0x8] sm:$0xff]  ;;  %v4468_v6 = vld [vmem:[#allocation19 + $0x20] sm:$0xff]  }
 0x808   :  { %v1995_v22 = vpack.c.bf16 %v410_v21, %v409_v17  ;;  %v4469_v23 = vld [vmem:[#allocation19 + $0x28] sm:$0xff]  }
 0x86c   :  { %v4312_v24 = vpop.permute.xlu0 %4311 }
 0x86d   :  { %v4314_v25 = vunpack.i.h.bf16 %v4312_v24  ;;  %v4313_v26 = vunpack.i.l.bf16 %v4312_v24  ;;  %v4470_v24 = vld [vmem:[#allocation19 + $0x30] sm:$0xff]  }
 0x86f   :  { %v1693_v31 = vsel %vm822_vm5, %v5999_v41, %v4313_v26  ;;  %v1710_v32 = vsel %vm822_vm5, %v1537_v8, %v4314_v25  ;;  %v4455_v8 = vld [vmem:[#allocation19] sm:$0xff]   ;;  %v4471_v25 = vld [vmem:[#allocation19 + $0x38] sm:$0xff]  }
 0x870   :  { %4135 = vmatpush3.bf16.msra.mxu1 %v4455_v8  ;;  %v411_v26 = vld [vmem:[#allocation5 + $0x10] sm:$0xff] }
 0x871   :  { %4136 = vmatprep.subr.bf16.mxu1 %v5268_v13 }
 0x874   :  { %v4322_v15 = vpop.permute.xlu0 %4321  ;;  %4137 = vmatpush3.bf16.msra.mxu1 %v4459_v11 }
 0x875   :  { %v4324_v33 = vunpack.i.h.bf16 %v4322_v15  ;;  %v4323_v34 = vunpack.i.l.bf16 %v4322_v15  ;;  %4138 = vmatprep.subr.bf16.mxu1 %v5268_v13  ;;  %v412_v15 = vld [vmem:[#allocation5 + $0x18] sm:$0xff] }
 0x878   :  { %4139 = vmatpush3.bf16.msra.mxu1 %v4463_v16 }
 0x879   :  { %v4317_v28 = vpop.permute.xlu1 %4316  ;;  %4140 = vmatprep.subr.bf16.mxu1 %v5268_v13 }
 0x87a   :  { %v4319_v29 = vunpack.i.h.bf16 %v4317_v28  ;;  %v4318_v30 = vunpack.i.l.bf16 %v4317_v28  ;;  %v1996_v28 = vpack.c.bf16 %v412_v15, %v411_v26 }
 0x87c   :  { %v1711_v35 = vsel %vm1694_vm1, %v1710_v32, %v4319_v29  ;;  %v1695_v36 = vsel %vm1694_vm1, %v1693_v31, %v4318_v30  ;;  %4141 = vmatpush3.bf16.msra.mxu1 %v4467_v20 }
 0x87d   :  { %v1697_v37 = vsel %vm1696_vm2, %v1695_v36, %v4323_v34  ;;  %v1712_v38 = vsel %vm1696_vm2, %v1711_v35, %v4324_v33  ;;  %4142 = vmatprep.subr.bf16.mxu1 %v5268_v13 }
 0x87e   :  { %v1713_v39 = vpack.c.bf16 %v1712_v38, %v1697_v37 }
 0x880   :  { %4131 = vmatmul.mubr.bf16.vlgmr.msra.gmra.mrb[40].mxu0 %v1713_v39  ;;  %4143 = vmatpush3.bf16.msra.mxu1 %v4468_v6 }
 0x881   :  { %2137 = vmatprep.mubr.bf16.mxu0 %v5269_v27  ;;  %2106 = vmatpush1.bf16.msra.mxu0 %v4440_v50 }
 0x882   :  { %2107 = vmatprep.subr.bf16.mxu0 %v4445_v52  ;;  %4144 = vmatprep.subr.bf16.mxu1 %v5268_v13  ;;  %v3790_v52 = vld [vmem:[#allocation29] ss:$0 sm:$0xff] }
 0x884   :  { %4145 = vmatpush3.bf16.msra.mxu1 %v4469_v23 }
 0x885   :  { %2108 = vmatpush1.bf16.msra.mxu0 %v4443_v53  ;;  %4146 = vmatprep.subr.bf16.mxu1 %v5268_v13 }
 0x886   :  { %2109 = vmatprep.subr.bf16.mxu0 %v4448_v55 }
 0x888   :  { %4147 = vmatpush3.bf16.msra.mxu1 %v4470_v24 }
 0x889   :  { %2110 = vmatpush1.bf16.msra.mxu0 %v4446_v56  ;;  %4148 = vmatprep.subr.bf16.mxu1 %v5268_v13 }
 0x88a   :  { %2111 = vmatprep.subr.bf16.mxu0 %v4451_v2 }
 0x88c   :  { %4149 = vmatpush3.bf16.msra.mxu1 %v4471_v25 }
 0x88d   :  { %2112 = vmatpush1.bf16.msra.mxu0 %v4449_v4  ;;  %4154 = vmatprep.subr.bf16.mxu1 %v5268_v13 }
 0x88e   :  { %2113 = vmatprep.subr.bf16.mxu0 %v4454_v5 }
 0x891   :  { %2114 = vmatpush1.bf16.msra.mxu0 %v4452_v7 }
 0x892   :  { %2115 = vmatprep.subr.bf16.mxu0 %v4458_v9 }
 0x895   :  { %2116 = vmatpush1.bf16.msra.mxu0 %v4456_v10 }
 0x896   :  { %2117 = vmatprep.subr.bf16.mxu0 %v4462_v12 }
 0x899   :  { %2118 = vmatpush1.bf16.msra.mxu0 %v4460_v14 }
 0x89a   :  { %2119 = vmatprep.subr.bf16.mxu0 %v4466_v18 }
 0x89d   :  { %2120 = vmatpush1.bf16.msra.mxu0 %v4464_v19 }
 0x89e   :  { %4184 = vmatprep.subr.bf16.mxu0 %v5268_v13 }
 0x8a0   :  { %2138 = vmatmul.mubr.bf16.vlgmr.msra.gmra.mrb[44].mxu0 %v1995_v22 }
 0x8a1   :  { %2147 = vmatprep.mubr.bf16.mxu0 %v5269_v27 }
 0x8a8   :  { %2148 = vmatmul.mubr.bf16.gmra.mrb[48].mxu0 %v1996_v28 }
 0x8a9   :  { %4186 = vmatprep.mubr.msk.bf16.mxu0 %vm5270_vm0, %v5268_v13 }
 0x953   :  { %v1819_v42 = vpop.f32.mrb[40].mxu0 }
 0x954   :  { %v1820_v43 = vadd.f32 %v3780_v40, %v1819_v42  ;;  %v4132_v41 = vpop.f32.mrb[41].mxu0 }
 0x955   :  { %v1822_v44 = vpop.f32.mrb[42].mxu0 }
 0x956   :  { %v6019_v54 = vadd.f32 %v4608_v45, %v1820_v43  ;;  %v1823_v46 = vadd.f32 %v3780_v40, %v1822_v44  ;;  %v4133_v47 = vpop.f32.mrb[43].mxu0  ;;  %v3789_v45 = vld [vmem:[#allocation28] ss:$0 sm:$0xff] }
 0x958   :  { %v6021_v49 = vadd.f32 %v4609_v48, %v1823_v46  ;;  %1828 = vadd.xlane.f32.xlu1 %v6019_v54 }
 0x95a   :  { %1830 = vadd.xlane.f32.xlu0 %v6021_v49 }
 0x9e5   :  { %v1829_v57 = vpop.xlane.xlu1 %1828 }
 0x9e6   :  { %v1832_v58 = vmul.f32 0.0078125, %v1829_v57 }
 0x9e7   :  { %v1831_v59 = vpop.xlane.xlu0 %1830 }
 0x9e8   :  { %v6026_v60 = vsub.f32 %v6019_v54, %v1832_v58  ;;  %v1833_v61 = vmul.f32 0.0078125, %v1831_v59  ;;  %v2013_v58 = vld [vmem:[#allocation23] sm:$0x3] }
 0x9e9   :  { %v2018_v59 = vrot.slane %v2013_v58, %v5810_v1 }
 0x9ea   :  { %v6029_v62 = vsub.f32 %v6021_v49, %v1833_v61  ;;  %v1836_v63 = vmul.f32 %v6026_v60, %v6026_v60  ;;  %v1869_v47 = vmul.f32 %v3789_v45, %v6026_v60  ;;  %v2139_v61 = vpop.f32.mrb[44].mxu0 }
 0x9eb   :  { %v2140_v60 = vadd.f32 %v2139_v61, %v2018_v59 }
 0x9ec   :  { %1838 = vadd.xlane.f32.xlu0 %v1836_v63  ;;  %v1837_v0 = vmul.f32 %v6029_v62, %v6029_v62  ;;  %v1870_v48 = vmul.f32 %v3789_v45, %v6029_v62  ;;  %v2022_v63 = vrot.slane %v2013_v58, %v5812_v3 }
 0x9f0   :  { %1840 = vadd.xlane.f32.xlu0 %v1837_v0  ;;  %v2141_v0 = vpop.f32.mrb[45].mxu0 }
 0x9f1   :  { %v2143_v62 = vpop.f32.mrb[46].mxu0  ;;  %v6053_v5 = vadd.f32 %v2141_v0, %v2022_v63 }
 0x9f2   :  { %v2144_v2 = vadd.f32 %v2143_v62, %v2018_v59  ;;  %v2145_v4 = vpop.f32.mrb[47].mxu0 }
 0x9f3   :  { %v6055_v7 = vadd.f32 %v2145_v4, %v2022_v63  ;;  %v2149_v14 = vpop.f32.mrb[48].mxu0 }
 0x9f4   :  { %v4325_v8 = vpack.i.bf16 %v2144_v2, %v2140_v60  ;;  %v2234_v9 = vpack.c.bf16 %v2144_v2, %v2140_v60  ;;  %v6067_v16 = vadd.f32 %v2149_v14, %v2018_v59  ;;  %v2151_v18 = vpop.f32.mrb[49].mxu0 }
 0x9f5   :  { %v2282_v11 = vpack.c.bf16 %v6055_v7, %v6053_v5  ;;  %v6064_v12 = vpack.i.bf16 %v6055_v7, %v6053_v5  ;;  %v2153_v19 = vpop.f32.mrb[50].mxu0  ;;  %v6069_v20 = vadd.f32 %v2151_v18, %v2022_v63 }
 0x9f6   :  { %4326 = vrot.lane.b32.xlu1 %v4325_v8, %s5271_s16  ;;  %v2294_v10 = vsel %vm822_vm5, %v2234_v9, 0  ;;  %v6071_v17 = vadd.f32 %v2153_v19, %v2018_v59  ;;  %v2155_v21 = vpop.f32.mrb[51].mxu0 }
 0x9f7   :  { %v6073_v22 = vadd.f32 %v2155_v21, %v2022_v63 }
 0x9f8   :  { %v4345_v6 = vpack.i.bf16 %v6071_v17, %v6067_v16  ;;  %v2238_v23 = vpack.c.bf16 %v6071_v17, %v6067_v16 }
 0x9f9   :  { %v6081_v24 = vpack.i.bf16 %v6073_v22, %v6069_v20  ;;  %v2286_v25 = vpack.c.bf16 %v6073_v22, %v6069_v20 }
 0x9fa   :  { %4331 = vrot.lane.b32.xlu1 %v4325_v8, %s5256_s27  ;;  %v2478_v18 = vsel %vm822_vm5, %v2238_v23, 0 }
 0xa68   :  { %v4327_v26 = vpop.permute.xlu1 %4326 }
 0xa69   :  { %v4329_v15 = vunpack.i.h.bf16 %v4327_v26  ;;  %v4328_v28 = vunpack.i.l.bf16 %v4327_v26 }
 0xa79   :  { %v1839_v29 = vpop.xlane.xlu0 %1838 }
 0xa7a   :  { %v1842_v30 = vmul.f32 0.007874016, %v1839_v29  ;;  %v3791_v29 = vld [vmem:[#allocation20] ss:$0 sm:$0xff] }
 0xa7c   :  { %4560 = vrsqrt.f32 %v1842_v30  ;;  %vm1846_vm3 = vcmp.eq.f32.partialorder %v1842_v30, inf  ;;  %v1849_v35 = vand.u32 2147483648, %v1842_v30  ;;  %vm1848_vm4 = vcmp.eq.f32.partialorder %v1842_v30, 0.0 }
 0xa7d   :  { %v1841_v31 = vpop.xlane.xlu0 %1840 }
 0xa7e   :  { %v1843_v32 = vmul.f32 0.007874016, %v1841_v31 }
 0xa80   :  { %4562 = vrsqrt.f32 %v1843_v32  ;;  %vm1853_vm6 = vcmp.eq.f32.partialorder %v1843_v32, inf  ;;  %v1856_v42 = vand.u32 2147483648, %v1843_v32  ;;  %vm1855_vm7 = vcmp.eq.f32.partialorder %v1843_v32, 0.0 }
 0xa86   :  { %v4561_v33 = vpop.eup %4560 }
 0xa87   :  { %v1845_v34 = vmul.f32 %v4561_v33, %v1842_v30 }
 0xa89   :  { %v1847_v36 = vsel %vm1846_vm3, %v1842_v30, %v1845_v34  ;;  %v2235_v30 = vpack.c.bf16 %v4329_v15, %v4328_v28  ;;  %v2158_v28 = vld [vmem:[#allocation8] sm:$0x1] }
 0xa8a   :  { %v4563_v37 = vpop.eup %4562  ;;  %v1850_v38 = vsel %vm1848_vm4, %v1849_v35, %v1847_v36  ;;  %vm2666_vm8 = vcmp.eq.f32.partialorder %v2158_v28, 0.0 }
 0xa8b   :  { %v1858_v39 = vadd.f32 1e-06, %v1850_v38  ;;  %v1852_v40 = vmul.f32 %v4563_v37, %v1843_v32  ;;  %v2340_v37 = vsel %vm822_vm5, %v2235_v30, 0 }
 0xa8d   :  { %4564 = vrcp.f32 %v1858_v39  ;;  %v1854_v43 = vsel %vm1853_vm6, %v1843_v32, %v1852_v40  ;;  %v4332_v39 = vpop.permute.xlu1 %4331 }
 0xa8e   :  { %v1857_v41 = vsel %vm1855_vm7, %v1856_v42, %v1854_v43  ;;  %v4334_v40 = vunpack.i.h.bf16 %v4332_v39  ;;  %v4333_v42 = vunpack.i.l.bf16 %v4332_v39 }
 0xa8f   :  { %v1859_v44 = vadd.f32 1e-06, %v1857_v41 }
 0xa90   :  { %v2236_v43 = vpack.c.bf16 %v4334_v40, %v4333_v42 }
 0xa91   :  { %4566 = vrcp.f32 %v1859_v44 }
 0xa97   :  { %v4565_v46 = vpop.eup %4564 }
 0xa98   :  { %v1871_v50 = vmul.f32 %v4565_v46, %v1869_v47  ;;  %v2386_v46 = vsel %vm822_vm5, %v2236_v43, 0 }
 0xa9a   :  { %v1880_v55 = vadd.f32 %v3790_v52, %v1871_v50 }
 0xa9b   :  { %v4567_v51 = vpop.eup %4566 }
 0xa9c   :  { %v1872_v53 = vmul.f32 %v4567_v51, %v1870_v48 }
 0xa9e   :  { %v1881_v56 = vadd.f32 %v3790_v52, %v1872_v53 }
 0xaa0   :  { %v1882_v57 = vpack.c.bf16 %v1881_v56, %v1880_v55 }
 0xaa2   :  { %4151 = vmatmul.mubr.bf16.vlgmr.msra.gmra.mrb[32].mxu1 %v1882_v57 }
 0xaa3   :  { %4156 = vmatprep.mubr.msk.bf16.mxu1 %vm5270_vm0, %v5268_v13  ;;  %4155 = vmatpush3.bf16.xpose.msra.mxu1 %v2294_v10 }
 0xaa4   :  { %4160 = vmatprep.subr.bf16.mxu1 %v5268_v13 }
 0xb75   :  { %v1988_v31 = vpop.f32.mrb[32].mxu1 }
 0xb76   :  { %v1989_v32 = vadd.f32 %v3791_v29, %v1988_v31  ;;  %v4152_v33 = vpop.f32.mrb[33].mxu1 }
 0xb77   :  { %v1991_v34 = vpop.f32.mrb[34].mxu1 }
 0xb78   :  { %v2186_v35 = vpack.c.bf16 %v1989_v32, %v1989_v32  ;;  %2167 = vrot.lane.b32.xlu0 %v1989_v32, %s5271_s16  ;;  %v4153_v36 = vpop.f32.mrb[35].mxu1  ;;  %2170 = vrot.lane.b32.xlu1 %v1989_v32, %s5256_s27  ;;  %v1992_v38 = vadd.f32 %v3791_v29, %v1991_v34  ;;  %v2674_v29 = vsel %vm2666_vm8, 1, %v5269_v27 }
 0xb79   :  { %v2685_v30 = vrot.slane %v2674_v29, %v5810_v1 }
 0xb7a   :  { %4157 = vmatmul.mubr.msk.bf16.vlgmr.msra.gmra.mrb[36].mxu1 %vm822_vm5, %v2186_v35  ;;  %v2190_v17 = vpack.c.bf16 %v1992_v38, %v1992_v38 }
 0xb7b   :  { %4161 = vmatpush3.bf16.xpose.msra.mxu1 %v2340_v37  ;;  %4162 = vmatprep.mubr.msk.bf16.mxu1 %vm5270_vm0, %v5268_v13  ;;  %vm2714_vm9 = vcmp.eq.s32.totalorder %v2685_v30, 1  ;;  %v2160_v37 = vld [vmem:[#allocation8 + $0x2] sm:$0x1] }
 0xb7c   :  { %2173 = vrot.lane.b32.xlu0 %v1989_v32, %s5272_s29  ;;  %4336 = vrot.lane.b32.xlu1 %v4325_v8, %s5272_s29  ;;  %vm2668_vm12 = vcmp.eq.f32.partialorder %v2160_v37, 0.0 }
 0xb7d   :  { %4166 = vmatprep.subr.bf16.mxu1 %v5268_v13  ;;  %v2676_v43 = vsel %vm2668_vm12, 1, %v5269_v27 }
 0xb80   :  { %4346 = vrot.lane.b32.xlu0 %v4345_v6, %s5256_s27  ;;  %4341 = vrot.lane.b32.xlu1 %v4345_v6, %s5271_s16 }
 0xb84   :  { %4351 = vrot.lane.b32.xlu0 %v4345_v6, %s5272_s29  ;;  %2177 = vrot.lane.b32.xlu1 %v1992_v38, %s5271_s16 }
 0xb88   :  { %2183 = vrot.lane.b32.xlu0 %v1992_v38, %s5272_s29  ;;  %2180 = vrot.lane.b32.xlu1 %v1992_v38, %s5256_s27 }
 0xbea   :  { %v2168_v41 = vpop.permute.xlu0 %2167  ;;  %v2171_v44 = vpop.permute.xlu1 %2170 }
 0xbeb   :  { %v2187_v45 = vpack.c.bf16 %v2168_v41, %v2168_v41  ;;  %v2188_v56 = vpack.c.bf16 %v2171_v44, %v2171_v44 }
 0xbed   :  { %4163 = vmatmul.mubr.msk.bf16.vlgmr.msra.gmra.mrb[40].mxu1 %vm822_vm5, %v2187_v45 }
 0xbee   :  { %4167 = vmatpush3.bf16.xpose.msra.mxu1 %v2386_v46  ;;  %v2174_v47 = vpop.permute.xlu0 %2173  ;;  %v4337_v48 = vpop.permute.xlu1 %4336  ;;  %4168 = vmatprep.mubr.msk.bf16.mxu1 %vm5270_vm0, %v5268_v13  ;;  %v2161_v46 = vld [vmem:[#allocation8 + $0x3] sm:$0x1] }
 0xbef   :  { %v4339_v50 = vunpack.i.h.bf16 %v4337_v48  ;;  %v4338_v51 = vunpack.i.l.bf16 %v4337_v48  ;;  %4172 = vmatprep.subr.bf16.mxu1 %v5268_v13  ;;  %v2189_v4 = vpack.c.bf16 %v2174_v47, %v2174_v47  ;;  %v2693_v48 = vrot.slane %v2676_v43, %v5810_v1 }
 0xbf0   :  { %vm2669_vm14 = vcmp.eq.f32.partialorder %v2161_v46, 0.0 }
 0xbf1   :  { %v2237_v52 = vpack.c.bf16 %v4339_v50, %v4338_v51  ;;  %v2163_v50 = vld [vmem:[#allocation8 + $0x5] sm:$0x1]  ;;  %vm2716_vm15 = vcmp.eq.s32.totalorder %v2693_v48, 1 }
 0xbf2   :  { %v4347_v53 = vpop.permute.xlu0 %4346  ;;  %v4342_v55 = vpop.permute.xlu1 %4341  ;;  %vm2671_vm3 = vcmp.eq.f32.partialorder %v2163_v50, 0.0 }
 0xbf3   :  { %v4344_v57 = vunpack.i.h.bf16 %v4342_v55  ;;  %v4343_v58 = vunpack.i.l.bf16 %v4342_v55  ;;  %v2432_v59 = vsel %vm822_vm5, %v2237_v52, 0  ;;  %v4349_v9 = vunpack.i.h.bf16 %v4347_v53 }
 0xbf4   :  { %v4348_v10 = vunpack.i.l.bf16 %v4347_v53  ;;  %v2677_v55 = vsel %vm2669_vm14, 1, %v5269_v27 }
 0xbf5   :  { %v2239_v61 = vpack.c.bf16 %v4344_v57, %v4343_v58  ;;  %4169 = vmatmul.mubr.msk.bf16.vlgmr.msra.gmra.mrb[44].mxu1 %vm822_vm5, %v2188_v56 }
 0xbf6   :  { %4173 = vmatpush3.bf16.xpose.msra.mxu1 %v2432_v59  ;;  %v4352_v63 = vpop.permute.xlu0 %4351  ;;  %4174 = vmatprep.mubr.msk.bf16.mxu1 %vm5270_vm0, %v5268_v13  ;;  %v2178_v2 = vpop.permute.xlu1 %2177  ;;  %v2240_v21 = vpack.c.bf16 %v4349_v9, %v4348_v10  ;;  %v2679_v59 = vsel %vm2671_vm3, 1, %v5269_v27 }
 0xbf7   :  { %v4354_v60 = vunpack.i.h.bf16 %v4352_v63  ;;  %v4353_v0 = vunpack.i.l.bf16 %v4352_v63  ;;  %v2524_v62 = vsel %vm822_vm5, %v2239_v61, 0  ;;  %4178 = vmatprep.subr.bf16.mxu1 %v5268_v13  ;;  %v2191_v14 = vpack.c.bf16 %v2178_v2, %v2178_v2  ;;  %v2162_v61 = vld [vmem:[#allocation8 + $0x4] sm:$0x1] }
 0xbf8   :  { %4185 = vmatpush3.bf16.xpose.msra.mxu0 %v2524_v62  ;;  %v2570_v23 = vsel %vm822_vm5, %v2240_v21, 0  ;;  %v2705_v62 = vrot.slane %v2679_v59, %v5810_v1  ;;  %vm2670_vm4 = vcmp.eq.f32.partialorder %v2162_v61, 0.0 }
 0xbf9   :  { %4196 = vmatprep.subr.bf16.mxu0 %v5268_v13  ;;  %v2241_v8 = vpack.c.bf16 %v4354_v60, %v4353_v0  ;;  %v2697_v60 = vrot.slane %v2677_v55, %v5810_v1  ;;  %v2165_v0 = vld [vmem:[#allocation8 + $0x7] sm:$0x1]  ;;  %v2678_v9 = vsel %vm2670_vm4, 1, %v5269_v27 }
 0xbfa   :  { %v2184_v16 = vpop.permute.xlu0 %2183  ;;  %v2181_v26 = vpop.permute.xlu1 %2180  ;;  %vm2673_vm6 = vcmp.eq.f32.partialorder %v2165_v0, 0.0  ;;  %vm2719_vm8 = vcmp.eq.s32.totalorder %v2705_v62, 1 }
 0xbfb   :  { %v2616_v19 = vsel %vm822_vm5, %v2241_v8, 0  ;;  %v2193_v6 = vpack.c.bf16 %v2184_v16, %v2184_v16  ;;  %v2192_v15 = vpack.c.bf16 %v2181_v26, %v2181_v26  ;;  %vm2717_vm7 = vcmp.eq.s32.totalorder %v2697_v60, 1 }
 0xbfd   :  { %4175 = vmatmul.mubr.msk.bf16.vlgmr.msra.gmra.mrb[48].mxu1 %vm822_vm5, %v2189_v4 }
 0xbfe   :  { %4179 = vmatpush3.bf16.xpose.msra.mxu1 %v2478_v18  ;;  %4180 = vmatprep.mubr.msk.bf16.mxu1 %vm5270_vm0, %v5268_v13  ;;  %v2681_v18 = vsel %vm2673_vm6, 1, %v5269_v27 }
 0xbff   :  { %4187 = vmatmul.mubr.msk.bf16.vlgmr.msra.gmra.mrb[52].mxu0 %vm822_vm5, %v2191_v14  ;;  %4190 = vmatprep.subr.bf16.mxu1 %v5268_v13  ;;  %v2713_v30 = vrot.slane %v2681_v18, %v5810_v1 }
 0xc00   :  { %4197 = vmatpush3.bf16.xpose.msra.mxu0 %v2616_v19  ;;  %4198 = vmatprep.mubr.msk.bf16.mxu0 %vm5270_vm0, %v5268_v13  ;;  %v2164_v19 = vld [vmem:[#allocation8 + $0x6] sm:$0x1] }
 0xc01   :  { %4208 = vmatprep.subr.bf16.mxu0 %v5268_v13  ;;  %vm2721_vm12 = vcmp.eq.s32.totalorder %v2713_v30, 1 }
 0xc05   :  { %4181 = vmatmul.mubr.msk.bf16.vlgmr.msra.gmra.mrb[52].mxu1 %vm822_vm5, %v2190_v17 }
 0xc06   :  { %4191 = vmatpush3.bf16.xpose.msra.mxu1 %v2570_v23  ;;  %4192 = vmatprep.mubr.msk.bf16.mxu1 %vm5270_vm0, %v5268_v13 }
 0xc07   :  { %4199 = vmatmul.mubr.msk.bf16.vlgmr.msra.gmra.mrb[56].mxu0 %vm822_vm5, %v2193_v6  ;;  %4202 = vmatprep.subr.bf16.mxu1 %v5268_v13 }
 0xc08   :  { %4210 = vmatprep.mubr.msk.bf16.mxu0 %vm5270_vm0, %v5268_v13 }
 0xc0d   :  { %4193 = vmatmul.mubr.msk.bf16.vlgmr.msra.gmra.mrb[56].mxu1 %vm822_vm5, %v2192_v15  ;;  %v2701_v15 = vrot.slane %v2678_v9, %v5810_v1 }
 0xc0e   :  { %4203 = vmatpush3.bf16.msra.mxu1 %v2282_v11  ;;  %4204 = vmatprep.mubr.msk.bf16.mxu1 %vm5270_vm0, %v5268_v13  ;;  %v2159_v11 = vld [vmem:[#allocation8 + $0x1] sm:$0x1] }
 0xc0f   :  { %4214 = vmatprep.subr.bf16.mxu1 %v5268_v13  ;;  %vm2667_vm11 = vcmp.eq.f32.partialorder %v2159_v11, 0.0 }
 0xc10   :  { %v2675_v36 = vsel %vm2667_vm11, 1, %v5269_v27  ;;  %vm2718_vm11 = vcmp.eq.s32.totalorder %v2701_v15, 1 }
 0xc11   :  { %v2689_v38 = vrot.slane %v2675_v36, %v5810_v1 }
 0xc13   :  { %vm2715_vm13 = vcmp.eq.s32.totalorder %v2689_v38, 1 }
 0xc4d   :  { %v2330_v31 = vpop.f32.mrb[36].mxu1 }
 0xc4e   :  { %v2658_v32 = vmul.f32 0.17677669, %v2330_v31  ;;  %v4158_v33 = vpop.f32.mrb[37].mxu1 }
 0xc4f   :  { %v2333_v34 = vpop.f32.mrb[38].mxu1 }
 0xc50   :  { %v4159_v35 = vpop.f32.mrb[39].mxu1  ;;  %v6142_v5 = vsel %vm2714_vm9, -1e+09, %v2658_v32  ;;  %vm2672_vm9 = vcmp.eq.f32.partialorder %v2164_v19, 0.0 }
 0xc51   :  { %v2731_v7 = vsel %vm2730_vm10, %v6142_v5, -inf  ;;  %v2680_v35 = vsel %vm2672_vm9, 1, %v5269_v27 }
 0xc52   :  { %2732 = vmax.xlane.f32.xlu1 %v2731_v7  ;;  %v2709_v43 = vrot.slane %v2680_v35, %v5810_v1 }
 0xcc0   :  { %v2376_v39 = vpop.f32.mrb[40].mxu1 }
 0xcc1   :  { %v2659_v40 = vmul.f32 0.17677669, %v2376_v39  ;;  %v4164_v42 = vpop.f32.mrb[41].mxu1 }
 0xcc2   :  { %v2379_v41 = vpop.f32.mrb[42].mxu1 }
 0xcc3   :  { %v4165_v44 = vpop.f32.mrb[43].mxu1  ;;  %v6149_v45 = vsel %vm2715_vm13, -1e+09, %v2659_v40  ;;  %vm2720_vm13 = vcmp.eq.s32.totalorder %v2709_v43, 1 }
 0xcc4   :  { %v2734_v47 = vsel %vm2730_vm10, %v6149_v45, -inf }
 0xcc5   :  { %2735 = vmax.xlane.f32.xlu0 %v2734_v47 }
 0xcc8   :  { %v2422_v51 = vpop.f32.mrb[44].mxu1 }
 0xcc9   :  { %v2660_v52 = vmul.f32 0.17677669, %v2422_v51  ;;  %v4170_v53 = vpop.f32.mrb[45].mxu1 }
 0xcca   :  { %v2425_v56 = vpop.f32.mrb[46].mxu1 }
 0xccb   :  { %v4171_v57 = vpop.f32.mrb[47].mxu1  ;;  %v6155_v58 = vsel %vm2716_vm15, -1e+09, %v2660_v52 }
 0xccc   :  { %v2737_v63 = vsel %vm2730_vm10, %v6155_v58, -inf }
 0xccd   :  { %2738 = vmax.xlane.f32.xlu0 %v2737_v63 }
 0xcd0   :  { %v2468_v2 = vpop.f32.mrb[48].mxu1 }
 0xcd1   :  { %v2661_v4 = vmul.f32 0.17677669, %v2468_v2  ;;  %v4176_v8 = vpop.f32.mrb[49].mxu1 }
 0xcd2   :  { %v2471_v10 = vpop.f32.mrb[50].mxu1  ;;  %v2560_v14 = vpop.f32.mrb[52].mxu0 }
 0xcd3   :  { %v2663_v21 = vmul.f32 0.17677669, %v2560_v14  ;;  %v4177_v16 = vpop.f32.mrb[51].mxu1  ;;  %v4188_v17 = vpop.f32.mrb[53].mxu0  ;;  %v6164_v6 = vsel %vm2717_vm7, -1e+09, %v2661_v4 }
 0xcd4   :  { %v2563_v23 = vpop.f32.mrb[54].mxu0  ;;  %v2740_v26 = vsel %vm2730_vm10, %v6164_v6, -inf }
 0xcd5   :  { %v4189_v28 = vpop.f32.mrb[55].mxu0  ;;  %2741 = vmax.xlane.f32.xlu0 %v2740_v26  ;;  %v2727_v29 = vsel %vm2719_vm8, -1e+09, %v2663_v21 }
 0xcd6   :  { %v2746_v32 = vsel %vm2730_vm10, %v2727_v29, -inf }
 0xcd8   :  { %v2514_v31 = vpop.f32.mrb[52].mxu1 }
 0xcd9   :  { %v2662_v33 = vmul.f32 0.17677669, %v2514_v31  ;;  %2747 = vmax.xlane.f32.xlu0 %v2746_v32  ;;  %v4182_v34 = vpop.f32.mrb[53].mxu1 }
 0xcda   :  { %v2517_v7 = vpop.f32.mrb[54].mxu1  ;;  %v2652_v11 = vpop.f32.mrb[56].mxu0 }
 0xcdb   :  { %v2665_v36 = vmul.f32 0.17677669, %v2652_v11  ;;  %v4183_v37 = vpop.f32.mrb[55].mxu1  ;;  %v4200_v38 = vpop.f32.mrb[57].mxu0  ;;  %v6172_v39 = vsel %vm2718_vm11, -1e+09, %v2662_v33 }
 0xcdc   :  { %v2655_v40 = vpop.f32.mrb[58].mxu0  ;;  %v2743_v42 = vsel %vm2730_vm10, %v6172_v39, -inf }
 0xcdd   :  { %v4201_v41 = vpop.f32.mrb[59].mxu0  ;;  %2744 = vmax.xlane.f32.xlu1 %v2743_v42  ;;  %v2729_v44 = vsel %vm2721_vm12, -1e+09, %v2665_v36 }
 0xcde   :  { %v2752_v46 = vsel %vm2730_vm10, %v2729_v44, -inf }
 0xcdf   :  { %v2733_v47 = vpop.xlane.xlu1 %2732  ;;  %2753 = vmax.xlane.f32.xlu0 %v2752_v46 }
 0xce0   :  { %v2755_v48 = vsub.f32 %v6142_v5, %v2733_v47  ;;  %v2606_v50 = vpop.f32.mrb[56].mxu1 }
 0xce1   :  { %v2664_v51 = vmul.f32 0.17677669, %v2606_v50  ;;  %v4194_v52 = vpop.f32.mrb[57].mxu1 }
 0xce2   :  { %v2763_v53 = vmul.f32 1.442695, %v2755_v48  ;;  %v2609_v55 = vpop.f32.mrb[58].mxu1 }
 0xce3   :  { %v4195_v56 = vpop.f32.mrb[59].mxu1  ;;  %v2728_v57 = vsel %vm2720_vm13, -1e+09, %v2664_v51 }
 0xce4   :  { %4568 = vpow2.f32 %v2763_v53  ;;  %v2749_v59 = vsel %vm2730_vm10, %v2728_v57, -inf }
 0xce5   :  { %2750 = vmax.xlane.f32.xlu1 %v2749_v59 }
 0xcee   :  { %v4569_v61 = vpop.eup %4568 }
 0xcef   :  { %v2779_v63 = vsel %vm2730_vm10, %v4569_v61, 0.0 }
 0xcf0   :  { %2780 = vadd.xlane.f32.xlu1 %v2779_v63 }
 0xd52   :  { %v2736_v60 = vpop.xlane.xlu0 %2735 }
 0xd53   :  { %v2756_v0 = vsub.f32 %v6149_v45, %v2736_v60 }
 0xd55   :  { %v2765_v5 = vmul.f32 1.442695, %v2756_v0 }
 0xd57   :  { %4570 = vpow2.f32 %v2765_v5 }
 0xd5a   :  { %v2739_v62 = vpop.xlane.xlu0 %2738 }
 0xd5b   :  { %v2757_v2 = vsub.f32 %v6155_v58, %v2739_v62 }
 0xd5d   :  { %v2767_v4 = vmul.f32 1.442695, %v2757_v2 }
 0xd5f   :  { %4572 = vpow2.f32 %v2767_v4 }
 0xd61   :  { %v6183_v8 = vpop.eup %4570 }
 0xd62   :  { %v2742_v9 = vpop.xlane.xlu0 %2741  ;;  %v2782_v10 = vsel %vm2730_vm10, %v6183_v8, 0.0 }
 0xd63   :  { %2783 = vadd.xlane.f32.xlu0 %v2782_v10  ;;  %v2758_v14 = vsub.f32 %v6164_v6, %v2742_v9 }
 0xd65   :  { %v2769_v45 = vmul.f32 1.442695, %v2758_v14 }
 0xd66   :  { %v2748_v18 = vpop.xlane.xlu0 %2747 }
 0xd67   :  { %v2760_v19 = vsub.f32 %v2727_v29, %v2748_v18 }
 0xd69   :  { %v6188_v21 = vpop.eup %4572  ;;  %v2773_v16 = vmul.f32 1.442695, %v2760_v19 }
 0xd6a   :  { %v2785_v58 = vsel %vm2730_vm10, %v6188_v21, 0.0  ;;  %v2745_v28 = vpop.xlane.xlu1 %2744 }
 0xd6b   :  { %4574 = vpow2.f32 %v2773_v16  ;;  %2786 = vadd.xlane.f32.xlu1 %v2785_v58  ;;  %v2759_v36 = vsub.f32 %v6172_v39, %v2745_v28 }
 0xd6c   :  { %v2754_v17 = vpop.xlane.xlu0 %2753  ;;  %4576 = vpow2.f32 %v2769_v45 }
 0xd6d   :  { %v2762_v23 = vsub.f32 %v2729_v44, %v2754_v17  ;;  %v2771_v37 = vmul.f32 1.442695, %v2759_v36 }
 0xd6f   :  { %v2777_v26 = vmul.f32 1.442695, %v2762_v23 }
 0xd71   :  { %4578 = vpow2.f32 %v2777_v26 }
 0xd72   :  { %v2751_v30 = vpop.xlane.xlu1 %2750 }
 0xd73   :  { %v2761_v38 = vsub.f32 %v2728_v57, %v2751_v30 }
 0xd75   :  { %v6192_v15 = vpop.eup %4574  ;;  %v2775_v40 = vmul.f32 1.442695, %v2761_v38 }
 0xd76   :  { %v2794_v6 = vsel %vm2730_vm10, %v6192_v15, 0.0  ;;  %v6196_v29 = vpop.eup %4576 }
 0xd77   :  { %2795 = vadd.xlane.f32.xlu0 %v2794_v6  ;;  %v2788_v31 = vsel %vm2730_vm10, %v6196_v29, 0.0 }
 0xd7b   :  { %v6200_v32 = vpop.eup %4578  ;;  %2789 = vadd.xlane.f32.xlu0 %v2788_v31 }
 0xd7c   :  { %v2800_v33 = vsel %vm2730_vm10, %v6200_v32, 0.0 }
 0xd7d   :  { %2801 = vadd.xlane.f32.xlu1 %v2800_v33  ;;  %v2781_v34 = vpop.xlane.xlu1 %2780 }
 0xd7e   :  { %4580 = vrcp.f32 %v2781_v34 }
 0xd7f   :  { %4582 = vpow2.f32 %v2771_v37 }
 0xd80   :  { %4584 = vpow2.f32 %v2775_v40 }
 0xd88   :  { %v4581_v35 = vpop.eup %4580 }
 0xd89   :  { %v2811_v7 = vmul.f32 %v4581_v35, %v4569_v61  ;;  %v6218_v42 = vpop.eup %4582 }
 0xd8a   :  { %v2791_v43 = vsel %vm2730_vm10, %v6218_v42, 0.0  ;;  %v6222_v41 = vpop.eup %4584 }
 0xd8b   :  { %v2819_v11 = vpack.c.bf16 %v2811_v7, %v2811_v7 }
 0xd8d   :  { %4205 = vmatmul.mubr.msk.bf16.vlgmr.msra.gmra.mrb[60].mxu1 %vm2730_vm10, %v2819_v11 }
 0xd8e   :  { %4361 = vrot.lane.b32.xlu1 %v6064_v12, %s5256_s27  ;;  %4216 = vmatprep.mubr.msk.bf16.mxu1 %vm5270_vm0, %v5268_v13 }
 0xd91   :  { %4356 = vrot.lane.b32.xlu0 %v6064_v12, %s5271_s16 }
 0xd92   :  { %4366 = vrot.lane.b32.xlu1 %v6064_v12, %s5272_s29  ;;  %v2797_v12 = vsel %vm2730_vm10, %v6222_v41, 0.0 }
 0xd95   :  { %4371 = vrot.lane.b32.xlu0 %v6081_v24, %s5271_s16 }
 0xd99   :  { %4381 = vrot.lane.b32.xlu0 %v6081_v24, %s5272_s29 }
 0xdb6   :  { %2792 = vadd.xlane.f32.xlu1 %v2791_v43 }
 0xdba   :  { %2798 = vadd.xlane.f32.xlu1 %v2797_v12 }
 0xdcb   :  { %4376 = vrot.lane.b32.xlu1 %v6081_v24, %s5256_s27 }
 0xdf0   :  { %v2784_v39 = vpop.xlane.xlu0 %2783 }
 0xdf1   :  { %4586 = vrcp.f32 %v2784_v39 }
 0xdf8   :  { %v2787_v44 = vpop.xlane.xlu1 %2786 }
 0xdf9   :  { %4588 = vrcp.f32 %v2787_v44 }
 0xdfb   :  { %v4587_v50 = vpop.eup %4586 }
 0xdfc   :  { %v2812_v56 = vmul.f32 %v4587_v50, %v6183_v8 }
 0xdfe   :  { %v2820_v5 = vpack.c.bf16 %v2812_v56, %v2812_v56 }
 0xe03   :  { %v4589_v52 = vpop.eup %4588 }
 0xe04   :  { %v2796_v46 = vpop.xlane.xlu0 %2795  ;;  %v2813_v24 = vmul.f32 %v4589_v52, %v6188_v21 }
 0xe06   :  { %v2821_v8 = vpack.c.bf16 %v2813_v24, %v2813_v24 }
 0xe08   :  { %v2790_v47 = vpop.xlane.xlu0 %2789 }
 0xe09   :  { %4590 = vrcp.f32 %v2790_v47 }
 0xe0a   :  { %v2802_v48 = vpop.xlane.xlu1 %2801  ;;  %4592 = vrcp.f32 %v2796_v46 }
 0xe0b   :  { %4594 = vrcp.f32 %v2802_v48 }
 0xe0c   :  { %v4357_v51 = vpop.permute.xlu0 %4356 }
 0xe0d   :  { %v4359_v53 = vunpack.i.h.bf16 %v4357_v51  ;;  %v4358_v55 = vunpack.i.l.bf16 %v4357_v51 }
 0xe0e   :  { %v4362_v57 = vpop.permute.xlu1 %4361 }
 0xe0f   :  { %v2283_v59 = vpack.c.bf16 %v4359_v53, %v4358_v55  ;;  %v4364_v61 = vunpack.i.h.bf16 %v4362_v57  ;;  %v4363_v63 = vunpack.i.l.bf16 %v4362_v57  ;;  %v4472_v55 = vld [vmem:[#allocation25] sm:$0xff]   ;;  %v4473_v57 = vld [vmem:[#allocation25 + $0x8] sm:$0xff]  }
 0xe10   :  { %v4372_v9 = vpop.permute.xlu0 %4371 }
 0xe11   :  { %v2284_v60 = vpack.c.bf16 %v4364_v61, %v4363_v63  ;;  %4209 = vmatpush3.bf16.msra.mxu0 %v2283_v59  ;;  %v4374_v18 = vunpack.i.h.bf16 %v4372_v9  ;;  %v4373_v19 = vunpack.i.l.bf16 %v4372_v9 }
 0xe12   :  { %v4367_v0 = vpop.permute.xlu1 %4366  ;;  %4220 = vmatprep.subr.bf16.mxu0 %v5268_v13 }
 0xe13   :  { %v4591_v62 = vpop.eup %4590  ;;  %v4369_v2 = vunpack.i.h.bf16 %v4367_v0  ;;  %v4368_v4 = vunpack.i.l.bf16 %v4367_v0  ;;  %4215 = vmatpush3.bf16.msra.mxu1 %v2284_v60  ;;  %v2287_v16 = vpack.c.bf16 %v4374_v18, %v4373_v19  ;;  %v4474_v60 = vld [vmem:[#allocation25 + $0x10] sm:$0xff]   ;;  %v4479_v19 = vld [vmem:[#allocation25 + $0x38] sm:$0xff]  }
 0xe14   :  { %4211 = vmatmul.mubr.msk.bf16.vlgmr.msra.gmra.mrb[60].mxu0 %vm2730_vm10, %v2820_v5  ;;  %4226 = vmatprep.subr.bf16.mxu1 %v5268_v13  ;;  %v2814_v14 = vmul.f32 %v4591_v62, %v6196_v29  ;;  %v4593_v45 = vpop.eup %4592  ;;  %v4382_v58 = vpop.permute.xlu0 %4381  ;;  %v4475_v5 = vld [vmem:[#allocation25 + $0x18] sm:$0xff]  }
 0xe15   :  { %v2285_v10 = vpack.c.bf16 %v4369_v2, %v4368_v4  ;;  %4222 = vmatprep.mubr.msk.bf16.mxu0 %vm5270_vm0, %v5268_v13  ;;  %v2816_v20 = vmul.f32 %v4593_v45, %v6192_v15  ;;  %v4384_v22 = vunpack.i.h.bf16 %v4382_v58  ;;  %v4595_v23 = vpop.eup %4594 }
 0xe16   :  { %4217 = vmatmul.mubr.msk.bf16.vlgmr.msra.gmra.mrb[64].mxu1 %vm2730_vm10, %v2821_v8  ;;  %v2822_v21 = vpack.c.bf16 %v2814_v14, %v2814_v14  ;;  %v2818_v28 = vmul.f32 %v4595_v23, %v6200_v32  ;;  %v4476_v8 = vld [vmem:[#allocation25 + $0x20] sm:$0xff]   ;;  %v4478_v14 = vld [vmem:[#allocation25 + $0x30] sm:$0xff]  }
 0xe17   :  { %4221 = vmatpush3.bf16.msra.mxu0 %v2285_v10  ;;  %4227 = vmatpush3.bf16.msra.mxu1 %v2286_v25  ;;  %v4383_v25 = vunpack.i.l.bf16 %v4382_v58  ;;  %v2824_v17 = vpack.c.bf16 %v2816_v20, %v2816_v20  ;;  %v4477_v10 = vld [vmem:[#allocation25 + $0x28] sm:$0xff]  }
 0xe18   :  { %4232 = vmatprep.subr.bf16.mxu0 %v5268_v13  ;;  %4228 = vmatprep.mubr.msk.bf16.mxu1 %vm5270_vm0, %v5268_v13  ;;  %v2826_v6 = vpack.c.bf16 %v2818_v28, %v2818_v28 }
 0xe19   :  { %4238 = vmatprep.subr.bf16.mxu1 %v5268_v13  ;;  %v2289_v26 = vpack.c.bf16 %v4384_v22, %v4383_v25 }
 0xe1c   :  { %4223 = vmatmul.mubr.msk.bf16.vlgmr.msra.gmra.mrb[64].mxu0 %vm2730_vm10, %v2822_v21 }
 0xe1d   :  { %4233 = vmatpush3.bf16.msra.mxu0 %v2287_v16  ;;  %4234 = vmatprep.mubr.msk.bf16.mxu0 %vm5270_vm0, %v5268_v13 }
 0xe1e   :  { %4244 = vmatprep.subr.bf16.mxu0 %v5268_v13 }
 0xe24   :  { %4235 = vmatmul.mubr.msk.bf16.vlgmr.msra.gmra.mrb[68].mxu0 %vm2730_vm10, %v2824_v17 }
 0xe25   :  { %4245 = vmatpush3.bf16.msra.mxu0 %v2289_v26  ;;  %4246 = vmatprep.mubr.msk.bf16.mxu0 %vm5270_vm0, %v5268_v13 }
 0xe2c   :  { %4247 = vmatmul.mubr.msk.bf16.vlgmr.msra.gmra.mrb[72].mxu0 %vm2730_vm10, %v2826_v6 }
 0xe2d   :  { %3511 = vmatprep.mubr.bf16.mxu0 %v5269_v27 }
 0xe43   :  { %v2793_v15 = vpop.xlane.xlu1 %2792 }
 0xe44   :  { %4596 = vrcp.f32 %v2793_v15 }
 0xe47   :  { %v2799_v29 = vpop.xlane.xlu1 %2798 }
 0xe48   :  { %4598 = vrcp.f32 %v2799_v29 }
 0xe4b   :  { %v4377_v30 = vpop.permute.xlu1 %4376 }
 0xe4c   :  { %v4379_v33 = vunpack.i.h.bf16 %v4377_v30  ;;  %v4378_v34 = vunpack.i.l.bf16 %v4377_v30 }
 0xe4e   :  { %v4597_v31 = vpop.eup %4596  ;;  %v2288_v36 = vpack.c.bf16 %v4379_v33, %v4378_v34 }
 0xe4f   :  { %v2815_v35 = vmul.f32 %v4597_v31, %v6218_v42 }
 0xe51   :  { %v2823_v7 = vpack.c.bf16 %v2815_v35, %v2815_v35 }
 0xe52   :  { %v4599_v11 = vpop.eup %4598 }
 0xe53   :  { %4229 = vmatmul.mubr.msk.bf16.vlgmr.msra.gmra.mrb[68].mxu1 %vm2730_vm10, %v2823_v7  ;;  %v2817_v27 = vmul.f32 %v4599_v11, %v6222_v41 }
 0xe54   :  { %4239 = vmatpush3.bf16.msra.mxu1 %v2288_v36  ;;  %4240 = vmatprep.mubr.msk.bf16.mxu1 %vm5270_vm0, %v5268_v13 }
 0xe55   :  { %4250 = vmatprep.subr.bf16.mxu1 %v5268_v13  ;;  %v2825_v32 = vpack.c.bf16 %v2817_v27, %v2817_v27 }
 0xe5b   :  { %4241 = vmatmul.mubr.msk.bf16.vlgmr.msra.gmra.mrb[72].mxu1 %vm2730_vm10, %v2825_v32  ;;  %v3832_v32 = vld [vmem:[#allocation26] ss:$0 sm:$0xff] }
 0xe5c   :  { %4266 = vmatprep.mubr.msk.bf16.mxu1 %vm5270_vm0, %v5268_v13  ;;  %4251 = vmatpush3.bf16.msra.mxu1 %v4472_v55  ;;  %v4485_v55 = vld [vmem:[#allocation31 + $0x14] ss:$8 sps:$4 sm:$0xff]  }
 0xe5d   :  { %4252 = vmatprep.subr.bf16.mxu1 %v5268_v13 }
 0xe60   :  { %v6264_v37 = vpop.f32.mrb[60].mxu1  ;;  %4253 = vmatpush3.bf16.msra.mxu1 %v4473_v57  ;;  %v4488_v57 = vld [vmem:[#allocation31 + $0x24] ss:$8 sps:$4 sm:$0xff]  }
 0xe61   :  { %v4206_v38 = vpop.f32.mrb[61].mxu1  ;;  %4254 = vmatprep.subr.bf16.mxu1 %v5268_v13 }
 0xe62   :  { %v2867_v40 = vpop.f32.mrb[62].mxu1 }
 0xe63   :  { %v4207_v42 = vpop.f32.mrb[63].mxu1 }
 0xe64   :  { %4255 = vmatpush3.bf16.msra.mxu1 %v4474_v60  ;;  %v4494_v60 = vld [vmem:[#allocation31 + $0x44] ss:$8 sps:$4 sm:$0xff]  }
 0xe65   :  { %4256 = vmatprep.subr.bf16.mxu1 %v5268_v13 }
 0xe68   :  { %4257 = vmatpush3.bf16.msra.mxu1 %v4475_v5  ;;  %v4495_v5 = vld [vmem:[#allocation31 + $0x50] ss:$8 sps:$4 sm:$0xff]  }
 0xe69   :  { %4258 = vmatprep.subr.bf16.mxu1 %v5268_v13 }
 0xe6c   :  { %4259 = vmatpush3.bf16.msra.mxu1 %v4476_v8  ;;  %v4504_v8 = vld [vmem:[#allocation34 + $0x40] sm:$0xff]  }
 0xe6d   :  { %4260 = vmatprep.subr.bf16.mxu1 %v5268_v13 }
 0xe70   :  { %4261 = vmatpush3.bf16.msra.mxu1 %v4477_v10  ;;  %v4505_v10 = vld [vmem:[#allocation34] sm:$0xff]  }
 0xe71   :  { %4262 = vmatprep.subr.bf16.mxu1 %v5268_v13 }
 0xe74   :  { %4263 = vmatpush3.bf16.msra.mxu1 %v4478_v14  ;;  %v4506_v14 = vld [vmem:[#allocation34 + $0x48] sm:$0xff]  }
 0xe75   :  { %4264 = vmatprep.subr.bf16.mxu1 %v5268_v13 }
 0xe78   :  { %4265 = vmatpush3.bf16.msra.mxu1 %v4479_v19  ;;  %v4508_v19 = vld [vmem:[#allocation34 + $0x50] sm:$0xff]  }
 0xe79   :  { %3976 = vmatprep.subr.bf16.mxu1 %v4504_v8 }
 0xee7   :  { %v2907_v43 = vpop.f32.mrb[60].mxu0 }
 0xee8   :  { %v4212_v12 = vpop.f32.mrb[61].mxu0 }
 0xee9   :  { %v2910_v39 = vpop.f32.mrb[62].mxu0  ;;  %v2950_v44 = vpop.f32.mrb[64].mxu1 }
 0xeea   :  { %v4213_v46 = vpop.f32.mrb[63].mxu0  ;;  %v4218_v47 = vpop.f32.mrb[65].mxu1 }
 0xeeb   :  { %v2953_v41 = vpop.f32.mrb[66].mxu1 }
 0xeec   :  { %v4219_v48 = vpop.f32.mrb[67].mxu1 }
 0xeef   :  { %v2993_v50 = vpop.f32.mrb[64].mxu0 }
 0xef0   :  { %v4224_v51 = vpop.f32.mrb[65].mxu0 }
 0xef1   :  { %v2996_v52 = vpop.f32.mrb[66].mxu0 }
 0xef2   :  { %v4225_v53 = vpop.f32.mrb[67].mxu0  ;;  %v4482_v52 = vld [vmem:[#allocation31 + $0x4] ss:$8 sps:$4 sm:$0xff]  }
 0xef3   :  { %v4480_v53 = vld [vmem:[#allocation31] ss:$8 sps:$4 sm:$0xff]   ;;  %3479 = vmatprep.subr.bf16.mxu0 %v4482_v52 }
 0xef4   :  { %3480 = vmatpush1.bf16.msra.mxu0 %v4480_v53  ;;  %v4519_v52 = vld [vmem:[#allocation34 + $0x38] sm:$0xff]  }
 0xef5   :  { %3481 = vmatprep.subr.bf16.mxu0 %v4485_v55 }
 0xef7   :  { %v3079_v56 = vpop.f32.mrb[68].mxu0 }
 0xef8   :  { %v4385_v59 = vpack.i.bf16 %v3079_v56, %v2907_v43  ;;  %v4236_v61 = vpop.f32.mrb[69].mxu0  ;;  %v4483_v56 = vld [vmem:[#allocation31 + $0x10] ss:$8 sps:$4 sm:$0xff]  }
 0xef9   :  { %v3082_v63 = vpop.f32.mrb[70].mxu0  ;;  %3482 = vmatpush1.bf16.msra.mxu0 %v4483_v56  ;;  %v4491_v61 = vld [vmem:[#allocation31 + $0x34] ss:$8 sps:$4 sm:$0xff]  }
 0xefa   :  { %4386 = vrot.lane.b32.xlu1 %v4385_v59, %s5272_s29  ;;  %v4237_v24 = vpop.f32.mrb[71].mxu0  ;;  %v4486_v59 = vld [vmem:[#allocation31 + $0x20] ss:$8 sps:$4 sm:$0xff]   ;;  %3483 = vmatprep.subr.bf16.mxu0 %v4488_v57  ;;  %v4489_v63 = vld [vmem:[#allocation31 + $0x30] ss:$8 sps:$4 sm:$0xff]  }
 0xefb   :  { %v4492_v24 = vld [vmem:[#allocation31 + $0x40] ss:$8 sps:$4 sm:$0xff]  }
 0xefd   :  { %3484 = vmatpush1.bf16.msra.mxu0 %v4486_v59 }
 0xefe   :  { %3485 = vmatprep.subr.bf16.mxu0 %v4491_v61 }
 0xeff   :  { %v3165_v0 = vpop.f32.mrb[72].mxu0 }
 0xf00   :  { %v4395_v62 = vpack.i.bf16 %v3165_v0, %v2993_v50  ;;  %v4248_v2 = vpop.f32.mrb[73].mxu0  ;;  %v4497_v0 = vld [vmem:[#allocation31 + $0x54] ss:$8 sps:$4 sm:$0xff]  }
 0xf01   :  { %v3168_v4 = vpop.f32.mrb[74].mxu0  ;;  %3486 = vmatpush1.bf16.msra.mxu0 %v4489_v63  ;;  %v4498_v2 = vld [vmem:[#allocation31 + $0x60] ss:$8 sps:$4 sm:$0xff]  }
 0xf02   :  { %4396 = vrot.lane.b32.xlu1 %v4395_v62, %s5271_s16  ;;  %v4249_v9 = vpop.f32.mrb[75].mxu0  ;;  %3487 = vmatprep.subr.bf16.mxu0 %v4494_v60  ;;  %v4500_v62 = vld [vmem:[#allocation31 + $0x64] ss:$8 sps:$4 sm:$0xff]   ;;  %v4503_v4 = vld [vmem:[#allocation31 + $0x74] ss:$8 sps:$4 sm:$0xff]  }
 0xf03   :  { %v4501_v9 = vld [vmem:[#allocation31 + $0x70] ss:$8 sps:$4 sm:$0xff]  }
 0xf05   :  { %3488 = vmatpush1.bf16.msra.mxu0 %v4492_v24 }
 0xf06   :  { %3489 = vmatprep.subr.bf16.mxu0 %v4497_v0 }
 0xf09   :  { %3490 = vmatpush1.bf16.msra.mxu0 %v4495_v5 }
 0xf0a   :  { %3491 = vmatprep.subr.bf16.mxu0 %v4500_v62 }
 0xf0d   :  { %3492 = vmatpush1.bf16.msra.mxu0 %v4498_v2 }
 0xf0e   :  { %3493 = vmatprep.subr.bf16.mxu0 %v4503_v4 }
 0xf11   :  { %3494 = vmatpush1.bf16.msra.mxu0 %v4501_v9 }
 0xf26   :  { %v3036_v18 = vpop.f32.mrb[68].mxu1 }
 0xf27   :  { %v4230_v21 = vpop.f32.mrb[69].mxu1 }
 0xf28   :  { %v3039_v45 = vpop.f32.mrb[70].mxu1  ;;  %v4509_v21 = vld [vmem:[#allocation34 + $0x10] sm:$0xff]  }
 0xf29   :  { %v4231_v16 = vpop.f32.mrb[71].mxu1  ;;  %v4510_v45 = vld [vmem:[#allocation34 + $0x58] sm:$0xff]  }
 0xf2a   :  { %v4511_v16 = vld [vmem:[#allocation34 + $0x18] sm:$0xff]  }
 0xf2e   :  { %v3122_v58 = vpop.f32.mrb[72].mxu1 }
 0xf2f   :  { %v4390_v20 = vpack.i.bf16 %v3122_v58, %v2950_v44  ;;  %v4242_v22 = vpop.f32.mrb[73].mxu1  ;;  %v4512_v58 = vld [vmem:[#allocation34 + $0x60] sm:$0xff]  }
 0xf30   :  { %v3125_v25 = vpop.f32.mrb[74].mxu1  ;;  %v4514_v22 = vld [vmem:[#allocation34 + $0x68] sm:$0xff]  }
 0xf31   :  { %4391 = vrot.lane.b32.xlu0 %v4390_v20, %s5256_s27  ;;  %v4243_v17 = vpop.f32.mrb[75].mxu1  ;;  %v4513_v20 = vld [vmem:[#allocation34 + $0x20] sm:$0xff]   ;;  %s5273_s27 = smov [#allocation43]  }
 0xf32   :  { %s3713_s3 = sshll.u32 %s5273_s27, 4  ;;  %s3714_s3 = int_to_ptr.vmem [resolvable:$true] %s3713_s3 }
 0xf33   :  { %s5182_s10 = scalar_lea.vmem %s3714_s3, 256  ;;  %p5187_p13 = scmp.lt.s32.totalorder %s3714_s3, %s3714_s3 }
 0xf34   :  { %p5183_p12 = scmp.ne.s32.totalorder %s3714_s3, %s5182_s10  ;;  %p5188_p0 = scmp.lt.s32.totalorder %s5182_s10, %s5182_s10 }
 0xf36   :  { %p5189_p1 = por %p5188_p0, %p5187_p13 }
 0xf38   :  { %p5190_p2 = pnand %p5189_p1, %p5183_p12 }
 0xf6c   :  { %v4387_v23 = vpop.permute.xlu1 %4386 }
 0xf6d   :  { %v4389_v26 = vunpack.i.h.bf16 %v4387_v23  ;;  %v4388_v28 = vunpack.i.l.bf16 %v4387_v23 }
 0xf6f   :  { %v3183_v30 = vsel %vm822_vm5, %v6264_v37, %v4388_v28  ;;  %v3198_v31 = vsel %vm822_vm5, %v3036_v18, %v4389_v26  ;;  %v4507_v18 = vld [vmem:[#allocation34 + $0x8] sm:$0xff]  }
 0xf74   :  { %v4397_v6 = vpop.permute.xlu1 %4396 }
 0xf75   :  { %v4399_v33 = vunpack.i.h.bf16 %v4397_v6  ;;  %v4398_v34 = vunpack.i.l.bf16 %v4397_v6 }
 0xfa3   :  { %v4392_v15 = vpop.permute.xlu0 %4391 }
 0xfa4   :  { %v4394_v29 = vunpack.i.h.bf16 %v4392_v15  ;;  %v4393_v13 = vunpack.i.l.bf16 %v4392_v15 }
 0xfa6   :  { %v3199_v35 = vsel %vm1694_vm1, %v3198_v31, %v4394_v29  ;;  %v3184_v7 = vsel %vm1694_vm1, %v3183_v30, %v4393_v13 }
 0xfa7   :  { %v3185_v11 = vsel %vm1696_vm2, %v3184_v7, %v4398_v34  ;;  %v3200_v36 = vsel %vm1696_vm2, %v3199_v35, %v4399_v33 }
 0xfa8   :  { %v3201_v27 = vpack.c.bf16 %v3200_v36, %v3185_v11  ;;  %v3841_v36 = vld [vmem:[#allocation37] ss:$0 sm:$0xff] }
 0xfaa   :  { %4267 = vmatmul.mubr.bf16.vlgmr.msra.gmra.mrb[76].mxu1 %v3201_v27 }
 0xfab   :  { %3977 = vmatpush3.bf16.msra.mxu1 %v4505_v10 }
 0xfac   :  { %3978 = vmatprep.subr.bf16.mxu1 %v4506_v14 }
 0xfaf   :  { %3979 = vmatpush3.bf16.msra.mxu1 %v4507_v18 }
 0xfb0   :  { %3980 = vmatprep.subr.bf16.mxu1 %v4508_v19 }
 0xfb3   :  { %3981 = vmatpush3.bf16.msra.mxu1 %v4509_v21 }
 0xfb4   :  { %3982 = vmatprep.subr.bf16.mxu1 %v4510_v45 }
 0xfb7   :  { %3983 = vmatpush3.bf16.msra.mxu1 %v4511_v16 }
 0xfb8   :  { %3984 = vmatprep.subr.bf16.mxu1 %v4512_v58 }
 0xfbb   :  { %3985 = vmatpush3.bf16.msra.mxu1 %v4513_v20 }
 0xfbc   :  { %3986 = vmatprep.subr.bf16.mxu1 %v4514_v22 }
0x107d   :  { %v3307_v38 = vpop.f32.mrb[76].mxu1 }
0x107e   :  { %v3308_v40 = vadd.f32 %v3832_v32, %v3307_v38  ;;  %v4268_v42 = vpop.f32.mrb[77].mxu1 }
0x107f   :  { %v3310_v43 = vpop.f32.mrb[78].mxu1 }
0x1080   :  { %v6284_v37 = vadd.f32 %v3308_v40, %v6019_v54  ;;  %v3311_v12 = vadd.f32 %v3832_v32, %v3310_v43  ;;  %v4269_v39 = vpop.f32.mrb[79].mxu1  ;;  %v3842_v43 = vld [vmem:[#allocation38] ss:$0 sm:$0xff] }
0x1082   :  { %v6287_v44 = vadd.f32 %v3311_v12, %v6021_v49  ;;  %3316 = vadd.xlane.f32.xlu0 %v6284_v37 }
0x1084   :  { %3318 = vadd.xlane.f32.xlu1 %v6287_v44 }
0x110f   :  { %v3317_v46 = vpop.xlane.xlu0 %3316 }
0x1110   :  { %v3320_v47 = vmul.f32 0.0078125, %v3317_v46 }
0x1111   :  { %v3319_v41 = vpop.xlane.xlu1 %3318 }
0x1112   :  { %v6292_v48 = vsub.f32 %v6284_v37, %v3320_v47  ;;  %v3321_v50 = vmul.f32 0.0078125, %v3319_v41  ;;  %v4515_v41 = vld [vmem:[#allocation34 + $0x28] sm:$0xff]  }
0x1113   :  { %3987 = vmatpush3.bf16.msra.mxu1 %v4515_v41 }
0x1114   :  { %v6295_v51 = vsub.f32 %v6287_v44, %v3321_v50  ;;  %v3324_v54 = vmul.f32 %v6292_v48, %v6292_v48  ;;  %v3357_v32 = vmul.f32 %v3841_v36, %v6292_v48  ;;  %v4516_v50 = vld [vmem:[#allocation34 + $0x70] sm:$0xff]   ;;  %v3387_v48 = vld [vmem:[#allocation32] sm:$0x3] }
0x1115   :  { %3988 = vmatprep.subr.bf16.mxu1 %v4516_v50  ;;  %v3396_v53 = vrot.slane %v3387_v48, %v5812_v3 }
0x1116   :  { %3326 = vadd.xlane.f32.xlu0 %v3324_v54  ;;  %v3325_v49 = vmul.f32 %v6295_v51, %v6295_v51  ;;  %v3358_v38 = vmul.f32 %v3841_v36, %v6295_v51  ;;  %v4517_v54 = vld [vmem:[#allocation34 + $0x30] sm:$0xff]   ;;  %v3392_v51 = vrot.slane %v3387_v48, %v5810_v1  ;;  %v3859_v1 = vld [vmem:[#allocation35] ss:$0 sm:$0xff] }
0x1117   :  { %3989 = vmatpush3.bf16.msra.mxu1 %v4517_v54 }
0x111a   :  { %3328 = vadd.xlane.f32.xlu0 %v3325_v49  ;;  %v4518_v49 = vld [vmem:[#allocation34 + $0x78] sm:$0xff]  }
0x111b   :  { %3990 = vmatprep.subr.bf16.mxu1 %v4518_v49 }
0x111c   :  { %3991 = vmatpush3.bf16.msra.mxu1 %v4519_v52 }
0x11a3   :  { %v3327_v25 = vpop.xlane.xlu0 %3326 }
0x11a4   :  { %v3330_v17 = vmul.f32 0.007874016, %v3327_v25 }
0x11a6   :  { %4600 = vrsqrt.f32 %v3330_v17  ;;  %vm3334_vm0 = vcmp.eq.f32.partialorder %v3330_v17, inf  ;;  %v3337_v15 = vand.u32 2147483648, %v3330_v17  ;;  %vm3336_vm5 = vcmp.eq.f32.partialorder %v3330_v17, 0.0 }
0x11a7   :  { %v3329_v23 = vpop.xlane.xlu0 %3328 }
0x11a8   :  { %v3331_v26 = vmul.f32 0.007874016, %v3329_v23 }
0x11aa   :  { %4602 = vrsqrt.f32 %v3331_v26  ;;  %vm3341_vm1 = vcmp.eq.f32.partialorder %v3331_v26, inf  ;;  %v3344_v34 = vand.u32 2147483648, %v3331_v26  ;;  %vm3343_vm2 = vcmp.eq.f32.partialorder %v3331_v26, 0.0 }
0x11b0   :  { %v4601_v28 = vpop.eup %4600 }
0x11b1   :  { %v3333_v6 = vmul.f32 %v4601_v28, %v3330_v17 }
0x11b3   :  { %v3335_v29 = vsel %vm3334_vm0, %v3330_v17, %v3333_v6 }
0x11b4   :  { %v4603_v13 = vpop.eup %4602  ;;  %v3338_v30 = vsel %vm3336_vm5, %v3337_v15, %v3335_v29 }
0x11b5   :  { %v3346_v31 = vadd.f32 1e-06, %v3338_v30  ;;  %v3340_v33 = vmul.f32 %v4603_v13, %v3331_v26 }
0x11b7   :  { %4604 = vrcp.f32 %v3346_v31  ;;  %v3342_v35 = vsel %vm3341_vm1, %v3331_v26, %v3340_v33 }
0x11b8   :  { %v3345_v7 = vsel %vm3343_vm2, %v3344_v34, %v3342_v35 }
0x11b9   :  { %v3347_v11 = vadd.f32 1e-06, %v3345_v7 }
0x11bb   :  { %4606 = vrcp.f32 %v3347_v11 }
0x11c1   :  { %v4605_v27 = vpop.eup %4604 }
0x11c2   :  { %v3359_v40 = vmul.f32 %v4605_v27, %v3357_v32 }
0x11c4   :  { %v3368_v39 = vadd.f32 %v3842_v43, %v3359_v40 }
0x11c5   :  { %v4607_v42 = vpop.eup %4606 }
0x11c6   :  { %v3360_v12 = vmul.f32 %v4607_v42, %v3358_v38 }
0x11c8   :  { %v3369_v46 = vadd.f32 %v3842_v43, %v3360_v12 }
0x11ca   :  { %v3370_v47 = vpack.c.bf16 %v3369_v46, %v3368_v39 }
0x11cc   :  { %3512 = vmatmul.mubr.bf16.vlgmr.msra.gmra.mrb[76].mxu0 %v3370_v47 }
0x129f   :  { %v3513_v55 = vpop.f32.mrb[76].mxu0 }
0x12a0   :  { %v3514_v56 = vadd.f32 %v3513_v55, %v3392_v51  ;;  %v3515_v57 = vpop.f32.mrb[77].mxu0 }
0x12a1   :  { %v3516_v59 = vadd.f32 %v3515_v57, %v3396_v53  ;;  %v3517_v61 = vpop.f32.mrb[78].mxu0 }
0x12a2   :  { %v3518_v63 = vadd.f32 %v3517_v61, %v3392_v51  ;;  %v3519_v24 = vpop.f32.mrb[79].mxu0  ;;  %v3522_v0 = vmax.f32 %v3514_v56, 0.0 }
0x12a3   :  { %v3520_v60 = vadd.f32 %v3519_v24, %v3396_v53  ;;  %v3523_v62 = vmax.f32 %v3516_v59, 0.0 }
0x12a4   :  { %v3524_v5 = vmax.f32 %v3518_v63, 0.0 }
0x12a5   :  { %v3525_v2 = vmax.f32 %v3520_v60, 0.0 }
0x12a6   :  { %v3526_v4 = vpack.c.bf16 %v3524_v5, %v3522_v0 }
0x12a7   :  { %v3527_v9 = vpack.c.bf16 %v3525_v2, %v3523_v62 }
0x12a9   :  { %3695 = vmatprep.mubr.bf16.mxu1 %v3527_v9 }
0x12aa   :  { %3696 = vmatmul.mubr.bf16.vlgmr.msra.gmra.mrb[80].mxu1 %v3526_v4 }
0x137d   :  { %v3992_v8 = vpop.f32.mrb[80].mxu1 }
0x137e   :  { %v3993_v10 = vpop.f32.mrb[81].mxu1 }
0x137f   :  { %v3994_v3 = vadd.f32 %v3993_v10, %v3992_v8  ;;  %v3995_v14 = vpop.f32.mrb[82].mxu1 }
0x1380   :  { %v3996_v18 = vpop.f32.mrb[83].mxu1 }
0x1381   :  { %v3698_v19 = vadd.f32 %v3994_v3, %v3859_v1  ;;  %v3997_v21 = vadd.f32 %v3996_v18, %v3995_v14 }
0x1383   :  { %v3704_v45 = vadd.f32 %v3698_v19, %v6284_v37  ;;  %v3701_v16 = vadd.f32 %v3997_v21, %v3859_v1 }
0x1385   :  { %3706 = vst [vmem:[#allocation43] sm:$0xff] %v3704_v45  ;;  %v3705_v58 = vadd.f32 %v3701_v16, %v6287_v44 }
0x1387   :  { %3707 = vst [vmem:[#allocation43 + $0x8] sm:$0xff] %v3705_v58 }
0x1388   :  { %5193 = shalt.err (!%p5190_p2)
}
0x1389   :  { %s6396_s28 = sld [smem:[#allocation72_spill]] }
0x138f   :  { %s5194_s13 = scalar_lea.hbm %s6396_s28, 256 }
0x1390   :  { %p5195_p3 = scmp.ne.s32.totalorder %s6396_s28, %s5194_s13  ;;  %p5198_p4 = scmp.lt.u32.totalorder %s5194_s13, %s6396_s28 }
0x1392   :  { %p5200_p5 = pnand %p5198_p4, %p5195_p3 }
0x1394   :  { %5203 = shalt.err (!%p5200_p5)
}
0x1395   :  { %3719 = dma.vmem_to_hbm [thread:$0]  %s3714_s3, 256, %s6396_s28, [#allocation4], %s6388_s2, %s6388_s2, %s6387_s6  }
0x1396   :  { %5232 = dma.done.wait [#allocation4], 256  }
0x1397   :  { %5233 = vsyncadd [#allocation4], 4294967040 }
0x1398   :  { %3723 = vsyncpa [#allocation3], 1 }
0x1399   :  { %3724 = vsyncpa [#allocation6], 1 }
0x139a   :  { %3725 = vsyncpa [#allocation9], 1 }
0x139b   :  { %3726 = vsyncpa [#allocation12], 1 }
0x139c   :  { %3727 = vsyncpa [#allocation15], 1 }
0x139d   :  { %3728 = vsyncpa [#allocation18], 1 }
0x139e   :  { %3729 = vsyncpa [#allocation21], 1 }
0x139f   :  { %3730 = vsyncpa [#allocation24], 1 }
0x13a0   :  { %3731 = vsyncpa [#allocation27], 1 }
0x13a1   :  { %3732 = vsyncpa [#allocation30], 1 }
0x13a2   :  { %3733 = vsyncpa [#allocation33], 1 }
0x13a3   :  { %3734 = vsyncpa [#allocation36], 1 }
0x13a4   :  { %3735 = vsyncpa [#allocation39], 1 }
0x13a5   :  { %3736 = vsyncpa [#allocation42], 1 }
0x13a6   :  { %3737 = vsyncpa [#allocation4], 1 }

</bundles_post_ra>
